<compile_context>
chip_gen: v7x
topology: tpu7x:2x2x1
jax: 0.10.0
libtpu: 0.0.40
codegen_flags: <defaults>
</compile_context>

<pallas_src>
import jax
import jax.numpy as jnp
from jax import lax
from jax.experimental import pallas as pl
from jax.experimental.pallas import tpu as pltpu


# ----------------------------- Pallas kernels --------------------------------
def _upsample_fuse_kernel(p_ref, w_ref, b_ref, o_ref):
    # One GEMM = conv_before + PixelShuffle3D + conv_after  AND  ConvTranspose3d.
    o_ref[...] = (jnp.dot(p_ref[...], w_ref[...],
                          preferred_element_type=jnp.float32)
                  + b_ref[...]).astype(o_ref.dtype)


def _moments(acc):
    # Per-channel partial GroupNorm moments of the pre-norm conv output:
    # row 0 = sum over spatial, row 1 = sum of squares.  (2, Cout) f32.
    return jnp.concatenate(
        [jnp.sum(acc, axis=0, keepdims=True),
         jnp.sum(acc * acc, axis=0, keepdims=True)], axis=0)


def _conv3x3x3_kernel(z0_ref, z1_ref, z2_ref, w_ref, b_ref, o_ref, mom_ref):
    # Implicit-GEMM 3x3x3 conv (stride 1, 'same'): three padded depth slices in
    # VMEM, 27 shifted (H*W, Cin) x (Cin, Cout) dots accumulated in f32.
    hh, wh, c1 = o_ref.shape
    acc = jnp.zeros((hh * wh, c1), jnp.float32) + b_ref[...]
    for kd, z_ref in enumerate((z0_ref, z1_ref, z2_ref)):
        z = z_ref[...]                                    # (hh+2, wh+2, Cin)
        for kh in range(3):
            for kw in range(3):
                lhs = z[kh:kh + hh, kw:kw + wh, :].reshape(hh * wh, -1)
                acc = acc + jnp.dot(lhs, w_ref[kd * 9 + kh * 3 + kw],
                                    preferred_element_type=jnp.float32)
    o_ref[...] = acc.reshape(hh, wh, c1).astype(o_ref.dtype)
    mom_ref[...] = _moments(acc)


def _skip_conv_kernel(a0_ref, a1_ref, a2_ref, s0_ref, s1_ref, s2_ref,
                      scale_ref, shift_ref, mask_ref, wa_ref, wb_ref, b_ref,
                      o_ref, mom_ref):
    # skip_conv = conv3x3x3( concat[ relu6(groupnorm(y1)), skip ] ) + bias,
    # with the norm+act of y1 and the channel concat fused in-kernel.
    hh, wh, c1 = o_ref.shape
    d = pl.program_id(1)
    nd = pl.num_programs(1)
    scale = scale_ref[...]                                 # (1, c1) per-sample
    shift = shift_ref[...]
    hw_mask = mask_ref[...]                                # (hh+2, wh+2, 1)
    acc = jnp.zeros((hh * wh, c1), jnp.float32) + b_ref[...]
    a_refs = (a0_ref, a1_ref, a2_ref)
    s_refs = (s0_ref, s1_ref, s2_ref)
    for kd in range(3):
        # zero-padded halo must remain exactly zero AFTER the affine+ReLU6,
        # so mask the H/W border and fully-invalid depth slices.
        dvalid = jnp.logical_and(d + kd - 1 >= 0, d + kd - 1 < nd)
        mask = hw_mask * jnp.where(dvalid, 1.0, 0.0)
        za = jnp.clip(a_refs[kd][...] * scale + shift, 0.0, 6.0) * mask
        zs = s_refs[kd][...]
        for kh in range(3):
            for kw in range(3):
                t = kd * 9 + kh * 3 + kw
                acc = acc + jnp.dot(
                    za[kh:kh + hh, kw:kw + wh, :].reshape(hh * wh, -1),
                    wa_ref[t], preferred_element_type=jnp.float32)
                acc = acc + jnp.dot(
                    zs[kh:kh + hh, kw:kw + wh, :].reshape(hh * wh, -1),
                    wb_ref[t], preferred_element_type=jnp.float32)
    o_ref[...] = acc.reshape(hh, wh, c1).astype(o_ref.dtype)
    mom_ref[...] = _moments(acc)


def _norm_act_kernel(x_ref, scale_ref, shift_ref, o_ref):
    # Final GroupNorm(1, C) affine + ReLU6 (stats precomputed from moments).
    o_ref[...] = jnp.clip(x_ref[...] * scale_ref[...] + shift_ref[...],
                          0.0, 6.0).astype(o_ref.dtype)


# ------------------------------ pallas_call wrappers --------------------------
def _upsample_gemm(p2, w1, b1, out_dtype, tile_m):
    m, k = p2.shape
    n_out = w1.shape[1]
    return pl.pallas_call(
        _upsample_fuse_kernel,
        out_shape=jax.ShapeDtypeStruct((m, n_out), out_dtype),
        grid_spec=pltpu.PrefetchScalarGridSpec(
            num_scalar_prefetch=0,
            grid=(m // tile_m,),
            in_specs=[
                pl.BlockSpec((tile_m, k), lambda i: (i, 0)),
                pl.BlockSpec((k, n_out), lambda i: (0, 0)),
                pl.BlockSpec((1, n_out), lambda i: (0, 0)),
            ],
            out_specs=pl.BlockSpec((tile_m, n_out), lambda i: (i, 0)),
        ),
        compiler_params=pltpu.CompilerParams(
            dimension_semantics=("parallel",)),
    )(p2, w1, b1)


def _slab_spec(hp2, wp2, c, off):
    return pl.BlockSpec((None, None, hp2, wp2, c),
                        lambda b, d: (b, d + off, 0, 0, 0))


def _concat_conv_call(x_pad, w27, bias, out_dtype):
    n, dp2, hp2, wp2, cin = x_pad.shape
    dh, hh, wh = dp2 - 2, hp2 - 2, wp2 - 2
    c1 = w27.shape[-1]
    return pl.pallas_call(
        _conv3x3x3_kernel,
        out_shape=(jax.ShapeDtypeStruct((n, dh, hh, wh, c1), out_dtype),
                   jax.ShapeDtypeStruct((n, dh, 2, c1), jnp.float32)),
        grid_spec=pltpu.PrefetchScalarGridSpec(
            num_scalar_prefetch=0,
            grid=(n, dh),
            in_specs=[
                _slab_spec(hp2, wp2, cin, 0),
                _slab_spec(hp2, wp2, cin, 1),
                _slab_spec(hp2, wp2, cin, 2),
                pl.BlockSpec((27, cin, c1), lambda b, d: (0, 0, 0)),
                pl.BlockSpec((1, c1), lambda b, d: (0, 0)),
            ],
            out_specs=(
                pl.BlockSpec((None, None, hh, wh, c1),
                             lambda b, d: (b, d, 0, 0, 0)),
                pl.BlockSpec((None, None, 2, c1),
                             lambda b, d: (b, d, 0, 0)),
            ),
        ),
        compiler_params=pltpu.CompilerParams(
            dimension_semantics=("parallel", "parallel")),
    )(x_pad, x_pad, x_pad, w27, bias)


def _skip_conv_call(y1_pad, skip_pad, scale1, shift1, hw_mask,
                    wa27, wb27, bias, out_dtype):
    n, dp2, hp2, wp2, c1 = y1_pad.shape
    csk = skip_pad.shape[-1]
    dh, hh, wh = dp2 - 2, hp2 - 2, wp2 - 2
    return pl.pallas_call(
        _skip_conv_kernel,
        out_shape=(jax.ShapeDtypeStruct((n, dh, hh, wh, c1), out_dtype),
                   jax.ShapeDtypeStruct((n, dh, 2, c1), jnp.float32)),
        grid_spec=pltpu.PrefetchScalarGridSpec(
            num_scalar_prefetch=0,
            grid=(n, dh),
            in_specs=[
                _slab_spec(hp2, wp2, c1, 0),
                _slab_spec(hp2, wp2, c1, 1),
                _slab_spec(hp2, wp2, c1, 2),
                _slab_spec(hp2, wp2, csk, 0),
                _slab_spec(hp2, wp2, csk, 1),
                _slab_spec(hp2, wp2, csk, 2),
                pl.BlockSpec((None, 1, c1), lambda b, d: (b, 0, 0)),
                pl.BlockSpec((None, 1, c1), lambda b, d: (b, 0, 0)),
                pl.BlockSpec((hp2, wp2, 1), lambda b, d: (0, 0, 0)),
                pl.BlockSpec((27, c1, c1), lambda b, d: (0, 0, 0)),
                pl.BlockSpec((27, csk, c1), lambda b, d: (0, 0, 0)),
                pl.BlockSpec((1, c1), lambda b, d: (0, 0)),
            ],
            out_specs=(
                pl.BlockSpec((None, None, hh, wh, c1),
                             lambda b, d: (b, d, 0, 0, 0)),
                pl.BlockSpec((None, None, 2, c1),
                             lambda b, d: (b, d, 0, 0)),
            ),
        ),
        compiler_params=pltpu.CompilerParams(
            dimension_semantics=("parallel", "parallel")),
    )(y1_pad, y1_pad, y1_pad, skip_pad, skip_pad, skip_pad,
      scale1, shift1, hw_mask, wa27, wb27, bias)


def _norm_act_call(y, scale, shift):
    n, dh, hh, wh, c1 = y.shape
    return pl.pallas_call(
        _norm_act_kernel,
        out_shape=jax.ShapeDtypeStruct(y.shape, y.dtype),
        grid_spec=pltpu.PrefetchScalarGridSpec(
            num_scalar_prefetch=0,
            grid=(n, dh),
            in_specs=[
                pl.BlockSpec((None, None, hh, wh, c1),
                             lambda b, d: (b, d, 0, 0, 0)),
                pl.BlockSpec((None, 1, c1), lambda b, d: (b, 0, 0)),
                pl.BlockSpec((None, 1, c1), lambda b, d: (b, 0, 0)),
            ],
            out_specs=pl.BlockSpec((None, None, hh, wh, c1),
                                   lambda b, d: (b, d, 0, 0, 0)),
        ),
        compiler_params=pltpu.CompilerParams(
            dimension_semantics=("parallel", "parallel")),
    )(y, scale, shift)


# ------------------------------ JAX glue --------------------------------------
def _ct_tap(parity, s):
    # ConvTranspose3d(k=3, stride=2, padding=1, output_padding=1):
    # output index 2m+parity receives input m+s through kernel tap k (or None).
    if parity == 0:
        return 1 if s == 0 else None
    return 2 if s == 0 else 0


def _build_upsample_weights(params, cin, c1):
    """Fold both upsampling branches into one GEMM weight (8*Cin, 16*Cout)."""
    wb, bb = params["w_before"], params["b_before"]      # (2*cin, cin), (2*cin,)
    wa, ba = params["w_after"], params["b_after"]        # (c1, cin//4), (c1,)
    wct, bct = params["w_ct"], params["b_ct"]            # (cin, c1, 3,3,3), (c1,)
    dtype = wb.dtype
    w_cols, b_cols = [], []
    for pd in (0, 1):
        for ph in (0, 1):
            for pw in (0, 1):
                pi = pd * 4 + ph * 2 + pw
                # pixel-shuffle branch: conv_before -> shuffle -> conv_after
                w_ps = wa @ wb[pi::8, :]                  # (c1, cin)
                b_ps = ba + wa @ bb[pi::8]                # (c1,)
                wp = jnp.zeros((8 * cin, c1), dtype).at[:cin, :].set(w_ps.T)
                # conv-transpose branch (sub-pixel decomposition)
                wc = jnp.zeros((8 * cin, c1), dtype)
                for sd in (0, 1):
                    kd = _ct_tap(pd, sd)
                    if kd is None:
                        continue
                    for sh in (0, 1):
                        kh = _ct_tap(ph, sh)
                        if kh is None:
                            continue
                        for sw in (0, 1):
                            kw = _ct_tap(pw, sw)
                            if kw is None:
                                continue
                            si = sd * 4 + sh * 2 + sw
                            wc = wc.at[si * cin:(si + 1) * cin, :].set(
                                wct[:, :, kd, kh, kw])
                w_cols += [wp, wc]
                b_cols += [b_ps, bct]
    w1 = jnp.concatenate(w_cols, axis=1)                  # (8*cin, 16*c1)
    b1 = jnp.concatenate(b_cols, axis=0).reshape(1, 16 * c1)
    return w1, b1


def _coeffs_from_moments(mom, gamma, beta, count, eps):
    # mom: (N, D, 2, C) per-depth partial sums / sums-of-squares.
    # GroupNorm(1, C): per-sample scalar stats over (D, H, W, C).
    sums = jnp.sum(mom[:, :, 0, :], axis=(1, 2))               # (N,)
    sumsq = jnp.sum(mom[:, :, 1, :], axis=(1, 2))              # (N,)
    mean = sums / count
    var = jnp.maximum(sumsq / count - mean * mean, 0.0)
    scale = gamma[None, :] / jnp.sqrt(var + eps)[:, None]      # (N, C)
    shift = beta[None, :] - mean[:, None] * scale
    return scale[:, None, :], shift[:, None, :]                # (N, 1, C)


def _pad_dhw(t):
    return jnp.pad(t, ((0, 0), (1, 1), (1, 1), (1, 1), (0, 0)))


def multi_decoder_3d_v2(x, skip, params, *, tile_m=512, eps=1e-5):
    n, cin, d, h, w = x.shape
    c1 = params["b_cc"].shape[0]
    csk = skip.shape[1]
    dh, hh, wh = 2 * d, 2 * h, 2 * w

    x_l = jnp.transpose(x, (0, 2, 3, 4, 1))            # NDHWC, low-res
    skip_l = jnp.transpose(skip, (0, 2, 3, 4, 1))      # NDHWC, high-res

    # ---- stage 1: single fused upsampling GEMM (pixel-shuffle path + transpose conv)
    w1, b1 = _build_upsample_weights(params, cin, c1)
    xp = jnp.pad(x_l, ((0, 0), (0, 1), (0, 1), (0, 1), (0, 0)))
    cols = [xp[:, sd:sd + d, sh:sh + h, sw:sw + w, :]
            for sd in (0, 1) for sh in (0, 1) for sw in (0, 1)]
    p2 = jnp.concatenate(cols, axis=-1).reshape(n * d * h * w, 8 * cin)
    m = n * d * h * w
    tm = min(tile_m, m)
    while m % tm:
        tm //= 2
    up_flat = _upsample_gemm(p2, w1, b1, x.dtype, tm)          # (M_low, 16*c1)
    up = up_flat.reshape(n, d, h, w, 2, 2, 2, 2 * c1)
    up = jnp.transpose(up, (0, 1, 4, 2, 5, 3, 6, 7)).reshape(n, dh, hh, wh, 2 * c1)

    # ---- stage 2: concat_conv (3x3x3 conv + bias) as implicit GEMM.
    # GroupNorm moments of y1 are produced inside the kernel (no extra HBM pass).
    up_pad = _pad_dhw(up)
    w_cc27 = params["w_cc"].reshape(27, 2 * c1, c1)
    y1, mom1 = _concat_conv_call(up_pad, w_cc27,
                                 params["b_cc"].reshape(1, c1), x.dtype)
    count = float(dh * hh * wh * c1)
    scale1, shift1 = _coeffs_from_moments(mom1, params["gamma1"],
                                          params["beta1"], count, eps)

    # ---- stage 3: skip_conv; GroupNorm+ReLU6 of y1 and concat with skip are fused
    y1_pad = _pad_dhw(y1)
    skip_pad = _pad_dhw(skip_l)
    hw_mask = jnp.zeros((hh + 2, wh + 2, 1), jnp.float32).at[1:-1, 1:-1, :].set(1.0)
    wa27 = params["w_sc"][:, :, :, :c1, :].reshape(27, c1, c1)
    wb27 = params["w_sc"][:, :, :, c1:, :].reshape(27, csk, c1)
    y2, mom2 = _skip_conv_call(y1_pad, skip_pad, scale1, shift1, hw_mask,
                               wa27, wb27, params["b_sc"].reshape(1, c1), x.dtype)

    # ---- stage 4: final GroupNorm + ReLU6 (stats from in-kernel moments)
    scale2, shift2 = _coeffs_from_moments(mom2, params["gamma2"],
                                          params["beta2"], count, eps)
    out = _norm_act_call(y2, scale2, shift2)
    return jnp.transpose(out, (0, 4, 1, 2, 3))                 # back to NCDHW


# ------------------------------ parameter init --------------------------------
def init_params(key, in_channels, skip_channels, out_channels,
                dtype=jnp.float32):
    assert in_channels % 4 == 0, "pixel-shuffle path needs in_channels % 4 == 0"
    ks = jax.random.split(key, 14)
    cmid = in_channels * 2                    # in_channels * prod(2,2,2) // 4
    cps = in_channels // 4
    c1 = out_channels

    def rnd(k, shape, fan_in):
        return jax.random.normal(k, shape, dtype) / jnp.sqrt(
            jnp.asarray(fan_in, dtype))

    return dict(
        # conv_before_pixel_shuffle (1x1x1): weight (Cmid, Cin)
        w_before=rnd(ks[0], (cmid, in_channels), in_channels),
        b_before=0.1 * jax.random.normal(ks[1], (cmid,), dtype),
        # conv_after_pixel_shuffle (1x1x1): weight (Cout, Cin//4)
        w_after=rnd(ks[2], (c1, cps), cps),
        b_after=0.1 * jax.random.normal(ks[3], (c1,), dtype),
        # conv_transpose: PyTorch layout (Cin, Cout, 3, 3, 3)
        w_ct=rnd(ks[4], (in_channels, c1, 3, 3, 3), in_channels * 27),
        b_ct=0.1 * jax.random.normal(ks[5], (c1,), dtype),
        # concat_conv ConvBlock3D: weight DHWIO (3,3,3, 2*Cout, Cout)
        w_cc=rnd(ks[6], (3, 3, 3, 2 * c1, c1), 2 * c1 * 27),
        b_cc=0.1 * jax.random.normal(ks[7], (c1,), dtype),
        gamma1=1.0 + 0.1 * jax.random.normal(ks[8], (c1,), dtype),
        beta1=0.1 * jax.random.normal(ks[9], (c1,), dtype),
        # skip_conv ConvBlock3D: weight DHWIO (3,3,3, Cout+Cskip, Cout)
        w_sc=rnd(ks[10], (3, 3, 3, c1 + skip_channels, c1),
                 (c1 + skip_channels) * 27),
        b_sc=0.1 * jax.random.normal(ks[11], (c1,), dtype),
        gamma2=1.0 + 0.1 * jax.random.normal(ks[12], (c1,), dtype),
        beta2=0.1 * jax.random.normal(ks[13], (c1,), dtype),
    )


# ----------------------- pure-JAX reference (for checking) --------------------
def _group_norm_relu6_ref(y, gamma, beta, eps):
    mean = jnp.mean(y, axis=(1, 2, 3, 4), keepdims=True)
    var = jnp.var(y, axis=(1, 2, 3, 4), keepdims=True)
    return jnp.clip((y - mean) / jnp.sqrt(var + eps) * gamma + beta, 0.0, 6.0)


def multi_decoder_3d_v2_ref(x, skip, params, eps=1e-5):
    n, cin, d, h, w = x.shape
    c1 = params["b_cc"].shape[0]
    x_l = jnp.transpose(x, (0, 2, 3, 4, 1))
    skip_l = jnp.transpose(skip, (0, 2, 3, 4, 1))
    hp = lax.Precision.HIGHEST
    # pixel-shuffle branch
    h0 = jnp.einsum("ndhwc,oc->ndhwo", x_l, params["w_before"],
                    precision=hp) + params["b_before"]
    cps = cin // 4
    t = h0.reshape(n, d, h, w, cps, 2, 2, 2)
    t = jnp.transpose(t, (0, 1, 5, 2, 6, 3, 7, 4))
    ps_in = t.reshape(n, 2 * d, 2 * h, 2 * w, cps)
    ps = jnp.einsum("ndhwc,oc->ndhwo", ps_in, params["w_after"],
                    precision=hp) + params["b_after"]
    # conv-transpose branch (stride 2, k 3, pad 1, output_padding 1)
    w_dhwio = jnp.transpose(jnp.flip(params["w_ct"], axis=(2, 3, 4)),
                            (2, 3, 4, 0, 1))
    ct = lax.conv_general_dilated(
        x_l, w_dhwio, window_strides=(1, 1, 1), padding=[(1, 2)] * 3,
        lhs_dilation=(2, 2, 2),
        dimension_numbers=("NDHWC", "DHWIO", "NDHWC"),
        precision=hp) + params["b_ct"]
    up = jnp.concatenate([ps, ct], axis=-1)
    # concat_conv
    y1 = lax.conv_general_dilated(
        up, params["w_cc"], (1, 1, 1), [(1, 1)] * 3,
        dimension_numbers=("NDHWC", "DHWIO", "NDHWC"), precision=hp
    ) + params["b_cc"]
    y1 = _group_norm_relu6_ref(y1, params["gamma1"], params["beta1"], eps)
    # skip_conv
    z = jnp.concatenate([y1, skip_l], axis=-1)
    y2 = lax.conv_general_dilated(
        z, params["w_sc"], (1, 1, 1), [(1, 1)] * 3,
        dimension_numbers=("NDHWC", "DHWIO", "NDHWC"), precision=hp
    ) + params["b_sc"]
    y2 = _group_norm_relu6_ref(y2, params["gamma2"], params["beta2"], eps)
    return jnp.transpose(y2, (0, 4, 1, 2, 3))


# --------------------------------- main ----------------------------------------
if __name__ == "__main__":
    key = jax.random.PRNGKey(0)
    kx, ks, kp = jax.random.split(key, 3)

    N, CIN, CSKIP, COUT = 2, 8, 8, 8
    D = H = W = 4                                     # low-res; output is 8x8x8
    x = jax.random.normal(kx, (N, CIN, D, H, W), jnp.float32)
    skip = jax.random.normal(ks, (N, CSKIP, 2 * D, 2 * H, 2 * W), jnp.float32)
    params = init_params(kp, CIN, CSKIP, COUT)

    fwd = jax.jit(multi_decoder_3d_v2)
    out = jax.block_until_ready(fwd(x, skip, params))
    assert out.shape == (N, COUT, 2 * D, 2 * H, 2 * W), out.shape

    ref = jax.block_until_ready(multi_decoder_3d_v2_ref(x, skip, params))
    max_err = float(jnp.max(jnp.abs(out - ref)))
    assert jnp.allclose(out, ref, atol=3e-2, rtol=3e-2), max_err

    print("KERNEL_OK")
</pallas_src>

<mosaic_0001>
module attributes {stable_mosaic.version = 11 : i64} {
  func.func @_upsample_fuse_kernel(%arg0: i32, %arg1: memref<128x64xf32, #tpu.memory_space<vmem>>, %arg2: memref<64x128xf32, #tpu.memory_space<vmem>>, %arg3: memref<1x128xf32, #tpu.memory_space<vmem>>, %arg4: memref<128x128xf32, #tpu.memory_space<vmem>>) attributes {dimension_semantics = [#tpu.dimension_semantics<parallel>], iteration_bounds = array<i64: 1>, scalar_prefetch = 0 : i64, scratch_operands = 0 : i64, tpu.core_type = #tpu.core_type<tc>, window_params = [{transform_indices = @transform_0, window_bounds = array<i64: 128, 64>}, {pipeline_mode = #tpu.pipeline_mode<synchronous>, transform_indices = @transform_1, window_bounds = array<i64: 64, 128>}, {pipeline_mode = #tpu.pipeline_mode<synchronous>, transform_indices = @transform_2, window_bounds = array<i64: 1, 128>}, {transform_indices = @transform_3, window_bounds = array<i64: 128, 128>}]} {
    %c0 = arith.constant 0 : index
    %c0_0 = arith.constant 0 : index
    %0 = vector.load %arg1[%c0, %c0_0] : memref<128x64xf32, #tpu.memory_space<vmem>>, vector<128x64xf32>
    %c0_1 = arith.constant 0 : index
    %c0_2 = arith.constant 0 : index
    %1 = vector.load %arg2[%c0_1, %c0_2] : memref<64x128xf32, #tpu.memory_space<vmem>>, vector<64x128xf32>
    %cst = arith.constant dense<0.000000e+00> : vector<128x128xf32>
    %2 = tpu.matmul %0, %1, %cst {dimension_numbers = #tpu.dot_dimension_numbers<[1], [0], [0], [1], [0, 0, 1, 1], [], []>} : vector<128x64xf32>, vector<64x128xf32>, vector<128x128xf32> -> vector<128x128xf32>
    %c0_3 = arith.constant 0 : index
    %c0_4 = arith.constant 0 : index
    %3 = vector.load %arg3[%c0_3, %c0_4] : memref<1x128xf32, #tpu.memory_space<vmem>>, vector<1x128xf32>
    %4 = vector.broadcast %3 : vector<1x128xf32> to vector<128x128xf32>
    %5 = arith.addf %2, %4 : vector<128x128xf32>
    %c0_5 = arith.constant 0 : index
    %c0_6 = arith.constant 0 : index
    %6 = vector.load %arg4[%c0_5, %c0_6] : memref<128x128xf32, #tpu.memory_space<vmem>>, vector<128x128xf32>
    tpu.vector_store %arg4[%c0_5, %c0_6], %5 {strides = array<i32>} : memref<128x128xf32, #tpu.memory_space<vmem>>, vector<128x128xf32>,
    return
  }
  func.func @transform_0(%arg0: i32) -> (i32, i32) {
    %c0_i32 = arith.constant 0 : i32
    %c0_i32_0 = arith.constant 0 : i32
    return %arg0, %c0_i32 : i32, i32
  }
  func.func @transform_1(%arg0: i32) -> (i32, i32) {
    %c0_i32 = arith.constant 0 : i32
    %c0_i32_0 = arith.constant 0 : i32
    %c0_i32_1 = arith.constant 0 : i32
    return %c0_i32, %c0_i32_0 : i32, i32
  }
  func.func @transform_2(%arg0: i32) -> (i32, i32) {
    %c0_i32 = arith.constant 0 : i32
    %c0_i32_0 = arith.constant 0 : i32
    %c0_i32_1 = arith.constant 0 : i32
    return %c0_i32, %c0_i32_0 : i32, i32
  }
  func.func @transform_3(%arg0: i32) -> (i32, i32) {
    %c0_i32 = arith.constant 0 : i32
    %c0_i32_0 = arith.constant 0 : i32
    return %arg0, %c0_i32 : i32, i32
  }
}

module attributes {stable_mosaic.version = 11 : i64} {
  func.func @_conv3x3x3_kernel(%arg0: i32, %arg1: i32, %arg2: memref<1x1x10x10x16xf32, #tpu.memory_space<vmem>>, %arg3: memref<1x1x10x10x16xf32, #tpu.memory_space<vmem>>, %arg4: memref<1x1x10x10x16xf32, #tpu.memory_space<vmem>>, %arg5: memref<27x16x8xf32, #tpu.memory_space<vmem>>, %arg6: memref<1x8xf32, #tpu.memory_space<vmem>>, %arg7: memref<1x1x8x8x8xf32, #tpu.memory_space<vmem>>, %arg8: memref<1x1x2x8xf32, #tpu.memory_space<vmem>>) attributes {dimension_semantics = [#tpu.dimension_semantics<parallel>, #tpu.dimension_semantics<parallel>], iteration_bounds = array<i64: 2, 8>, scalar_prefetch = 0 : i64, scratch_operands = 0 : i64, tpu.core_type = #tpu.core_type<tc>, window_params = [{transform_indices = @transform_0, window_bounds = array<i64: 1, 1, 10, 10, 16>}, {transform_indices = @transform_1, window_bounds = array<i64: 1, 1, 10, 10, 16>}, {transform_indices = @transform_2, window_bounds = array<i64: 1, 1, 10, 10, 16>}, {pipeline_mode = #tpu.pipeline_mode<synchronous>, transform_indices = @transform_3, window_bounds = array<i64: 27, 16, 8>}, {pipeline_mode = #tpu.pipeline_mode<synchronous>, transform_indices = @transform_4, window_bounds = array<i64: 1, 8>}, {transform_indices = @transform_5, window_bounds = array<i64: 1, 1, 8, 8, 8>}, {transform_indices = @transform_6, window_bounds = array<i64: 1, 1, 2, 8>}]} {
    %cst = arith.constant 0.000000e+00 : f32
    %0 = vector.broadcast %cst : f32 to vector<64x8xf32>
    %c0 = arith.constant 0 : index
    %c0_0 = arith.constant 0 : index
    %1 = vector.load %arg6[%c0, %c0_0] : memref<1x8xf32, #tpu.memory_space<vmem>>, vector<1x8xf32>
    %2 = vector.broadcast %1 : vector<1x8xf32> to vector<64x8xf32>
    %3 = arith.addf %0, %2 : vector<64x8xf32>
    %c0_1 = arith.constant 0 : index
    %c0_2 = arith.constant 0 : index
    %c0_3 = arith.constant 0 : index
    %c0_4 = arith.constant 0 : index
    %c0_5 = arith.constant 0 : index
    %4 = vector.load %arg2[%c0_1, %c0_2, %c0_3, %c0_4, %c0_5] : memref<1x1x10x10x16xf32, #tpu.memory_space<vmem>>, vector<1x1x10x10x16xf32>
    %5 = vector.shape_cast %4 : vector<1x1x10x10x16xf32> to vector<10x10x16xf32>
    %6 = vector.extract_strided_slice %5 {offsets = [0, 0, 0], sizes = [8, 8, 16], strides = [1, 1, 1]} : vector<10x10x16xf32> to vector<8x8x16xf32>
    %7 = vector.shape_cast %6 : vector<8x8x16xf32> to vector<64x16xf32>
    %c0_6 = arith.constant 0 : index
    %c0_7 = arith.constant 0 : index
    %c0_8 = arith.constant 0 : index
    %8 = vector.load %arg5[%c0_6, %c0_7, %c0_8] : memref<27x16x8xf32, #tpu.memory_space<vmem>>, vector<1x16x8xf32>
    %9 = vector.shape_cast %8 : vector<1x16x8xf32> to vector<16x8xf32>
    %cst_9 = arith.constant dense<0.000000e+00> : vector<64x8xf32>
    %10 = tpu.matmul %7, %9, %cst_9 {dimension_numbers = #tpu.dot_dimension_numbers<[1], [0], [0], [1], [0, 0, 1, 1], [], []>} : vector<64x16xf32>, vector<16x8xf32>, vector<64x8xf32> -> vector<64x8xf32>
    %11 = arith.addf %3, %10 : vector<64x8xf32>
    %12 = vector.extract_strided_slice %5 {offsets = [0, 1, 0], sizes = [8, 8, 16], strides = [1, 1, 1]} : vector<10x10x16xf32> to vector<8x8x16xf32>
    %13 = vector.shape_cast %12 : vector<8x8x16xf32> to vector<64x16xf32>
    %c1 = arith.constant 1 : index
    %c0_10 = arith.constant 0 : index
    %c0_11 = arith.constant 0 : index
    %14 = vector.load %arg5[%c1, %c0_10, %c0_11] : memref<27x16x8xf32, #tpu.memory_space<vmem>>, vector<1x16x8xf32>
    %15 = vector.shape_cast %14 : vector<1x16x8xf32> to vector<16x8xf32>
    %cst_12 = arith.constant dense<0.000000e+00> : vector<64x8xf32>
    %16 = tpu.matmul %13, %15, %cst_12 {dimension_numbers = #tpu.dot_dimension_numbers<[1], [0], [0], [1], [0, 0, 1, 1], [], []>} : vector<64x16xf32>, vector<16x8xf32>, vector<64x8xf32> -> vector<64x8xf32>
    %17 = arith.addf %11, %16 : vector<64x8xf32>
    %18 = vector.extract_strided_slice %5 {offsets = [0, 2, 0], sizes = [8, 8, 16], strides = [1, 1, 1]} : vector<10x10x16xf32> to vector<8x8x16xf32>
    %19 = vector.shape_cast %18 : vector<8x8x16xf32> to vector<64x16xf32>
    %c2 = arith.constant 2 : index
    %c0_13 = arith.constant 0 : index
    %c0_14 = arith.constant 0 : index
    %20 = vector.load %arg5[%c2, %c0_13, %c0_14] : memref<27x16x8xf32, #tpu.memory_space<vmem>>, vector<1x16x8xf32>
    %21 = vector.shape_cast %20 : vector<1x16x8xf32> to vector<16x8xf32>
    %cst_15 = arith.constant dense<0.000000e+00> : vector<64x8xf32>
    %22 = tpu.matmul %19, %21, %cst_15 {dimension_numbers = #tpu.dot_dimension_numbers<[1], [0], [0], [1], [0, 0, 1, 1], [], []>} : vector<64x16xf32>, vector<16x8xf32>, vector<64x8xf32> -> vector<64x8xf32>
    %23 = arith.addf %17, %22 : vector<64x8xf32>
    %24 = vector.extract_strided_slice %5 {offsets = [1, 0, 0], sizes = [8, 8, 16], strides = [1, 1, 1]} : vector<10x10x16xf32> to vector<8x8x16xf32>
    %25 = vector.shape_cast %24 : vector<8x8x16xf32> to vector<64x16xf32>
    %c3 = arith.constant 3 : index
    %c0_16 = arith.constant 0 : index
    %c0_17 = arith.constant 0 : index
    %26 = vector.load %arg5[%c3, %c0_16, %c0_17] : memref<27x16x8xf32, #tpu.memory_space<vmem>>, vector<1x16x8xf32>
    %27 = vector.shape_cast %26 : vector<1x16x8xf32> to vector<16x8xf32>
    %cst_18 = arith.constant dense<0.000000e+00> : vector<64x8xf32>
    %28 = tpu.matmul %25, %27, %cst_18 {dimension_numbers = #tpu.dot_dimension_numbers<[1], [0], [0], [1], [0, 0, 1, 1], [], []>} : vector<64x16xf32>, vector<16x8xf32>, vector<64x8xf32> -> vector<64x8xf32>
    %29 = arith.addf %23, %28 : vector<64x8xf32>
    %30 = vector.extract_strided_slice %5 {offsets = [1, 1, 0], sizes = [8, 8, 16], strides = [1, 1, 1]} : vector<10x10x16xf32> to vector<8x8x16xf32>
    %31 = vector.shape_cast %30 : vector<8x8x16xf32> to vector<64x16xf32>
    %c4 = arith.constant 4 : index
    %c0_19 = arith.constant 0 : index
    %c0_20 = arith.constant 0 : index
    %32 = vector.load %arg5[%c4, %c0_19, %c0_20] : memref<27x16x8xf32, #tpu.memory_space<vmem>>, vector<1x16x8xf32>
    %33 = vector.shape_cast %32 : vector<1x16x8xf32> to vector<16x8xf32>
    %cst_21 = arith.constant dense<0.000000e+00> : vector<64x8xf32>
    %34 = tpu.matmul %31, %33, %cst_21 {dimension_numbers = #tpu.dot_dimension_numbers<[1], [0], [0], [1], [0, 0, 1, 1], [], []>} : vector<64x16xf32>, vector<16x8xf32>, vector<64x8xf32> -> vector<64x8xf32>
    %35 = arith.addf %29, %34 : vector<64x8xf32>
    %36 = vector.extract_strided_slice %5 {offsets = [1, 2, 0], sizes = [8, 8, 16], strides = [1, 1, 1]} : vector<10x10x16xf32> to vector<8x8x16xf32>
    %37 = vector.shape_cast %36 : vector<8x8x16xf32> to vector<64x16xf32>
    %c5 = arith.constant 5 : index
    %c0_22 = arith.constant 0 : index
    %c0_23 = arith.constant 0 : index
    %38 = vector.load %arg5[%c5, %c0_22, %c0_23] : memref<27x16x8xf32, #tpu.memory_space<vmem>>, vector<1x16x8xf32>
    %39 = vector.shape_cast %38 : vector<1x16x8xf32> to vector<16x8xf32>
    %cst_24 = arith.constant dense<0.000000e+00> : vector<64x8xf32>
    %40 = tpu.matmul %37, %39, %cst_24 {dimension_numbers = #tpu.dot_dimension_numbers<[1], [0], [0], [1], [0, 0, 1, 1], [], []>} : vector<64x16xf32>, vector<16x8xf32>, vector<64x8xf32> -> vector<64x8xf32>
    %41 = arith.addf %35, %40 : vector<64x8xf32>
    %42 = vector.extract_strided_slice %5 {offsets = [2, 0, 0], sizes = [8, 8, 16], strides = [1, 1, 1]} : vector<10x10x16xf32> to vector<8x8x16xf32>
    %43 = vector.shape_cast %42 : vector<8x8x16xf32> to vector<64x16xf32>
    %c6 = arith.constant 6 : index
    %c0_25 = arith.constant 0 : index
    %c0_26 = arith.constant 0 : index
    %44 = vector.load %arg5[%c6, %c0_25, %c0_26] : memref<27x16x8xf32, #tpu.memory_space<vmem>>, vector<1x16x8xf32>
    %45 = vector.shape_cast %44 : vector<1x16x8xf32> to vector<16x8xf32>
    %cst_27 = arith.constant dense<0.000000e+00> : vector<64x8xf32>
    %46 = tpu.matmul %43, %45, %cst_27 {dimension_numbers = #tpu.dot_dimension_numbers<[1], [0], [0], [1], [0, 0, 1, 1], [], []>} : vector<64x16xf32>, vector<16x8xf32>, vector<64x8xf32> -> vector<64x8xf32>
    %47 = arith.addf %41, %46 : vector<64x8xf32>
    %48 = vector.extract_strided_slice %5 {offsets = [2, 1, 0], sizes = [8, 8, 16], strides = [1, 1, 1]} : vector<10x10x16xf32> to vector<8x8x16xf32>
    %49 = vector.shape_cast %48 : vector<8x8x16xf32> to vector<64x16xf32>
    %c7 = arith.constant 7 : index
    %c0_28 = arith.constant 0 : index
    %c0_29 = arith.constant 0 : index
    %50 = vector.load %arg5[%c7, %c0_28, %c0_29] : memref<27x16x8xf32, #tpu.memory_space<vmem>>, vector<1x16x8xf32>
    %51 = vector.shape_cast %50 : vector<1x16x8xf32> to vector<16x8xf32>
    %cst_30 = arith.constant dense<0.000000e+00> : vector<64x8xf32>
    %52 = tpu.matmul %49, %51, %cst_30 {dimension_numbers = #tpu.dot_dimension_numbers<[1], [0], [0], [1], [0, 0, 1, 1], [], []>} : vector<64x16xf32>, vector<16x8xf32>, vector<64x8xf32> -> vector<64x8xf32>
    %53 = arith.addf %47, %52 : vector<64x8xf32>
    %54 = vector.extract_strided_slice %5 {offsets = [2, 2, 0], sizes = [8, 8, 16], strides = [1, 1, 1]} : vector<10x10x16xf32> to vector<8x8x16xf32>
    %55 = vector.shape_cast %54 : vector<8x8x16xf32> to vector<64x16xf32>
    %c8 = arith.constant 8 : index
    %c0_31 = arith.constant 0 : index
    %c0_32 = arith.constant 0 : index
    %56 = vector.load %arg5[%c8, %c0_31, %c0_32] : memref<27x16x8xf32, #tpu.memory_space<vmem>>, vector<1x16x8xf32>
    %57 = vector.shape_cast %56 : vector<1x16x8xf32> to vector<16x8xf32>
    %cst_33 = arith.constant dense<0.000000e+00> : vector<64x8xf32>
    %58 = tpu.matmul %55, %57, %cst_33 {dimension_numbers = #tpu.dot_dimension_numbers<[1], [0], [0], [1], [0, 0, 1, 1], [], []>} : vector<64x16xf32>, vector<16x8xf32>, vector<64x8xf32> -> vector<64x8xf32>
    %59 = arith.addf %53, %58 : vector<64x8xf32>
    %c0_34 = arith.constant 0 : index
    %c0_35 = arith.constant 0 : index
    %c0_36 = arith.constant 0 : index
    %c0_37 = arith.constant 0 : index
    %c0_38 = arith.constant 0 : index
    %60 = vector.load %arg3[%c0_34, %c0_35, %c0_36, %c0_37, %c0_38] : memref<1x1x10x10x16xf32, #tpu.memory_space<vmem>>, vector<1x1x10x10x16xf32>
    %61 = vector.shape_cast %60 : vector<1x1x10x10x16xf32> to vector<10x10x16xf32>
    %62 = vector.extract_strided_slice %61 {offsets = [0, 0, 0], sizes = [8, 8, 16], strides = [1, 1, 1]} : vector<10x10x16xf32> to vector<8x8x16xf32>
    %63 = vector.shape_cast %62 : vector<8x8x16xf32> to vector<64x16xf32>
    %c9 = arith.constant 9 : index
    %c0_39 = arith.constant 0 : index
    %c0_40 = arith.constant 0 : index
    %64 = vector.load %arg5[%c9, %c0_39, %c0_40] : memref<27x16x8xf32, #tpu.memory_space<vmem>>, vector<1x16x8xf32>
    %65 = vector.shape_cast %64 : vector<1x16x8xf32> to vector<16x8xf32>
    %cst_41 = arith.constant dense<0.000000e+00> : vector<64x8xf32>
    %66 = tpu.matmul %63, %65, %cst_41 {dimension_numbers = #tpu.dot_dimension_numbers<[1], [0], [0], [1], [0, 0, 1, 1], [], []>} : vector<64x16xf32>, vector<16x8xf32>, vector<64x8xf32> -> vector<64x8xf32>
    %67 = arith.addf %59, %66 : vector<64x8xf32>
    %68 = vector.extract_strided_slice %61 {offsets = [0, 1, 0], sizes = [8, 8, 16], strides = [1, 1, 1]} : vector<10x10x16xf32> to vector<8x8x16xf32>
    %69 = vector.shape_cast %68 : vector<8x8x16xf32> to vector<64x16xf32>
    %c10 = arith.constant 10 : index
    %c0_42 = arith.constant 0 : index
    %c0_43 = arith.constant 0 : index
    %70 = vector.load %arg5[%c10, %c0_42, %c0_43] : memref<27x16x8xf32, #tpu.memory_space<vmem>>, vector<1x16x8xf32>
    %71 = vector.shape_cast %70 : vector<1x16x8xf32> to vector<16x8xf32>
    %cst_44 = arith.constant dense<0.000000e+00> : vector<64x8xf32>
    %72 = tpu.matmul %69, %71, %cst_44 {dimension_numbers = #tpu.dot_dimension_numbers<[1], [0], [0], [1], [0, 0, 1, 1], [], []>} : vector<64x16xf32>, vector<16x8xf32>, vector<64x8xf32> -> vector<64x8xf32>
    %73 = arith.addf %67, %72 : vector<64x8xf32>
    %74 = vector.extract_strided_slice %61 {offsets = [0, 2, 0], sizes = [8, 8, 16], strides = [1, 1, 1]} : vector<10x10x16xf32> to vector<8x8x16xf32>
    %75 = vector.shape_cast %74 : vector<8x8x16xf32> to vector<64x16xf32>
    %c11 = arith.constant 11 : index
    %c0_45 = arith.constant 0 : index
    %c0_46 = arith.constant 0 : index
    %76 = vector.load %arg5[%c11, %c0_45, %c0_46] : memref<27x16x8xf32, #tpu.memory_space<vmem>>, vector<1x16x8xf32>
    %77 = vector.shape_cast %76 : vector<1x16x8xf32> to vector<16x8xf32>
    %cst_47 = arith.constant dense<0.000000e+00> : vector<64x8xf32>
    %78 = tpu.matmul %75, %77, %cst_47 {dimension_numbers = #tpu.dot_dimension_numbers<[1], [0], [0], [1], [0, 0, 1, 1], [], []>} : vector<64x16xf32>, vector<16x8xf32>, vector<64x8xf32> -> vector<64x8xf32>
    %79 = arith.addf %73, %78 : vector<64x8xf32>
    %80 = vector.extract_strided_slice %61 {offsets = [1, 0, 0], sizes = [8, 8, 16], strides = [1, 1, 1]} : vector<10x10x16xf32> to vector<8x8x16xf32>
    %81 = vector.shape_cast %80 : vector<8x8x16xf32> to vector<64x16xf32>
    %c12 = arith.constant 12 : index
    %c0_48 = arith.constant 0 : index
    %c0_49 = arith.constant 0 : index
    %82 = vector.load %arg5[%c12, %c0_48, %c0_49] : memref<27x16x8xf32, #tpu.memory_space<vmem>>, vector<1x16x8xf32>
    %83 = vector.shape_cast %82 : vector<1x16x8xf32> to vector<16x8xf32>
    %cst_50 = arith.constant dense<0.000000e+00> : vector<64x8xf32>
    %84 = tpu.matmul %81, %83, %cst_50 {dimension_numbers = #tpu.dot_dimension_numbers<[1], [0], [0], [1], [0, 0, 1, 1], [], []>} : vector<64x16xf32>, vector<16x8xf32>, vector<64x8xf32> -> vector<64x8xf32>
    %85 = arith.addf %79, %84 : vector<64x8xf32>
    %86 = vector.extract_strided_slice %61 {offsets = [1, 1, 0], sizes = [8, 8, 16], strides = [1, 1, 1]} : vector<10x10x16xf32> to vector<8x8x16xf32>
    %87 = vector.shape_cast %86 : vector<8x8x16xf32> to vector<64x16xf32>
    %c13 = arith.constant 13 : index
    %c0_51 = arith.constant 0 : index
    %c0_52 = arith.constant 0 : index
    %88 = vector.load %arg5[%c13, %c0_51, %c0_52] : memref<27x16x8xf32, #tpu.memory_space<vmem>>, vector<1x16x8xf32>
    %89 = vector.shape_cast %88 : vector<1x16x8xf32> to vector<16x8xf32>
    %cst_53 = arith.constant dense<0.000000e+00> : vector<64x8xf32>
    %90 = tpu.matmul %87, %89, %cst_53 {dimension_numbers = #tpu.dot_dimension_numbers<[1], [0], [0], [1], [0, 0, 1, 1], [], []>} : vector<64x16xf32>, vector<16x8xf32>, vector<64x8xf32> -> vector<64x8xf32>
    %91 = arith.addf %85, %90 : vector<64x8xf32>
    %92 = vector.extract_strided_slice %61 {offsets = [1, 2, 0], sizes = [8, 8, 16], strides = [1, 1, 1]} : vector<10x10x16xf32> to vector<8x8x16xf32>
    %93 = vector.shape_cast %92 : vector<8x8x16xf32> to vector<64x16xf32>
    %c14 = arith.constant 14 : index
    %c0_54 = arith.constant 0 : index
    %c0_55 = arith.constant 0 : index
    %94 = vector.load %arg5[%c14, %c0_54, %c0_55] : memref<27x16x8xf32, #tpu.memory_space<vmem>>, vector<1x16x8xf32>
    %95 = vector.shape_cast %94 : vector<1x16x8xf32> to vector<16x8xf32>
    %cst_56 = arith.constant dense<0.000000e+00> : vector<64x8xf32>
    %96 = tpu.matmul %93, %95, %cst_56 {dimension_numbers = #tpu.dot_dimension_numbers<[1], [0], [0], [1], [0, 0, 1, 1], [], []>} : vector<64x16xf32>, vector<16x8xf32>, vector<64x8xf32> -> vector<64x8xf32>
    %97 = arith.addf %91, %96 : vector<64x8xf32>
    %98 = vector.extract_strided_slice %61 {offsets = [2, 0, 0], sizes = [8, 8, 16], strides = [1, 1, 1]} : vector<10x10x16xf32> to vector<8x8x16xf32>
    %99 = vector.shape_cast %98 : vector<8x8x16xf32> to vector<64x16xf32>
    %c15 = arith.constant 15 : index
    %c0_57 = arith.constant 0 : index
    %c0_58 = arith.constant 0 : index
    %100 = vector.load %arg5[%c15, %c0_57, %c0_58] : memref<27x16x8xf32, #tpu.memory_space<vmem>>, vector<1x16x8xf32>
    %101 = vector.shape_cast %100 : vector<1x16x8xf32> to vector<16x8xf32>
    %cst_59 = arith.constant dense<0.000000e+00> : vector<64x8xf32>
    %102 = tpu.matmul %99, %101, %cst_59 {dimension_numbers = #tpu.dot_dimension_numbers<[1], [0], [0], [1], [0, 0, 1, 1], [], []>} : vector<64x16xf32>, vector<16x8xf32>, vector<64x8xf32> -> vector<64x8xf32>
    %103 = arith.addf %97, %102 : vector<64x8xf32>
    %104 = vector.extract_strided_slice %61 {offsets = [2, 1, 0], sizes = [8, 8, 16], strides = [1, 1, 1]} : vector<10x10x16xf32> to vector<8x8x16xf32>
    %105 = vector.shape_cast %104 : vector<8x8x16xf32> to vector<64x16xf32>
    %c16 = arith.constant 16 : index
    %c0_60 = arith.constant 0 : index
    %c0_61 = arith.constant 0 : index
    %106 = vector.load %arg5[%c16, %c0_60, %c0_61] : memref<27x16x8xf32, #tpu.memory_space<vmem>>, vector<1x16x8xf32>
    %107 = vector.shape_cast %106 : vector<1x16x8xf32> to vector<16x8xf32>
    %cst_62 = arith.constant dense<0.000000e+00> : vector<64x8xf32>
    %108 = tpu.matmul %105, %107, %cst_62 {dimension_numbers = #tpu.dot_dimension_numbers<[1], [0], [0], [1], [0, 0, 1, 1], [], []>} : vector<64x16xf32>, vector<16x8xf32>, vector<64x8xf32> -> vector<64x8xf32>
    %109 = arith.addf %103, %108 : vector<64x8xf32>
    %110 = vector.extract_strided_slice %61 {offsets = [2, 2, 0], sizes = [8, 8, 16], strides = [1, 1, 1]} : vector<10x10x16xf32> to vector<8x8x16xf32>
    %111 = vector.shape_cast %110 : vector<8x8x16xf32> to vector<64x16xf32>
    %c17 = arith.constant 17 : index
    %c0_63 = arith.constant 0 : index
    %c0_64 = arith.constant 0 : index
    %112 = vector.load %arg5[%c17, %c0_63, %c0_64] : memref<27x16x8xf32, #tpu.memory_space<vmem>>, vector<1x16x8xf32>
    %113 = vector.shape_cast %112 : vector<1x16x8xf32> to vector<16x8xf32>
    %cst_65 = arith.constant dense<0.000000e+00> : vector<64x8xf32>
    %114 = tpu.matmul %111, %113, %cst_65 {dimension_numbers = #tpu.dot_dimension_numbers<[1], [0], [0], [1], [0, 0, 1, 1], [], []>} : vector<64x16xf32>, vector<16x8xf32>, vector<64x8xf32> -> vector<64x8xf32>
    %115 = arith.addf %109, %114 : vector<64x8xf32>
    %c0_66 = arith.constant 0 : index
    %c0_67 = arith.constant 0 : index
    %c0_68 = arith.constant 0 : index
    %c0_69 = arith.constant 0 : index
    %c0_70 = arith.constant 0 : index
    %116 = vector.load %arg4[%c0_66, %c0_67, %c0_68, %c0_69, %c0_70] : memref<1x1x10x10x16xf32, #tpu.memory_space<vmem>>, vector<1x1x10x10x16xf32>
    %117 = vector.shape_cast %116 : vector<1x1x10x10x16xf32> to vector<10x10x16xf32>
    %118 = vector.extract_strided_slice %117 {offsets = [0, 0, 0], sizes = [8, 8, 16], strides = [1, 1, 1]} : vector<10x10x16xf32> to vector<8x8x16xf32>
    %119 = vector.shape_cast %118 : vector<8x8x16xf32> to vector<64x16xf32>
    %c18 = arith.constant 18 : index
    %c0_71 = arith.constant 0 : index
    %c0_72 = arith.constant 0 : index
    %120 = vector.load %arg5[%c18, %c0_71, %c0_72] : memref<27x16x8xf32, #tpu.memory_space<vmem>>, vector<1x16x8xf32>
    %121 = vector.shape_cast %120 : vector<1x16x8xf32> to vector<16x8xf32>
    %cst_73 = arith.constant dense<0.000000e+00> : vector<64x8xf32>
    %122 = tpu.matmul %119, %121, %cst_73 {dimension_numbers = #tpu.dot_dimension_numbers<[1], [0], [0], [1], [0, 0, 1, 1], [], []>} : vector<64x16xf32>, vector<16x8xf32>, vector<64x8xf32> -> vector<64x8xf32>
    %123 = arith.addf %115, %122 : vector<64x8xf32>
    %124 = vector.extract_strided_slice %117 {offsets = [0, 1, 0], sizes = [8, 8, 16], strides = [1, 1, 1]} : vector<10x10x16xf32> to vector<8x8x16xf32>
    %125 = vector.shape_cast %124 : vector<8x8x16xf32> to vector<64x16xf32>
    %c19 = arith.constant 19 : index
    %c0_74 = arith.constant 0 : index
    %c0_75 = arith.constant 0 : index
    %126 = vector.load %arg5[%c19, %c0_74, %c0_75] : memref<27x16x8xf32, #tpu.memory_space<vmem>>, vector<1x16x8xf32>
    %127 = vector.shape_cast %126 : vector<1x16x8xf32> to vector<16x8xf32>
    %cst_76 = arith.constant dense<0.000000e+00> : vector<64x8xf32>
    %128 = tpu.matmul %125, %127, %cst_76 {dimension_numbers = #tpu.dot_dimension_numbers<[1], [0], [0], [1], [0, 0, 1, 1], [], []>} : vector<64x16xf32>, vector<16x8xf32>, vector<64x8xf32> -> vector<64x8xf32>
    %129 = arith.addf %123, %128 : vector<64x8xf32>
    %130 = vector.extract_strided_slice %117 {offsets = [0, 2, 0], sizes = [8, 8, 16], strides = [1, 1, 1]} : vector<10x10x16xf32> to vector<8x8x16xf32>
    %131 = vector.shape_cast %130 : vector<8x8x16xf32> to vector<64x16xf32>
    %c20 = arith.constant 20 : index
    %c0_77 = arith.constant 0 : index
    %c0_78 = arith.constant 0 : index
    %132 = vector.load %arg5[%c20, %c0_77, %c0_78] : memref<27x16x8xf32, #tpu.memory_space<vmem>>, vector<1x16x8xf32>
    %133 = vector.shape_cast %132 : vector<1x16x8xf32> to vector<16x8xf32>
    %cst_79 = arith.constant dense<0.000000e+00> : vector<64x8xf32>
    %134 = tpu.matmul %131, %133, %cst_79 {dimension_numbers = #tpu.dot_dimension_numbers<[1], [0], [0], [1], [0, 0, 1, 1], [], []>} : vector<64x16xf32>, vector<16x8xf32>, vector<64x8xf32> -> vector<64x8xf32>
    %135 = arith.addf %129, %134 : vector<64x8xf32>
    %136 = vector.extract_strided_slice %117 {offsets = [1, 0, 0], sizes = [8, 8, 16], strides = [1, 1, 1]} : vector<10x10x16xf32> to vector<8x8x16xf32>
    %137 = vector.shape_cast %136 : vector<8x8x16xf32> to vector<64x16xf32>
    %c21 = arith.constant 21 : index
    %c0_80 = arith.constant 0 : index
    %c0_81 = arith.constant 0 : index
    %138 = vector.load %arg5[%c21, %c0_80, %c0_81] : memref<27x16x8xf32, #tpu.memory_space<vmem>>, vector<1x16x8xf32>
    %139 = vector.shape_cast %138 : vector<1x16x8xf32> to vector<16x8xf32>
    %cst_82 = arith.constant dense<0.000000e+00> : vector<64x8xf32>
    %140 = tpu.matmul %137, %139, %cst_82 {dimension_numbers = #tpu.dot_dimension_numbers<[1], [0], [0], [1], [0, 0, 1, 1], [], []>} : vector<64x16xf32>, vector<16x8xf32>, vector<64x8xf32> -> vector<64x8xf32>
    %141 = arith.addf %135, %140 : vector<64x8xf32>
    %142 = vector.extract_strided_slice %117 {offsets = [1, 1, 0], sizes = [8, 8, 16], strides = [1, 1, 1]} : vector<10x10x16xf32> to vector<8x8x16xf32>
    %143 = vector.shape_cast %142 : vector<8x8x16xf32> to vector<64x16xf32>
    %c22 = arith.constant 22 : index
    %c0_83 = arith.constant 0 : index
    %c0_84 = arith.constant 0 : index
    %144 = vector.load %arg5[%c22, %c0_83, %c0_84] : memref<27x16x8xf32, #tpu.memory_space<vmem>>, vector<1x16x8xf32>
    %145 = vector.shape_cast %144 : vector<1x16x8xf32> to vector<16x8xf32>
    %cst_85 = arith.constant dense<0.000000e+00> : vector<64x8xf32>
    %146 = tpu.matmul %143, %145, %cst_85 {dimension_numbers = #tpu.dot_dimension_numbers<[1], [0], [0], [1], [0, 0, 1, 1], [], []>} : vector<64x16xf32>, vector<16x8xf32>, vector<64x8xf32> -> vector<64x8xf32>
    %147 = arith.addf %141, %146 : vector<64x8xf32>
    %148 = vector.extract_strided_slice %117 {offsets = [1, 2, 0], sizes = [8, 8, 16], strides = [1, 1, 1]} : vector<10x10x16xf32> to vector<8x8x16xf32>
    %149 = vector.shape_cast %148 : vector<8x8x16xf32> to vector<64x16xf32>
    %c23 = arith.constant 23 : index
    %c0_86 = arith.constant 0 : index
    %c0_87 = arith.constant 0 : index
    %150 = vector.load %arg5[%c23, %c0_86, %c0_87] : memref<27x16x8xf32, #tpu.memory_space<vmem>>, vector<1x16x8xf32>
    %151 = vector.shape_cast %150 : vector<1x16x8xf32> to vector<16x8xf32>
    %cst_88 = arith.constant dense<0.000000e+00> : vector<64x8xf32>
    %152 = tpu.matmul %149, %151, %cst_88 {dimension_numbers = #tpu.dot_dimension_numbers<[1], [0], [0], [1], [0, 0, 1, 1], [], []>} : vector<64x16xf32>, vector<16x8xf32>, vector<64x8xf32> -> vector<64x8xf32>
    %153 = arith.addf %147, %152 : vector<64x8xf32>
    %154 = vector.extract_strided_slice %117 {offsets = [2, 0, 0], sizes = [8, 8, 16], strides = [1, 1, 1]} : vector<10x10x16xf32> to vector<8x8x16xf32>
    %155 = vector.shape_cast %154 : vector<8x8x16xf32> to vector<64x16xf32>
    %c24 = arith.constant 24 : index
    %c0_89 = arith.constant 0 : index
    %c0_90 = arith.constant 0 : index
    %156 = vector.load %arg5[%c24, %c0_89, %c0_90] : memref<27x16x8xf32, #tpu.memory_space<vmem>>, vector<1x16x8xf32>
    %157 = vector.shape_cast %156 : vector<1x16x8xf32> to vector<16x8xf32>
    %cst_91 = arith.constant dense<0.000000e+00> : vector<64x8xf32>
    %158 = tpu.matmul %155, %157, %cst_91 {dimension_numbers = #tpu.dot_dimension_numbers<[1], [0], [0], [1], [0, 0, 1, 1], [], []>} : vector<64x16xf32>, vector<16x8xf32>, vector<64x8xf32> -> vector<64x8xf32>
    %159 = arith.addf %153, %158 : vector<64x8xf32>
    %160 = vector.extract_strided_slice %117 {offsets = [2, 1, 0], sizes = [8, 8, 16], strides = [1, 1, 1]} : vector<10x10x16xf32> to vector<8x8x16xf32>
    %161 = vector.shape_cast %160 : vector<8x8x16xf32> to vector<64x16xf32>
    %c25 = arith.constant 25 : index
    %c0_92 = arith.constant 0 : index
    %c0_93 = arith.constant 0 : index
    %162 = vector.load %arg5[%c25, %c0_92, %c0_93] : memref<27x16x8xf32, #tpu.memory_space<vmem>>, vector<1x16x8xf32>
    %163 = vector.shape_cast %162 : vector<1x16x8xf32> to vector<16x8xf32>
    %cst_94 = arith.constant dense<0.000000e+00> : vector<64x8xf32>
    %164 = tpu.matmul %161, %163, %cst_94 {dimension_numbers = #tpu.dot_dimension_numbers<[1], [0], [0], [1], [0, 0, 1, 1], [], []>} : vector<64x16xf32>, vector<16x8xf32>, vector<64x8xf32> -> vector<64x8xf32>
    %165 = arith.addf %159, %164 : vector<64x8xf32>
    %166 = vector.extract_strided_slice %117 {offsets = [2, 2, 0], sizes = [8, 8, 16], strides = [1, 1, 1]} : vector<10x10x16xf32> to vector<8x8x16xf32>
    %167 = vector.shape_cast %166 : vector<8x8x16xf32> to vector<64x16xf32>
    %c26 = arith.constant 26 : index
    %c0_95 = arith.constant 0 : index
    %c0_96 = arith.constant 0 : index
    %168 = vector.load %arg5[%c26, %c0_95, %c0_96] : memref<27x16x8xf32, #tpu.memory_space<vmem>>, vector<1x16x8xf32>
    %169 = vector.shape_cast %168 : vector<1x16x8xf32> to vector<16x8xf32>
    %cst_97 = arith.constant dense<0.000000e+00> : vector<64x8xf32>
    %170 = tpu.matmul %167, %169, %cst_97 {dimension_numbers = #tpu.dot_dimension_numbers<[1], [0], [0], [1], [0, 0, 1, 1], [], []>} : vector<64x16xf32>, vector<16x8xf32>, vector<64x8xf32> -> vector<64x8xf32>
    %171 = arith.addf %165, %170 : vector<64x8xf32>
    %172 = vector.shape_cast %171 : vector<64x8xf32> to vector<8x8x8xf32>
    %c0_98 = arith.constant 0 : index
    %c0_99 = arith.constant 0 : index
    %c0_100 = arith.constant 0 : index
    %c0_101 = arith.constant 0 : index
    %c0_102 = arith.constant 0 : index
    %173 = vector.load %arg7[%c0_98, %c0_99, %c0_100, %c0_101, %c0_102] : memref<1x1x8x8x8xf32, #tpu.memory_space<vmem>>, vector<1x1x8x8x8xf32>
    %174 = vector.shape_cast %173 : vector<1x1x8x8x8xf32> to vector<8x8x8xf32>
    %175 = vector.shape_cast %172 : vector<8x8x8xf32> to vector<1x1x8x8x8xf32>
    tpu.vector_store %arg7[%c0_98, %c0_99, %c0_100, %c0_101, %c0_102], %175 {strides = array<i32>} : memref<1x1x8x8x8xf32, #tpu.memory_space<vmem>>, vector<1x1x8x8x8xf32>,
    %cst_103 = arith.constant dense<0.000000e+00> : vector<8xf32>
    %176 = vector.multi_reduction <add>, %171, %cst_103 [0] : vector<64x8xf32> to vector<8xf32>
    %177 = vector.shape_cast %176 : vector<8xf32> to vector<1x8xf32>
    %178 = arith.mulf %171, %171 : vector<64x8xf32>
    %cst_104 = arith.constant dense<0.000000e+00> : vector<8xf32>
    %179 = vector.multi_reduction <add>, %178, %cst_104 [0] : vector<64x8xf32> to vector<8xf32>
    %180 = vector.shape_cast %179 : vector<8xf32> to vector<1x8xf32>
    %181 = tpu.concatenate %177, %180 in 0 : vector<1x8xf32>, vector<1x8xf32> -> vector<2x8xf32>
    %c0_105 = arith.constant 0 : index
    %c0_106 = arith.constant 0 : index
    %c0_107 = arith.constant 0 : index
    %c0_108 = arith.constant 0 : index
    %182 = vector.load %arg8[%c0_105, %c0_106, %c0_107, %c0_108] : memref<1x1x2x8xf32, #tpu.memory_space<vmem>>, vector<1x1x2x8xf32>
    %183 = vector.shape_cast %182 : vector<1x1x2x8xf32> to vector<2x8xf32>
    %184 = vector.shape_cast %181 : vector<2x8xf32> to vector<1x1x2x8xf32>
    tpu.vector_store %arg8[%c0_105, %c0_106, %c0_107, %c0_108], %184 {strides = array<i32>} : memref<1x1x2x8xf32, #tpu.memory_space<vmem>>, vector<1x1x2x8xf32>,
    return
  }
  func.func @transform_0(%arg0: i32, %arg1: i32) -> (i32, i32, i32, i32, i32) {
    %c0_i32 = arith.constant 0 : i32
    %0 = arith.addi %arg1, %c0_i32 : i32
    %c0_i32_0 = arith.constant 0 : i32
    %c0_i32_1 = arith.constant 0 : i32
    %c0_i32_2 = arith.constant 0 : i32
    %c0_i32_3 = arith.constant 0 : i32
    return %arg0, %0, %c0_i32_0, %c0_i32_1, %c0_i32_2 : i32, i32, i32, i32, i32
  }
  func.func @transform_1(%arg0: i32, %arg1: i32) -> (i32, i32, i32, i32, i32) {
    %c1_i32 = arith.constant 1 : i32
    %0 = arith.addi %arg1, %c1_i32 : i32
    %c0_i32 = arith.constant 0 : i32
    %c0_i32_0 = arith.constant 0 : i32
    %c0_i32_1 = arith.constant 0 : i32
    %c0_i32_2 = arith.constant 0 : i32
    return %arg0, %0, %c0_i32, %c0_i32_0, %c0_i32_1 : i32, i32, i32, i32, i32
  }
  func.func @transform_2(%arg0: i32, %arg1: i32) -> (i32, i32, i32, i32, i32) {
    %c2_i32 = arith.constant 2 : i32
    %0 = arith.addi %arg1, %c2_i32 : i32
    %c0_i32 = arith.constant 0 : i32
    %c0_i32_0 = arith.constant 0 : i32
    %c0_i32_1 = arith.constant 0 : i32
    %c0_i32_2 = arith.constant 0 : i32
    return %arg0, %0, %c0_i32, %c0_i32_0, %c0_i32_1 : i32, i32, i32, i32, i32
  }
  func.func @transform_3(%arg0: i32, %arg1: i32) -> (i32, i32, i32) {
    %c0_i32 = arith.constant 0 : i32
    %c0_i32_0 = arith.constant 0 : i32
    %c0_i32_1 = arith.constant 0 : i32
    %c0_i32_2 = arith.constant 0 : i32
    return %c0_i32, %c0_i32_0, %c0_i32_1 : i32, i32, i32
  }
  func.func @transform_4(%arg0: i32, %arg1: i32) -> (i32, i32) {
    %c0_i32 = arith.constant 0 : i32
    %c0_i32_0 = arith.constant 0 : i32
    %c0_i32_1 = arith.constant 0 : i32
    return %c0_i32, %c0_i32_0 : i32, i32
  }
  func.func @transform_5(%arg0: i32, %arg1: i32) -> (i32, i32, i32, i32, i32) {
    %c0_i32 = arith.constant 0 : i32
    %c0_i32_0 = arith.constant 0 : i32
    %c0_i32_1 = arith.constant 0 : i32
    %c0_i32_2 = arith.constant 0 : i32
    return %arg0, %arg1, %c0_i32, %c0_i32_0, %c0_i32_1 : i32, i32, i32, i32, i32
  }
  func.func @transform_6(%arg0: i32, %arg1: i32) -> (i32, i32, i32, i32) {
    %c0_i32 = arith.constant 0 : i32
    %c0_i32_0 = arith.constant 0 : i32
    %c0_i32_1 = arith.constant 0 : i32
    return %arg0, %arg1, %c0_i32, %c0_i32_0 : i32, i32, i32, i32
  }
}

module attributes {stable_mosaic.version = 11 : i64} {
  func.func @_norm_act_kernel(%arg0: i32, %arg1: i32, %arg2: memref<1x1x8x8x8xf32, #tpu.memory_space<vmem>>, %arg3: memref<1x1x8xf32, #tpu.memory_space<vmem>>, %arg4: memref<1x1x8xf32, #tpu.memory_space<vmem>>, %arg5: memref<1x1x8x8x8xf32, #tpu.memory_space<vmem>>) attributes {dimension_semantics = [#tpu.dimension_semantics<parallel>, #tpu.dimension_semantics<parallel>], iteration_bounds = array<i64: 2, 8>, scalar_prefetch = 0 : i64, scratch_operands = 0 : i64, tpu.core_type = #tpu.core_type<tc>, window_params = [{transform_indices = @transform_0, window_bounds = array<i64: 1, 1, 8, 8, 8>}, {transform_indices = @transform_1, window_bounds = array<i64: 1, 1, 8>}, {transform_indices = @transform_2, window_bounds = array<i64: 1, 1, 8>}, {transform_indices = @transform_3, window_bounds = array<i64: 1, 1, 8, 8, 8>}]} {
    %c0 = arith.constant 0 : index
    %c0_0 = arith.constant 0 : index
    %c0_1 = arith.constant 0 : index
    %c0_2 = arith.constant 0 : index
    %c0_3 = arith.constant 0 : index
    %0 = vector.load %arg2[%c0, %c0_0, %c0_1, %c0_2, %c0_3] : memref<1x1x8x8x8xf32, #tpu.memory_space<vmem>>, vector<1x1x8x8x8xf32>
    %1 = vector.shape_cast %0 : vector<1x1x8x8x8xf32> to vector<8x8x8xf32>
    %c0_4 = arith.constant 0 : index
    %c0_5 = arith.constant 0 : index
    %c0_6 = arith.constant 0 : index
    %2 = vector.load %arg3[%c0_4, %c0_5, %c0_6] : memref<1x1x8xf32, #tpu.memory_space<vmem>>, vector<1x1x8xf32>
    %3 = vector.shape_cast %2 : vector<1x1x8xf32> to vector<1x8xf32>
    %4 = vector.shape_cast %3 : vector<1x8xf32> to vector<1x1x8xf32>
    %5 = vector.broadcast %4 : vector<1x1x8xf32> to vector<8x8x8xf32>
    %6 = arith.mulf %1, %5 : vector<8x8x8xf32>
    %c0_7 = arith.constant 0 : index
    %c0_8 = arith.constant 0 : index
    %c0_9 = arith.constant 0 : index
    %7 = vector.load %arg4[%c0_7, %c0_8, %c0_9] : memref<1x1x8xf32, #tpu.memory_space<vmem>>, vector<1x1x8xf32>
    %8 = vector.shape_cast %7 : vector<1x1x8xf32> to vector<1x8xf32>
    %9 = vector.shape_cast %8 : vector<1x8xf32> to vector<1x1x8xf32>
    %10 = vector.broadcast %9 : vector<1x1x8xf32> to vector<8x8x8xf32>
    %11 = arith.addf %6, %10 : vector<8x8x8xf32>
    %cst = arith.constant 0.000000e+00 : f32
    %cst_10 = arith.constant 6.000000e+00 : f32
    %12 = vector.broadcast %cst : f32 to vector<8x8x8xf32>
    %13 = arith.maximumf %12, %11 : vector<8x8x8xf32>
    %14 = vector.broadcast %cst_10 : f32 to vector<8x8x8xf32>
    %15 = arith.minimumf %14, %13 : vector<8x8x8xf32>
    %c0_11 = arith.constant 0 : index
    %c0_12 = arith.constant 0 : index
    %c0_13 = arith.constant 0 : index
    %c0_14 = arith.constant 0 : index
    %c0_15 = arith.constant 0 : index
    %16 = vector.load %arg5[%c0_11, %c0_12, %c0_13, %c0_14, %c0_15] : memref<1x1x8x8x8xf32, #tpu.memory_space<vmem>>, vector<1x1x8x8x8xf32>
    %17 = vector.shape_cast %16 : vector<1x1x8x8x8xf32> to vector<8x8x8xf32>
    %18 = vector.shape_cast %15 : vector<8x8x8xf32> to vector<1x1x8x8x8xf32>
    tpu.vector_store %arg5[%c0_11, %c0_12, %c0_13, %c0_14, %c0_15], %18 {strides = array<i32>} : memref<1x1x8x8x8xf32, #tpu.memory_space<vmem>>, vector<1x1x8x8x8xf32>,
    return
  }
  func.func @transform_0(%arg0: i32, %arg1: i32) -> (i32, i32, i32, i32, i32) {
    %c0_i32 = arith.constant 0 : i32
    %c0_i32_0 = arith.constant 0 : i32
    %c0_i32_1 = arith.constant 0 : i32
    %c0_i32_2 = arith.constant 0 : i32
    return %arg0, %arg1, %c0_i32, %c0_i32_0, %c0_i32_1 : i32, i32, i32, i32, i32
  }
  func.func @transform_1(%arg0: i32, %arg1: i32) -> (i32, i32, i32) {
    %c0_i32 = arith.constant 0 : i32
    %c0_i32_0 = arith.constant 0 : i32
    %c0_i32_1 = arith.constant 0 : i32
    return %arg0, %c0_i32, %c0_i32_0 : i32, i32, i32
  }
  func.func @transform_2(%arg0: i32, %arg1: i32) -> (i32, i32, i32) {
    %c0_i32 = arith.constant 0 : i32
    %c0_i32_0 = arith.constant 0 : i32
    %c0_i32_1 = arith.constant 0 : i32
    return %arg0, %c0_i32, %c0_i32_0 : i32, i32, i32
  }
  func.func @transform_3(%arg0: i32, %arg1: i32) -> (i32, i32, i32, i32, i32) {
    %c0_i32 = arith.constant 0 : i32
    %c0_i32_0 = arith.constant 0 : i32
    %c0_i32_1 = arith.constant 0 : i32
    %c0_i32_2 = arith.constant 0 : i32
    return %arg0, %arg1, %c0_i32, %c0_i32_0, %c0_i32_1 : i32, i32, i32, i32, i32
  }
}

module attributes {stable_mosaic.version = 11 : i64} {
  func.func @_skip_conv_kernel(%arg0: i32, %arg1: i32, %arg2: memref<1x1x10x10x8xf32, #tpu.memory_space<vmem>>, %arg3: memref<1x1x10x10x8xf32, #tpu.memory_space<vmem>>, %arg4: memref<1x1x10x10x8xf32, #tpu.memory_space<vmem>>, %arg5: memref<1x1x10x10x8xf32, #tpu.memory_space<vmem>>, %arg6: memref<1x1x10x10x8xf32, #tpu.memory_space<vmem>>, %arg7: memref<1x1x10x10x8xf32, #tpu.memory_space<vmem>>, %arg8: memref<1x1x8xf32, #tpu.memory_space<vmem>>, %arg9: memref<1x1x8xf32, #tpu.memory_space<vmem>>, %arg10: memref<10x10x1xf32, #tpu.memory_space<vmem>>, %arg11: memref<27x8x8xf32, #tpu.memory_space<vmem>>, %arg12: memref<27x8x8xf32, #tpu.memory_space<vmem>>, %arg13: memref<1x8xf32, #tpu.memory_space<vmem>>, %arg14: memref<1x1x8x8x8xf32, #tpu.memory_space<vmem>>, %arg15: memref<1x1x2x8xf32, #tpu.memory_space<vmem>>) attributes {dimension_semantics = [#tpu.dimension_semantics<parallel>, #tpu.dimension_semantics<parallel>], iteration_bounds = array<i64: 2, 8>, scalar_prefetch = 0 : i64, scratch_operands = 0 : i64, tpu.core_type = #tpu.core_type<tc>, window_params = [{transform_indices = @transform_0, window_bounds = array<i64: 1, 1, 10, 10, 8>}, {transform_indices = @transform_1, window_bounds = array<i64: 1, 1, 10, 10, 8>}, {transform_indices = @transform_2, window_bounds = array<i64: 1, 1, 10, 10, 8>}, {transform_indices = @transform_3, window_bounds = array<i64: 1, 1, 10, 10, 8>}, {transform_indices = @transform_4, window_bounds = array<i64: 1, 1, 10, 10, 8>}, {transform_indices = @transform_5, window_bounds = array<i64: 1, 1, 10, 10, 8>}, {transform_indices = @transform_6, window_bounds = array<i64: 1, 1, 8>}, {transform_indices = @transform_7, window_bounds = array<i64: 1, 1, 8>}, {pipeline_mode = #tpu.pipeline_mode<synchronous>, transform_indices = @transform_8, window_bounds = array<i64: 10, 10, 1>}, {pipeline_mode = #tpu.pipeline_mode<synchronous>, transform_indices = @transform_9, window_bounds = array<i64: 27, 8, 8>}, {pipeline_mode = #tpu.pipeline_mode<synchronous>, transform_indices = @transform_10, window_bounds = array<i64: 27, 8, 8>}, {pipeline_mode = #tpu.pipeline_mode<synchronous>, transform_indices = @transform_11, window_bounds = array<i64: 1, 8>}, {transform_indices = @transform_12, window_bounds = array<i64: 1, 1, 8, 8, 8>}, {transform_indices = @transform_13, window_bounds = array<i64: 1, 1, 2, 8>}]} {
    %c0 = arith.constant 0 : index
    %c0_0 = arith.constant 0 : index
    %c0_1 = arith.constant 0 : index
    %0 = vector.load %arg8[%c0, %c0_0, %c0_1] : memref<1x1x8xf32, #tpu.memory_space<vmem>>, vector<1x1x8xf32>
    %1 = vector.shape_cast %0 : vector<1x1x8xf32> to vector<1x8xf32>
    %c0_2 = arith.constant 0 : index
    %c0_3 = arith.constant 0 : index
    %c0_4 = arith.constant 0 : index
    %2 = vector.load %arg9[%c0_2, %c0_3, %c0_4] : memref<1x1x8xf32, #tpu.memory_space<vmem>>, vector<1x1x8xf32>
    %3 = vector.shape_cast %2 : vector<1x1x8xf32> to vector<1x8xf32>
    %c0_5 = arith.constant 0 : index
    %c0_6 = arith.constant 0 : index
    %c0_7 = arith.constant 0 : index
    %4 = vector.load %arg10[%c0_5, %c0_6, %c0_7] : memref<10x10x1xf32, #tpu.memory_space<vmem>>, vector<10x10x1xf32>
    %cst = arith.constant 0.000000e+00 : f32
    %5 = vector.broadcast %cst : f32 to vector<64x8xf32>
    %c0_8 = arith.constant 0 : index
    %c0_9 = arith.constant 0 : index
    %6 = vector.load %arg13[%c0_8, %c0_9] : memref<1x8xf32, #tpu.memory_space<vmem>>, vector<1x8xf32>
    %7 = vector.broadcast %6 : vector<1x8xf32> to vector<64x8xf32>
    %8 = arith.addf %5, %7 : vector<64x8xf32>
    %c0_i32 = arith.constant 0 : i32
    %9 = arith.addi %arg1, %c0_i32 : i32
    %c1_i32 = arith.constant 1 : i32
    %10 = arith.subi %9, %c1_i32 : i32
    %c0_i32_10 = arith.constant 0 : i32
    %11 = arith.cmpi sge, %10, %c0_i32_10 : i32
    %c0_i32_11 = arith.constant 0 : i32
    %12 = arith.addi %arg1, %c0_i32_11 : i32
    %c1_i32_12 = arith.constant 1 : i32
    %13 = arith.subi %12, %c1_i32_12 : i32
    %c8_i32 = arith.constant 8 : i32
    %14 = arith.cmpi slt, %13, %c8_i32 : i32
    %15 = arith.andi %11, %14 : i1
    %cst_13 = arith.constant 1.000000e+00 : f32
    %cst_14 = arith.constant 0.000000e+00 : f32
    %16 = arith.select %15, %cst_13, %cst_14 : f32
    %17 = vector.broadcast %16 : f32 to vector<10x10x1xf32>
    %18 = arith.mulf %4, %17 : vector<10x10x1xf32>
    %c0_15 = arith.constant 0 : index
    %c0_16 = arith.constant 0 : index
    %c0_17 = arith.constant 0 : index
    %c0_18 = arith.constant 0 : index
    %c0_19 = arith.constant 0 : index
    %19 = vector.load %arg2[%c0_15, %c0_16, %c0_17, %c0_18, %c0_19] : memref<1x1x10x10x8xf32, #tpu.memory_space<vmem>>, vector<1x1x10x10x8xf32>
    %20 = vector.shape_cast %19 : vector<1x1x10x10x8xf32> to vector<10x10x8xf32>
    %21 = vector.shape_cast %1 : vector<1x8xf32> to vector<1x1x8xf32>
    %22 = vector.broadcast %21 : vector<1x1x8xf32> to vector<10x10x8xf32>
    %23 = arith.mulf %20, %22 : vector<10x10x8xf32>
    %24 = vector.shape_cast %3 : vector<1x8xf32> to vector<1x1x8xf32>
    %25 = vector.broadcast %24 : vector<1x1x8xf32> to vector<10x10x8xf32>
    %26 = arith.addf %23, %25 : vector<10x10x8xf32>
    %cst_20 = arith.constant 0.000000e+00 : f32
    %cst_21 = arith.constant 6.000000e+00 : f32
    %27 = vector.broadcast %cst_20 : f32 to vector<10x10x8xf32>
    %28 = arith.maximumf %27, %26 : vector<10x10x8xf32>
    %29 = vector.broadcast %cst_21 : f32 to vector<10x10x8xf32>
    %30 = arith.minimumf %29, %28 : vector<10x10x8xf32>
    %31 = vector.broadcast %18 : vector<10x10x1xf32> to vector<10x10x8xf32>
    %32 = arith.mulf %30, %31 : vector<10x10x8xf32>
    %c0_22 = arith.constant 0 : index
    %c0_23 = arith.constant 0 : index
    %c0_24 = arith.constant 0 : index
    %c0_25 = arith.constant 0 : index
    %c0_26 = arith.constant 0 : index
    %33 = vector.load %arg5[%c0_22, %c0_23, %c0_24, %c0_25, %c0_26] : memref<1x1x10x10x8xf32, #tpu.memory_space<vmem>>, vector<1x1x10x10x8xf32>
    %34 = vector.shape_cast %33 : vector<1x1x10x10x8xf32> to vector<10x10x8xf32>
    %35 = vector.extract_strided_slice %32 {offsets = [0, 0, 0], sizes = [8, 8, 8], strides = [1, 1, 1]} : vector<10x10x8xf32> to vector<8x8x8xf32>
    %36 = vector.shape_cast %35 : vector<8x8x8xf32> to vector<64x8xf32>
    %c0_27 = arith.constant 0 : index
    %c0_28 = arith.constant 0 : index
    %c0_29 = arith.constant 0 : index
    %37 = vector.load %arg11[%c0_27, %c0_28, %c0_29] : memref<27x8x8xf32, #tpu.memory_space<vmem>>, vector<1x8x8xf32>
    %38 = vector.shape_cast %37 : vector<1x8x8xf32> to vector<8x8xf32>
    %cst_30 = arith.constant dense<0.000000e+00> : vector<64x8xf32>
    %39 = tpu.matmul %36, %38, %cst_30 {dimension_numbers = #tpu.dot_dimension_numbers<[1], [0], [0], [1], [0, 0, 1, 1], [], []>} : vector<64x8xf32>, vector<8x8xf32>, vector<64x8xf32> -> vector<64x8xf32>
    %40 = arith.addf %8, %39 : vector<64x8xf32>
    %41 = vector.extract_strided_slice %34 {offsets = [0, 0, 0], sizes = [8, 8, 8], strides = [1, 1, 1]} : vector<10x10x8xf32> to vector<8x8x8xf32>
    %42 = vector.shape_cast %41 : vector<8x8x8xf32> to vector<64x8xf32>
    %c0_31 = arith.constant 0 : index
    %c0_32 = arith.constant 0 : index
    %c0_33 = arith.constant 0 : index
    %43 = vector.load %arg12[%c0_31, %c0_32, %c0_33] : memref<27x8x8xf32, #tpu.memory_space<vmem>>, vector<1x8x8xf32>
    %44 = vector.shape_cast %43 : vector<1x8x8xf32> to vector<8x8xf32>
    %cst_34 = arith.constant dense<0.000000e+00> : vector<64x8xf32>
    %45 = tpu.matmul %42, %44, %cst_34 {dimension_numbers = #tpu.dot_dimension_numbers<[1], [0], [0], [1], [0, 0, 1, 1], [], []>} : vector<64x8xf32>, vector<8x8xf32>, vector<64x8xf32> -> vector<64x8xf32>
    %46 = arith.addf %40, %45 : vector<64x8xf32>
    %47 = vector.extract_strided_slice %32 {offsets = [0, 1, 0], sizes = [8, 8, 8], strides = [1, 1, 1]} : vector<10x10x8xf32> to vector<8x8x8xf32>
    %48 = vector.shape_cast %47 : vector<8x8x8xf32> to vector<64x8xf32>
    %c1 = arith.constant 1 : index
    %c0_35 = arith.constant 0 : index
    %c0_36 = arith.constant 0 : index
    %49 = vector.load %arg11[%c1, %c0_35, %c0_36] : memref<27x8x8xf32, #tpu.memory_space<vmem>>, vector<1x8x8xf32>
    %50 = vector.shape_cast %49 : vector<1x8x8xf32> to vector<8x8xf32>
    %cst_37 = arith.constant dense<0.000000e+00> : vector<64x8xf32>
    %51 = tpu.matmul %48, %50, %cst_37 {dimension_numbers = #tpu.dot_dimension_numbers<[1], [0], [0], [1], [0, 0, 1, 1], [], []>} : vector<64x8xf32>, vector<8x8xf32>, vector<64x8xf32> -> vector<64x8xf32>
    %52 = arith.addf %46, %51 : vector<64x8xf32>
    %53 = vector.extract_strided_slice %34 {offsets = [0, 1, 0], sizes = [8, 8, 8], strides = [1, 1, 1]} : vector<10x10x8xf32> to vector<8x8x8xf32>
    %54 = vector.shape_cast %53 : vector<8x8x8xf32> to vector<64x8xf32>
    %c1_38 = arith.constant 1 : index
    %c0_39 = arith.constant 0 : index
    %c0_40 = arith.constant 0 : index
    %55 = vector.load %arg12[%c1_38, %c0_39, %c0_40] : memref<27x8x8xf32, #tpu.memory_space<vmem>>, vector<1x8x8xf32>
    %56 = vector.shape_cast %55 : vector<1x8x8xf32> to vector<8x8xf32>
    %cst_41 = arith.constant dense<0.000000e+00> : vector<64x8xf32>
    %57 = tpu.matmul %54, %56, %cst_41 {dimension_numbers = #tpu.dot_dimension_numbers<[1], [0], [0], [1], [0, 0, 1, 1], [], []>} : vector<64x8xf32>, vector<8x8xf32>, vector<64x8xf32> -> vector<64x8xf32>
    %58 = arith.addf %52, %57 : vector<64x8xf32>
    %59 = vector.extract_strided_slice %32 {offsets = [0, 2, 0], sizes = [8, 8, 8], strides = [1, 1, 1]} : vector<10x10x8xf32> to vector<8x8x8xf32>
    %60 = vector.shape_cast %59 : vector<8x8x8xf32> to vector<64x8xf32>
    %c2 = arith.constant 2 : index
    %c0_42 = arith.constant 0 : index
    %c0_43 = arith.constant 0 : index
    %61 = vector.load %arg11[%c2, %c0_42, %c0_43] : memref<27x8x8xf32, #tpu.memory_space<vmem>>, vector<1x8x8xf32>
    %62 = vector.shape_cast %61 : vector<1x8x8xf32> to vector<8x8xf32>
    %cst_44 = arith.constant dense<0.000000e+00> : vector<64x8xf32>
    %63 = tpu.matmul %60, %62, %cst_44 {dimension_numbers = #tpu.dot_dimension_numbers<[1], [0], [0], [1], [0, 0, 1, 1], [], []>} : vector<64x8xf32>, vector<8x8xf32>, vector<64x8xf32> -> vector<64x8xf32>
    %64 = arith.addf %58, %63 : vector<64x8xf32>
    %65 = vector.extract_strided_slice %34 {offsets = [0, 2, 0], sizes = [8, 8, 8], strides = [1, 1, 1]} : vector<10x10x8xf32> to vector<8x8x8xf32>
    %66 = vector.shape_cast %65 : vector<8x8x8xf32> to vector<64x8xf32>
    %c2_45 = arith.constant 2 : index
    %c0_46 = arith.constant 0 : index
    %c0_47 = arith.constant 0 : index
    %67 = vector.load %arg12[%c2_45, %c0_46, %c0_47] : memref<27x8x8xf32, #tpu.memory_space<vmem>>, vector<1x8x8xf32>
    %68 = vector.shape_cast %67 : vector<1x8x8xf32> to vector<8x8xf32>
    %cst_48 = arith.constant dense<0.000000e+00> : vector<64x8xf32>
    %69 = tpu.matmul %66, %68, %cst_48 {dimension_numbers = #tpu.dot_dimension_numbers<[1], [0], [0], [1], [0, 0, 1, 1], [], []>} : vector<64x8xf32>, vector<8x8xf32>, vector<64x8xf32> -> vector<64x8xf32>
    %70 = arith.addf %64, %69 : vector<64x8xf32>
    %71 = vector.extract_strided_slice %32 {offsets = [1, 0, 0], sizes = [8, 8, 8], strides = [1, 1, 1]} : vector<10x10x8xf32> to vector<8x8x8xf32>
    %72 = vector.shape_cast %71 : vector<8x8x8xf32> to vector<64x8xf32>
    %c3 = arith.constant 3 : index
    %c0_49 = arith.constant 0 : index
    %c0_50 = arith.constant 0 : index
    %73 = vector.load %arg11[%c3, %c0_49, %c0_50] : memref<27x8x8xf32, #tpu.memory_space<vmem>>, vector<1x8x8xf32>
    %74 = vector.shape_cast %73 : vector<1x8x8xf32> to vector<8x8xf32>
    %cst_51 = arith.constant dense<0.000000e+00> : vector<64x8xf32>
    %75 = tpu.matmul %72, %74, %cst_51 {dimension_numbers = #tpu.dot_dimension_numbers<[1], [0], [0], [1], [0, 0, 1, 1], [], []>} : vector<64x8xf32>, vector<8x8xf32>, vector<64x8xf32> -> vector<64x8xf32>
    %76 = arith.addf %70, %75 : vector<64x8xf32>
    %77 = vector.extract_strided_slice %34 {offsets = [1, 0, 0], sizes = [8, 8, 8], strides = [1, 1, 1]} : vector<10x10x8xf32> to vector<8x8x8xf32>
    %78 = vector.shape_cast %77 : vector<8x8x8xf32> to vector<64x8xf32>
    %c3_52 = arith.constant 3 : index
    %c0_53 = arith.constant 0 : index
    %c0_54 = arith.constant 0 : index
    %79 = vector.load %arg12[%c3_52, %c0_53, %c0_54] : memref<27x8x8xf32, #tpu.memory_space<vmem>>, vector<1x8x8xf32>
    %80 = vector.shape_cast %79 : vector<1x8x8xf32> to vector<8x8xf32>
    %cst_55 = arith.constant dense<0.000000e+00> : vector<64x8xf32>
    %81 = tpu.matmul %78, %80, %cst_55 {dimension_numbers = #tpu.dot_dimension_numbers<[1], [0], [0], [1], [0, 0, 1, 1], [], []>} : vector<64x8xf32>, vector<8x8xf32>, vector<64x8xf32> -> vector<64x8xf32>
    %82 = arith.addf %76, %81 : vector<64x8xf32>
    %83 = vector.extract_strided_slice %32 {offsets = [1, 1, 0], sizes = [8, 8, 8], strides = [1, 1, 1]} : vector<10x10x8xf32> to vector<8x8x8xf32>
    %84 = vector.shape_cast %83 : vector<8x8x8xf32> to vector<64x8xf32>
    %c4 = arith.constant 4 : index
    %c0_56 = arith.constant 0 : index
    %c0_57 = arith.constant 0 : index
    %85 = vector.load %arg11[%c4, %c0_56, %c0_57] : memref<27x8x8xf32, #tpu.memory_space<vmem>>, vector<1x8x8xf32>
    %86 = vector.shape_cast %85 : vector<1x8x8xf32> to vector<8x8xf32>
    %cst_58 = arith.constant dense<0.000000e+00> : vector<64x8xf32>
    %87 = tpu.matmul %84, %86, %cst_58 {dimension_numbers = #tpu.dot_dimension_numbers<[1], [0], [0], [1], [0, 0, 1, 1], [], []>} : vector<64x8xf32>, vector<8x8xf32>, vector<64x8xf32> -> vector<64x8xf32>
    %88 = arith.addf %82, %87 : vector<64x8xf32>
    %89 = vector.extract_strided_slice %34 {offsets = [1, 1, 0], sizes = [8, 8, 8], strides = [1, 1, 1]} : vector<10x10x8xf32> to vector<8x8x8xf32>
    %90 = vector.shape_cast %89 : vector<8x8x8xf32> to vector<64x8xf32>
    %c4_59 = arith.constant 4 : index
    %c0_60 = arith.constant 0 : index
    %c0_61 = arith.constant 0 : index
    %91 = vector.load %arg12[%c4_59, %c0_60, %c0_61] : memref<27x8x8xf32, #tpu.memory_space<vmem>>, vector<1x8x8xf32>
    %92 = vector.shape_cast %91 : vector<1x8x8xf32> to vector<8x8xf32>
    %cst_62 = arith.constant dense<0.000000e+00> : vector<64x8xf32>
    %93 = tpu.matmul %90, %92, %cst_62 {dimension_numbers = #tpu.dot_dimension_numbers<[1], [0], [0], [1], [0, 0, 1, 1], [], []>} : vector<64x8xf32>, vector<8x8xf32>, vector<64x8xf32> -> vector<64x8xf32>
    %94 = arith.addf %88, %93 : vector<64x8xf32>
    %95 = vector.extract_strided_slice %32 {offsets = [1, 2, 0], sizes = [8, 8, 8], strides = [1, 1, 1]} : vector<10x10x8xf32> to vector<8x8x8xf32>
    %96 = vector.shape_cast %95 : vector<8x8x8xf32> to vector<64x8xf32>
    %c5 = arith.constant 5 : index
    %c0_63 = arith.constant 0 : index
    %c0_64 = arith.constant 0 : index
    %97 = vector.load %arg11[%c5, %c0_63, %c0_64] : memref<27x8x8xf32, #tpu.memory_space<vmem>>, vector<1x8x8xf32>
    %98 = vector.shape_cast %97 : vector<1x8x8xf32> to vector<8x8xf32>
    %cst_65 = arith.constant dense<0.000000e+00> : vector<64x8xf32>
    %99 = tpu.matmul %96, %98, %cst_65 {dimension_numbers = #tpu.dot_dimension_numbers<[1], [0], [0], [1], [0, 0, 1, 1], [], []>} : vector<64x8xf32>, vector<8x8xf32>, vector<64x8xf32> -> vector<64x8xf32>
    %100 = arith.addf %94, %99 : vector<64x8xf32>
    %101 = vector.extract_strided_slice %34 {offsets = [1, 2, 0], sizes = [8, 8, 8], strides = [1, 1, 1]} : vector<10x10x8xf32> to vector<8x8x8xf32>
    %102 = vector.shape_cast %101 : vector<8x8x8xf32> to vector<64x8xf32>
    %c5_66 = arith.constant 5 : index
    %c0_67 = arith.constant 0 : index
    %c0_68 = arith.constant 0 : index
    %103 = vector.load %arg12[%c5_66, %c0_67, %c0_68] : memref<27x8x8xf32, #tpu.memory_space<vmem>>, vector<1x8x8xf32>
    %104 = vector.shape_cast %103 : vector<1x8x8xf32> to vector<8x8xf32>
    %cst_69 = arith.constant dense<0.000000e+00> : vector<64x8xf32>
    %105 = tpu.matmul %102, %104, %cst_69 {dimension_numbers = #tpu.dot_dimension_numbers<[1], [0], [0], [1], [0, 0, 1, 1], [], []>} : vector<64x8xf32>, vector<8x8xf32>, vector<64x8xf32> -> vector<64x8xf32>
    %106 = arith.addf %100, %105 : vector<64x8xf32>
    %107 = vector.extract_strided_slice %32 {offsets = [2, 0, 0], sizes = [8, 8, 8], strides = [1, 1, 1]} : vector<10x10x8xf32> to vector<8x8x8xf32>
    %108 = vector.shape_cast %107 : vector<8x8x8xf32> to vector<64x8xf32>
    %c6 = arith.constant 6 : index
    %c0_70 = arith.constant 0 : index
    %c0_71 = arith.constant 0 : index
    %109 = vector.load %arg11[%c6, %c0_70, %c0_71] : memref<27x8x8xf32, #tpu.memory_space<vmem>>, vector<1x8x8xf32>
    %110 = vector.shape_cast %109 : vector<1x8x8xf32> to vector<8x8xf32>
    %cst_72 = arith.constant dense<0.000000e+00> : vector<64x8xf32>
    %111 = tpu.matmul %108, %110, %cst_72 {dimension_numbers = #tpu.dot_dimension_numbers<[1], [0], [0], [1], [0, 0, 1, 1], [], []>} : vector<64x8xf32>, vector<8x8xf32>, vector<64x8xf32> -> vector<64x8xf32>
    %112 = arith.addf %106, %111 : vector<64x8xf32>
    %113 = vector.extract_strided_slice %34 {offsets = [2, 0, 0], sizes = [8, 8, 8], strides = [1, 1, 1]} : vector<10x10x8xf32> to vector<8x8x8xf32>
    %114 = vector.shape_cast %113 : vector<8x8x8xf32> to vector<64x8xf32>
    %c6_73 = arith.constant 6 : index
    %c0_74 = arith.constant 0 : index
    %c0_75 = arith.constant 0 : index
    %115 = vector.load %arg12[%c6_73, %c0_74, %c0_75] : memref<27x8x8xf32, #tpu.memory_space<vmem>>, vector<1x8x8xf32>
    %116 = vector.shape_cast %115 : vector<1x8x8xf32> to vector<8x8xf32>
    %cst_76 = arith.constant dense<0.000000e+00> : vector<64x8xf32>
    %117 = tpu.matmul %114, %116, %cst_76 {dimension_numbers = #tpu.dot_dimension_numbers<[1], [0], [0], [1], [0, 0, 1, 1], [], []>} : vector<64x8xf32>, vector<8x8xf32>, vector<64x8xf32> -> vector<64x8xf32>
    %118 = arith.addf %112, %117 : vector<64x8xf32>
    %119 = vector.extract_strided_slice %32 {offsets = [2, 1, 0], sizes = [8, 8, 8], strides = [1, 1, 1]} : vector<10x10x8xf32> to vector<8x8x8xf32>
    %120 = vector.shape_cast %119 : vector<8x8x8xf32> to vector<64x8xf32>
    %c7 = arith.constant 7 : index
    %c0_77 = arith.constant 0 : index
    %c0_78 = arith.constant 0 : index
    %121 = vector.load %arg11[%c7, %c0_77, %c0_78] : memref<27x8x8xf32, #tpu.memory_space<vmem>>, vector<1x8x8xf32>
    %122 = vector.shape_cast %121 : vector<1x8x8xf32> to vector<8x8xf32>
    %cst_79 = arith.constant dense<0.000000e+00> : vector<64x8xf32>
    %123 = tpu.matmul %120, %122, %cst_79 {dimension_numbers = #tpu.dot_dimension_numbers<[1], [0], [0], [1], [0, 0, 1, 1], [], []>} : vector<64x8xf32>, vector<8x8xf32>, vector<64x8xf32> -> vector<64x8xf32>
    %124 = arith.addf %118, %123 : vector<64x8xf32>
    %125 = vector.extract_strided_slice %34 {offsets = [2, 1, 0], sizes = [8, 8, 8], strides = [1, 1, 1]} : vector<10x10x8xf32> to vector<8x8x8xf32>
    %126 = vector.shape_cast %125 : vector<8x8x8xf32> to vector<64x8xf32>
    %c7_80 = arith.constant 7 : index
    %c0_81 = arith.constant 0 : index
    %c0_82 = arith.constant 0 : index
    %127 = vector.load %arg12[%c7_80, %c0_81, %c0_82] : memref<27x8x8xf32, #tpu.memory_space<vmem>>, vector<1x8x8xf32>
    %128 = vector.shape_cast %127 : vector<1x8x8xf32> to vector<8x8xf32>
    %cst_83 = arith.constant dense<0.000000e+00> : vector<64x8xf32>
    %129 = tpu.matmul %126, %128, %cst_83 {dimension_numbers = #tpu.dot_dimension_numbers<[1], [0], [0], [1], [0, 0, 1, 1], [], []>} : vector<64x8xf32>, vector<8x8xf32>, vector<64x8xf32> -> vector<64x8xf32>
    %130 = arith.addf %124, %129 : vector<64x8xf32>
    %131 = vector.extract_strided_slice %32 {offsets = [2, 2, 0], sizes = [8, 8, 8], strides = [1, 1, 1]} : vector<10x10x8xf32> to vector<8x8x8xf32>
    %132 = vector.shape_cast %131 : vector<8x8x8xf32> to vector<64x8xf32>
    %c8 = arith.constant 8 : index
    %c0_84 = arith.constant 0 : index
    %c0_85 = arith.constant 0 : index
    %133 = vector.load %arg11[%c8, %c0_84, %c0_85] : memref<27x8x8xf32, #tpu.memory_space<vmem>>, vector<1x8x8xf32>
    %134 = vector.shape_cast %133 : vector<1x8x8xf32> to vector<8x8xf32>
    %cst_86 = arith.constant dense<0.000000e+00> : vector<64x8xf32>
    %135 = tpu.matmul %132, %134, %cst_86 {dimension_numbers = #tpu.dot_dimension_numbers<[1], [0], [0], [1], [0, 0, 1, 1], [], []>} : vector<64x8xf32>, vector<8x8xf32>, vector<64x8xf32> -> vector<64x8xf32>
    %136 = arith.addf %130, %135 : vector<64x8xf32>
    %137 = vector.extract_strided_slice %34 {offsets = [2, 2, 0], sizes = [8, 8, 8], strides = [1, 1, 1]} : vector<10x10x8xf32> to vector<8x8x8xf32>
    %138 = vector.shape_cast %137 : vector<8x8x8xf32> to vector<64x8xf32>
    %c8_87 = arith.constant 8 : index
    %c0_88 = arith.constant 0 : index
    %c0_89 = arith.constant 0 : index
    %139 = vector.load %arg12[%c8_87, %c0_88, %c0_89] : memref<27x8x8xf32, #tpu.memory_space<vmem>>, vector<1x8x8xf32>
    %140 = vector.shape_cast %139 : vector<1x8x8xf32> to vector<8x8xf32>
    %cst_90 = arith.constant dense<0.000000e+00> : vector<64x8xf32>
    %141 = tpu.matmul %138, %140, %cst_90 {dimension_numbers = #tpu.dot_dimension_numbers<[1], [0], [0], [1], [0, 0, 1, 1], [], []>} : vector<64x8xf32>, vector<8x8xf32>, vector<64x8xf32> -> vector<64x8xf32>
    %142 = arith.addf %136, %141 : vector<64x8xf32>
    %c1_i32_91 = arith.constant 1 : i32
    %143 = arith.addi %arg1, %c1_i32_91 : i32
    %c1_i32_92 = arith.constant 1 : i32
    %144 = arith.subi %143, %c1_i32_92 : i32
    %c0_i32_93 = arith.constant 0 : i32
    %145 = arith.cmpi sge, %144, %c0_i32_93 : i32
    %c1_i32_94 = arith.constant 1 : i32
    %146 = arith.addi %arg1, %c1_i32_94 : i32
    %c1_i32_95 = arith.constant 1 : i32
    %147 = arith.subi %146, %c1_i32_95 : i32
    %c8_i32_96 = arith.constant 8 : i32
    %148 = arith.cmpi slt, %147, %c8_i32_96 : i32
    %149 = arith.andi %145, %148 : i1
    %cst_97 = arith.constant 1.000000e+00 : f32
    %cst_98 = arith.constant 0.000000e+00 : f32
    %150 = arith.select %149, %cst_97, %cst_98 : f32
    %151 = vector.broadcast %150 : f32 to vector<10x10x1xf32>
    %152 = arith.mulf %4, %151 : vector<10x10x1xf32>
    %c0_99 = arith.constant 0 : index
    %c0_100 = arith.constant 0 : index
    %c0_101 = arith.constant 0 : index
    %c0_102 = arith.constant 0 : index
    %c0_103 = arith.constant 0 : index
    %153 = vector.load %arg3[%c0_99, %c0_100, %c0_101, %c0_102, %c0_103] : memref<1x1x10x10x8xf32, #tpu.memory_space<vmem>>, vector<1x1x10x10x8xf32>
    %154 = vector.shape_cast %153 : vector<1x1x10x10x8xf32> to vector<10x10x8xf32>
    %155 = vector.shape_cast %1 : vector<1x8xf32> to vector<1x1x8xf32>
    %156 = vector.broadcast %155 : vector<1x1x8xf32> to vector<10x10x8xf32>
    %157 = arith.mulf %154, %156 : vector<10x10x8xf32>
    %158 = vector.shape_cast %3 : vector<1x8xf32> to vector<1x1x8xf32>
    %159 = vector.broadcast %158 : vector<1x1x8xf32> to vector<10x10x8xf32>
    %160 = arith.addf %157, %159 : vector<10x10x8xf32>
    %cst_104 = arith.constant 0.000000e+00 : f32
    %cst_105 = arith.constant 6.000000e+00 : f32
    %161 = vector.broadcast %cst_104 : f32 to vector<10x10x8xf32>
    %162 = arith.maximumf %161, %160 : vector<10x10x8xf32>
    %163 = vector.broadcast %cst_105 : f32 to vector<10x10x8xf32>
    %164 = arith.minimumf %163, %162 : vector<10x10x8xf32>
    %165 = vector.broadcast %152 : vector<10x10x1xf32> to vector<10x10x8xf32>
    %166 = arith.mulf %164, %165 : vector<10x10x8xf32>
    %c0_106 = arith.constant 0 : index
    %c0_107 = arith.constant 0 : index
    %c0_108 = arith.constant 0 : index
    %c0_109 = arith.constant 0 : index
    %c0_110 = arith.constant 0 : index
    %167 = vector.load %arg6[%c0_106, %c0_107, %c0_108, %c0_109, %c0_110] : memref<1x1x10x10x8xf32, #tpu.memory_space<vmem>>, vector<1x1x10x10x8xf32>
    %168 = vector.shape_cast %167 : vector<1x1x10x10x8xf32> to vector<10x10x8xf32>
    %169 = vector.extract_strided_slice %166 {offsets = [0, 0, 0], sizes = [8, 8, 8], strides = [1, 1, 1]} : vector<10x10x8xf32> to vector<8x8x8xf32>
    %170 = vector.shape_cast %169 : vector<8x8x8xf32> to vector<64x8xf32>
    %c9 = arith.constant 9 : index
    %c0_111 = arith.constant 0 : index
    %c0_112 = arith.constant 0 : index
    %171 = vector.load %arg11[%c9, %c0_111, %c0_112] : memref<27x8x8xf32, #tpu.memory_space<vmem>>, vector<1x8x8xf32>
    %172 = vector.shape_cast %171 : vector<1x8x8xf32> to vector<8x8xf32>
    %cst_113 = arith.constant dense<0.000000e+00> : vector<64x8xf32>
    %173 = tpu.matmul %170, %172, %cst_113 {dimension_numbers = #tpu.dot_dimension_numbers<[1], [0], [0], [1], [0, 0, 1, 1], [], []>} : vector<64x8xf32>, vector<8x8xf32>, vector<64x8xf32> -> vector<64x8xf32>
    %174 = arith.addf %142, %173 : vector<64x8xf32>
    %175 = vector.extract_strided_slice %168 {offsets = [0, 0, 0], sizes = [8, 8, 8], strides = [1, 1, 1]} : vector<10x10x8xf32> to vector<8x8x8xf32>
    %176 = vector.shape_cast %175 : vector<8x8x8xf32> to vector<64x8xf32>
    %c9_114 = arith.constant 9 : index
    %c0_115 = arith.constant 0 : index
    %c0_116 = arith.constant 0 : index
    %177 = vector.load %arg12[%c9_114, %c0_115, %c0_116] : memref<27x8x8xf32, #tpu.memory_space<vmem>>, vector<1x8x8xf32>
    %178 = vector.shape_cast %177 : vector<1x8x8xf32> to vector<8x8xf32>
    %cst_117 = arith.constant dense<0.000000e+00> : vector<64x8xf32>
    %179 = tpu.matmul %176, %178, %cst_117 {dimension_numbers = #tpu.dot_dimension_numbers<[1], [0], [0], [1], [0, 0, 1, 1], [], []>} : vector<64x8xf32>, vector<8x8xf32>, vector<64x8xf32> -> vector<64x8xf32>
    %180 = arith.addf %174, %179 : vector<64x8xf32>
    %181 = vector.extract_strided_slice %166 {offsets = [0, 1, 0], sizes = [8, 8, 8], strides = [1, 1, 1]} : vector<10x10x8xf32> to vector<8x8x8xf32>
    %182 = vector.shape_cast %181 : vector<8x8x8xf32> to vector<64x8xf32>
    %c10 = arith.constant 10 : index
    %c0_118 = arith.constant 0 : index
    %c0_119 = arith.constant 0 : index
    %183 = vector.load %arg11[%c10, %c0_118, %c0_119] : memref<27x8x8xf32, #tpu.memory_space<vmem>>, vector<1x8x8xf32>
    %184 = vector.shape_cast %183 : vector<1x8x8xf32> to vector<8x8xf32>
    %cst_120 = arith.constant dense<0.000000e+00> : vector<64x8xf32>
    %185 = tpu.matmul %182, %184, %cst_120 {dimension_numbers = #tpu.dot_dimension_numbers<[1], [0], [0], [1], [0, 0, 1, 1], [], []>} : vector<64x8xf32>, vector<8x8xf32>, vector<64x8xf32> -> vector<64x8xf32>
    %186 = arith.addf %180, %185 : vector<64x8xf32>
    %187 = vector.extract_strided_slice %168 {offsets = [0, 1, 0], sizes = [8, 8, 8], strides = [1, 1, 1]} : vector<10x10x8xf32> to vector<8x8x8xf32>
    %188 = vector.shape_cast %187 : vector<8x8x8xf32> to vector<64x8xf32>
    %c10_121 = arith.constant 10 : index
    %c0_122 = arith.constant 0 : index
    %c0_123 = arith.constant 0 : index
    %189 = vector.load %arg12[%c10_121, %c0_122, %c0_123] : memref<27x8x8xf32, #tpu.memory_space<vmem>>, vector<1x8x8xf32>
    %190 = vector.shape_cast %189 : vector<1x8x8xf32> to vector<8x8xf32>
    %cst_124 = arith.constant dense<0.000000e+00> : vector<64x8xf32>
    %191 = tpu.matmul %188, %190, %cst_124 {dimension_numbers = #tpu.dot_dimension_numbers<[1], [0], [0], [1], [0, 0, 1, 1], [], []>} : vector<64x8xf32>, vector<8x8xf32>, vector<64x8xf32> -> vector<64x8xf32>
    %192 = arith.addf %186, %191 : vector<64x8xf32>
    %193 = vector.extract_strided_slice %166 {offsets = [0, 2, 0], sizes = [8, 8, 8], strides = [1, 1, 1]} : vector<10x10x8xf32> to vector<8x8x8xf32>
    %194 = vector.shape_cast %193 : vector<8x8x8xf32> to vector<64x8xf32>
    %c11 = arith.constant 11 : index
    %c0_125 = arith.constant 0 : index
    %c0_126 = arith.constant 0 : index
    %195 = vector.load %arg11[%c11, %c0_125, %c0_126] : memref<27x8x8xf32, #tpu.memory_space<vmem>>, vector<1x8x8xf32>
    %196 = vector.shape_cast %195 : vector<1x8x8xf32> to vector<8x8xf32>
    %cst_127 = arith.constant dense<0.000000e+00> : vector<64x8xf32>
    %197 = tpu.matmul %194, %196, %cst_127 {dimension_numbers = #tpu.dot_dimension_numbers<[1], [0], [0], [1], [0, 0, 1, 1], [], []>} : vector<64x8xf32>, vector<8x8xf32>, vector<64x8xf32> -> vector<64x8xf32>
    %198 = arith.addf %192, %197 : vector<64x8xf32>
    %199 = vector.extract_strided_slice %168 {offsets = [0, 2, 0], sizes = [8, 8, 8], strides = [1, 1, 1]} : vector<10x10x8xf32> to vector<8x8x8xf32>
    %200 = vector.shape_cast %199 : vector<8x8x8xf32> to vector<64x8xf32>
    %c11_128 = arith.constant 11 : index
    %c0_129 = arith.constant 0 : index
    %c0_130 = arith.constant 0 : index
    %201 = vector.load %arg12[%c11_128, %c0_129, %c0_130] : memref<27x8x8xf32, #tpu.memory_space<vmem>>, vector<1x8x8xf32>
    %202 = vector.shape_cast %201 : vector<1x8x8xf32> to vector<8x8xf32>
    %cst_131 = arith.constant dense<0.000000e+00> : vector<64x8xf32>
    %203 = tpu.matmul %200, %202, %cst_131 {dimension_numbers = #tpu.dot_dimension_numbers<[1], [0], [0], [1], [0, 0, 1, 1], [], []>} : vector<64x8xf32>, vector<8x8xf32>, vector<64x8xf32> -> vector<64x8xf32>
    %204 = arith.addf %198, %203 : vector<64x8xf32>
    %205 = vector.extract_strided_slice %166 {offsets = [1, 0, 0], sizes = [8, 8, 8], strides = [1, 1, 1]} : vector<10x10x8xf32> to vector<8x8x8xf32>
    %206 = vector.shape_cast %205 : vector<8x8x8xf32> to vector<64x8xf32>
    %c12 = arith.constant 12 : index
    %c0_132 = arith.constant 0 : index
    %c0_133 = arith.constant 0 : index
    %207 = vector.load %arg11[%c12, %c0_132, %c0_133] : memref<27x8x8xf32, #tpu.memory_space<vmem>>, vector<1x8x8xf32>
    %208 = vector.shape_cast %207 : vector<1x8x8xf32> to vector<8x8xf32>
    %cst_134 = arith.constant dense<0.000000e+00> : vector<64x8xf32>
    %209 = tpu.matmul %206, %208, %cst_134 {dimension_numbers = #tpu.dot_dimension_numbers<[1], [0], [0], [1], [0, 0, 1, 1], [], []>} : vector<64x8xf32>, vector<8x8xf32>, vector<64x8xf32> -> vector<64x8xf32>
    %210 = arith.addf %204, %209 : vector<64x8xf32>
    %211 = vector.extract_strided_slice %168 {offsets = [1, 0, 0], sizes = [8, 8, 8], strides = [1, 1, 1]} : vector<10x10x8xf32> to vector<8x8x8xf32>
    %212 = vector.shape_cast %211 : vector<8x8x8xf32> to vector<64x8xf32>
    %c12_135 = arith.constant 12 : index
    %c0_136 = arith.constant 0 : index
    %c0_137 = arith.constant 0 : index
    %213 = vector.load %arg12[%c12_135, %c0_136, %c0_137] : memref<27x8x8xf32, #tpu.memory_space<vmem>>, vector<1x8x8xf32>
    %214 = vector.shape_cast %213 : vector<1x8x8xf32> to vector<8x8xf32>
    %cst_138 = arith.constant dense<0.000000e+00> : vector<64x8xf32>
    %215 = tpu.matmul %212, %214, %cst_138 {dimension_numbers = #tpu.dot_dimension_numbers<[1], [0], [0], [1], [0, 0, 1, 1], [], []>} : vector<64x8xf32>, vector<8x8xf32>, vector<64x8xf32> -> vector<64x8xf32>
    %216 = arith.addf %210, %215 : vector<64x8xf32>
    %217 = vector.extract_strided_slice %166 {offsets = [1, 1, 0], sizes = [8, 8, 8], strides = [1, 1, 1]} : vector<10x10x8xf32> to vector<8x8x8xf32>
    %218 = vector.shape_cast %217 : vector<8x8x8xf32> to vector<64x8xf32>
    %c13 = arith.constant 13 : index
    %c0_139 = arith.constant 0 : index
    %c0_140 = arith.constant 0 : index
    %219 = vector.load %arg11[%c13, %c0_139, %c0_140] : memref<27x8x8xf32, #tpu.memory_space<vmem>>, vector<1x8x8xf32>
    %220 = vector.shape_cast %219 : vector<1x8x8xf32> to vector<8x8xf32>
    %cst_141 = arith.constant dense<0.000000e+00> : vector<64x8xf32>
    %221 = tpu.matmul %218, %220, %cst_141 {dimension_numbers = #tpu.dot_dimension_numbers<[1], [0], [0], [1], [0, 0, 1, 1], [], []>} : vector<64x8xf32>, vector<8x8xf32>, vector<64x8xf32> -> vector<64x8xf32>
    %222 = arith.addf %216, %221 : vector<64x8xf32>
    %223 = vector.extract_strided_slice %168 {offsets = [1, 1, 0], sizes = [8, 8, 8], strides = [1, 1, 1]} : vector<10x10x8xf32> to vector<8x8x8xf32>
    %224 = vector.shape_cast %223 : vector<8x8x8xf32> to vector<64x8xf32>
    %c13_142 = arith.constant 13 : index
    %c0_143 = arith.constant 0 : index
    %c0_144 = arith.constant 0 : index
    %225 = vector.load %arg12[%c13_142, %c0_143, %c0_144] : memref<27x8x8xf32, #tpu.memory_space<vmem>>, vector<1x8x8xf32>
    %226 = vector.shape_cast %225 : vector<1x8x8xf32> to vector<8x8xf32>
    %cst_145 = arith.constant dense<0.000000e+00> : vector<64x8xf32>
    %227 = tpu.matmul %224, %226, %cst_145 {dimension_numbers = #tpu.dot_dimension_numbers<[1], [0], [0], [1], [0, 0, 1, 1], [], []>} : vector<64x8xf32>, vector<8x8xf32>, vector<64x8xf32> -> vector<64x8xf32>
    %228 = arith.addf %222, %227 : vector<64x8xf32>
    %229 = vector.extract_strided_slice %166 {offsets = [1, 2, 0], sizes = [8, 8, 8], strides = [1, 1, 1]} : vector<10x10x8xf32> to vector<8x8x8xf32>
    %230 = vector.shape_cast %229 : vector<8x8x8xf32> to vector<64x8xf32>
    %c14 = arith.constant 14 : index
    %c0_146 = arith.constant 0 : index
    %c0_147 = arith.constant 0 : index
    %231 = vector.load %arg11[%c14, %c0_146, %c0_147] : memref<27x8x8xf32, #tpu.memory_space<vmem>>, vector<1x8x8xf32>
    %232 = vector.shape_cast %231 : vector<1x8x8xf32> to vector<8x8xf32>
    %cst_148 = arith.constant dense<0.000000e+00> : vector<64x8xf32>
    %233 = tpu.matmul %230, %232, %cst_148 {dimension_numbers = #tpu.dot_dimension_numbers<[1], [0], [0], [1], [0, 0, 1, 1], [], []>} : vector<64x8xf32>, vector<8x8xf32>, vector<64x8xf32> -> vector<64x8xf32>
    %234 = arith.addf %228, %233 : vector<64x8xf32>
    %235 = vector.extract_strided_slice %168 {offsets = [1, 2, 0], sizes = [8, 8, 8], strides = [1, 1, 1]} : vector<10x10x8xf32> to vector<8x8x8xf32>
    %236 = vector.shape_cast %235 : vector<8x8x8xf32> to vector<64x8xf32>
    %c14_149 = arith.constant 14 : index
    %c0_150 = arith.constant 0 : index
    %c0_151 = arith.constant 0 : index
    %237 = vector.load %arg12[%c14_149, %c0_150, %c0_151] : memref<27x8x8xf32, #tpu.memory_space<vmem>>, vector<1x8x8xf32>
    %238 = vector.shape_cast %237 : vector<1x8x8xf32> to vector<8x8xf32>
    %cst_152 = arith.constant dense<0.000000e+00> : vector<64x8xf32>
    %239 = tpu.matmul %236, %238, %cst_152 {dimension_numbers = #tpu.dot_dimension_numbers<[1], [0], [0], [1], [0, 0, 1, 1], [], []>} : vector<64x8xf32>, vector<8x8xf32>, vector<64x8xf32> -> vector<64x8xf32>
    %240 = arith.addf %234, %239 : vector<64x8xf32>
    %241 = vector.extract_strided_slice %166 {offsets = [2, 0, 0], sizes = [8, 8, 8], strides = [1, 1, 1]} : vector<10x10x8xf32> to vector<8x8x8xf32>
    %242 = vector.shape_cast %241 : vector<8x8x8xf32> to vector<64x8xf32>
    %c15 = arith.constant 15 : index
    %c0_153 = arith.constant 0 : index
    %c0_154 = arith.constant 0 : index
    %243 = vector.load %arg11[%c15, %c0_153, %c0_154] : memref<27x8x8xf32, #tpu.memory_space<vmem>>, vector<1x8x8xf32>
    %244 = vector.shape_cast %243 : vector<1x8x8xf32> to vector<8x8xf32>
    %cst_155 = arith.constant dense<0.000000e+00> : vector<64x8xf32>
    %245 = tpu.matmul %242, %244, %cst_155 {dimension_numbers = #tpu.dot_dimension_numbers<[1], [0], [0], [1], [0, 0, 1, 1], [], []>} : vector<64x8xf32>, vector<8x8xf32>, vector<64x8xf32> -> vector<64x8xf32>
    %246 = arith.addf %240, %245 : vector<64x8xf32>
    %247 = vector.extract_strided_slice %168 {offsets = [2, 0, 0], sizes = [8, 8, 8], strides = [1, 1, 1]} : vector<10x10x8xf32> to vector<8x8x8xf32>
    %248 = vector.shape_cast %247 : vector<8x8x8xf32> to vector<64x8xf32>
    %c15_156 = arith.constant 15 : index
    %c0_157 = arith.constant 0 : index
    %c0_158 = arith.constant 0 : index
    %249 = vector.load %arg12[%c15_156, %c0_157, %c0_158] : memref<27x8x8xf32, #tpu.memory_space<vmem>>, vector<1x8x8xf32>
    %250 = vector.shape_cast %249 : vector<1x8x8xf32> to vector<8x8xf32>
    %cst_159 = arith.constant dense<0.000000e+00> : vector<64x8xf32>
    %251 = tpu.matmul %248, %250, %cst_159 {dimension_numbers = #tpu.dot_dimension_numbers<[1], [0], [0], [1], [0, 0, 1, 1], [], []>} : vector<64x8xf32>, vector<8x8xf32>, vector<64x8xf32> -> vector<64x8xf32>
    %252 = arith.addf %246, %251 : vector<64x8xf32>
    %253 = vector.extract_strided_slice %166 {offsets = [2, 1, 0], sizes = [8, 8, 8], strides = [1, 1, 1]} : vector<10x10x8xf32> to vector<8x8x8xf32>
    %254 = vector.shape_cast %253 : vector<8x8x8xf32> to vector<64x8xf32>
    %c16 = arith.constant 16 : index
    %c0_160 = arith.constant 0 : index
    %c0_161 = arith.constant 0 : index
    %255 = vector.load %arg11[%c16, %c0_160, %c0_161] : memref<27x8x8xf32, #tpu.memory_space<vmem>>, vector<1x8x8xf32>
    %256 = vector.shape_cast %255 : vector<1x8x8xf32> to vector<8x8xf32>
    %cst_162 = arith.constant dense<0.000000e+00> : vector<64x8xf32>
    %257 = tpu.matmul %254, %256, %cst_162 {dimension_numbers = #tpu.dot_dimension_numbers<[1], [0], [0], [1], [0, 0, 1, 1], [], []>} : vector<64x8xf32>, vector<8x8xf32>, vector<64x8xf32> -> vector<64x8xf32>
    %258 = arith.addf %252, %257 : vector<64x8xf32>
    %259 = vector.extract_strided_slice %168 {offsets = [2, 1, 0], sizes = [8, 8, 8], strides = [1, 1, 1]} : vector<10x10x8xf32> to vector<8x8x8xf32>
    %260 = vector.shape_cast %259 : vector<8x8x8xf32> to vector<64x8xf32>
    %c16_163 = arith.constant 16 : index
    %c0_164 = arith.constant 0 : index
    %c0_165 = arith.constant 0 : index
    %261 = vector.load %arg12[%c16_163, %c0_164, %c0_165] : memref<27x8x8xf32, #tpu.memory_space<vmem>>, vector<1x8x8xf32>
    %262 = vector.shape_cast %261 : vector<1x8x8xf32> to vector<8x8xf32>
    %cst_166 = arith.constant dense<0.000000e+00> : vector<64x8xf32>
    %263 = tpu.matmul %260, %262, %cst_166 {dimension_numbers = #tpu.dot_dimension_numbers<[1], [0], [0], [1], [0, 0, 1, 1], [], []>} : vector<64x8xf32>, vector<8x8xf32>, vector<64x8xf32> -> vector<64x8xf32>
    %264 = arith.addf %258, %263 : vector<64x8xf32>
    %265 = vector.extract_strided_slice %166 {offsets = [2, 2, 0], sizes = [8, 8, 8], strides = [1, 1, 1]} : vector<10x10x8xf32> to vector<8x8x8xf32>
    %266 = vector.shape_cast %265 : vector<8x8x8xf32> to vector<64x8xf32>
    %c17 = arith.constant 17 : index
    %c0_167 = arith.constant 0 : index
    %c0_168 = arith.constant 0 : index
    %267 = vector.load %arg11[%c17, %c0_167, %c0_168] : memref<27x8x8xf32, #tpu.memory_space<vmem>>, vector<1x8x8xf32>
    %268 = vector.shape_cast %267 : vector<1x8x8xf32> to vector<8x8xf32>
    %cst_169 = arith.constant dense<0.000000e+00> : vector<64x8xf32>
    %269 = tpu.matmul %266, %268, %cst_169 {dimension_numbers = #tpu.dot_dimension_numbers<[1], [0], [0], [1], [0, 0, 1, 1], [], []>} : vector<64x8xf32>, vector<8x8xf32>, vector<64x8xf32> -> vector<64x8xf32>
    %270 = arith.addf %264, %269 : vector<64x8xf32>
    %271 = vector.extract_strided_slice %168 {offsets = [2, 2, 0], sizes = [8, 8, 8], strides = [1, 1, 1]} : vector<10x10x8xf32> to vector<8x8x8xf32>
    %272 = vector.shape_cast %271 : vector<8x8x8xf32> to vector<64x8xf32>
    %c17_170 = arith.constant 17 : index
    %c0_171 = arith.constant 0 : index
    %c0_172 = arith.constant 0 : index
    %273 = vector.load %arg12[%c17_170, %c0_171, %c0_172] : memref<27x8x8xf32, #tpu.memory_space<vmem>>, vector<1x8x8xf32>
    %274 = vector.shape_cast %273 : vector<1x8x8xf32> to vector<8x8xf32>
    %cst_173 = arith.constant dense<0.000000e+00> : vector<64x8xf32>
    %275 = tpu.matmul %272, %274, %cst_173 {dimension_numbers = #tpu.dot_dimension_numbers<[1], [0], [0], [1], [0, 0, 1, 1], [], []>} : vector<64x8xf32>, vector<8x8xf32>, vector<64x8xf32> -> vector<64x8xf32>
    %276 = arith.addf %270, %275 : vector<64x8xf32>
    %c2_i32 = arith.constant 2 : i32
    %277 = arith.addi %arg1, %c2_i32 : i32
    %c1_i32_174 = arith.constant 1 : i32
    %278 = arith.subi %277, %c1_i32_174 : i32
    %c0_i32_175 = arith.constant 0 : i32
    %279 = arith.cmpi sge, %278, %c0_i32_175 : i32
    %c2_i32_176 = arith.constant 2 : i32
    %280 = arith.addi %arg1, %c2_i32_176 : i32
    %c1_i32_177 = arith.constant 1 : i32
    %281 = arith.subi %280, %c1_i32_177 : i32
    %c8_i32_178 = arith.constant 8 : i32
    %282 = arith.cmpi slt, %281, %c8_i32_178 : i32
    %283 = arith.andi %279, %282 : i1
    %cst_179 = arith.constant 1.000000e+00 : f32
    %cst_180 = arith.constant 0.000000e+00 : f32
    %284 = arith.select %283, %cst_179, %cst_180 : f32
    %285 = vector.broadcast %284 : f32 to vector<10x10x1xf32>
    %286 = arith.mulf %4, %285 : vector<10x10x1xf32>
    %c0_181 = arith.constant 0 : index
    %c0_182 = arith.constant 0 : index
    %c0_183 = arith.constant 0 : index
    %c0_184 = arith.constant 0 : index
    %c0_185 = arith.constant 0 : index
    %287 = vector.load %arg4[%c0_181, %c0_182, %c0_183, %c0_184, %c0_185] : memref<1x1x10x10x8xf32, #tpu.memory_space<vmem>>, vector<1x1x10x10x8xf32>
    %288 = vector.shape_cast %287 : vector<1x1x10x10x8xf32> to vector<10x10x8xf32>
    %289 = vector.shape_cast %1 : vector<1x8xf32> to vector<1x1x8xf32>
    %290 = vector.broadcast %289 : vector<1x1x8xf32> to vector<10x10x8xf32>
    %291 = arith.mulf %288, %290 : vector<10x10x8xf32>
    %292 = vector.shape_cast %3 : vector<1x8xf32> to vector<1x1x8xf32>
    %293 = vector.broadcast %292 : vector<1x1x8xf32> to vector<10x10x8xf32>
    %294 = arith.addf %291, %293 : vector<10x10x8xf32>
    %cst_186 = arith.constant 0.000000e+00 : f32
    %cst_187 = arith.constant 6.000000e+00 : f32
    %295 = vector.broadcast %cst_186 : f32 to vector<10x10x8xf32>
    %296 = arith.maximumf %295, %294 : vector<10x10x8xf32>
    %297 = vector.broadcast %cst_187 : f32 to vector<10x10x8xf32>
    %298 = arith.minimumf %297, %296 : vector<10x10x8xf32>
    %299 = vector.broadcast %286 : vector<10x10x1xf32> to vector<10x10x8xf32>
    %300 = arith.mulf %298, %299 : vector<10x10x8xf32>
    %c0_188 = arith.constant 0 : index
    %c0_189 = arith.constant 0 : index
    %c0_190 = arith.constant 0 : index
    %c0_191 = arith.constant 0 : index
    %c0_192 = arith.constant 0 : index
    %301 = vector.load %arg7[%c0_188, %c0_189, %c0_190, %c0_191, %c0_192] : memref<1x1x10x10x8xf32, #tpu.memory_space<vmem>>, vector<1x1x10x10x8xf32>
    %302 = vector.shape_cast %301 : vector<1x1x10x10x8xf32> to vector<10x10x8xf32>
    %303 = vector.extract_strided_slice %300 {offsets = [0, 0, 0], sizes = [8, 8, 8], strides = [1, 1, 1]} : vector<10x10x8xf32> to vector<8x8x8xf32>
    %304 = vector.shape_cast %303 : vector<8x8x8xf32> to vector<64x8xf32>
    %c18 = arith.constant 18 : index
    %c0_193 = arith.constant 0 : index
    %c0_194 = arith.constant 0 : index
    %305 = vector.load %arg11[%c18, %c0_193, %c0_194] : memref<27x8x8xf32, #tpu.memory_space<vmem>>, vector<1x8x8xf32>
    %306 = vector.shape_cast %305 : vector<1x8x8xf32> to vector<8x8xf32>
    %cst_195 = arith.constant dense<0.000000e+00> : vector<64x8xf32>
    %307 = tpu.matmul %304, %306, %cst_195 {dimension_numbers = #tpu.dot_dimension_numbers<[1], [0], [0], [1], [0, 0, 1, 1], [], []>} : vector<64x8xf32>, vector<8x8xf32>, vector<64x8xf32> -> vector<64x8xf32>
    %308 = arith.addf %276, %307 : vector<64x8xf32>
    %309 = vector.extract_strided_slice %302 {offsets = [0, 0, 0], sizes = [8, 8, 8], strides = [1, 1, 1]} : vector<10x10x8xf32> to vector<8x8x8xf32>
    %310 = vector.shape_cast %309 : vector<8x8x8xf32> to vector<64x8xf32>
    %c18_196 = arith.constant 18 : index
    %c0_197 = arith.constant 0 : index
    %c0_198 = arith.constant 0 : index
    %311 = vector.load %arg12[%c18_196, %c0_197, %c0_198] : memref<27x8x8xf32, #tpu.memory_space<vmem>>, vector<1x8x8xf32>
    %312 = vector.shape_cast %311 : vector<1x8x8xf32> to vector<8x8xf32>
    %cst_199 = arith.constant dense<0.000000e+00> : vector<64x8xf32>
    %313 = tpu.matmul %310, %312, %cst_199 {dimension_numbers = #tpu.dot_dimension_numbers<[1], [0], [0], [1], [0, 0, 1, 1], [], []>} : vector<64x8xf32>, vector<8x8xf32>, vector<64x8xf32> -> vector<64x8xf32>
    %314 = arith.addf %308, %313 : vector<64x8xf32>
    %315 = vector.extract_strided_slice %300 {offsets = [0, 1, 0], sizes = [8, 8, 8], strides = [1, 1, 1]} : vector<10x10x8xf32> to vector<8x8x8xf32>
    %316 = vector.shape_cast %315 : vector<8x8x8xf32> to vector<64x8xf32>
    %c19 = arith.constant 19 : index
    %c0_200 = arith.constant 0 : index
    %c0_201 = arith.constant 0 : index
    %317 = vector.load %arg11[%c19, %c0_200, %c0_201] : memref<27x8x8xf32, #tpu.memory_space<vmem>>, vector<1x8x8xf32>
    %318 = vector.shape_cast %317 : vector<1x8x8xf32> to vector<8x8xf32>
    %cst_202 = arith.constant dense<0.000000e+00> : vector<64x8xf32>
    %319 = tpu.matmul %316, %318, %cst_202 {dimension_numbers = #tpu.dot_dimension_numbers<[1], [0], [0], [1], [0, 0, 1, 1], [], []>} : vector<64x8xf32>, vector<8x8xf32>, vector<64x8xf32> -> vector<64x8xf32>
    %320 = arith.addf %314, %319 : vector<64x8xf32>
    %321 = vector.extract_strided_slice %302 {offsets = [0, 1, 0], sizes = [8, 8, 8], strides = [1, 1, 1]} : vector<10x10x8xf32> to vector<8x8x8xf32>
    %322 = vector.shape_cast %321 : vector<8x8x8xf32> to vector<64x8xf32>
    %c19_203 = arith.constant 19 : index
    %c0_204 = arith.constant 0 : index
    %c0_205 = arith.constant 0 : index
    %323 = vector.load %arg12[%c19_203, %c0_204, %c0_205] : memref<27x8x8xf32, #tpu.memory_space<vmem>>, vector<1x8x8xf32>
    %324 = vector.shape_cast %323 : vector<1x8x8xf32> to vector<8x8xf32>
    %cst_206 = arith.constant dense<0.000000e+00> : vector<64x8xf32>
    %325 = tpu.matmul %322, %324, %cst_206 {dimension_numbers = #tpu.dot_dimension_numbers<[1], [0], [0], [1], [0, 0, 1, 1], [], []>} : vector<64x8xf32>, vector<8x8xf32>, vector<64x8xf32> -> vector<64x8xf32>
    %326 = arith.addf %320, %325 : vector<64x8xf32>
    %327 = vector.extract_strided_slice %300 {offsets = [0, 2, 0], sizes = [8, 8, 8], strides = [1, 1, 1]} : vector<10x10x8xf32> to vector<8x8x8xf32>
    %328 = vector.shape_cast %327 : vector<8x8x8xf32> to vector<64x8xf32>
    %c20 = arith.constant 20 : index
    %c0_207 = arith.constant 0 : index
    %c0_208 = arith.constant 0 : index
    %329 = vector.load %arg11[%c20, %c0_207, %c0_208] : memref<27x8x8xf32, #tpu.memory_space<vmem>>, vector<1x8x8xf32>
    %330 = vector.shape_cast %329 : vector<1x8x8xf32> to vector<8x8xf32>
    %cst_209 = arith.constant dense<0.000000e+00> : vector<64x8xf32>
    %331 = tpu.matmul %328, %330, %cst_209 {dimension_numbers = #tpu.dot_dimension_numbers<[1], [0], [0], [1], [0, 0, 1, 1], [], []>} : vector<64x8xf32>, vector<8x8xf32>, vector<64x8xf32> -> vector<64x8xf32>
    %332 = arith.addf %326, %331 : vector<64x8xf32>
    %333 = vector.extract_strided_slice %302 {offsets = [0, 2, 0], sizes = [8, 8, 8], strides = [1, 1, 1]} : vector<10x10x8xf32> to vector<8x8x8xf32>
    %334 = vector.shape_cast %333 : vector<8x8x8xf32> to vector<64x8xf32>
    %c20_210 = arith.constant 20 : index
    %c0_211 = arith.constant 0 : index
    %c0_212 = arith.constant 0 : index
    %335 = vector.load %arg12[%c20_210, %c0_211, %c0_212] : memref<27x8x8xf32, #tpu.memory_space<vmem>>, vector<1x8x8xf32>
    %336 = vector.shape_cast %335 : vector<1x8x8xf32> to vector<8x8xf32>
    %cst_213 = arith.constant dense<0.000000e+00> : vector<64x8xf32>
    %337 = tpu.matmul %334, %336, %cst_213 {dimension_numbers = #tpu.dot_dimension_numbers<[1], [0], [0], [1], [0, 0, 1, 1], [], []>} : vector<64x8xf32>, vector<8x8xf32>, vector<64x8xf32> -> vector<64x8xf32>
    %338 = arith.addf %332, %337 : vector<64x8xf32>
    %339 = vector.extract_strided_slice %300 {offsets = [1, 0, 0], sizes = [8, 8, 8], strides = [1, 1, 1]} : vector<10x10x8xf32> to vector<8x8x8xf32>
    %340 = vector.shape_cast %339 : vector<8x8x8xf32> to vector<64x8xf32>
    %c21 = arith.constant 21 : index
    %c0_214 = arith.constant 0 : index
    %c0_215 = arith.constant 0 : index
    %341 = vector.load %arg11[%c21, %c0_214, %c0_215] : memref<27x8x8xf32, #tpu.memory_space<vmem>>, vector<1x8x8xf32>
    %342 = vector.shape_cast %341 : vector<1x8x8xf32> to vector<8x8xf32>
    %cst_216 = arith.constant dense<0.000000e+00> : vector<64x8xf32>
    %343 = tpu.matmul %340, %342, %cst_216 {dimension_numbers = #tpu.dot_dimension_numbers<[1], [0], [0], [1], [0, 0, 1, 1], [], []>} : vector<64x8xf32>, vector<8x8xf32>, vector<64x8xf32> -> vector<64x8xf32>
    %344 = arith.addf %338, %343 : vector<64x8xf32>
    %345 = vector.extract_strided_slice %302 {offsets = [1, 0, 0], sizes = [8, 8, 8], strides = [1, 1, 1]} : vector<10x10x8xf32> to vector<8x8x8xf32>
    %346 = vector.shape_cast %345 : vector<8x8x8xf32> to vector<64x8xf32>
    %c21_217 = arith.constant 21 : index
    %c0_218 = arith.constant 0 : index
    %c0_219 = arith.constant 0 : index
    %347 = vector.load %arg12[%c21_217, %c0_218, %c0_219] : memref<27x8x8xf32, #tpu.memory_space<vmem>>, vector<1x8x8xf32>
    %348 = vector.shape_cast %347 : vector<1x8x8xf32> to vector<8x8xf32>
    %cst_220 = arith.constant dense<0.000000e+00> : vector<64x8xf32>
    %349 = tpu.matmul %346, %348, %cst_220 {dimension_numbers = #tpu.dot_dimension_numbers<[1], [0], [0], [1], [0, 0, 1, 1], [], []>} : vector<64x8xf32>, vector<8x8xf32>, vector<64x8xf32> -> vector<64x8xf32>
    %350 = arith.addf %344, %349 : vector<64x8xf32>
    %351 = vector.extract_strided_slice %300 {offsets = [1, 1, 0], sizes = [8, 8, 8], strides = [1, 1, 1]} : vector<10x10x8xf32> to vector<8x8x8xf32>
    %352 = vector.shape_cast %351 : vector<8x8x8xf32> to vector<64x8xf32>
    %c22 = arith.constant 22 : index
    %c0_221 = arith.constant 0 : index
    %c0_222 = arith.constant 0 : index
    %353 = vector.load %arg11[%c22, %c0_221, %c0_222] : memref<27x8x8xf32, #tpu.memory_space<vmem>>, vector<1x8x8xf32>
    %354 = vector.shape_cast %353 : vector<1x8x8xf32> to vector<8x8xf32>
    %cst_223 = arith.constant dense<0.000000e+00> : vector<64x8xf32>
    %355 = tpu.matmul %352, %354, %cst_223 {dimension_numbers = #tpu.dot_dimension_numbers<[1], [0], [0], [1], [0, 0, 1, 1], [], []>} : vector<64x8xf32>, vector<8x8xf32>, vector<64x8xf32> -> vector<64x8xf32>
    %356 = arith.addf %350, %355 : vector<64x8xf32>
    %357 = vector.extract_strided_slice %302 {offsets = [1, 1, 0], sizes = [8, 8, 8], strides = [1, 1, 1]} : vector<10x10x8xf32> to vector<8x8x8xf32>
    %358 = vector.shape_cast %357 : vector<8x8x8xf32> to vector<64x8xf32>
    %c22_224 = arith.constant 22 : index
    %c0_225 = arith.constant 0 : index
    %c0_226 = arith.constant 0 : index
    %359 = vector.load %arg12[%c22_224, %c0_225, %c0_226] : memref<27x8x8xf32, #tpu.memory_space<vmem>>, vector<1x8x8xf32>
    %360 = vector.shape_cast %359 : vector<1x8x8xf32> to vector<8x8xf32>
    %cst_227 = arith.constant dense<0.000000e+00> : vector<64x8xf32>
    %361 = tpu.matmul %358, %360, %cst_227 {dimension_numbers = #tpu.dot_dimension_numbers<[1], [0], [0], [1], [0, 0, 1, 1], [], []>} : vector<64x8xf32>, vector<8x8xf32>, vector<64x8xf32> -> vector<64x8xf32>
    %362 = arith.addf %356, %361 : vector<64x8xf32>
    %363 = vector.extract_strided_slice %300 {offsets = [1, 2, 0], sizes = [8, 8, 8], strides = [1, 1, 1]} : vector<10x10x8xf32> to vector<8x8x8xf32>
    %364 = vector.shape_cast %363 : vector<8x8x8xf32> to vector<64x8xf32>
    %c23 = arith.constant 23 : index
    %c0_228 = arith.constant 0 : index
    %c0_229 = arith.constant 0 : index
    %365 = vector.load %arg11[%c23, %c0_228, %c0_229] : memref<27x8x8xf32, #tpu.memory_space<vmem>>, vector<1x8x8xf32>
    %366 = vector.shape_cast %365 : vector<1x8x8xf32> to vector<8x8xf32>
    %cst_230 = arith.constant dense<0.000000e+00> : vector<64x8xf32>
    %367 = tpu.matmul %364, %366, %cst_230 {dimension_numbers = #tpu.dot_dimension_numbers<[1], [0], [0], [1], [0, 0, 1, 1], [], []>} : vector<64x8xf32>, vector<8x8xf32>, vector<64x8xf32> -> vector<64x8xf32>
    %368 = arith.addf %362, %367 : vector<64x8xf32>
    %369 = vector.extract_strided_slice %302 {offsets = [1, 2, 0], sizes = [8, 8, 8], strides = [1, 1, 1]} : vector<10x10x8xf32> to vector<8x8x8xf32>
    %370 = vector.shape_cast %369 : vector<8x8x8xf32> to vector<64x8xf32>
    %c23_231 = arith.constant 23 : index
    %c0_232 = arith.constant 0 : index
    %c0_233 = arith.constant 0 : index
    %371 = vector.load %arg12[%c23_231, %c0_232, %c0_233] : memref<27x8x8xf32, #tpu.memory_space<vmem>>, vector<1x8x8xf32>
    %372 = vector.shape_cast %371 : vector<1x8x8xf32> to vector<8x8xf32>
    %cst_234 = arith.constant dense<0.000000e+00> : vector<64x8xf32>
    %373 = tpu.matmul %370, %372, %cst_234 {dimension_numbers = #tpu.dot_dimension_numbers<[1], [0], [0], [1], [0, 0, 1, 1], [], []>} : vector<64x8xf32>, vector<8x8xf32>, vector<64x8xf32> -> vector<64x8xf32>
    %374 = arith.addf %368, %373 : vector<64x8xf32>
    %375 = vector.extract_strided_slice %300 {offsets = [2, 0, 0], sizes = [8, 8, 8], strides = [1, 1, 1]} : vector<10x10x8xf32> to vector<8x8x8xf32>
    %376 = vector.shape_cast %375 : vector<8x8x8xf32> to vector<64x8xf32>
    %c24 = arith.constant 24 : index
    %c0_235 = arith.constant 0 : index
    %c0_236 = arith.constant 0 : index
    %377 = vector.load %arg11[%c24, %c0_235, %c0_236] : memref<27x8x8xf32, #tpu.memory_space<vmem>>, vector<1x8x8xf32>
    %378 = vector.shape_cast %377 : vector<1x8x8xf32> to vector<8x8xf32>
    %cst_237 = arith.constant dense<0.000000e+00> : vector<64x8xf32>
    %379 = tpu.matmul %376, %378, %cst_237 {dimension_numbers = #tpu.dot_dimension_numbers<[1], [0], [0], [1], [0, 0, 1, 1], [], []>} : vector<64x8xf32>, vector<8x8xf32>, vector<64x8xf32> -> vector<64x8xf32>
    %380 = arith.addf %374, %379 : vector<64x8xf32>
    %381 = vector.extract_strided_slice %302 {offsets = [2, 0, 0], sizes = [8, 8, 8], strides = [1, 1, 1]} : vector<10x10x8xf32> to vector<8x8x8xf32>
    %382 = vector.shape_cast %381 : vector<8x8x8xf32> to vector<64x8xf32>
    %c24_238 = arith.constant 24 : index
    %c0_239 = arith.constant 0 : index
    %c0_240 = arith.constant 0 : index
    %383 = vector.load %arg12[%c24_238, %c0_239, %c0_240] : memref<27x8x8xf32, #tpu.memory_space<vmem>>, vector<1x8x8xf32>
    %384 = vector.shape_cast %383 : vector<1x8x8xf32> to vector<8x8xf32>
    %cst_241 = arith.constant dense<0.000000e+00> : vector<64x8xf32>
    %385 = tpu.matmul %382, %384, %cst_241 {dimension_numbers = #tpu.dot_dimension_numbers<[1], [0], [0], [1], [0, 0, 1, 1], [], []>} : vector<64x8xf32>, vector<8x8xf32>, vector<64x8xf32> -> vector<64x8xf32>
    %386 = arith.addf %380, %385 : vector<64x8xf32>
    %387 = vector.extract_strided_slice %300 {offsets = [2, 1, 0], sizes = [8, 8, 8], strides = [1, 1, 1]} : vector<10x10x8xf32> to vector<8x8x8xf32>
    %388 = vector.shape_cast %387 : vector<8x8x8xf32> to vector<64x8xf32>
    %c25 = arith.constant 25 : index
    %c0_242 = arith.constant 0 : index
    %c0_243 = arith.constant 0 : index
    %389 = vector.load %arg11[%c25, %c0_242, %c0_243] : memref<27x8x8xf32, #tpu.memory_space<vmem>>, vector<1x8x8xf32>
    %390 = vector.shape_cast %389 : vector<1x8x8xf32> to vector<8x8xf32>
    %cst_244 = arith.constant dense<0.000000e+00> : vector<64x8xf32>
    %391 = tpu.matmul %388, %390, %cst_244 {dimension_numbers = #tpu.dot_dimension_numbers<[1], [0], [0], [1], [0, 0, 1, 1], [], []>} : vector<64x8xf32>, vector<8x8xf32>, vector<64x8xf32> -> vector<64x8xf32>
    %392 = arith.addf %386, %391 : vector<64x8xf32>
    %393 = vector.extract_strided_slice %302 {offsets = [2, 1, 0], sizes = [8, 8, 8], strides = [1, 1, 1]} : vector<10x10x8xf32> to vector<8x8x8xf32>
    %394 = vector.shape_cast %393 : vector<8x8x8xf32> to vector<64x8xf32>
    %c25_245 = arith.constant 25 : index
    %c0_246 = arith.constant 0 : index
    %c0_247 = arith.constant 0 : index
    %395 = vector.load %arg12[%c25_245, %c0_246, %c0_247] : memref<27x8x8xf32, #tpu.memory_space<vmem>>, vector<1x8x8xf32>
    %396 = vector.shape_cast %395 : vector<1x8x8xf32> to vector<8x8xf32>
    %cst_248 = arith.constant dense<0.000000e+00> : vector<64x8xf32>
    %397 = tpu.matmul %394, %396, %cst_248 {dimension_numbers = #tpu.dot_dimension_numbers<[1], [0], [0], [1], [0, 0, 1, 1], [], []>} : vector<64x8xf32>, vector<8x8xf32>, vector<64x8xf32> -> vector<64x8xf32>
    %398 = arith.addf %392, %397 : vector<64x8xf32>
    %399 = vector.extract_strided_slice %300 {offsets = [2, 2, 0], sizes = [8, 8, 8], strides = [1, 1, 1]} : vector<10x10x8xf32> to vector<8x8x8xf32>
    %400 = vector.shape_cast %399 : vector<8x8x8xf32> to vector<64x8xf32>
    %c26 = arith.constant 26 : index
    %c0_249 = arith.constant 0 : index
    %c0_250 = arith.constant 0 : index
    %401 = vector.load %arg11[%c26, %c0_249, %c0_250] : memref<27x8x8xf32, #tpu.memory_space<vmem>>, vector<1x8x8xf32>
    %402 = vector.shape_cast %401 : vector<1x8x8xf32> to vector<8x8xf32>
    %cst_251 = arith.constant dense<0.000000e+00> : vector<64x8xf32>
    %403 = tpu.matmul %400, %402, %cst_251 {dimension_numbers = #tpu.dot_dimension_numbers<[1], [0], [0], [1], [0, 0, 1, 1], [], []>} : vector<64x8xf32>, vector<8x8xf32>, vector<64x8xf32> -> vector<64x8xf32>
    %404 = arith.addf %398, %403 : vector<64x8xf32>
    %405 = vector.extract_strided_slice %302 {offsets = [2, 2, 0], sizes = [8, 8, 8], strides = [1, 1, 1]} : vector<10x10x8xf32> to vector<8x8x8xf32>
    %406 = vector.shape_cast %405 : vector<8x8x8xf32> to vector<64x8xf32>
    %c26_252 = arith.constant 26 : index
    %c0_253 = arith.constant 0 : index
    %c0_254 = arith.constant 0 : index
    %407 = vector.load %arg12[%c26_252, %c0_253, %c0_254] : memref<27x8x8xf32, #tpu.memory_space<vmem>>, vector<1x8x8xf32>
    %408 = vector.shape_cast %407 : vector<1x8x8xf32> to vector<8x8xf32>
    %cst_255 = arith.constant dense<0.000000e+00> : vector<64x8xf32>
    %409 = tpu.matmul %406, %408, %cst_255 {dimension_numbers = #tpu.dot_dimension_numbers<[1], [0], [0], [1], [0, 0, 1, 1], [], []>} : vector<64x8xf32>, vector<8x8xf32>, vector<64x8xf32> -> vector<64x8xf32>
    %410 = arith.addf %404, %409 : vector<64x8xf32>
    %411 = vector.shape_cast %410 : vector<64x8xf32> to vector<8x8x8xf32>
    %c0_256 = arith.constant 0 : index
    %c0_257 = arith.constant 0 : index
    %c0_258 = arith.constant 0 : index
    %c0_259 = arith.constant 0 : index
    %c0_260 = arith.constant 0 : index
    %412 = vector.load %arg14[%c0_256, %c0_257, %c0_258, %c0_259, %c0_260] : memref<1x1x8x8x8xf32, #tpu.memory_space<vmem>>, vector<1x1x8x8x8xf32>
    %413 = vector.shape_cast %412 : vector<1x1x8x8x8xf32> to vector<8x8x8xf32>
    %414 = vector.shape_cast %411 : vector<8x8x8xf32> to vector<1x1x8x8x8xf32>
    tpu.vector_store %arg14[%c0_256, %c0_257, %c0_258, %c0_259, %c0_260], %414 {strides = array<i32>} : memref<1x1x8x8x8xf32, #tpu.memory_space<vmem>>, vector<1x1x8x8x8xf32>,
    %cst_261 = arith.constant dense<0.000000e+00> : vector<8xf32>
    %415 = vector.multi_reduction <add>, %410, %cst_261 [0] : vector<64x8xf32> to vector<8xf32>
    %416 = vector.shape_cast %415 : vector<8xf32> to vector<1x8xf32>
    %417 = arith.mulf %410, %410 : vector<64x8xf32>
    %cst_262 = arith.constant dense<0.000000e+00> : vector<8xf32>
    %418 = vector.multi_reduction <add>, %417, %cst_262 [0] : vector<64x8xf32> to vector<8xf32>
    %419 = vector.shape_cast %418 : vector<8xf32> to vector<1x8xf32>
    %420 = tpu.concatenate %416, %419 in 0 : vector<1x8xf32>, vector<1x8xf32> -> vector<2x8xf32>
    %c0_263 = arith.constant 0 : index
    %c0_264 = arith.constant 0 : index
    %c0_265 = arith.constant 0 : index
    %c0_266 = arith.constant 0 : index
    %421 = vector.load %arg15[%c0_263, %c0_264, %c0_265, %c0_266] : memref<1x1x2x8xf32, #tpu.memory_space<vmem>>, vector<1x1x2x8xf32>
    %422 = vector.shape_cast %421 : vector<1x1x2x8xf32> to vector<2x8xf32>
    %423 = vector.shape_cast %420 : vector<2x8xf32> to vector<1x1x2x8xf32>
    tpu.vector_store %arg15[%c0_263, %c0_264, %c0_265, %c0_266], %423 {strides = array<i32>} : memref<1x1x2x8xf32, #tpu.memory_space<vmem>>, vector<1x1x2x8xf32>,
    return
  }
  func.func @transform_0(%arg0: i32, %arg1: i32) -> (i32, i32, i32, i32, i32) {
    %c0_i32 = arith.constant 0 : i32
    %0 = arith.addi %arg1, %c0_i32 : i32
    %c0_i32_0 = arith.constant 0 : i32
    %c0_i32_1 = arith.constant 0 : i32
    %c0_i32_2 = arith.constant 0 : i32
    %c0_i32_3 = arith.constant 0 : i32
    return %arg0, %0, %c0_i32_0, %c0_i32_1, %c0_i32_2 : i32, i32, i32, i32, i32
  }
  func.func @transform_1(%arg0: i32, %arg1: i32) -> (i32, i32, i32, i32, i32) {
    %c1_i32 = arith.constant 1 : i32
    %0 = arith.addi %arg1, %c1_i32 : i32
    %c0_i32 = arith.constant 0 : i32
    %c0_i32_0 = arith.constant 0 : i32
    %c0_i32_1 = arith.constant 0 : i32
    %c0_i32_2 = arith.constant 0 : i32
    return %arg0, %0, %c0_i32, %c0_i32_0, %c0_i32_1 : i32, i32, i32, i32, i32
  }
  func.func @transform_2(%arg0: i32, %arg1: i32) -> (i32, i32, i32, i32, i32) {
    %c2_i32 = arith.constant 2 : i32
    %0 = arith.addi %arg1, %c2_i32 : i32
    %c0_i32 = arith.constant 0 : i32
    %c0_i32_0 = arith.constant 0 : i32
    %c0_i32_1 = arith.constant 0 : i32
    %c0_i32_2 = arith.constant 0 : i32
    return %arg0, %0, %c0_i32, %c0_i32_0, %c0_i32_1 : i32, i32, i32, i32, i32
  }
  func.func @transform_3(%arg0: i32, %arg1: i32) -> (i32, i32, i32, i32, i32) {
    %c0_i32 = arith.constant 0 : i32
    %0 = arith.addi %arg1, %c0_i32 : i32
    %c0_i32_0 = arith.constant 0 : i32
    %c0_i32_1 = arith.constant 0 : i32
    %c0_i32_2 = arith.constant 0 : i32
    %c0_i32_3 = arith.constant 0 : i32
    return %arg0, %0, %c0_i32_0, %c0_i32_1, %c0_i32_2 : i32, i32, i32, i32, i32
  }
  func.func @transform_4(%arg0: i32, %arg1: i32) -> (i32, i32, i32, i32, i32) {
    %c1_i32 = arith.constant 1 : i32
    %0 = arith.addi %arg1, %c1_i32 : i32
    %c0_i32 = arith.constant 0 : i32
    %c0_i32_0 = arith.constant 0 : i32
    %c0_i32_1 = arith.constant 0 : i32
    %c0_i32_2 = arith.constant 0 : i32
    return %arg0, %0, %c0_i32, %c0_i32_0, %c0_i32_1 : i32, i32, i32, i32, i32
  }
  func.func @transform_5(%arg0: i32, %arg1: i32) -> (i32, i32, i32, i32, i32) {
    %c2_i32 = arith.constant 2 : i32
    %0 = arith.addi %arg1, %c2_i32 : i32
    %c0_i32 = arith.constant 0 : i32
    %c0_i32_0 = arith.constant 0 : i32
    %c0_i32_1 = arith.constant 0 : i32
    %c0_i32_2 = arith.constant 0 : i32
    return %arg0, %0, %c0_i32, %c0_i32_0, %c0_i32_1 : i32, i32, i32, i32, i32
  }
  func.func @transform_6(%arg0: i32, %arg1: i32) -> (i32, i32, i32) {
    %c0_i32 = arith.constant 0 : i32
    %c0_i32_0 = arith.constant 0 : i32
    %c0_i32_1 = arith.constant 0 : i32
    return %arg0, %c0_i32, %c0_i32_0 : i32, i32, i32
  }
  func.func @transform_7(%arg0: i32, %arg1: i32) -> (i32, i32, i32) {
    %c0_i32 = arith.constant 0 : i32
    %c0_i32_0 = arith.constant 0 : i32
    %c0_i32_1 = arith.constant 0 : i32
    return %arg0, %c0_i32, %c0_i32_0 : i32, i32, i32
  }
  func.func @transform_8(%arg0: i32, %arg1: i32) -> (i32, i32, i32) {
    %c0_i32 = arith.constant 0 : i32
    %c0_i32_0 = arith.constant 0 : i32
    %c0_i32_1 = arith.constant 0 : i32
    %c0_i32_2 = arith.constant 0 : i32
    return %c0_i32, %c0_i32_0, %c0_i32_1 : i32, i32, i32
  }
  func.func @transform_9(%arg0: i32, %arg1: i32) -> (i32, i32, i32) {
    %c0_i32 = arith.constant 0 : i32
    %c0_i32_0 = arith.constant 0 : i32
    %c0_i32_1 = arith.constant 0 : i32
    %c0_i32_2 = arith.constant 0 : i32
    return %c0_i32, %c0_i32_0, %c0_i32_1 : i32, i32, i32
  }
  func.func @transform_10(%arg0: i32, %arg1: i32) -> (i32, i32, i32) {
    %c0_i32 = arith.constant 0 : i32
    %c0_i32_0 = arith.constant 0 : i32
    %c0_i32_1 = arith.constant 0 : i32
    %c0_i32_2 = arith.constant 0 : i32
    return %c0_i32, %c0_i32_0, %c0_i32_1 : i32, i32, i32
  }
  func.func @transform_11(%arg0: i32, %arg1: i32) -> (i32, i32) {
    %c0_i32 = arith.constant 0 : i32
    %c0_i32_0 = arith.constant 0 : i32
    %c0_i32_1 = arith.constant 0 : i32
    return %c0_i32, %c0_i32_0 : i32, i32
  }
  func.func @transform_12(%arg0: i32, %arg1: i32) -> (i32, i32, i32, i32, i32) {
    %c0_i32 = arith.constant 0 : i32
    %c0_i32_0 = arith.constant 0 : i32
    %c0_i32_1 = arith.constant 0 : i32
    %c0_i32_2 = arith.constant 0 : i32
    return %arg0, %arg1, %c0_i32, %c0_i32_0, %c0_i32_1 : i32, i32, i32, i32, i32
  }
  func.func @transform_13(%arg0: i32, %arg1: i32) -> (i32, i32, i32, i32) {
    %c0_i32 = arith.constant 0 : i32
    %c0_i32_0 = arith.constant 0 : i32
    %c0_i32_1 = arith.constant 0 : i32
    return %arg0, %arg1, %c0_i32, %c0_i32_0 : i32, i32, i32, i32
  }
}

</mosaic_0001>

<bundles_post_ra>
// kernel: multi_decoder_3d_v2.4
= control target key start
LH: loop header
LB: loop body
LE: loop exit
PB: predicated region body
PF: predicated region fallthrough
CT: control target
= control target key end

     0   :  { %vm45_vm0 = vcmask 523264   ;;  %s523_s1 = inlined_call_operand.vmem [shape: f32[64,128], index: 1, kind: input, shape index: {}]   ;;  %s524_s0 = inlined_call_operand.vmem [shape: f32[128,64], index: 0, kind: input, shape index: {}]   ;;  %s525_s2 = inlined_call_operand.vmem [shape: f32[1,128], index: 2, kind: input, shape index: {}]   ;;  %s526_s3 = inlined_call_operand.vmem [shape: f32[128,128], index: 3, kind: output, shape index: {}]  }
   0x1   :  { %v30_v0 = vld [vmem:[%s523_s1] sm:$0xff]  ;;  %v31_v1 = vld [vmem:[%s523_s1 + $0x8] sm:$0xff]  ;;  %v32_v2 = vld [vmem:[%s523_s1 + $0x10] sm:$0xff] }
   0x2   :  { %v340_v3 = vpack.c.bf16 %v31_v1, %v30_v0  ;;  %v33_v4 = vld [vmem:[%s523_s1 + $0x18] sm:$0xff]  ;;  %v34_v6 = vld [vmem:[%s523_s1 + $0x20] sm:$0xff]  ;;  %v35_v7 = vld [vmem:[%s523_s1 + $0x28] sm:$0xff] }
   0x3   :  { %v344_v5 = vpack.c.bf16 %v33_v4, %v32_v2  ;;  %v14_v8 = vld [vmem:[%s524_s0] sm:$0xff]  ;;  %v348_v10 = vpack.c.bf16 %v35_v7, %v34_v6  ;;  %v36_v11 = vld [vmem:[%s523_s1 + $0x30] sm:$0xff]  ;;  %v37_v12 = vld [vmem:[%s523_s1 + $0x38] sm:$0xff] }
   0x4   :  { %341 = vmatprep.subr.bf16.mxu0 %v340_v3  ;;  %356 = vmatprep.subr.bf16.mxu1 %v340_v3  ;;  %v22_v9 = vld [vmem:[%s524_s0 + $0x40] sm:$0xff]  ;;  %v352_v13 = vpack.c.bf16 %v37_v12, %v36_v11  ;;  %v15_v14 = vld [vmem:[%s524_s0 + $0x8] sm:$0xff]  ;;  %v16_v16 = vld [vmem:[%s524_s0 + $0x10] sm:$0xff] }
   0x5   :  { %343 = vmatpush3.bf16.msra.mxu0 %v340_v3  ;;  %360 = vmatpush3.bf16.msra.mxu1 %v340_v3  ;;  %v23_v15 = vld [vmem:[%s524_s0 + $0x48] sm:$0xff]  ;;  %v24_v17 = vld [vmem:[%s524_s0 + $0x50] sm:$0xff]  ;;  %v17_v18 = vld [vmem:[%s524_s0 + $0x18] sm:$0xff] }
   0x6   :  { %345 = vmatprep.subr.bf16.mxu0 %v344_v5  ;;  %357 = vmatprep.subr.bf16.mxu1 %v344_v5  ;;  %v25_v19 = vld [vmem:[%s524_s0 + $0x58] sm:$0xff]  ;;  %v18_v20 = vld [vmem:[%s524_s0 + $0x20] sm:$0xff]  ;;  %v19_v22 = vld [vmem:[%s524_s0 + $0x28] sm:$0xff] }
   0x7   :  { %316 = vmatprep.mubr.msk.f32.mxu0 %vm45_vm0, %v14_v8  ;;  %328 = vmatprep.mubr.msk.f32.mxu1 %vm45_vm0, %v22_v9  ;;  %v26_v21 = vld [vmem:[%s524_s0 + $0x60] sm:$0xff]  ;;  %v27_v23 = vld [vmem:[%s524_s0 + $0x68] sm:$0xff]  ;;  %v20_v24 = vld [vmem:[%s524_s0 + $0x30] sm:$0xff] }
   0x8   :  { %v28_v25 = vld [vmem:[%s524_s0 + $0x70] sm:$0xff]  ;;  %v21_v26 = vld [vmem:[%s524_s0 + $0x38] sm:$0xff]  ;;  %v259_v28 = vld [vmem:[%s525_s2] ss:$0 sm:$0xff] }
   0x9   :  { %347 = vmatpush3.bf16.msra.mxu0 %v344_v5  ;;  %361 = vmatpush3.bf16.msra.mxu1 %v344_v5  ;;  %v29_v27 = vld [vmem:[%s524_s0 + $0x78] sm:$0xff] }
   0xa   :  { %349 = vmatprep.subr.bf16.mxu0 %v348_v10  ;;  %358 = vmatprep.subr.bf16.mxu1 %v348_v10 }
   0xd   :  { %351 = vmatpush3.bf16.msra.mxu0 %v348_v10  ;;  %362 = vmatpush3.bf16.msra.mxu1 %v348_v10 }
   0xe   :  { %353 = vmatprep.subr.bf16.mxu0 %v352_v13  ;;  %359 = vmatprep.subr.bf16.mxu1 %v352_v13 }
  0x11   :  { %355 = vmatpush3.bf16.msra.mxu0 %v352_v13  ;;  %363 = vmatpush3.bf16.msra.mxu1 %v352_v13 }
  0x14   :  { %317 = vmatmul.mubr.msk.f32.vlgmr.msra.gmra.mrb[0].mxu0 %vm45_vm0, %v15_v14  ;;  %329 = vmatmul.mubr.msk.f32.vlgmr.msra.gmra.mrb[0].mxu1 %vm45_vm0, %v23_v15 }
  0x15   :  { %319 = vmatprep.mubr.msk.f32.mxu0 %vm45_vm0, %v16_v16  ;;  %331 = vmatprep.mubr.msk.f32.mxu1 %vm45_vm0, %v24_v17 }
  0x18   :  { %320 = vmatmul.mubr.msk.f32.gmra.mrb[2].mxu0 %vm45_vm0, %v17_v18  ;;  %332 = vmatmul.mubr.msk.f32.gmra.mrb[2].mxu1 %vm45_vm0, %v25_v19 }
  0x19   :  { %322 = vmatprep.mubr.msk.f32.mxu0 %vm45_vm0, %v18_v20  ;;  %334 = vmatprep.mubr.msk.f32.mxu1 %vm45_vm0, %v26_v21 }
  0x1c   :  { %323 = vmatmul.mubr.msk.f32.gmra.mrb[4].mxu0 %vm45_vm0, %v19_v22  ;;  %335 = vmatmul.mubr.msk.f32.gmra.mrb[4].mxu1 %vm45_vm0, %v27_v23 }
  0x1d   :  { %325 = vmatprep.mubr.msk.f32.mxu0 %vm45_vm0, %v20_v24  ;;  %337 = vmatprep.mubr.msk.f32.mxu1 %vm45_vm0, %v28_v25 }
  0x20   :  { %326 = vmatmul.mubr.msk.f32.gmra.mrb[6].mxu0 %vm45_vm0, %v21_v26  ;;  %338 = vmatmul.mubr.msk.f32.gmra.mrb[6].mxu1 %vm45_vm0, %v29_v27 }
  0xe7   :  { %v318_v29 = vpop.f32.mrb[0].mxu0  ;;  %v330_v30 = vpop.f32.mrb[0].mxu1 }
  0xe8   :  { %v166_v31 = vadd.f32 %v318_v29, %v259_v28  ;;  %v206_v32 = vadd.f32 %v330_v30, %v259_v28  ;;  %v160_v33 = vpop.f32.mrb[1].mxu0  ;;  %v200_v34 = vpop.f32.mrb[1].mxu1 }
  0xe9   :  { %v161_v35 = vadd.f32 %v259_v28, %v160_v33  ;;  %v201_v36 = vadd.f32 %v259_v28, %v200_v34 }
  0xea   :  { %240 = vst [vmem:[%s526_s3 + $0x8] sm:$0xff] %v166_v31  ;;  %248 = vst [vmem:[%s526_s3 + $0x48] sm:$0xff] %v206_v32 }
  0xeb   :  { %239 = vst [vmem:[%s526_s3] sm:$0xff] %v161_v35  ;;  %247 = vst [vmem:[%s526_s3 + $0x40] sm:$0xff] %v201_v36  ;;  %v321_v37 = vpop.f32.mrb[2].mxu0  ;;  %v333_v38 = vpop.f32.mrb[2].mxu1 }
  0xec   :  { %v176_v39 = vadd.f32 %v321_v37, %v259_v28  ;;  %v216_v40 = vadd.f32 %v333_v38, %v259_v28  ;;  %v170_v41 = vpop.f32.mrb[3].mxu0  ;;  %v210_v42 = vpop.f32.mrb[3].mxu1 }
  0xed   :  { %v171_v43 = vadd.f32 %v259_v28, %v170_v41  ;;  %v211_v44 = vadd.f32 %v259_v28, %v210_v42 }
  0xee   :  { %242 = vst [vmem:[%s526_s3 + $0x18] sm:$0xff] %v176_v39  ;;  %250 = vst [vmem:[%s526_s3 + $0x58] sm:$0xff] %v216_v40 }
  0xef   :  { %241 = vst [vmem:[%s526_s3 + $0x10] sm:$0xff] %v171_v43  ;;  %249 = vst [vmem:[%s526_s3 + $0x50] sm:$0xff] %v211_v44  ;;  %v324_v45 = vpop.f32.mrb[4].mxu0  ;;  %v336_v46 = vpop.f32.mrb[4].mxu1 }
  0xf0   :  { %v186_v47 = vadd.f32 %v324_v45, %v259_v28  ;;  %v226_v48 = vadd.f32 %v336_v46, %v259_v28  ;;  %v180_v49 = vpop.f32.mrb[5].mxu0  ;;  %v220_v50 = vpop.f32.mrb[5].mxu1 }
  0xf1   :  { %v181_v51 = vadd.f32 %v259_v28, %v180_v49  ;;  %v221_v52 = vadd.f32 %v259_v28, %v220_v50 }
  0xf2   :  { %244 = vst [vmem:[%s526_s3 + $0x28] sm:$0xff] %v186_v47  ;;  %252 = vst [vmem:[%s526_s3 + $0x68] sm:$0xff] %v226_v48 }
  0xf3   :  { %243 = vst [vmem:[%s526_s3 + $0x20] sm:$0xff] %v181_v51  ;;  %251 = vst [vmem:[%s526_s3 + $0x60] sm:$0xff] %v221_v52  ;;  %v327_v53 = vpop.f32.mrb[6].mxu0  ;;  %v339_v54 = vpop.f32.mrb[6].mxu1 }
  0xf4   :  { %v196_v55 = vadd.f32 %v327_v53, %v259_v28  ;;  %v236_v56 = vadd.f32 %v339_v54, %v259_v28  ;;  %v190_v57 = vpop.f32.mrb[7].mxu0  ;;  %v230_v58 = vpop.f32.mrb[7].mxu1 }
  0xf5   :  { %v191_v59 = vadd.f32 %v259_v28, %v190_v57  ;;  %v231_v60 = vadd.f32 %v259_v28, %v230_v58 }
  0xf6   :  { %246 = vst [vmem:[%s526_s3 + $0x38] sm:$0xff] %v196_v55  ;;  %254 = vst [vmem:[%s526_s3 + $0x78] sm:$0xff] %v236_v56 }
  0xf7   :  { %245 = vst [vmem:[%s526_s3 + $0x30] sm:$0xff] %v191_v59  ;;  %253 = vst [vmem:[%s526_s3 + $0x70] sm:$0xff] %v231_v60 }

// kernel: multi_decoder_3d_v2.5
= control target key start
LH: loop header
LB: loop body
LE: loop exit
PB: predicated region body
PF: predicated region fallthrough
CT: control target
= control target key end

     0   :  { %s5695_s21 = smov 0   ;;  %s5697_s22 = smov 0   ;;  %s6863_s0 = inlined_call_operand.vmem [shape: f32[2,10,10,10,16], index: 0, kind: input, shape index: {}, may-alias: {0,1,2}]   ;;  %s6864_s1 = inlined_call_operand.vmem [shape: f32[2,10,10,10,16], index: 1, kind: input, shape index: {}, may-alias: {0,1,2}]   ;;  %s6865_s2 = inlined_call_operand.vmem [shape: f32[2,10,10,10,16], index: 2, kind: input, shape index: {}, may-alias: {0,1,2}]   ;;  %s6866_s3 = inlined_call_operand.vmem [shape: f32[27,16,8], index: 3, kind: input, shape index: {}]   ;;  %s6867_s4 = inlined_call_operand.vmem [shape: f32[1,8], index: 4, kind: input, shape index: {}]   ;;  %s6868_s5 = inlined_call_operand.vmem [shape: f32[2,8,8,8,8], index: 5, kind: output, shape index: {0}]   ;;  %s6869_s6 = inlined_call_operand.vmem [shape: f32[2,8,2,8], index: 6, kind: output, shape index: {1}]  }
   0x1   :  { %s5699_s23 = smov 0   ;;  %s5701_s24 = smov 0  }
   0x2   :  { %s5703_s25 = smov 0  }
   0x3 LB: > { %s26_s26 = sadd.s32 1, %s5650_s23  ;;  %s29_s27 = sadd.s32 1, %s5654_s24  ;;  %s5658_s25 = sphi %s5703_s25, %s17_s25   ;;  %s5654_s24 = sphi %s5701_s24, %s6923_s24   ;;  %s5650_s23 = sphi %s5699_s23, %s6922_s23   ;;  %s5646_s22 = sphi %s5697_s22, %s6921_s22   ;;  %s5642_s21 = sphi %s5695_s21, %s6920_s21  }
   0x4   : > { %p27_p0 = scmp.ge.s32.totalorder %s26_s26, 8  ;;  %p4264_p1 = scmp.ge.s32.totalorder %s5658_s25, 1 }
   0x5   : > { %p277_p2 = scmp.lt.s32.totalorder %s5658_s25, 17 }
   0x6   : > { %s6925_s26 = smov (%p27_p0, %s26_s26), 0  ;;  %s6927_s27 = smov (!%p27_p0, %s29_s27), %s5654_s24 }
   0x7   : > { %p278_p3 = pnand %p4264_p1, %p277_p2  ;;  %p31_p4 = scmp.ge.s32.totalorder %s6927_s27, 2 }
   0x9   : > { %s6929_s27 = smov (%p31_p4, %s6927_s27), 0  ;;  %281 = sbr.rel (%p278_p3) target bundleno = 482 (0x1e2), region = 40 }
  0x10   : > { %v419_v0 = vld [vmem:[%s6866_s3] sm:$0xff]  ;;  %v420_v1 = vld [vmem:[%s6866_s3 + $0x8] sm:$0xff]  ;;  %p343_p5 = scmp.lt.s32.totalorder %s5646_s22, 1  ;;  %p345_p6 = scmp.lt.s32.totalorder %s5642_s21, 9  ;;  %v4402_v2 = vld [vmem:[%s6866_s3 + $0xd0] sm:$0xff]  ;;  %vm421_vm0 = vcmask 130048  }
  0x11   : > { %v5246_v3 = vpack.c.bf16 %v420_v1, %v419_v0  ;;  %v4403_v4 = vld [vmem:[%s6866_s3 + $0xd8] sm:$0xff]  ;;  %v4282_v5 = vld [vmem:[%s6866_s3 + $0x10] sm:$0xff]  ;;  %s352_s16 = sadd.s32 1, %s5642_s21  ;;  %v4412_v9 = vld [vmem:[%s6866_s3 + $0xe0] sm:$0xff]  ;;  %vm567_vm1 = vcmask 1046528   ;;  %vm724_vm2 = vcmask 1045504  }
  0x12   : > { %v4283_v6 = vld [vmem:[%s6866_s3 + $0x18] sm:$0xff]  ;;  %s6931_s22 = smov (!%p343_p5, %s5646_s22), 1  ;;  %v5749_v7 = vpack.c.bf16 %v4403_v4, %v4402_v2  ;;  %v4413_v10 = vld [vmem:[%s6866_s3 + $0xe8] sm:$0xff]  ;;  %p355_p7 = scmp.lt.s32.totalorder %s352_s16, 9  ;;  %v4292_v12 = vld [vmem:[%s6866_s3 + $0x20] sm:$0xff]  ;;  %vm4013_vm3 = vcmask 64512  }
  0x13   : > { %v5250_v8 = vpack.c.bf16 %v4283_v6, %v4282_v5  ;;  %5247 = vmatprep.subr.bf16.mxu1 %v5246_v3  ;;  %s346_s28 = scalar_select %p345_p6, %s5642_s21, 9  ;;  %v5758_v11 = vpack.c.bf16 %v4413_v10, %v4412_v9  ;;  %v4293_v13 = vld [vmem:[%s6866_s3 + $0x28] sm:$0xff]  ;;  %v4422_v19 = vld [vmem:[%s6866_s3 + $0xf0] sm:$0xff]  ;;  %v4423_v20 = vld [vmem:[%s6866_s3 + $0xf8] sm:$0xff]  ;;  %vm4072_vm4 = vcmask 1040384   ;;  %vm4074_vm5 = vcmask 58368  }
  0x14   : > { %6889 = vst [vmem:[#allocation2_spill] sm:$0xff] %v5749_v7  ;;  %5249 = vmatpush3.bf16.msra.mxu1 %v5246_v3  ;;  %s5761_s29 = smul.u32 200, %s6931_s22  ;;  %5299 = vmatprep.subr.bf16.mxu0 %v5749_v7  ;;  %s6933_s16 = smov (!%p355_p7, %s352_s16), 9  ;;  %v5788_v17 = vpack.c.bf16 %v4293_v13, %v4292_v12  ;;  %v5831_v34 = vpack.c.bf16 %v4423_v20, %v4422_v19  ;;  %v4432_v57 = vld [vmem:[%s6866_s3 + $0x100] sm:$0xff]  ;;  %v4433_v58 = vld [vmem:[%s6866_s3 + $0x108] sm:$0xff]  ;;  %v4302_v9 = vld [vmem:[%s6866_s3 + $0x30] sm:$0xff] }
  0x15   : > { %s5572_s30 = smul.u32 20, %s346_s28  ;;  %5301 = vmatpush3.bf16.msra.mxu0 %v5749_v7  ;;  %5251 = vmatprep.subr.bf16.mxu1 %v5250_v8  ;;  %v4303_v10 = vld [vmem:[%s6866_s3 + $0x38] sm:$0xff]  ;;  %s363_s19 = sadd.s32 2, %s5642_s21 }
  0x16   : > { %5303 = vmatprep.subr.bf16.mxu0 %v5758_v11  ;;  %s5574_s13 = smul.u32 20, %s6933_s16  ;;  %p6034_p8 = scmp.lt.s32.totalorder %s363_s19, 9 }
  0x17   : > { %s349_s7 = sadd.s32 %s5761_s29, %s5572_s30  ;;  %p376_p9 = scmp.lt.s32.totalorder %s5642_s21, 7 }
  0x18   : > { %s4265_s12 = sshll.u32 %s349_s7, 3  ;;  %s359_s18 = sadd.s32 %s5574_s13, %s5761_s29 }
  0x19   : > { %s5776_s17 = scalar_lea.vmem %s6863_s0, %s4265_s12  ;;  %s4266_s16 = sshll.u32 %s359_s18, 3 }
  0x1a   : > { %v5779_v14 = vld [vmem:[%s5776_s17] sm:$0xff]  ;;  %v5782_v15 = vld [vmem:[%s5776_s17 + $0x10] sm:$0xff]  ;;  %s5797_s28 = scalar_lea.vmem %s6864_s1, %s4266_s16  ;;  %v5856_v44 = vld [vmem:[%s5776_s17 + $0x8] sm:$0x3]  ;;  %s6935_s19 = smov (!%p6034_p8, %s363_s19), 9 }
  0x1b   : > { %v5785_v16 = vld [vmem:[%s5776_s17 + $0x20] sm:$0xff]  ;;  %4818 = vmatprep.mubr.msk.f32.mxu1 %vm421_vm0, %v5779_v14  ;;  %v5800_v18 = vld [vmem:[%s5776_s17 + $0x30] sm:$0xff]  ;;  %v1608_v22 = vld [vmem:[%s5797_s28 + $0x18] sm:$0x3]  ;;  %v568_v45 = vrot.slane %v5779_v14, 1  ;;  %v569_v48 = vrot.slane %v5856_v44, 1 }
  0x1c   : > { %4819 = vmatmul.mubr.msk.f32.vlgmr.msra.gmra.mrb[0].mxu1 %vm421_vm0, %v5782_v15  ;;  %v5811_v21 = vld [vmem:[%s5797_s28 + $0x10] sm:$0xff]  ;;  %v5815_v23 = vld [vmem:[%s5797_s28 + $0x20] sm:$0xff]  ;;  %v1777_v25 = vrot.slane %v1608_v22, 1  ;;  %v1610_v26 = vld [vmem:[%s5797_s28 + $0x28] sm:$0x3]  ;;  %v1933_v29 = vrot.slane %v1608_v22, 2  ;;  %v5944_v22 = vpack.c.bf16 %v4433_v58, %v4432_v57 }
  0x1d   : > { %5253 = vmatpush3.bf16.msra.mxu1 %v5250_v8  ;;  %4821 = vmatprep.mubr.msk.f32.mxu1 %vm421_vm0, %v5785_v16  ;;  %v1776_v24 = vrot.slane %v5811_v21, 1  ;;  %v1779_v27 = vrot.slane %v5815_v23, 1  ;;  %v5821_v28 = vld [vmem:[%s5776_s17 + $0x40] sm:$0xff]  ;;  %v1780_v30 = vrot.slane %v1610_v26, 1  ;;  %v5825_v31 = vld [vmem:[%s5797_s28 + $0x30] sm:$0xff]  ;;  %v1932_v43 = vrot.slane %v5811_v21, 2 }
  0x1e   : > { %5255 = vmatprep.subr.bf16.mxu1 %v5788_v17  ;;  %v1612_v32 = vld [vmem:[%s5797_s28 + $0x38] sm:$0x3]  ;;  %v5829_v33 = vld [vmem:[%s5797_s28 + $0x40] sm:$0xff]  ;;  %v1782_v36 = vrot.slane %v5825_v31, 1  ;;  %v5840_v38 = vld [vmem:[%s5797_s28 + $0x48] sm:$0x3]  ;;  %v570_v0 = vsel %vm567_vm1, %v568_v45, %v569_v48 }
  0x1f   : > { %v5834_v35 = vsel %vm567_vm1, %v1776_v24, %v1777_v25  ;;  %v1783_v37 = vrot.slane %v1612_v32, 1  ;;  %v1785_v39 = vrot.slane %v5829_v33, 1  ;;  %v5846_v40 = vsel %vm567_vm1, %v1779_v27, %v1780_v30  ;;  %v5851_v41 = vld [vmem:[%s5776_s17 + $0x50] sm:$0xff]  ;;  %v5865_v47 = vld [vmem:[%s5776_s17 + $0x60] sm:$0xff]  ;;  %v5869_v49 = vld [vmem:[%s5776_s17 + $0x18] sm:$0x3] }
  0x20   : > { %4822 = vmatmul.mubr.msk.f32.gmra.mrb[2].mxu1 %vm421_vm0, %v5800_v18  ;;  %5026 = vmatprep.mubr.msk.f32.mxu0 %vm421_vm0, %v5834_v35  ;;  %v1786_v42 = vrot.slane %v5840_v38, 1  ;;  %v1936_v50 = vrot.slane %v1610_v26, 2  ;;  %v1935_v52 = vrot.slane %v5815_v23, 2  ;;  %v5879_v53 = vld [vmem:[%s5776_s17 + $0x28] sm:$0x3]  ;;  %v5884_v54 = vsel %vm724_vm2, %v1932_v43, %v1933_v29  ;;  %v5898_v60 = vld [vmem:[%s5776_s17 + $0x70] sm:$0xff] }
  0x21   : > { %4824 = vmatprep.mubr.msk.f32.mxu1 %vm421_vm0, %v5821_v28  ;;  %5027 = vmatmul.mubr.msk.f32.vlgmr.msra.gmra.mrb[0].mxu0 %vm421_vm0, %v5846_v40  ;;  %v5862_v46 = vsel %vm567_vm1, %v1782_v36, %v1783_v37  ;;  %6891 = vst [vmem:[#allocation4_spill] sm:$0xff] %v5884_v54  ;;  %v1938_v55 = vrot.slane %v5825_v31, 2  ;;  %v1939_v56 = vrot.slane %v1612_v32, 2  ;;  %v571_v59 = vrot.slane %v5782_v15, 1  ;;  %v5902_v62 = vld [vmem:[%s5797_s28 + $0x50] sm:$0xff]  ;;  %v5939_v19 = vld [vmem:[%s5797_s28 + $0x60] sm:$0xff] }
  0x22   : > { %5305 = vmatpush3.bf16.msra.mxu0 %v5758_v11  ;;  %5029 = vmatprep.mubr.msk.f32.mxu0 %vm421_vm0, %v5862_v46  ;;  %v5875_v51 = vsel %vm567_vm1, %v1785_v39, %v1786_v42  ;;  %v572_v61 = vrot.slane %v5869_v49, 1  ;;  %v5905_v63 = vld [vmem:[%s5797_s28 + $0x58] sm:$0x3]  ;;  %v574_v1 = vrot.slane %v5785_v16, 1  ;;  %v575_v2 = vrot.slane %v5879_v53, 1  ;;  %v5953_v27 = vld [vmem:[%s5797_s28 + $0x70] sm:$0xff] }
  0x23   : > { %6890 = vst [vmem:[#allocation3_spill] sm:$0xff] %v5875_v51  ;;  %5307 = vmatprep.subr.bf16.mxu0 %v5831_v34  ;;  %v5913_v3 = vld [vmem:[%s5776_s17 + $0x38] sm:$0x3]  ;;  %v5918_v4 = vsel %vm724_vm2, %v1935_v52, %v1936_v50  ;;  %v1941_v5 = vrot.slane %v5829_v33, 2  ;;  %v1942_v6 = vrot.slane %v5840_v38, 2  ;;  %v5934_v11 = vsel %vm724_vm2, %v1938_v55, %v1939_v56  ;;  %v5989_v52 = vld [vmem:[%s5797_s28 + $0x80] sm:$0xff] }
  0x24   : > { %4825 = vmatmul.mubr.msk.f32.gmra.mrb[4].mxu1 %vm421_vm0, %v5851_v41  ;;  %6892 = vst [vmem:[#allocation5_spill] sm:$0xff] %v5918_v4  ;;  %v5923_v8 = vld [vmem:[%s5776_s17 + $0x48] sm:$0x3]  ;;  %6893 = vst [vmem:[#allocation6_spill] sm:$0xff] %v5934_v11  ;;  %v1944_v12 = vrot.slane %v5902_v62, 2  ;;  %v1945_v13 = vrot.slane %v5905_v63, 2  ;;  %v5948_v24 = vsel %vm567_vm1, %v571_v59, %v572_v61  ;;  %v5961_v30 = vsel %vm567_vm1, %v574_v1, %v575_v2 }
  0x25   : > { %4827 = vmatprep.mubr.msk.f32.mxu1 %vm421_vm0, %v5865_v47  ;;  %5030 = vmatmul.mubr.msk.f32.gmra.mrb[2].mxu0 %vm421_vm0, %v5875_v51  ;;  %v5942_v20 = vld [vmem:[%s5797_s28 + $0x68] sm:$0x3]  ;;  %v577_v25 = vrot.slane %v5800_v18, 1  ;;  %v578_v26 = vrot.slane %v5913_v3, 1  ;;  %v5956_v29 = vld [vmem:[%s5797_s28 + $0x78] sm:$0x3]  ;;  %v5968_v38 = vpack.c.bf16 %v4303_v10, %v4302_v9  ;;  %v5974_v39 = vsel %vm724_vm2, %v1941_v5, %v1942_v6 }
  0x26   : > { %5042 = vmatprep.mubr.msk.f32.mxu0 %vm421_vm0, %v5884_v54  ;;  %v580_v32 = vrot.slane %v5821_v28, 1  ;;  %v581_v36 = vrot.slane %v5923_v8, 1  ;;  %v5966_v37 = vld [vmem:[%s5776_s17 + $0x58] sm:$0x3]  ;;  %6894 = vst [vmem:[#allocation7_spill] sm:$0xff] %v5974_v39  ;;  %v1947_v42 = vrot.slane %v5939_v19, 2  ;;  %v5984_v48 = vsel %vm724_vm2, %v1944_v12, %v1945_v13 }
  0x27   : > { %v1948_v43 = vrot.slane %v5942_v20, 2  ;;  %v5979_v45 = vld [vmem:[%s5776_s17 + $0x68] sm:$0x3]  ;;  %6895 = vst [vmem:[#allocation8_spill] sm:$0xff] %v5984_v48  ;;  %v1951_v50 = vrot.slane %v5956_v29, 2  ;;  %6896 = vst [vmem:[#allocation9_spill] sm:$0xff] %v5989_v52  ;;  %v5999_v56 = vsel %vm567_vm1, %v577_v25, %v578_v26 }
  0x28   : > { %4828 = vmatmul.mubr.msk.f32.gmra.mrb[6].mxu1 %vm421_vm0, %v5898_v60  ;;  %v5992_v55 = vld [vmem:[%s5797_s28 + $0x88] sm:$0x3]  ;;  %v583_v57 = vrot.slane %v5851_v41, 1  ;;  %v584_v58 = vrot.slane %v5966_v37, 1  ;;  %v6006_v59 = vsel %vm567_vm1, %v580_v32, %v581_v36  ;;  %v586_v61 = vrot.slane %v5865_v47, 1  ;;  %s5575_s14 = smul.u32 20, %s6935_s19 }
  0x29   : > { %4834 = vmatprep.mubr.msk.f32.mxu1 %vm421_vm0, %v570_v0  ;;  %5043 = vmatmul.mubr.msk.f32.vlgmr.msra.gmra.mrb[0].mxu0 %vm421_vm0, %v5918_v4  ;;  %v6011_v0 = vld [vmem:[%s5776_s17 + $0x78] sm:$0x3]  ;;  %v6018_v1 = vsel %vm724_vm2, %v1947_v42, %v1948_v43  ;;  %v2326_v2 = vrot.slane %v5989_v52, 2  ;;  %v2327_v5 = vrot.slane %v5992_v55, 2  ;;  %v589_v10 = vrot.slane %v5898_v60, 1  ;;  %s6937_s21 = smov (!%p376_p9, %s5642_s21), 7 }
  0x2a   : > { %5309 = vmatpush3.bf16.msra.mxu0 %v5831_v34  ;;  %5045 = vmatprep.mubr.msk.f32.mxu0 %vm421_vm0, %v5934_v11  ;;  %v1950_v34 = vrot.slane %v5953_v27, 2  ;;  %6897 = vst [vmem:[#allocation10_spill] sm:$0xff] %v6018_v1  ;;  %v6030_v9 = vsel %vm567_vm1, %v583_v57, %v584_v58  ;;  %v590_v12 = vrot.slane %v6011_v0, 1  ;;  %v725_v13 = vrot.slane %v5779_v14, 2  ;;  %v4443_v43 = vld [vmem:[%s6866_s3 + $0x118] sm:$0xff]  ;;  %v4312_v57 = vld [vmem:[%s6866_s3 + $0x40] sm:$0xff]  ;;  %s370_s15 = sadd.s32 %s5575_s14, %s5761_s29 }
  0x2b   : > { %5311 = vmatprep.subr.bf16.mxu0 %v5944_v22  ;;  %v726_v26 = vrot.slane %v5856_v44, 2  ;;  %v6048_v32 = vsel %vm724_vm2, %v2326_v2, %v2327_v5  ;;  %v728_v36 = vrot.slane %v5782_v15, 2  ;;  %v729_v42 = vrot.slane %v5869_v49, 2  ;;  %v4442_v44 = vld [vmem:[%s6866_s3 + $0x110] sm:$0xff]  ;;  %v4313_v58 = vld [vmem:[%s6866_s3 + $0x48] sm:$0xff]  ;;  %s4267_s29 = sshll.u32 %s370_s15, 3 }
  0x2c   : > { %4835 = vmatmul.mubr.msk.f32.vlgmr.msra.gmra.mrb[0].mxu1 %vm421_vm0, %v5948_v24  ;;  %v6025_v6 = vsel %vm724_vm2, %v1950_v34, %v1951_v50  ;;  %v6056_v14 = vsel %vm567_vm1, %v589_v10, %v590_v12  ;;  %v731_v50 = vrot.slane %v5785_v16, 2  ;;  %v732_v49 = vrot.slane %v5879_v53, 2  ;;  %s6149_s19 = scalar_lea.vmem %s6865_s2, %s4267_s29  ;;  %s4271_s7 = sshll.u32 %s6931_s22, 3 }
  0x2d   : > { %5257 = vmatpush3.bf16.msra.mxu1 %v5788_v17  ;;  %4837 = vmatprep.mubr.msk.f32.mxu1 %vm421_vm0, %v5961_v30  ;;  %v587_v17 = vrot.slane %v5979_v45, 1  ;;  %6898 = vst [vmem:[#allocation11_spill] sm:$0xff] %v6025_v6  ;;  %v727_v34 = vsel %vm724_vm2, %v725_v13, %v726_v26  ;;  %v6088_v53 = vsel %vm724_vm2, %v728_v36, %v729_v42  ;;  %v735_v2 = vrot.slane %v5913_v3, 2  ;;  %s388_s8 = sadd.s32 %s4271_s7, %s6937_s21 }
  0x2e   : > { %5046 = vmatmul.mubr.msk.f32.gmra.mrb[2].mxu0 %vm421_vm0, %v5974_v39  ;;  %5259 = vmatprep.subr.bf16.mxu1 %v5968_v38  ;;  %v6096_v5 = vsel %vm724_vm2, %v731_v50, %v732_v49  ;;  %v737_v10 = vrot.slane %v5821_v28, 2  ;;  %v738_v12 = vrot.slane %v5923_v8, 2  ;;  %v6100_v13 = vpack.c.bf16 %v4313_v58, %v4312_v57  ;;  %v4452_v49 = vld [vmem:[%s6866_s3 + $0x120] sm:$0xff]  ;;  %v4453_v57 = vld [vmem:[%s6866_s3 + $0x128] sm:$0xff]  ;;  %s4272_s9 = sshll.u32 %s388_s8, 1 }
  0x2f   : > { %5048 = vmatprep.mubr.msk.f32.mxu0 %vm421_vm0, %v5984_v48  ;;  %v6042_v25 = vsel %vm567_vm1, %v586_v61, %v587_v17  ;;  %v6084_v61 = vpack.c.bf16 %v4443_v43, %v4442_v44  ;;  %v734_v17 = vrot.slane %v5800_v18, 2  ;;  %v740_v8 = vrot.slane %v5851_v41, 2  ;;  %v6144_v43 = vld [vmem:[%s5797_s28 + $0x90] sm:$0xff]  ;;  %s390_s12 = scalar_lea.vmem %s6869_s6, %s4272_s9 }
  0x30   : > { %4838 = vmatmul.mubr.msk.f32.gmra.mrb[2].mxu1 %vm421_vm0, %v5999_v56  ;;  %v6120_v26 = vsel %vm724_vm2, %v737_v10, %v738_v12  ;;  %v744_v36 = vrot.slane %v5979_v45, 2  ;;  %v746_v42 = vrot.slane %v5898_v60, 2  ;;  %v747_v44 = vrot.slane %v6011_v0, 2  ;;  %v6154_v0 = vld [vmem:[%s6149_s19 + $0x80] sm:$0xff]  ;;  %v4322_v12 = vld [vmem:[%s6866_s3 + $0x50] sm:$0xff] }
  0x31   : > { %4840 = vmatprep.mubr.msk.f32.mxu1 %vm421_vm0, %v6006_v59  ;;  %v6112_v3 = vsel %vm724_vm2, %v734_v17, %v735_v2  ;;  %v3409_v58 = vrot.slane %v6154_v0, 1  ;;  %v3530_v17 = vrot.slane %v6154_v0, 2  ;;  %v1788_v2 = vrot.slane %v5902_v62, 1 }
  0x32   : > { %5049 = vmatmul.mubr.msk.f32.gmra.mrb[4].mxu0 %vm421_vm0, %v6018_v1  ;;  %v6160_v50 = vsel %vm724_vm2, %v746_v42, %v747_v44  ;;  %v1789_v10 = vrot.slane %v5905_v63, 1  ;;  %v5318_v42 = vpack.c.bf16 %v4453_v57, %v4452_v49  ;;  %v2205_v57 = vrot.slane %v5989_v52, 1 }
  0x33   : > { %5051 = vmatprep.mubr.msk.f32.mxu0 %vm421_vm0, %v6025_v6 }
  0x34   : > { %4841 = vmatmul.mubr.msk.f32.gmra.mrb[4].mxu1 %vm421_vm0, %v6030_v9 }
  0x35   : > { %4843 = vmatprep.mubr.msk.f32.mxu1 %vm421_vm0, %v6042_v25 }
  0x36   : > { %5052 = vmatmul.mubr.msk.f32.gmra.mrb[6].mxu0 %vm421_vm0, %v6048_v32 }
  0x37   : > { %5058 = vmatprep.mubr.msk.f32.mxu0 %vm421_vm0, %v5815_v23 }
  0x38   : > { %4844 = vmatmul.mubr.msk.f32.gmra.mrb[6].mxu1 %vm421_vm0, %v6056_v14 }
  0x39   : > { %4850 = vmatprep.mubr.msk.f32.mxu1 %vm421_vm0, %v727_v34  ;;  %v2826_v34 = vld [vmem:[%s6149_s19 + $0x88] sm:$0x3] }
  0x3a   : > { %5059 = vmatmul.mubr.msk.f32.vlgmr.msra.gmra.mrb[0].mxu0 %vm421_vm0, %v5825_v31  ;;  %v3531_v44 = vrot.slane %v2826_v34, 2 }
  0x3b   : > { %5313 = vmatpush3.bf16.msra.mxu0 %v5944_v22  ;;  %5061 = vmatprep.mubr.msk.f32.mxu0 %vm421_vm0, %v5829_v33  ;;  %v741_v22 = vrot.slane %v5966_v37, 2 }
  0x3c   : > { %4851 = vmatmul.mubr.msk.f32.vlgmr.msra.gmra.mrb[0].mxu1 %vm421_vm0, %v6088_v53  ;;  %5315 = vmatprep.subr.bf16.mxu0 %v6084_v61  ;;  %v6194_v54 = vsel %vm724_vm2, %v3530_v17, %v3531_v44 }
  0x3d   : > { %5261 = vmatpush3.bf16.msra.mxu1 %v5968_v38  ;;  %4853 = vmatprep.mubr.msk.f32.mxu1 %vm421_vm0, %v6096_v5  ;;  %v743_v38 = vrot.slane %v5865_v47, 2  ;;  %v6132_v37 = vsel %vm724_vm2, %v740_v8, %v741_v22  ;;  %v4323_v8 = vld [vmem:[%s6866_s3 + $0x58] sm:$0xff]  ;;  %v3410_v22 = vrot.slane %v2826_v34, 1  ;;  %6900 = vst [vmem:[#allocation12_spill] sm:$0xff] %v6194_v54  ;;  %v1795_v34 = vrot.slane %v5956_v29, 1 }
  0x3e   : > { %5062 = vmatmul.mubr.msk.f32.gmra.mrb[2].mxu0 %vm421_vm0, %v5902_v62  ;;  %5263 = vmatprep.subr.bf16.mxu1 %v6100_v13  ;;  %v5266_v7 = vpack.c.bf16 %v4323_v8, %v4322_v12  ;;  %v2567_v29 = vrot.slane %v6144_v43, 1  ;;  %v4462_v12 = vld [vmem:[%s6866_s3 + $0x130] sm:$0xff]  ;;  %v4463_v8 = vld [vmem:[%s6866_s3 + $0x138] sm:$0xff] }
  0x3f   : > { %5064 = vmatprep.mubr.msk.f32.mxu0 %vm421_vm0, %v5939_v19  ;;  %v6139_v45 = vsel %vm724_vm2, %v743_v38, %v744_v36  ;;  %v1791_v38 = vrot.slane %v5939_v19, 1  ;;  %v1792_v36 = vrot.slane %v5942_v20, 1  ;;  %v6189_v63 = vsel %vm567_vm1, %v3409_v58, %v3410_v22  ;;  %v1624_v58 = vld [vmem:[%s5797_s28 + $0x98] sm:$0x3]  ;;  %v4332_v22 = vld [vmem:[%s6866_s3 + $0x60] sm:$0xff] }
  0x40   : > { %4854 = vmatmul.mubr.msk.f32.gmra.mrb[2].mxu1 %vm421_vm0, %v6112_v3  ;;  %v6200_v20 = vsel %vm567_vm1, %v1788_v2, %v1789_v10  ;;  %v6240_v10 = vld [vmem:[%s5776_s17 + $0x80] sm:$0xff]  ;;  %v6420_v54 = vld [vmem:[%s6149_s19 + $0x58] sm:$0x3] }
  0x41   : > { %4856 = vmatprep.mubr.msk.f32.mxu1 %vm421_vm0, %v6120_v26  ;;  %6901 = vst [vmem:[#allocation13_spill] sm:$0xff] %v6200_v20  ;;  %v6207_v49 = vsel %vm567_vm1, %v1791_v38, %v1792_v36  ;;  %v4333_v38 = vld [vmem:[%s6866_s3 + $0x68] sm:$0xff]  ;;  %v5322_v36 = vpack.c.bf16 %v4463_v8, %v4462_v12  ;;  %v6319_v12 = vld [vmem:[%s6149_s19 + $0x20] sm:$0xff] }
  0x42   : > { %5065 = vmatmul.mubr.msk.f32.gmra.mrb[4].mxu0 %vm421_vm0, %v5953_v27  ;;  %6902 = vst [vmem:[#allocation14_spill] sm:$0xff] %v6207_v49  ;;  %v5270_v44 = vpack.c.bf16 %v4333_v38, %v4332_v22  ;;  %v6330_v38 = vld [vmem:[%s6149_s19 + $0x30] sm:$0xff] }
  0x43   : > { %5067 = vmatprep.mubr.msk.f32.mxu0 %vm421_vm0, %v5989_v52 }
  0x44   : > { %4857 = vmatmul.mubr.msk.f32.gmra.mrb[4].mxu1 %vm421_vm0, %v6132_v37 }
  0x45   : > { %4859 = vmatprep.mubr.msk.f32.mxu1 %vm421_vm0, %v6139_v45 }
  0x46   : > { %5068 = vmatmul.mubr.msk.f32.gmra.mrb[6].mxu0 %vm421_vm0, %v6144_v43 }
  0x47   : > { %5074 = vmatprep.mubr.msk.f32.mxu0 %vm421_vm0, %v5846_v40 }
  0x48   : > { %4860 = vmatmul.mubr.msk.f32.gmra.mrb[6].mxu1 %vm421_vm0, %v6160_v50 }
  0x49   : > { %4866 = vmatprep.mubr.msk.f32.mxu1 %vm421_vm0, %v5782_v15  ;;  %v1794_v15 = vrot.slane %v5953_v27, 1 }
  0x4a   : > { %5075 = vmatmul.mubr.msk.f32.vlgmr.msra.gmra.mrb[0].mxu0 %vm421_vm0, %v5862_v46 }
  0x4b   : > { %5317 = vmatpush3.bf16.msra.mxu0 %v6084_v61  ;;  %5077 = vmatprep.mubr.msk.f32.mxu0 %vm421_vm0, %v5875_v51  ;;  %v2206_v61 = vrot.slane %v5992_v55, 1  ;;  %v6221_v17 = vsel %vm567_vm1, %v1794_v15, %v1795_v34  ;;  %v2568_v55 = vrot.slane %v1624_v58, 1  ;;  %v2689_v15 = vrot.slane %v1624_v58, 2  ;;  %v4472_v58 = vld [vmem:[%s6866_s3 + $0x140] sm:$0xff] }
  0x4c   : > { %4867 = vmatmul.mubr.msk.f32.vlgmr.msra.gmra.mrb[0].mxu1 %vm421_vm0, %v5785_v16  ;;  %5319 = vmatprep.subr.bf16.mxu0 %v5318_v42  ;;  %6903 = vst [vmem:[#allocation15_spill] sm:$0xff] %v6221_v17 }
  0x4d   : > { %5265 = vmatpush3.bf16.msra.mxu1 %v6100_v13  ;;  %4869 = vmatprep.mubr.msk.f32.mxu1 %vm421_vm0, %v5800_v18  ;;  %v6226_v13 = vsel %vm567_vm1, %v2205_v57, %v2206_v61  ;;  %v2569_v2 = vsel %vm567_vm1, %v2567_v29, %v2568_v55  ;;  %v6291_v57 = vld [vmem:[%s6149_s19] sm:$0xff]  ;;  %v6308_v29 = vld [vmem:[%s6149_s19 + $0x10] sm:$0xff] }
  0x4e   : > { %5078 = vmatmul.mubr.msk.f32.gmra.mrb[2].mxu0 %vm421_vm0, %v6200_v20  ;;  %5267 = vmatprep.subr.bf16.mxu1 %v5266_v7  ;;  %6904 = vst [vmem:[#allocation16_spill] sm:$0xff] %v6226_v13  ;;  %v4342_v55 = vld [vmem:[%s6866_s3 + $0x70] sm:$0xff]  ;;  %v6425_v20 = vld [vmem:[%s6149_s19 + $0x68] sm:$0x3] }
  0x4f   : > { %5080 = vmatprep.mubr.msk.f32.mxu0 %vm421_vm0, %v6207_v49 }
  0x50   : > { %4870 = vmatmul.mubr.msk.f32.gmra.mrb[2].mxu1 %vm421_vm0, %v5821_v28 }
  0x51   : > { %4872 = vmatprep.mubr.msk.f32.mxu1 %vm421_vm0, %v5851_v41 }
  0x52   : > { %5081 = vmatmul.mubr.msk.f32.gmra.mrb[4].mxu0 %vm421_vm0, %v6221_v17  ;;  %v4353_v17 = vld [vmem:[%s6866_s3 + $0x88] sm:$0xff] }
  0x53   : > { %5083 = vmatprep.mubr.msk.f32.mxu0 %vm421_vm0, %v6226_v13 }
  0x54   : > { %4873 = vmatmul.mubr.msk.f32.gmra.mrb[4].mxu1 %vm421_vm0, %v5865_v47 }
  0x55   : > { %4875 = vmatprep.mubr.msk.f32.mxu1 %vm421_vm0, %v5898_v60 }
  0x56   : > { %5084 = vmatmul.mubr.msk.f32.gmra.mrb[6].mxu0 %vm421_vm0, %v2569_v2  ;;  %v4343_v2 = vld [vmem:[%s6866_s3 + $0x78] sm:$0xff] }
  0x57   : > { %5090 = vmatprep.mubr.msk.f32.mxu0 %vm421_vm0, %v5918_v4  ;;  %v6325_v22 = vpack.c.bf16 %v4343_v2, %v4342_v55  ;;  %v2980_v55 = vrot.slane %v6308_v29, 1  ;;  %v6373_v2 = vld [vmem:[%s6149_s19 + $0x70] sm:$0xff]  ;;  %v4352_v4 = vld [vmem:[%s6866_s3 + $0x80] sm:$0xff] }
  0x58   : > { %4876 = vmatmul.mubr.msk.f32.gmra.mrb[6].mxu1 %vm421_vm0, %v6240_v10  ;;  %v5278_v51 = vpack.c.bf16 %v4353_v17, %v4352_v4  ;;  %v2996_v4 = vrot.slane %v6425_v20, 1  ;;  %v6444_v17 = vld [vmem:[%s6149_s19 + $0x78] sm:$0x3] }
  0x59   : > { %4882 = vmatprep.mubr.msk.f32.mxu1 %vm421_vm0, %v5948_v24  ;;  %v6272_v24 = vld [vmem:[%s5776_s17 + $0x88] sm:$0x3] }
  0x5a   : > { %5091 = vmatmul.mubr.msk.f32.vlgmr.msra.gmra.mrb[0].mxu0 %vm421_vm0, %v5934_v11  ;;  %v1002_v34 = vrot.slane %v6272_v24, 1  ;;  %v4482_v11 = vld [vmem:[%s6866_s3 + $0x150] sm:$0xff] }
  0x5b   : > { %5321 = vmatpush3.bf16.msra.mxu0 %v5318_v42  ;;  %5093 = vmatprep.mubr.msk.f32.mxu0 %vm421_vm0, %v5974_v39  ;;  %v2688_v42 = vrot.slane %v6144_v43, 2  ;;  %v6390_v39 = vld [vmem:[%s6149_s19 + $0x48] sm:$0x3] }
  0x5c   : > { %4883 = vmatmul.mubr.msk.f32.vlgmr.msra.gmra.mrb[0].mxu1 %vm421_vm0, %v5961_v30  ;;  %5323 = vmatprep.subr.bf16.mxu0 %v5322_v36 }
  0x5d   : > { %5269 = vmatpush3.bf16.msra.mxu1 %v5266_v7  ;;  %4885 = vmatprep.mubr.msk.f32.mxu1 %vm421_vm0, %v5999_v56  ;;  %v1001_v7 = vrot.slane %v6240_v10, 1  ;;  %v2690_v43 = vsel %vm724_vm2, %v2688_v42, %v2689_v15  ;;  %v6335_v42 = vld [vmem:[%s6149_s19 + $0x40] sm:$0xff]  ;;  %v2977_v15 = vrot.slane %v6291_v57, 1 }
  0x5e   : > { %5094 = vmatmul.mubr.msk.f32.gmra.mrb[2].mxu0 %vm421_vm0, %v5984_v48  ;;  %5271 = vmatprep.subr.bf16.mxu1 %v5270_v44 }
  0x5f   : > { %5096 = vmatprep.mubr.msk.f32.mxu0 %vm421_vm0, %v6018_v1  ;;  %v6296_v61 = vsel %vm567_vm1, %v1001_v7, %v1002_v34  ;;  %v6358_v34 = vld [vmem:[%s6149_s19 + $0x18] sm:$0x3] }
  0x60   : > { %4886 = vmatmul.mubr.msk.f32.gmra.mrb[2].mxu1 %vm421_vm0, %v6006_v59  ;;  %v2981_v13 = vrot.slane %v6358_v34, 1  ;;  %v6382_v1 = vld [vmem:[%s6149_s19 + $0x38] sm:$0x3] }
  0x61   : > { %4888 = vmatprep.mubr.msk.f32.mxu1 %vm421_vm0, %v6030_v9 }
  0x62   : > { %5097 = vmatmul.mubr.msk.f32.gmra.mrb[4].mxu0 %vm421_vm0, %v6025_v6 }
  0x63   : > { %5099 = vmatprep.mubr.msk.f32.mxu0 %vm421_vm0, %v6048_v32  ;;  %v4473_v32 = vld [vmem:[%s6866_s3 + $0x148] sm:$0xff] }
  0x64   : > { %4889 = vmatmul.mubr.msk.f32.gmra.mrb[4].mxu1 %vm421_vm0, %v6042_v25  ;;  %v5326_v8 = vpack.c.bf16 %v4473_v32, %v4472_v58  ;;  %v1123_v58 = vrot.slane %v6272_v24, 2  ;;  %v6365_v32 = vld [vmem:[%s6149_s19 + $0x28] sm:$0x3]  ;;  %v2983_v24 = vrot.slane %v6319_v12, 1 }
  0x65   : > { %4891 = vmatprep.mubr.msk.f32.mxu1 %vm421_vm0, %v6056_v14  ;;  %v2984_v6 = vrot.slane %v6365_v32, 1 }
  0x66   : > { %5100 = vmatmul.mubr.msk.f32.gmra.mrb[6].mxu0 %vm421_vm0, %v2690_v43  ;;  %v1122_v43 = vrot.slane %v6240_v10, 2 }
  0x67   : > { %5106 = vmatprep.mubr.msk.f32.mxu0 %vm421_vm0, %v6291_v57 }
  0x68   : > { %4892 = vmatmul.mubr.msk.f32.gmra.mrb[6].mxu1 %vm421_vm0, %v6296_v61  ;;  %v6387_v48 = vsel %vm724_vm2, %v1122_v43, %v1123_v58  ;;  %v2986_v43 = vrot.slane %v6330_v38, 1  ;;  %v2987_v58 = vrot.slane %v6382_v1, 1 }
  0x69   : > { %4898 = vmatprep.mubr.msk.f32.mxu1 %vm421_vm0, %v6088_v53  ;;  %v6340_v53 = vld [vmem:[%s6149_s19 + $0x8] sm:$0x3] }
  0x6a   : > { %5107 = vmatmul.mubr.msk.f32.vlgmr.msra.gmra.mrb[0].mxu0 %vm421_vm0, %v6308_v29  ;;  %v2978_v7 = vrot.slane %v6340_v53, 1 }
  0x6b   : > { %5325 = vmatpush3.bf16.msra.mxu0 %v5322_v36  ;;  %5109 = vmatprep.mubr.msk.f32.mxu0 %vm421_vm0, %v6319_v12  ;;  %v6348_v36 = vld [vmem:[%s6149_s19 + $0x50] sm:$0xff] }
  0x6c   : > { %4899 = vmatmul.mubr.msk.f32.vlgmr.msra.gmra.mrb[0].mxu1 %vm421_vm0, %v6096_v5  ;;  %5327 = vmatprep.subr.bf16.mxu0 %v5326_v8  ;;  %v2979_v52 = vsel %vm567_vm1, %v2977_v15, %v2978_v7  ;;  %v4483_v15 = vld [vmem:[%s6866_s3 + $0x158] sm:$0xff]  ;;  %v6402_v7 = vsel %vm567_vm1, %v2980_v55, %v2981_v13  ;;  %v2989_v13 = vrot.slane %v6335_v42, 1  ;;  %v2990_v55 = vrot.slane %v6390_v39, 1 }
  0x6d   : > { %5273 = vmatpush3.bf16.msra.mxu1 %v5270_v44  ;;  %4901 = vmatprep.mubr.msk.f32.mxu1 %vm421_vm0, %v6112_v3  ;;  %v6354_v44 = vld [vmem:[%s6149_s19 + $0x60] sm:$0xff]  ;;  %v5330_v49 = vpack.c.bf16 %v4483_v15, %v4482_v11  ;;  %v2993_v11 = vrot.slane %v6420_v54, 1 }
  0x6e   : > { %5110 = vmatmul.mubr.msk.f32.gmra.mrb[2].mxu0 %vm421_vm0, %v6330_v38  ;;  %5275 = vmatprep.subr.bf16.mxu1 %v6325_v22  ;;  %v2995_v15 = vrot.slane %v6354_v44, 1 }
  0x6f   : > { %5112 = vmatprep.mubr.msk.f32.mxu0 %vm421_vm0, %v6335_v42 }
  0x70   : > { %4902 = vmatmul.mubr.msk.f32.gmra.mrb[2].mxu1 %vm421_vm0, %v6120_v26 }
  0x71   : > { %4904 = vmatprep.mubr.msk.f32.mxu1 %vm421_vm0, %v6132_v37 }
  0x72   : > { %5113 = vmatmul.mubr.msk.f32.gmra.mrb[4].mxu0 %vm421_vm0, %v6348_v36 }
  0x73   : > { %5115 = vmatprep.mubr.msk.f32.mxu0 %vm421_vm0, %v6354_v44 }
  0x74   : > { %4905 = vmatmul.mubr.msk.f32.gmra.mrb[4].mxu1 %vm421_vm0, %v6139_v45 }
  0x75   : > { %4907 = vmatprep.mubr.msk.f32.mxu1 %vm421_vm0, %v6160_v50 }
  0x76   : > { %5116 = vmatmul.mubr.msk.f32.gmra.mrb[6].mxu0 %vm421_vm0, %v6373_v2 }
  0x77   : > { %5122 = vmatprep.mubr.msk.f32.mxu0 %vm421_vm0, %v2979_v52  ;;  %v6415_v52 = vsel %vm567_vm1, %v2983_v24, %v2984_v6  ;;  %v6432_v6 = vsel %vm567_vm1, %v2986_v43, %v2987_v58  ;;  %v2992_v24 = vrot.slane %v6348_v36, 1  ;;  %v2999_v43 = vrot.slane %v6444_v17, 1 }
  0x78   : > { %4908 = vmatmul.mubr.msk.f32.gmra.mrb[6].mxu1 %vm421_vm0, %v6387_v48  ;;  %v3134_v58 = vrot.slane %v6340_v53, 2 }
  0x79   : > { %4914 = vmatprep.mubr.msk.f32.mxu1 %vm421_vm0, %v5785_v16  ;;  %v6439_v16 = vsel %vm567_vm1, %v2989_v13, %v2990_v55  ;;  %v3136_v13 = vrot.slane %v6308_v29, 2  ;;  %v3140_v55 = vrot.slane %v6365_v32, 2  ;;  %v3143_v32 = vrot.slane %v6382_v1, 2 }
  0x7a   : > { %5123 = vmatmul.mubr.msk.f32.vlgmr.msra.gmra.mrb[0].mxu0 %vm421_vm0, %v6402_v7 }
  0x7b   : > { %5329 = vmatpush3.bf16.msra.mxu0 %v5326_v8  ;;  %5125 = vmatprep.mubr.msk.f32.mxu0 %vm421_vm0, %v6415_v52  ;;  %v2998_v8 = vrot.slane %v6373_v2, 1 }
  0x7c   : > { %4915 = vmatmul.mubr.msk.f32.vlgmr.msra.gmra.mrb[0].mxu1 %vm421_vm0, %v5800_v18  ;;  %5331 = vmatprep.subr.bf16.mxu0 %v5330_v49  ;;  %v6454_v18 = vsel %vm567_vm1, %v2992_v24, %v2993_v11  ;;  %v6484_v24 = vld [vmem:[%s5776_s17 + $0x90] sm:$0xff]  ;;  %v4492_v11 = vld [vmem:[%s6866_s3 + $0x160] sm:$0xff] }
  0x7d   : > { %5277 = vmatpush3.bf16.msra.mxu1 %v6325_v22  ;;  %4917 = vmatprep.mubr.msk.f32.mxu1 %vm421_vm0, %v5821_v28  ;;  %v3133_v22 = vrot.slane %v6291_v57, 2  ;;  %v6462_v28 = vsel %vm567_vm1, %v2995_v15, %v2996_v4  ;;  %v6473_v57 = vsel %vm567_vm1, %v2998_v8, %v2999_v43  ;;  %v4362_v15 = vld [vmem:[%s6866_s3 + $0x90] sm:$0xff]  ;;  %v4363_v4 = vld [vmem:[%s6866_s3 + $0x98] sm:$0xff]  ;;  %v3145_v43 = vrot.slane %v6335_v42, 2 }
  0x7e   : > { %5126 = vmatmul.mubr.msk.f32.gmra.mrb[2].mxu0 %vm421_vm0, %v6432_v6  ;;  %5279 = vmatprep.subr.bf16.mxu1 %v5278_v51  ;;  %v5282_v1 = vpack.c.bf16 %v4363_v4, %v4362_v15  ;;  %v4392_v4 = vld [vmem:[%s6866_s3 + $0xc0] sm:$0xff] }
  0x7f   : > { %5128 = vmatprep.mubr.msk.f32.mxu0 %vm421_vm0, %v6439_v16  ;;  %v3135_v53 = vsel %vm724_vm2, %v3133_v22, %v3134_v58  ;;  %v3146_v22 = vrot.slane %v6390_v39, 2  ;;  %v3149_v39 = vrot.slane %v6420_v54, 2 }
  0x80   : > { %4918 = vmatmul.mubr.msk.f32.gmra.mrb[2].mxu1 %vm421_vm0, %v5851_v41  ;;  %v3137_v41 = vrot.slane %v6358_v34, 2  ;;  %v4493_v34 = vld [vmem:[%s6866_s3 + $0x168] sm:$0xff] }
  0x81   : > { %4920 = vmatprep.mubr.msk.f32.mxu1 %vm421_vm0, %v5865_v47  ;;  %v3139_v47 = vrot.slane %v6319_v12, 2  ;;  %v5334_v58 = vpack.c.bf16 %v4493_v34, %v4492_v11  ;;  %v4503_v11 = vld [vmem:[%s6866_s3 + $0x178] sm:$0xff] }
  0x82   : > { %5129 = vmatmul.mubr.msk.f32.gmra.mrb[4].mxu0 %vm421_vm0, %v6454_v18 }
  0x83   : > { %5131 = vmatprep.mubr.msk.f32.mxu0 %vm421_vm0, %v6462_v28  ;;  %v6509_v8 = vsel %vm724_vm2, %v3139_v47, %v3140_v55  ;;  %v418_v47 = vld [vmem:[%s5776_s17 + $0x98] sm:$0x3] }
  0x84   : > { %4921 = vmatmul.mubr.msk.f32.gmra.mrb[4].mxu1 %vm421_vm0, %v5898_v60  ;;  %v6496_v60 = vsel %vm724_vm2, %v3136_v13, %v3137_v41  ;;  %v3148_v41 = vrot.slane %v6348_v36, 2  ;;  %v1364_v55 = vrot.slane %v418_v47, 1 }
  0x85   : > { %4923 = vmatprep.mubr.msk.f32.mxu1 %vm421_vm0, %v6240_v10  ;;  %v3142_v10 = vrot.slane %v6330_v38, 2 }
  0x86   : > { %5132 = vmatmul.mubr.msk.f32.gmra.mrb[6].mxu0 %vm421_vm0, %v6473_v57  ;;  %v6539_v54 = vsel %vm724_vm2, %v3148_v41, %v3149_v39  ;;  %v6907_v41 = vld [vmem:[#allocation14_spill] sm:$0xff]  ;;  %v4533_v39 = vld [vmem:[%s6866_s3 + $0x1a8] sm:$0xff] }
  0x87   : > { %5138 = vmatprep.mubr.msk.f32.mxu0 %vm421_vm0, %v3135_v53  ;;  %v6520_v13 = vsel %vm724_vm2, %v3142_v10, %v3143_v32  ;;  %v3151_v53 = vrot.slane %v6354_v44, 2 }
  0x88   : > { %4924 = vmatmul.mubr.msk.f32.gmra.mrb[6].mxu1 %vm421_vm0, %v6484_v24 }
  0x89   : > { %4930 = vmatprep.mubr.msk.f32.mxu1 %vm421_vm0, %v5961_v30  ;;  %v6527_v30 = vsel %vm724_vm2, %v3145_v43, %v3146_v22  ;;  %v4393_v43 = vld [vmem:[%s6866_s3 + $0xc8] sm:$0xff] }
  0x8a   : > { %5139 = vmatmul.mubr.msk.f32.vlgmr.msra.gmra.mrb[0].mxu0 %vm421_vm0, %v6496_v60 }
  0x8b   : > { %5333 = vmatpush3.bf16.msra.mxu0 %v5330_v49  ;;  %5141 = vmatprep.mubr.msk.f32.mxu0 %vm421_vm0, %v6509_v8  ;;  %v3152_v49 = vrot.slane %v6425_v20, 2  ;;  %v3155_v20 = vrot.slane %v6444_v17, 2 }
  0x8c   : > { %4931 = vmatmul.mubr.msk.f32.vlgmr.msra.gmra.mrb[0].mxu1 %vm421_vm0, %v5999_v56  ;;  %5335 = vmatprep.subr.bf16.mxu0 %v5334_v58  ;;  %v3154_v56 = vrot.slane %v6373_v2, 2 }
  0x8d   : > { %5281 = vmatpush3.bf16.msra.mxu1 %v5278_v51  ;;  %4933 = vmatprep.mubr.msk.f32.mxu1 %vm421_vm0, %v6006_v59  ;;  %v6546_v51 = vsel %vm724_vm2, %v3151_v53, %v3152_v49  ;;  %v1363_v59 = vrot.slane %v6484_v24, 1  ;;  %v6908_v53 = vld [vmem:[#allocation12_spill] sm:$0xff] }
  0x8e   : > { %5142 = vmatmul.mubr.msk.f32.gmra.mrb[2].mxu0 %vm421_vm0, %v6520_v13  ;;  %5283 = vmatprep.subr.bf16.mxu1 %v5282_v1  ;;  %v6556_v17 = vsel %vm724_vm2, %v3154_v56, %v3155_v20  ;;  %v6910_v20 = vld [vmem:[#allocation4_spill] sm:$0xff] }
  0x8f   : > { %5144 = vmatprep.mubr.msk.f32.mxu0 %vm421_vm0, %v6527_v30 }
  0x90   : > { %4934 = vmatmul.mubr.msk.f32.gmra.mrb[2].mxu1 %vm421_vm0, %v6030_v9  ;;  %v1365_v9 = vsel %vm567_vm1, %v1363_v59, %v1364_v55  ;;  %v6912_v59 = vld [vmem:[#allocation2_spill] sm:$0xff]  ;;  %v6915_v55 = vld [vmem:[#allocation8_spill] sm:$0xff] }
  0x91   : > { %4936 = vmatprep.mubr.msk.f32.mxu1 %vm421_vm0, %v6042_v25  ;;  %v4502_v25 = vld [vmem:[%s6866_s3 + $0x170] sm:$0xff] }
  0x92   : > { %5145 = vmatmul.mubr.msk.f32.gmra.mrb[4].mxu0 %vm421_vm0, %v6539_v54  ;;  %v5338_v34 = vpack.c.bf16 %v4503_v11, %v4502_v25  ;;  %v2828_v25 = vld [vmem:[%s6149_s19 + $0x98] sm:$0x3] }
  0x93   : > { %5147 = vmatprep.mubr.msk.f32.mxu0 %vm421_vm0, %v6546_v51 }
  0x94   : > { %4937 = vmatmul.mubr.msk.f32.gmra.mrb[4].mxu1 %vm421_vm0, %v6056_v14  ;;  %v4372_v14 = vld [vmem:[%s6866_s3 + $0xa0] sm:$0xff] }
  0x95   : > { %4939 = vmatprep.mubr.msk.f32.mxu1 %vm421_vm0, %v6296_v61  ;;  %v4373_v61 = vld [vmem:[%s6866_s3 + $0xa8] sm:$0xff] }
  0x96   : > { %5148 = vmatmul.mubr.msk.f32.gmra.mrb[6].mxu0 %vm421_vm0, %v6556_v17  ;;  %v5286_v10 = vpack.c.bf16 %v4373_v61, %v4372_v14  ;;  %v5619_v14 = vld [vmem:[%s5797_s28 + $0x40] sm:$0xff] }
  0x97   : > { %5154 = vmatprep.mubr.msk.f32.mxu0 %vm421_vm0, %v6308_v29  ;;  %v1605_v29 = vld [vmem:[%s5797_s28] sm:$0xff] }
  0x98   : > { %4940 = vmatmul.mubr.msk.f32.gmra.mrb[6].mxu1 %vm421_vm0, %v1365_v9  ;;  %v6917_v9 = vld [vmem:[#allocation11_spill] sm:$0xff] }
  0x99   : > { %4946 = vmatprep.mubr.msk.f32.mxu1 %vm421_vm0, %v6096_v5  ;;  %v1484_v5 = vrot.slane %v6484_v24, 2 }
  0x9a   : > { %5155 = vmatmul.mubr.msk.f32.vlgmr.msra.gmra.mrb[0].mxu0 %vm421_vm0, %v6319_v12 }
  0x9b   : > { %5337 = vmatpush3.bf16.msra.mxu0 %v5334_v58  ;;  %5157 = vmatprep.mubr.msk.f32.mxu0 %vm421_vm0, %v6330_v38  ;;  %v5294_v58 = vpack.c.bf16 %v4393_v43, %v4392_v4 }
  0x9c   : > { %4947 = vmatmul.mubr.msk.f32.vlgmr.msra.gmra.mrb[0].mxu1 %vm421_vm0, %v6112_v3  ;;  %5339 = vmatprep.subr.bf16.mxu0 %v5338_v34  ;;  %v1485_v3 = vrot.slane %v418_v47, 2  ;;  %v6909_v47 = vld [vmem:[#allocation15_spill] sm:$0xff] }
  0x9d   : > { %5285 = vmatpush3.bf16.msra.mxu1 %v5282_v1  ;;  %4949 = vmatprep.mubr.msk.f32.mxu1 %vm421_vm0, %v6120_v26  ;;  %v1929_v1 = vrot.slane %v1605_v29, 2 }
  0x9e   : > { %5158 = vmatmul.mubr.msk.f32.gmra.mrb[2].mxu0 %vm421_vm0, %v6335_v42  ;;  %5287 = vmatprep.subr.bf16.mxu1 %v5286_v10  ;;  %v1486_v26 = vsel %vm724_vm2, %v1484_v5, %v1485_v3 }
  0x9f   : > { %5160 = vmatprep.mubr.msk.f32.mxu0 %vm421_vm0, %v6348_v36 }
  0xa0   : > { %4950 = vmatmul.mubr.msk.f32.gmra.mrb[2].mxu1 %vm421_vm0, %v6132_v37  ;;  %v4512_v37 = vld [vmem:[%s6866_s3 + $0x180] sm:$0xff] }
  0xa1   : > { %4952 = vmatprep.mubr.msk.f32.mxu1 %vm421_vm0, %v6139_v45  ;;  %v4513_v45 = vld [vmem:[%s6866_s3 + $0x188] sm:$0xff] }
  0xa2   : > { %5161 = vmatmul.mubr.msk.f32.gmra.mrb[4].mxu0 %vm421_vm0, %v6354_v44  ;;  %v5342_v24 = vpack.c.bf16 %v4513_v45, %v4512_v37 }
  0xa3   : > { %5163 = vmatprep.mubr.msk.f32.mxu0 %vm421_vm0, %v6373_v2 }
  0xa4   : > { %4953 = vmatmul.mubr.msk.f32.gmra.mrb[4].mxu1 %vm421_vm0, %v6160_v50  ;;  %v4383_v50 = vld [vmem:[%s6866_s3 + $0xb8] sm:$0xff] }
  0xa5   : > { %4955 = vmatprep.mubr.msk.f32.mxu1 %vm421_vm0, %v6387_v48  ;;  %v4382_v48 = vld [vmem:[%s6866_s3 + $0xb0] sm:$0xff] }
  0xa6   : > { %5164 = vmatmul.mubr.msk.f32.gmra.mrb[6].mxu0 %vm421_vm0, %v6154_v0  ;;  %v5290_v32 = vpack.c.bf16 %v4383_v50, %v4382_v48 }
  0xa7   : > { %5170 = vmatprep.mubr.msk.f32.mxu0 %vm421_vm0, %v6402_v7  ;;  %v1606_v7 = vld [vmem:[%s5797_s28 + $0x8] sm:$0x3] }
  0xa8   : > { %4956 = vmatmul.mubr.msk.f32.gmra.mrb[6].mxu1 %vm421_vm0, %v1486_v26  ;;  %v1774_v15 = vrot.slane %v1606_v7, 1 }
  0xa9   : > { %4962 = vmatprep.mubr.msk.f32.mxu1 %vm421_vm0, %v1605_v29 }
  0xaa   : > { %5171 = vmatmul.mubr.msk.f32.vlgmr.msra.gmra.mrb[0].mxu0 %vm421_vm0, %v6415_v52 }
  0xab   : > { %5341 = vmatpush3.bf16.msra.mxu0 %v5338_v34  ;;  %5173 = vmatprep.mubr.msk.f32.mxu0 %vm421_vm0, %v6432_v6 }
  0xac   : > { %4963 = vmatmul.mubr.msk.f32.vlgmr.msra.gmra.mrb[0].mxu1 %vm421_vm0, %v5811_v21  ;;  %5343 = vmatprep.subr.bf16.mxu0 %v5342_v24  ;;  %v1773_v21 = vrot.slane %v1605_v29, 1 }
  0xad   : > { %5289 = vmatpush3.bf16.msra.mxu1 %v5286_v10  ;;  %4965 = vmatprep.mubr.msk.f32.mxu1 %vm421_vm0, %v5815_v23  ;;  %v4522_v23 = vld [vmem:[%s6866_s3 + $0x190] sm:$0xff] }
  0xae   : > { %5174 = vmatmul.mubr.msk.f32.gmra.mrb[2].mxu0 %vm421_vm0, %v6439_v16  ;;  %5291 = vmatprep.subr.bf16.mxu1 %v5290_v32 }
  0xaf   : > { %5176 = vmatprep.mubr.msk.f32.mxu0 %vm421_vm0, %v6454_v18 }
  0xb0   : > { %4966 = vmatmul.mubr.msk.f32.gmra.mrb[2].mxu1 %vm421_vm0, %v5825_v31  ;;  %v4523_v31 = vld [vmem:[%s6866_s3 + $0x198] sm:$0xff] }
  0xb1   : > { %4968 = vmatprep.mubr.msk.f32.mxu1 %vm421_vm0, %v5829_v33  ;;  %v1775_v33 = vsel %vm567_vm1, %v1773_v21, %v1774_v15  ;;  %v5346_v22 = vpack.c.bf16 %v4523_v31, %v4522_v23 }
  0xb2   : > { %5177 = vmatmul.mubr.msk.f32.gmra.mrb[4].mxu0 %vm421_vm0, %v6462_v28 }
  0xb3   : > { %5179 = vmatprep.mubr.msk.f32.mxu0 %vm421_vm0, %v6473_v57 }
  0xb4   : > { %4969 = vmatmul.mubr.msk.f32.gmra.mrb[4].mxu1 %vm421_vm0, %v5902_v62 }
  0xb5   : > { %4971 = vmatprep.mubr.msk.f32.mxu1 %vm421_vm0, %v5939_v19 }
  0xb6   : > { %5180 = vmatmul.mubr.msk.f32.gmra.mrb[6].mxu0 %vm421_vm0, %v6189_v63 }
  0xb7   : > { %5186 = vmatprep.mubr.msk.f32.mxu0 %vm421_vm0, %v6496_v60  ;;  %v6905_v60 = vld [vmem:[#allocation3_spill] sm:$0xff] }
  0xb8   : > { %4972 = vmatmul.mubr.msk.f32.gmra.mrb[6].mxu1 %vm421_vm0, %v5953_v27 }
  0xb9   : > { %4978 = vmatprep.mubr.msk.f32.mxu1 %vm421_vm0, %v1775_v33 }
  0xba   : > { %5187 = vmatmul.mubr.msk.f32.vlgmr.msra.gmra.mrb[0].mxu0 %vm421_vm0, %v6509_v8 }
  0xbb   : > { %5345 = vmatpush3.bf16.msra.mxu0 %v5342_v24  ;;  %5189 = vmatprep.mubr.msk.f32.mxu0 %vm421_vm0, %v6520_v13 }
  0xbc   : > { %4979 = vmatmul.mubr.msk.f32.vlgmr.msra.gmra.mrb[0].mxu1 %vm421_vm0, %v5834_v35  ;;  %5347 = vmatprep.subr.bf16.mxu0 %v5346_v22  ;;  %v1930_v35 = vrot.slane %v1606_v7, 2 }
  0xbd   : > { %5293 = vmatpush3.bf16.msra.mxu1 %v5290_v32  ;;  %4981 = vmatprep.mubr.msk.f32.mxu1 %vm421_vm0, %v5846_v40  ;;  %v6906_v40 = vld [vmem:[#allocation13_spill] sm:$0xff] }
  0xbe   : > { %5190 = vmatmul.mubr.msk.f32.gmra.mrb[2].mxu0 %vm421_vm0, %v6527_v30  ;;  %5295 = vmatprep.subr.bf16.mxu1 %v5294_v58  ;;  %v1931_v49 = vsel %vm724_vm2, %v1929_v1, %v1930_v35 }
  0xbf   : > { %5192 = vmatprep.mubr.msk.f32.mxu0 %vm421_vm0, %v6539_v54 }
  0xc0   : > { %4982 = vmatmul.mubr.msk.f32.gmra.mrb[2].mxu1 %vm421_vm0, %v5862_v46  ;;  %v4532_v46 = vld [vmem:[%s6866_s3 + $0x1a0] sm:$0xff] }
  0xc1   : > { %4984 = vmatprep.mubr.msk.f32.mxu1 %vm421_vm0, %v6905_v60  ;;  %v5350_v56 = vpack.c.bf16 %v4533_v39, %v4532_v46 }
  0xc2   : > { %5193 = vmatmul.mubr.msk.f32.gmra.mrb[4].mxu0 %vm421_vm0, %v6546_v51 }
  0xc3   : > { %5195 = vmatprep.mubr.msk.f32.mxu0 %vm421_vm0, %v6556_v17 }
  0xc4   : > { %4985 = vmatmul.mubr.msk.f32.gmra.mrb[4].mxu1 %vm421_vm0, %v6906_v40 }
  0xc5   : > { %4987 = vmatprep.mubr.msk.f32.mxu1 %vm421_vm0, %v6907_v41 }
  0xc6   : > { %5196 = vmatmul.mubr.msk.f32.gmra.mrb[6].mxu0 %vm421_vm0, %v6908_v53 }
  0xc7   : > { %5202 = vmatprep.mubr.msk.f32.mxu0 %vm421_vm0, %v6319_v12  ;;  %v6911_v12 = vld [vmem:[#allocation5_spill] sm:$0xff] }
  0xc8   : > { %4988 = vmatmul.mubr.msk.f32.gmra.mrb[6].mxu1 %vm421_vm0, %v6909_v47 }
  0xc9   : > { %4994 = vmatprep.mubr.msk.f32.mxu1 %vm421_vm0, %v1931_v49 }
  0xca   : > { %5203 = vmatmul.mubr.msk.f32.vlgmr.msra.gmra.mrb[0].mxu0 %vm421_vm0, %v6330_v38  ;;  %v6913_v38 = vld [vmem:[#allocation6_spill] sm:$0xff] }
  0xcb   : > { %5349 = vmatpush3.bf16.msra.mxu0 %v5346_v22  ;;  %5205 = vmatprep.mubr.msk.f32.mxu0 %vm421_vm0, %v6335_v42  ;;  %v6914_v42 = vld [vmem:[#allocation7_spill] sm:$0xff] }
  0xcc   : > { %4995 = vmatmul.mubr.msk.f32.vlgmr.msra.gmra.mrb[0].mxu1 %vm421_vm0, %v6910_v20  ;;  %5351 = vmatprep.subr.bf16.mxu0 %v5350_v56 }
  0xcd   : > { %5297 = vmatpush3.bf16.msra.mxu1 %v5294_v58  ;;  %4997 = vmatprep.mubr.msk.f32.mxu1 %vm421_vm0, %v6911_v12 }
  0xce   : > { %5206 = vmatmul.mubr.msk.f32.gmra.mrb[2].mxu0 %vm421_vm0, %v6348_v36  ;;  %5354 = vmatprep.subr.bf16.mxu1 %v6912_v59  ;;  %v2827_v36 = vld [vmem:[%s6149_s19 + $0x90] sm:$0xff]  ;;  %s4269_s19 = sshll.u32 %s6931_s22, 6 }
  0xcf   : > { %5208 = vmatprep.mubr.msk.f32.mxu0 %vm421_vm0, %v6354_v44  ;;  %v6916_v44 = vld [vmem:[#allocation10_spill] sm:$0xff]  ;;  %v3771_v11 = vrot.slane %v2827_v36, 1 }
  0xd0   : > { %4998 = vmatmul.mubr.msk.f32.gmra.mrb[2].mxu1 %vm421_vm0, %v6913_v38 }
  0xd1   : > { %5000 = vmatprep.mubr.msk.f32.mxu1 %vm421_vm0, %v6914_v42 }
  0xd2   : > { %5209 = vmatmul.mubr.msk.f32.gmra.mrb[4].mxu0 %vm421_vm0, %v6373_v2  ;;  %v5616_v2 = vld [vmem:[%s5797_s28 + $0x10] sm:$0xff] }
  0xd3   : > { %5211 = vmatprep.mubr.msk.f32.mxu0 %vm421_vm0, %v6154_v0  ;;  %v5617_v0 = vld [vmem:[%s5797_s28 + $0x20] sm:$0xff] }
  0xd4   : > { %5001 = vmatmul.mubr.msk.f32.gmra.mrb[4].mxu1 %vm421_vm0, %v6915_v55 }
  0xd5   : > { %5003 = vmatprep.mubr.msk.f32.mxu1 %vm421_vm0, %v6916_v44 }
  0xd6   : > { %5212 = vmatmul.mubr.msk.f32.gmra.mrb[6].mxu0 %vm421_vm0, %v2827_v36 }
  0xd7   : > { %5218 = vmatprep.mubr.msk.f32.mxu0 %vm421_vm0, %v6415_v52  ;;  %v5618_v52 = vld [vmem:[%s5797_s28 + $0x30] sm:$0xff]  ;;  %s4268_s28 = sshll.u32 %s6937_s21, 3 }
  0xd8   : > { %5004 = vmatmul.mubr.msk.f32.gmra.mrb[6].mxu1 %vm421_vm0, %v6917_v9  ;;  %s380_s15 = sadd.s32 %s4269_s19, %s4268_s28 }
  0xd9   : > { %5010 = vmatprep.mubr.msk.f32.mxu1 %vm421_vm0, %v5616_v2  ;;  %s4270_s18 = sshll.u32 %s380_s15, 3 }
  0xda   : > { %5219 = vmatmul.mubr.msk.f32.vlgmr.msra.gmra.mrb[0].mxu0 %vm421_vm0, %v6432_v6  ;;  %v3772_v6 = vrot.slane %v2828_v25, 1  ;;  %s6809_s30 = scalar_lea.vmem %s6868_s5, %s4270_s18 }
  0xdb   : > { %5353 = vmatpush3.bf16.msra.mxu0 %v5350_v56  ;;  %5221 = vmatprep.mubr.msk.f32.mxu0 %vm421_vm0, %v6439_v16 }
  0xdc   : > { %5011 = vmatmul.mubr.msk.f32.vlgmr.msra.gmra.mrb[0].mxu1 %vm421_vm0, %v5617_v0  ;;  %v3773_v16 = vsel %vm567_vm1, %v3771_v11, %v3772_v6 }
  0xdd   : > { %5355 = vmatpush3.bf16.msra.mxu1 %v6912_v59  ;;  %5013 = vmatprep.mubr.msk.f32.mxu1 %vm421_vm0, %v5618_v52 }
  0xde   : > { %5222 = vmatmul.mubr.msk.f32.gmra.mrb[2].mxu0 %vm421_vm0, %v6454_v18 }
  0xdf   : > { %5224 = vmatprep.mubr.msk.f32.mxu0 %vm421_vm0, %v6462_v28 }
  0xe0   : > { %5014 = vmatmul.mubr.msk.f32.gmra.mrb[2].mxu1 %vm421_vm0, %v5619_v14 }
  0xe1   : > { %5016 = vmatprep.mubr.msk.f32.mxu1 %vm421_vm0, %v5902_v62  ;;  %v6918_v62 = vld [vmem:[#allocation9_spill] sm:$0xff] }
  0xe2   : > { %5225 = vmatmul.mubr.msk.f32.gmra.mrb[4].mxu0 %vm421_vm0, %v6473_v57 }
  0xe3   : > { %5227 = vmatprep.mubr.msk.f32.mxu0 %vm421_vm0, %v6189_v63  ;;  %v6919_v63 = vld [vmem:[#allocation16_spill] sm:$0xff] }
  0xe4   : > { %5017 = vmatmul.mubr.msk.f32.gmra.mrb[4].mxu1 %vm421_vm0, %v5939_v19  ;;  %v3892_v19 = vrot.slane %v2827_v36, 2 }
  0xe5   : > { %5019 = vmatprep.mubr.msk.f32.mxu1 %vm421_vm0, %v5953_v27  ;;  %v3893_v27 = vrot.slane %v2828_v25, 2 }
  0xe6   : > { %5228 = vmatmul.mubr.msk.f32.gmra.mrb[6].mxu0 %vm421_vm0, %v3773_v16 }
  0xe7   : > { %5234 = vmatprep.mubr.msk.f32.mxu0 %vm421_vm0, %v6509_v8  ;;  %v3894_v18 = vsel %vm724_vm2, %v3892_v19, %v3893_v27 }
  0xe8   : > { %5020 = vmatmul.mubr.msk.f32.gmra.mrb[6].mxu1 %vm421_vm0, %v6918_v62 }
  0xe9   : > { %5032 = vmatprep.mubr.msk.f32.mxu1 %vm421_vm0, %v6906_v40 }
  0xea   : > { %5235 = vmatmul.mubr.msk.f32.vlgmr.msra.gmra.mrb[0].mxu0 %vm421_vm0, %v6520_v13 }
  0xeb   : > { %5237 = vmatprep.mubr.msk.f32.mxu0 %vm421_vm0, %v6527_v30  ;;  %v4273_v30 = vld [vmem:[%s6867_s4] ss:$0 sm:$0xff] }
  0xec   : > { %5033 = vmatmul.mubr.msk.f32.vlgmr.msra.gmra.mrb[4].mxu1 %vm421_vm0, %v6907_v41 }
  0xed   : > { %5035 = vmatprep.mubr.msk.f32.mxu1 %vm421_vm0, %v6909_v47 }
  0xee   : > { %5238 = vmatmul.mubr.msk.f32.gmra.mrb[2].mxu0 %vm421_vm0, %v6539_v54 }
  0xef   : > { %5240 = vmatprep.mubr.msk.f32.mxu0 %vm421_vm0, %v6546_v51 }
  0xf0   : > { %5036 = vmatmul.mubr.msk.f32.gmra.mrb[6].mxu1 %vm421_vm0, %v6919_v63 }
  0xf2   : > { %5241 = vmatmul.mubr.msk.f32.gmra.mrb[4].mxu0 %vm421_vm0, %v6556_v17 }
  0xf3   : > { %5243 = vmatprep.mubr.msk.f32.mxu0 %vm421_vm0, %v6908_v53 }
  0xf6   : > { %5244 = vmatmul.mubr.msk.f32.gmra.mrb[6].mxu0 %vm421_vm0, %v3894_v18 }
 0x1af   : > { %v5012_v28 = vpop.f32.mrb[0].mxu1 }
 0x1b0   : > { %v2157_v57 = vpop.f32.mrb[1].mxu1  ;;  %v5356_v54 = vadd.f32 %v5012_v28, %v4273_v30 }
 0x1b1   : > { %v5358_v51 = vadd.f32 %v4273_v30, %v2157_v57 }
 0x1b3   : > { %v5015_v8 = vpop.f32.mrb[2].mxu1 }
 0x1b4   : > { %v2167_v13 = vpop.f32.mrb[3].mxu1  ;;  %v5360_v3 = vadd.f32 %v5015_v8, %v4273_v30 }
 0x1b5   : > { %v5362_v29 = vadd.f32 %v4273_v30, %v2167_v13 }
 0x1bd   : > { %v5236_v17 = vpop.f32.mrb[0].mxu0 }
 0x1be   : > { %v5357_v61 = vadd.f32 %v5356_v54, %v5236_v17  ;;  %v3966_v34 = vpop.f32.mrb[1].mxu0 }
 0x1bf   : > { %v5359_v10 = vadd.f32 %v5358_v51, %v3966_v34  ;;  %v5034_v5 = vpop.f32.mrb[4].mxu1 }
 0x1c0   : > { %4015 = vst.msk [vmem:[%s6809_s30 + $0x8] sm:$0xff] %vm4013_vm3, %v5357_v61  ;;  %v4023_v26 = vsel %vm4013_vm3, %v5357_v61, 0.0  ;;  %v4044_v37 = vmul.f32 %v5357_v61, %v5357_v61  ;;  %v2299_v45 = vpop.f32.mrb[5].mxu1  ;;  %v5364_v43 = vadd.f32 %v5034_v5, %v4273_v30 }
 0x1c1   : > { %4014 = vst.msk [vmem:[%s6809_s30] sm:$0xff] %vm4013_vm3, %v5359_v10  ;;  %v4022_v48 = vsel %vm4013_vm3, %v5359_v10, 0.0  ;;  %v4043_v50 = vmul.f32 %v5359_v10, %v5359_v10  ;;  %v5239_v24 = vpop.f32.mrb[2].mxu0  ;;  %v5366_v60 = vadd.f32 %v4273_v30, %v2299_v45 }
 0x1c2   : > { %v4052_v32 = vsel %vm4013_vm3, %v4044_v37, 0.0  ;;  %v4024_v7 = vadd.f32 %v4023_v26, %v4022_v48  ;;  %v5361_v21 = vadd.f32 %v5360_v3, %v5239_v24  ;;  %v3976_v15 = vpop.f32.mrb[3].mxu0 }
 0x1c3   : > { %v4051_v23 = vsel %vm4013_vm3, %v4043_v50, 0.0  ;;  %v5363_v31 = vadd.f32 %v5362_v29, %v3976_v15  ;;  %v5037_v33 = vpop.f32.mrb[6].mxu1 }
 0x1c4   : > { %v4053_v4 = vadd.f32 %v4052_v32, %v4051_v23  ;;  %4017 = vst.msk [vmem:[%s6809_s30 + $0x18] sm:$0xff] %vm4013_vm3, %v5361_v21  ;;  %v2309_v22 = vpop.f32.mrb[7].mxu1  ;;  %v4046_v58 = vmul.f32 %v5361_v21, %v5361_v21  ;;  %v4027_v53 = vsel %vm4013_vm3, %v5361_v21, 0.0  ;;  %v5368_v20 = vadd.f32 %v5037_v33, %v4273_v30 }
 0x1c5   : > { %4016 = vst.msk [vmem:[%s6809_s30 + $0x10] sm:$0xff] %vm4013_vm3, %v5363_v31  ;;  %v4025_v1 = vsel %vm4013_vm3, %v5363_v31, 0.0  ;;  %v4045_v35 = vmul.f32 %v5363_v31, %v5363_v31  ;;  %v5242_v40 = vpop.f32.mrb[4].mxu0  ;;  %v5370_v12 = vadd.f32 %v4273_v30, %v2309_v22 }
 0x1c6   : > { %v4026_v41 = vadd.f32 %v4025_v1, %v4024_v7  ;;  %v5365_v46 = vadd.f32 %v5364_v43, %v5242_v40  ;;  %v3986_v39 = vpop.f32.mrb[5].mxu0  ;;  %v4056_v38 = vsel %vm4013_vm3, %v4046_v58, 0.0 }
 0x1c7   : > { %v4054_v49 = vsel %vm4013_vm3, %v4045_v35, 0.0  ;;  %v5367_v47 = vadd.f32 %v5366_v60, %v3986_v39 }
 0x1c8   : > { %v4055_v56 = vadd.f32 %v4054_v49, %v4053_v4  ;;  %4019 = vst.msk [vmem:[%s6809_s30 + $0x28] sm:$0xff] %vm4013_vm3, %v5365_v46  ;;  %v4028_v59 = vadd.f32 %v4027_v53, %v4026_v41  ;;  %v4048_v42 = vmul.f32 %v5365_v46, %v5365_v46  ;;  %v4031_v52 = vsel %vm4013_vm3, %v5365_v46, 0.0 }
 0x1c9   : > { %4018 = vst.msk [vmem:[%s6809_s30 + $0x20] sm:$0xff] %vm4013_vm3, %v5367_v47  ;;  %v4029_v36 = vsel %vm4013_vm3, %v5367_v47, 0.0  ;;  %v4047_v55 = vmul.f32 %v5367_v47, %v5367_v47  ;;  %v5245_v44 = vpop.f32.mrb[6].mxu0 }
 0x1ca   : > { %v4030_v9 = vadd.f32 %v4029_v36, %v4028_v59  ;;  %v4057_v2 = vadd.f32 %v4056_v38, %v4055_v56  ;;  %v5369_v0 = vadd.f32 %v5368_v20, %v5245_v44  ;;  %v3996_v25 = vpop.f32.mrb[7].mxu0  ;;  %v4060_v62 = vsel %vm4013_vm3, %v4048_v42, 0.0 }
 0x1cb   : > { %v4058_v11 = vsel %vm4013_vm3, %v4047_v55, 0.0  ;;  %v5371_v6 = vadd.f32 %v5370_v12, %v3996_v25 }
 0x1cc   : > { %v4059_v14 = vadd.f32 %v4058_v11, %v4057_v2  ;;  %4021 = vst.msk [vmem:[%s6809_s30 + $0x38] sm:$0xff] %vm4013_vm3, %v5369_v0  ;;  %v4032_v16 = vadd.f32 %v4031_v52, %v4030_v9  ;;  %v4050_v19 = vmul.f32 %v5369_v0, %v5369_v0  ;;  %v4035_v57 = vsel %vm4013_vm3, %v5369_v0, 0.0 }
 0x1cd   : > { %4020 = vst.msk [vmem:[%s6809_s30 + $0x30] sm:$0xff] %vm4013_vm3, %v5371_v6  ;;  %v4033_v27 = vsel %vm4013_vm3, %v5371_v6, 0.0  ;;  %v4049_v63 = vmul.f32 %v5371_v6, %v5371_v6 }
 0x1ce   : > { %v4034_v18 = vadd.f32 %v4033_v27, %v4032_v16  ;;  %v4061_v28 = vadd.f32 %v4060_v62, %v4059_v14  ;;  %v4064_v54 = vsel %vm4013_vm3, %v4050_v19, 0.0 }
 0x1cf   : > { %v4062_v8 = vsel %vm4013_vm3, %v4049_v63, 0.0 }
 0x1d0   : > { %v4036_v13 = vadd.f32 %v4035_v57, %v4034_v18  ;;  %v4063_v30 = vadd.f32 %v4062_v8, %v4061_v28 }
 0x1d2   : > { %v4037_v51 = vrot.slane %v4036_v13, 4  ;;  %v4065_v17 = vadd.f32 %v4064_v54, %v4063_v30 }
 0x1d4   : > { %v4038_v61 = vadd.f32 %v4037_v51, %v4036_v13  ;;  %v4066_v34 = vrot.slane %v4065_v17, 4 }
 0x1d6   : > { %v4039_v10 = vrot.slane %v4038_v61, 2  ;;  %v4067_v5 = vadd.f32 %v4066_v34, %v4065_v17 }
 0x1d8   : > { %v4040_v3 = vadd.f32 %v4039_v10, %v4038_v61  ;;  %v4068_v26 = vrot.slane %v4067_v5, 2 }
 0x1da   : > { %v4041_v37 = vrot.slane %v4040_v3, 1  ;;  %v4069_v45 = vadd.f32 %v4068_v26, %v4067_v5 }
 0x1dc   : > { %v4070_v29 = vrot.slane %v4069_v45, 1  ;;  %v4042_v48 = vadd.f32 %v4041_v37, %v4040_v3 }
 0x1de   : > { %v4071_v50 = vadd.f32 %v4070_v29, %v4069_v45 }
 0x1e0   : > { %v4073_v24 = vsel %vm4072_vm4, %v4042_v48, %v4071_v50 }
 0x1e1   : > { %4075 = vst.msk [vmem:[%s390_s12] sm:$0x3] %vm4074_vm5, %v4073_v24 }
 0x1e2 PF: > { %s17_s25 = sadd.s32 1, %s5658_s25   ;;  %s6920_s21 = smov %s5650_s23 }
 0x1e3   : > { %p14_p10 = scmp.ge.s32.totalorder %s17_s25, 18   ;;  %s6921_s22 = smov %s5654_s24 }
 0x1e4   : > { %s6922_s23 = smov %s6925_s26  ;;  %s6923_s24 = smov %s6929_s27 }
 0x1e5   :  { %16 = sbr.rel (!%p14_p10) target bundleno = 3 (0x3), region = 114 }

// kernel: multi_decoder_3d_v2.7
= control target key start
LH: loop header
LB: loop body
LE: loop exit
PB: predicated region body
PF: predicated region fallthrough
CT: control target
= control target key end

     0   :  { %s526_s12 = smov 0   ;;  %s528_s13 = smov 0   ;;  %s598_s0 = inlined_call_operand.vmem [shape: f32[2,8,8,8,8], index: 0, kind: input, shape index: {}]   ;;  %s599_s1 = inlined_call_operand.vmem [shape: f32[2,1,8], index: 1, kind: input, shape index: {}]   ;;  %s600_s2 = inlined_call_operand.vmem [shape: f32[2,1,8], index: 2, kind: input, shape index: {}]   ;;  %s601_s3 = inlined_call_operand.vmem [shape: f32[2,8,8,8,8], index: 3, kind: output, shape index: {}]  }
   0x1   :  { %s530_s14 = smov 0   ;;  %s532_s15 = smov 0  }
   0x2   :  { %s534_s16 = smov 0  }
   0x3 LB: > { %s22_s17 = sadd.s32 1, %s496_s14  ;;  %s25_s18 = sadd.s32 1, %s500_s15  ;;  %s504_s16 = sphi %s534_s16, %s13_s16   ;;  %s500_s15 = sphi %s532_s15, %s605_s15   ;;  %s496_s14 = sphi %s530_s14, %s604_s14   ;;  %s492_s13 = sphi %s528_s13, %s603_s13   ;;  %s488_s12 = sphi %s526_s12, %s602_s12  }
   0x4   : > { %p23_p0 = scmp.ge.s32.totalorder %s22_s17, 8  ;;  %p415_p1 = scmp.ge.s32.totalorder %s504_s16, 1 }
   0x5   : > { %p173_p2 = scmp.lt.s32.totalorder %s504_s16, 17 }
   0x6   : > { %s607_s17 = smov (%p23_p0, %s22_s17), 0  ;;  %s609_s18 = smov (!%p23_p0, %s25_s18), %s500_s15 }
   0x7   : > { %p174_p3 = pnand %p415_p1, %p173_p2  ;;  %p27_p4 = scmp.ge.s32.totalorder %s609_s18, 2 }
   0x8   : > { %p211_p5 = scmp.lt.s32.totalorder (!%p174_p3), %s492_s13, 1  ;;  %p213_p6 = scmp.lt.s32.totalorder (!%p174_p3), %s488_s12, 7  ;;  %vm289_vm0 = vcmask (!%p174_p3), 64512  }
   0x9   : > { %s611_s18 = smov (%p27_p4, %s609_s18), 0  ;;  %177 = sbr.rel (%p174_p3) target bundleno = 35 (0x23), region = 32 }
  0x10   : > { %s613_s13 = smov (!%p211_p5, %s492_s13), 1  ;;  %s615_s12 = smov (!%p213_p6, %s488_s12), 7 }
  0x11   : > { %s417_s19 = sshll.u32 %s613_s13, 6  ;;  %s222_s22 = scalar_lea.vmem %s599_s1, %s613_s13 }
  0x12   : > { %s416_s23 = sshll.u32 %s615_s12, 3  ;;  %s225_s26 = scalar_lea.vmem %s600_s2, %s613_s13  ;;  %v422_v0 = vld [vmem:[%s222_s22] ss:$0 sm:$0xff] }
  0x13   : > { %s562_s27 = sadd.s32 %s417_s19, %s416_s23  ;;  %v423_v1 = vld [vmem:[%s225_s26] ss:$0 sm:$0xff] }
  0x14   : > { %s418_s28 = sshll.u32 %s562_s27, 3 }
  0x15   : > { %s219_s4 = scalar_lea.vmem %s598_s0, %s418_s28  ;;  %s234_s7 = scalar_lea.vmem %s601_s3, %s418_s28 }
  0x16   : > { %v235_v2 = vld [vmem:[%s219_s4] sm:$0xff]  ;;  %v236_v3 = vld [vmem:[%s219_s4 + $0x8] sm:$0xff]  ;;  %v237_v4 = vld [vmem:[%s219_s4 + $0x10] sm:$0xff] }
  0x17   : > { %v250_v5 = vmul.f32 %v422_v0, %v235_v2  ;;  %v251_v6 = vmul.f32 %v422_v0, %v236_v3  ;;  %v252_v7 = vmul.f32 %v422_v0, %v237_v4  ;;  %v238_v8 = vld [vmem:[%s219_s4 + $0x18] sm:$0xff]  ;;  %v239_v9 = vld [vmem:[%s219_s4 + $0x20] sm:$0xff]  ;;  %v240_v10 = vld [vmem:[%s219_s4 + $0x28] sm:$0xff] }
  0x18   : > { %v253_v11 = vmul.f32 %v422_v0, %v238_v8  ;;  %v254_v12 = vmul.f32 %v422_v0, %v239_v9  ;;  %v255_v13 = vmul.f32 %v422_v0, %v240_v10  ;;  %v241_v14 = vld [vmem:[%s219_s4 + $0x30] sm:$0xff]  ;;  %v242_v15 = vld [vmem:[%s219_s4 + $0x38] sm:$0xff] }
  0x19   : > { %v265_v16 = vadd.f32 %v423_v1, %v250_v5  ;;  %v266_v17 = vadd.f32 %v423_v1, %v251_v6  ;;  %v267_v18 = vadd.f32 %v423_v1, %v252_v7  ;;  %v256_v19 = vmul.f32 %v422_v0, %v241_v14 }
  0x1a   : > { %v268_v20 = vadd.f32 %v423_v1, %v253_v11  ;;  %v269_v21 = vadd.f32 %v423_v1, %v254_v12  ;;  %v270_v22 = vadd.f32 %v423_v1, %v255_v13  ;;  %v257_v23 = vmul.f32 %v422_v0, %v242_v15 }
  0x1b   : > { %v273_v24 = vmax.f32 %v265_v16, 0.0  ;;  %v274_v25 = vmax.f32 %v266_v17, 0.0  ;;  %v275_v26 = vmax.f32 %v267_v18, 0.0  ;;  %v271_v27 = vadd.f32 %v423_v1, %v256_v19 }
  0x1c   : > { %v276_v28 = vmax.f32 %v268_v20, 0.0  ;;  %v277_v29 = vmax.f32 %v269_v21, 0.0  ;;  %v278_v30 = vmax.f32 %v270_v22, 0.0  ;;  %v272_v31 = vadd.f32 %v423_v1, %v257_v23 }
  0x1d   : > { %v281_v32 = vmin.f32 %v273_v24, 6.0  ;;  %v282_v33 = vmin.f32 %v274_v25, 6.0  ;;  %v283_v34 = vmin.f32 %v275_v26, 6.0  ;;  %v279_v35 = vmax.f32 %v271_v27, 0.0 }
  0x1e   : > { %v284_v36 = vmin.f32 %v276_v28, 6.0  ;;  %v285_v37 = vmin.f32 %v277_v29, 6.0  ;;  %v286_v38 = vmin.f32 %v278_v30, 6.0  ;;  %v280_v39 = vmax.f32 %v272_v31, 0.0 }
  0x1f   : > { %290 = vst.msk [vmem:[%s234_s7] sm:$0xff] %vm289_vm0, %v281_v32  ;;  %291 = vst.msk [vmem:[%s234_s7 + $0x8] sm:$0xff] %vm289_vm0, %v282_v33  ;;  %v287_v40 = vmin.f32 %v279_v35, 6.0 }
  0x20   : > { %292 = vst.msk [vmem:[%s234_s7 + $0x10] sm:$0xff] %vm289_vm0, %v283_v34  ;;  %293 = vst.msk [vmem:[%s234_s7 + $0x18] sm:$0xff] %vm289_vm0, %v284_v36  ;;  %v288_v41 = vmin.f32 %v280_v39, 6.0 }
  0x21   : > { %294 = vst.msk [vmem:[%s234_s7 + $0x20] sm:$0xff] %vm289_vm0, %v285_v37  ;;  %295 = vst.msk [vmem:[%s234_s7 + $0x28] sm:$0xff] %vm289_vm0, %v286_v38 }
  0x22   : > { %296 = vst.msk [vmem:[%s234_s7 + $0x30] sm:$0xff] %vm289_vm0, %v287_v40  ;;  %297 = vst.msk [vmem:[%s234_s7 + $0x38] sm:$0xff] %vm289_vm0, %v288_v41 }
  0x23 PF: > { %s13_s16 = sadd.s32 1, %s504_s16   ;;  %s602_s12 = smov %s496_s14 }
  0x24   : > { %p10_p7 = scmp.ge.s32.totalorder %s13_s16, 18   ;;  %s603_s13 = smov %s500_s15 }
  0x25   : > { %s604_s14 = smov %s607_s17  ;;  %s605_s15 = smov %s611_s18 }
  0x26   :  { %12 = sbr.rel (!%p10_p7) target bundleno = 3 (0x3), region = 68 }

// kernel: multi_decoder_3d_v2.6
= control target key start
LH: loop header
LB: loop body
LE: loop exit
PB: predicated region body
PF: predicated region fallthrough
CT: control target
= control target key end

     0   :  { %s11309_s25 = smov 0   ;;  %s11311_s26 = smov 0   ;;  %s13852_s0 = inlined_call_operand.vmem [shape: f32[2,10,10,10,8], index: 0, kind: input, shape index: {}, may-alias: {0,1,2}]   ;;  %s13853_s1 = inlined_call_operand.vmem [shape: f32[2,10,10,10,8], index: 1, kind: input, shape index: {}, may-alias: {0,1,2}]   ;;  %s13854_s2 = inlined_call_operand.vmem [shape: f32[2,10,10,10,8], index: 2, kind: input, shape index: {}, may-alias: {0,1,2}]   ;;  %s13855_s3 = inlined_call_operand.vmem [shape: f32[2,10,10,10,8], index: 3, kind: input, shape index: {}, may-alias: {3,4,5}]   ;;  %s13856_s4 = inlined_call_operand.vmem [shape: f32[2,10,10,10,8], index: 4, kind: input, shape index: {}, may-alias: {3,4,5}]   ;;  %s13857_s5 = inlined_call_operand.vmem [shape: f32[2,10,10,10,8], index: 5, kind: input, shape index: {}, may-alias: {3,4,5}]   ;;  %s13858_s6 = inlined_call_operand.vmem [shape: f32[2,1,8], index: 6, kind: input, shape index: {}]   ;;  %s13859_s7 = inlined_call_operand.vmem [shape: f32[2,1,8], index: 7, kind: input, shape index: {}]   ;;  %s13860_s8 = inlined_call_operand.vmem [shape: f32[10,10,1], index: 8, kind: input, shape index: {}]   ;;  %s13861_s9 = inlined_call_operand.vmem [shape: f32[27,8,8], index: 9, kind: input, shape index: {}]   ;;  %s13862_s10 = inlined_call_operand.vmem [shape: f32[27,8,8], index: 10, kind: input, shape index: {}]   ;;  %s13863_s11 = inlined_call_operand.vmem [shape: f32[1,8], index: 11, kind: input, shape index: {}]   ;;  %s13864_s12 = inlined_call_operand.vmem [shape: f32[2,8,8,8,8], index: 12, kind: output, shape index: {0}]   ;;  %s13865_s13 = inlined_call_operand.vmem [shape: f32[2,8,2,8], index: 13, kind: output, shape index: {1}]  }
   0x1   :  { %14000 = sst [smem:[#allocation72_spill]] %s13852_s0  ;;  %s11313_s27 = smov 0  }
   0x2   :  { %14001 = sst [smem:[#allocation73_spill]] %s13856_s4  ;;  %s11315_s28 = smov 0  }
   0x3   :  { %s11317_s29 = smov 0  }
   0x4 LB: > { %s33_s30 = sadd.s32 1, %s11228_s27  ;;  %s36_s14 = sadd.s32 1, %s11232_s28  ;;  %s11236_s29 = sphi %s11317_s29, %s24_s29   ;;  %s11232_s28 = sphi %s11315_s28, %s14213_s28   ;;  %s11228_s27 = sphi %s11313_s27, %s14212_s27   ;;  %s11224_s26 = sphi %s11311_s26, %s14211_s26   ;;  %s11220_s25 = sphi %s11309_s25, %s14210_s25  }
   0x5   : > { %p34_p0 = scmp.ge.s32.totalorder %s33_s30, 8  ;;  %p8948_p1 = scmp.ge.s32.totalorder %s11236_s29, 1 }
   0x6   : > { %p524_p2 = scmp.lt.s32.totalorder %s11236_s29, 17 }
   0x7   : > { %s14215_s30 = smov (%p34_p0, %s33_s30), 0  ;;  %s14217_s14 = smov (!%p34_p0, %s36_s14), %s11232_s28 }
   0x8   : > { %p525_p3 = pnand %p8948_p1, %p524_p2  ;;  %p38_p4 = scmp.ge.s32.totalorder %s14217_s14, 2 }
   0xa   : > { %s14219_s14 = smov (%p38_p4, %s14217_s14), 0  ;;  %528 = sbr.rel (%p525_p3) target bundleno = 844 (0x34c), region = 68 }
   0xb   : > { %14002 = sst [smem:[#allocation2_spill]] %s14219_s14 }
  0x11   : > { %s754_s15 = sadd.s32 4294967295, %s11220_s25  ;;  %v11238_v0 = vmov 0   ;;  %v11347_v1 = vld [vmem:[%s13860_s8 + $0x20] sm:$0xff]  ;;  %p3384_p8 = scmp.ge.s32.totalorder %s11220_s25, 0  ;;  %v11361_v4 = vld [vmem:[%s13860_s8 + $0x30] sm:$0xff]  ;;  %v9206_v17 = vld [vmem:[%s13862_s10 + $0x68] sm:$0xff] }
  0x12   : > { %11172 = vset.pattern.permute.xlu1 %v11238_v0  ;;  %11171 = vset.pattern.permute.xlu0 %v11238_v0  ;;  %p755_p5 = scmp.ge.s32.totalorder %s754_s15, 0  ;;  %p756_p6 = scmp.lt.s32.totalorder %s754_s15, 8  ;;  %v11352_v2 = vld [vmem:[%s13860_s8] sm:$0xff]  ;;  %v11366_v5 = vld [vmem:[%s13860_s8 + $0x10] sm:$0xff]  ;;  %v11431_v20 = vld [vmem:[%s13860_s8 + $0x18] sm:$0x3] }
  0x13   : > { %p3385_p9 = scmp.lt.s32.totalorder %s11220_s25, 8  ;;  %p639_p10 = scmp.lt.s32.totalorder %s11224_s26, 1  ;;  %v11387_v10 = vld [vmem:[%s13860_s8 + $0x50] sm:$0xff]  ;;  %v11392_v11 = vld [vmem:[%s13860_s8 + $0x40] sm:$0xff]  ;;  %10316 = vmatprep.subr.mxu0 %v9206_v17  ;;  %v11453_v24 = vld [vmem:[%s13860_s8 + $0x8] sm:$0x3] }
  0x14   : > { %p757_p7 = pnand %p756_p6, %p755_p5  ;;  %s11382_s16 = sadd.s32 1, %s11220_s25  ;;  %v1033_v12 = vld [vmem:[%s13861_s9] sm:$0xff]  ;;  %v11410_v15 = vld [vmem:[%s13860_s8 + $0x70] sm:$0xff]  ;;  %10317 = vmatpush3.msra.mxu0 %v9206_v17  ;;  %v11464_v27 = vld [vmem:[%s13860_s8 + $0x28] sm:$0x3]  ;;  %vm1318_vm0 = vcmask 1046528  }
  0x15   : > { %p11377_p11 = pnand %p3385_p9, %p3384_p8  ;;  %p651_p12 = scmp.lt.s32.totalorder %s11382_s16, 9  ;;  %v11415_v16 = vld [vmem:[%s13860_s8 + $0x60] sm:$0xff]  ;;  %9938 = vmatprep.subr.mxu1 %v1033_v12  ;;  %v11489_v36 = vld [vmem:[%s13860_s8 + $0x38] sm:$0x3]  ;;  %vm1034_vm1 = vcmask 64512   ;;  %v9215_v53 = vld [vmem:[%s13861_s9 + $0x70] sm:$0xff] }
  0x16   : > { %s8961_s18 = scalar_select %p757_p7, 0.0, 1.0  ;;  %9939 = vmatpush3.msra.mxu1 %v1033_v12  ;;  %v11517_v46 = vld [vmem:[%s13860_s8 + $0x48] sm:$0x3]  ;;  %v11535_v52 = vld [vmem:[%s13862_s10] sm:$0xff]  ;;  %10330 = vmatprep.subr.mxu0 %v9215_v53  ;;  %vm1637_vm2 = vcmask 1045504  }
  0x17   : > { %s14221_s26 = smov (!%p639_p10, %s11224_s26), 1  ;;  %s14004_s4 = sld [smem:[#allocation73_spill]]  ;;  %9952 = vmatprep.subr.mxu1 %v11535_v52  ;;  %v11560_v62 = vld [vmem:[%s13860_s8 + $0x58] sm:$0x3]  ;;  %vm8675_vm3 = vcmask 1040384   ;;  %vm8677_vm4 = vcmask 58368  }
  0x18   : > { %v11356_v3 = vstv %s8961_s18  ;;  %s9124_s23 = scalar_select %p11377_p11, 0.0, 1.0 }
  0x19   : > { %v765_v6 = vmul.f32 %v11356_v3, %v11347_v1  ;;  %v761_v7 = vmul.f32 %v11356_v3, %v11352_v2  ;;  %v767_v8 = vmul.f32 %v11356_v3, %v11361_v4  ;;  %v763_v9 = vmul.f32 %v11356_v3, %v11366_v5  ;;  %s652_s22 = scalar_select %p651_p12, %s11382_s16, 9 }
  0x1a   : > { %v771_v13 = vmul.f32 %v11356_v3, %v11387_v10  ;;  %v769_v14 = vmul.f32 %v11356_v3, %v11392_v11  ;;  %s11422_s14 = smul.u32 200, %s14221_s26  ;;  %v775_v18 = vmul.f32 %v11356_v3, %v11410_v15  ;;  %v773_v19 = vmul.f32 %v11356_v3, %v11415_v16  ;;  %p6001_p13 = scmp.ge.s32.totalorder %s11382_s16, 0 }
  0x1b   : > { %915 = vperm.xlu1 %11172, %v765_v6   ;;  %895 = vperm.xlu0 %11171, %v761_v7   ;;  %s11128_s15 = smul.u32 20, %s652_s22  ;;  %v11433_v21 = vstv %s9124_s23  ;;  %p6002_p0 = scmp.lt.s32.totalorder %s11382_s16, 8 }
  0x1c   : > { %v3393_v22 = vmul.f32 %v11433_v21, %v11431_v20  ;;  %v3392_v23 = vmul.f32 %v11433_v21, %v11366_v5  ;;  %v11468_v28 = vmul.f32 %v11433_v21, %v11453_v24  ;;  %v11472_v29 = vmul.f32 %v11433_v21, %v11352_v2  ;;  %p641_p2 = scmp.lt.s32.totalorder %s11220_s25, 9  ;;  %s14013_s0 = sld [smem:[#allocation72_spill]] }
  0x1d   : > { %s11436_s18 = sadd.s32 %s11128_s15, %s11422_s14  ;;  %v3395_v33 = vmul.f32 %v11433_v21, %v11464_v27  ;;  %v3394_v34 = vmul.f32 %v11433_v21, %v11347_v1  ;;  %v3397_v42 = vmul.f32 %v11433_v21, %v11489_v36  ;;  %v3396_v43 = vmul.f32 %v11433_v21, %v11361_v4  ;;  %p6003_p1 = pnand %p6002_p0, %p6001_p13 }
  0x1e   : > { %s13866_s19 = sshll.u32 %s11436_s18, 3  ;;  %v3399_v58 = vmul.f32 %v11433_v21, %v11517_v46  ;;  %v3398_v59 = vmul.f32 %v11433_v21, %v11392_v11  ;;  %v3401_v17 = vmul.f32 %v11433_v21, %v11560_v62  ;;  %s11735_s17 = scalar_lea.vmem %s13859_s7, %s14221_s26 }
  0x1f   : > { %925 = vperm.xlu1 %11172, %v767_v8   ;;  %905 = vperm.xlu0 %11171, %v763_v9   ;;  %s11444_s22 = scalar_lea.vmem %s14004_s4, %s13866_s19  ;;  %s14014_s4 = sshll.u32 %s11436_s18, 3 }
  0x20   : > { %v11456_v25 = vld [vmem:[%s11444_s22 + $0x10] sm:$0xff]  ;;  %v11459_v26 = vld [vmem:[%s11444_s22 + $0x18] sm:$0x3]  ;;  %v11477_v32 = vld [vmem:[%s11444_s22 + $0x20] sm:$0xff]  ;;  %s9287_s16 = scalar_select %p6003_p1, 0.0, 1.0 }
  0x21   : > { %v4102_v30 = vrot.slane %v11456_v25, 1  ;;  %v4103_v31 = vrot.slane %v11459_v26, 1  ;;  %v11484_v35 = vld [vmem:[%s11444_s22 + $0x28] sm:$0x3]  ;;  %v4105_v38 = vrot.slane %v11477_v32, 1  ;;  %v11499_v40 = vld [vmem:[%s11444_s22 + $0x30] sm:$0xff]  ;;  %s11763_s24 = scalar_lea.vmem %s13853_s1, %s14014_s4 }
  0x22   : > { %v4106_v39 = vrot.slane %v11484_v35, 1  ;;  %v11502_v41 = vld [vmem:[%s11444_s22 + $0x38] sm:$0x3]  ;;  %v11509_v44 = vld [vmem:[%s11444_s22 + $0x40] sm:$0xff]  ;;  %v11512_v45 = vld [vmem:[%s11444_s22 + $0x48] sm:$0x3] }
  0x23   : > { %945 = vperm.xlu1 %11172, %v771_v13   ;;  %935 = vperm.xlu0 %11171, %v769_v14   ;;  %v11492_v37 = vsel %vm1318_vm0, %v4102_v30, %v4103_v31  ;;  %v11523_v48 = vld [vmem:[%s11444_s22 + $0x50] sm:$0xff]  ;;  %v4108_v49 = vrot.slane %v11499_v40, 1  ;;  %v4109_v50 = vrot.slane %v11502_v41, 1  ;;  %v11530_v51 = vld [vmem:[%s11444_s22 + $0x58] sm:$0x3]  ;;  %v4111_v54 = vrot.slane %v11509_v44, 1 }
  0x24   : > { %14005 = vst [vmem:[#allocation3_spill] sm:$0xff] %v11492_v37  ;;  %10318 = vmatprep.mubr.msk.f32.mxu0 %vm1034_vm1, %v11492_v37  ;;  %v11520_v47 = vsel %vm1318_vm0, %v4105_v38, %v4106_v39  ;;  %v4112_v55 = vrot.slane %v11512_v45, 1  ;;  %v11543_v56 = vld [vmem:[%s11444_s22 + $0x60] sm:$0xff]  ;;  %v11546_v57 = vld [vmem:[%s11444_s22 + $0x68] sm:$0x3]  ;;  %v4114_v61 = vrot.slane %v11523_v48, 1  ;;  %v3402_v38 = vmul.f32 %v11433_v21, %v11415_v16 }
  0x25   : > { %14006 = vst [vmem:[#allocation4_spill] sm:$0xff] %v11520_v47  ;;  %10319 = vmatmul.mubr.msk.f32.vlgmr.msra.gmra.mrb[0].mxu0 %vm1034_vm1, %v11520_v47  ;;  %v11554_v60 = vsel %vm1318_vm0, %v4108_v49, %v4109_v50  ;;  %v4115_v0 = vrot.slane %v11530_v51, 1  ;;  %v4117_v6 = vrot.slane %v11543_v56, 1  ;;  %v4118_v7 = vrot.slane %v11546_v57, 1  ;;  %v11573_v8 = vld [vmem:[%s11444_s22 + $0x70] sm:$0xff]  ;;  %v11582_v13 = vld [vmem:[%s11444_s22 + $0x80] sm:$0xff] }
  0x26   : > { %14007 = vst [vmem:[#allocation5_spill] sm:$0xff] %v11554_v60  ;;  %10321 = vmatprep.mubr.msk.f32.mxu0 %vm1034_vm1, %v11554_v60  ;;  %v11565_v63 = vsel %vm1318_vm0, %v4111_v54, %v4112_v55  ;;  %10331 = vmatpush3.msra.mxu0 %v9215_v53  ;;  %v11579_v12 = vld [vmem:[%s11444_s22 + $0x78] sm:$0x3]  ;;  %v11585_v14 = vld [vmem:[%s11444_s22 + $0x88] sm:$0x3]  ;;  %v4922_v31 = vrot.slane %v11582_v13, 1  ;;  %v3404_v50 = vmul.f32 %v11433_v21, %v11410_v15 }
  0x27   : > { %965 = vperm.xlu1 %11172, %v775_v18   ;;  %955 = vperm.xlu0 %11171, %v773_v19   ;;  %14008 = vst [vmem:[#allocation6_spill] sm:$0xff] %v11565_v63  ;;  %v11576_v9 = vsel %vm1318_vm0, %v4114_v61, %v4115_v0  ;;  %v3400_v18 = vmul.f32 %v11433_v21, %v11387_v10  ;;  %v11594_v19 = vld [vmem:[%s13860_s8 + $0x68] sm:$0x3]  ;;  %v4121_v30 = vrot.slane %v11579_v12, 1  ;;  %v11638_v54 = vld [vmem:[%s13860_s8 + $0x80] sm:$0xff]  ;;  %s642_s20 = scalar_select %p641_p2, %s11220_s25, 9 }
  0x28   : > { %14009 = vst [vmem:[#allocation7_spill] sm:$0xff] %v11576_v9  ;;  %v11633_v53 = vld [vmem:[%s13860_s8 + $0x88] sm:$0x3]  ;;  %v764_v61 = vmul.f32 %v11356_v3, %v11431_v20  ;;  %v762_v0 = vmul.f32 %v11356_v3, %v11453_v24  ;;  %s659_s4 = sadd.s32 2, %s11220_s25  ;;  %p709_p4 = scmp.lt.s32.totalorder %s11220_s25, 7 }
  0x29   : > { %10322 = vmatmul.mubr.msk.f32.gmra.mrb[2].mxu0 %vm1034_vm1, %v11565_v63  ;;  %v3407_v55 = vmul.f32 %v11433_v21, %v11633_v53  ;;  %s11126_s21 = smul.u32 20, %s642_s20  ;;  %p662_p3 = scmp.lt.s32.totalorder %s659_s4, 9 }
  0x2a   : > { %10324 = vmatprep.mubr.msk.f32.mxu0 %vm1034_vm1, %v11576_v9  ;;  %s14225_s25 = smov (!%p709_p4, %s11220_s25), 7  ;;  %s8958_s19 = sshll.u32 %s14221_s26, 3 }
  0x2b   : > { %3527 = vperm.xlu1 %11172, %v3393_v22   ;;  %3522 = vperm.xlu0 %11171, %v3392_v23   ;;  %v11597_v22 = vsel %vm1318_vm0, %v4117_v6, %v4118_v7  ;;  %v4120_v23 = vrot.slane %v11573_v8, 1  ;;  %v768_v6 = vmul.f32 %v11356_v3, %v11489_v36  ;;  %v766_v7 = vmul.f32 %v11356_v3, %v11464_v27  ;;  %s11709_s23 = sadd.s32 %s11422_s14, %s11126_s21  ;;  %s11725_s21 = scalar_lea.vmem %s13858_s6, %s14221_s26 }
  0x2c   : > { %14010 = vst [vmem:[#allocation8_spill] sm:$0xff] %v11597_v22  ;;  %s8949_s15 = sshll.u32 %s11709_s23, 3  ;;  %s14223_s4 = smov (!%p662_p3, %s659_s4), 9 }
  0x2d   : > { %10325 = vmatmul.mubr.msk.f32.gmra.mrb[4].mxu0 %vm1034_vm1, %v11597_v22  ;;  %v11612_v39 = vsel %vm1318_vm0, %v4120_v23, %v4121_v30  ;;  %v774_v30 = vmul.f32 %v11356_v3, %v11594_v19  ;;  %s11834_s18 = scalar_lea.vmem %s13855_s3, %s8949_s15  ;;  %s11129_s23 = smul.u32 20, %s14223_s4 }
  0x2e   : > { %14011 = vst [vmem:[#allocation9_spill] sm:$0xff] %v11612_v39  ;;  %10327 = vmatprep.mubr.msk.f32.mxu0 %vm1034_vm1, %v11612_v39 }
  0x2f   : > { %3537 = vperm.xlu1 %11172, %v3395_v33   ;;  %3532 = vperm.xlu0 %11171, %v3394_v34   ;;  %v4923_v33 = vrot.slane %v11585_v14, 1  ;;  %v3403_v34 = vmul.f32 %v11433_v21, %v11594_v19 }
  0x33   : > { %3547 = vperm.xlu1 %11172, %v3397_v42   ;;  %3542 = vperm.xlu0 %11171, %v3396_v43   ;;  %v11615_v42 = vsel %vm1318_vm0, %v4922_v31, %v4923_v33  ;;  %v11620_v43 = vld [vmem:[%s13860_s8 + $0x78] sm:$0x3]  ;;  %v11676_v33 = vld [vmem:[%s13860_s8 + $0x90] sm:$0xff] }
  0x34   : > { %14012 = vst [vmem:[#allocation10_spill] sm:$0xff] %v11615_v42  ;;  %10328 = vmatmul.mubr.msk.f32.gmra.mrb[6].mxu0 %vm1034_vm1, %v11615_v42  ;;  %v3405_v49 = vmul.f32 %v11433_v21, %v11620_v43  ;;  %v776_v23 = vmul.f32 %v11356_v3, %v11620_v43  ;;  %v11671_v31 = vld [vmem:[%s13860_s8 + $0x98] sm:$0x3]  ;;  %v11911_v42 = vld [vmem:[%s11834_s18 + $0x40] sm:$0xff] }
  0x37   : > { %3557 = vperm.xlu1 %11172, %v3399_v58   ;;  %3552 = vperm.xlu0 %11171, %v3398_v59   ;;  %v3406_v58 = vmul.f32 %v11433_v21, %v11638_v54  ;;  %v11647_v59 = vld [vmem:[%s13862_s10 + $0x70] sm:$0xff] }
  0x38   : > { %10344 = vmatprep.subr.mxu0 %v11647_v59 }
  0x3b   : > { %3567 = vperm.xlu1 %11172, %v3401_v17   ;;  %3562 = vperm.xlu0 %11171, %v3400_v18   ;;  %v772_v17 = vmul.f32 %v11356_v3, %v11560_v62  ;;  %v770_v18 = vmul.f32 %v11356_v3, %v11517_v46 }
  0x3f   : > { %3577 = vperm.xlu1 %11172, %v3403_v34   ;;  %3572 = vperm.xlu0 %11171, %v3402_v38   ;;  %v3409_v34 = vmul.f32 %v11433_v21, %v11671_v31  ;;  %v3408_v38 = vmul.f32 %v11433_v21, %v11676_v33 }
  0x43   : > { %3587 = vperm.xlu1 %11172, %v3405_v49   ;;  %3582 = vperm.xlu0 %11171, %v3404_v50   ;;  %v778_v49 = vmul.f32 %v11356_v3, %v11633_v53  ;;  %v777_v50 = vmul.f32 %v11356_v3, %v11638_v54 }
  0x47   : > { %3597 = vperm.xlu1 %11172, %v3407_v55   ;;  %3592 = vperm.xlu0 %11171, %v3406_v58   ;;  %v6006_v55 = vstv %s9287_s16  ;;  %s11719_s16 = scalar_lea.vmem %s14013_s0, %s8949_s15  ;;  %s12536_s15 = sadd.s32 %s11129_s23, %s11422_s14 }
  0x48   : > { %v6009_v58 = vmul.f32 %v6006_v55, %v11366_v5  ;;  %v6013_v21 = vmul.f32 %v6006_v55, %v11361_v4  ;;  %v6021_v5 = vmul.f32 %v6006_v55, %v11410_v15  ;;  %v6010_v4 = vmul.f32 %v6006_v55, %v11431_v20  ;;  %v788_v63 = vld [vmem:[%s11719_s16 + $0x38] sm:$0x3]  ;;  %s8951_s14 = sshll.u32 %s12536_s15, 3 }
  0x49   : > { %v6016_v15 = vmul.f32 %v6006_v55, %v11517_v46  ;;  %v6020_v20 = vmul.f32 %v6006_v55, %v11594_v19  ;;  %v6023_v46 = vmul.f32 %v6006_v55, %v11638_v54  ;;  %v6026_v19 = vmul.f32 %v6006_v55, %v11671_v31  ;;  %v11743_v54 = vld [vmem:[%s11735_s17] ss:$0 sm:$0xff]  ;;  %s12564_s4 = scalar_lea.vmem %s13854_s2, %s8951_s14  ;;  %s12730_s23 = scalar_lea.vmem %s13857_s5, %s8951_s14 }
  0x4b   : > { %910 = vperm.xlu1 %11172, %v764_v61   ;;  %900 = vperm.xlu0 %11171, %v762_v0   ;;  %v6007_v61 = vmul.f32 %v6006_v55, %v11352_v2  ;;  %v6011_v0 = vmul.f32 %v6006_v55, %v11347_v1  ;;  %v6019_v2 = vmul.f32 %v6006_v55, %v11415_v16 }
  0x4c   : > { %v6008_v1 = vmul.f32 %v6006_v55, %v11453_v24  ;;  %v6022_v16 = vmul.f32 %v6006_v55, %v11620_v43  ;;  %v780_v24 = vmul.f32 %v11356_v3, %v11671_v31  ;;  %v6025_v43 = vmul.f32 %v6006_v55, %v11676_v33 }
  0x4f   : > { %930 = vperm.xlu1 %11172, %v768_v6   ;;  %920 = vperm.xlu0 %11171, %v766_v7   ;;  %v6017_v6 = vmul.f32 %v6006_v55, %v11387_v10  ;;  %v6015_v7 = vmul.f32 %v6006_v55, %v11392_v11  ;;  %v6012_v10 = vmul.f32 %v6006_v55, %v11464_v27 }
  0x50   : > { %v6018_v11 = vmul.f32 %v6006_v55, %v11560_v62  ;;  %v779_v27 = vmul.f32 %v11356_v3, %v11676_v33  ;;  %v11728_v3 = vld [vmem:[%s11725_s21] ss:$0 sm:$0xff] }
  0x51   : > { %v781_v62 = vld [vmem:[%s11719_s16] sm:$0xff] }
  0x53   : > { %950 = vperm.xlu1 %11172, %v772_v17   ;;  %940 = vperm.xlu0 %11171, %v770_v18   ;;  %v6014_v17 = vmul.f32 %v6006_v55, %v11489_v36  ;;  %v6024_v36 = vmul.f32 %v6006_v55, %v11633_v53  ;;  %v807_v53 = vmul.f32 %v11728_v3, %v781_v62  ;;  %v783_v18 = vld [vmem:[%s11719_s16 + $0x10] sm:$0xff] }
  0x57   : > { %970 = vperm.xlu1 %11172, %v776_v23   ;;  %960 = vperm.xlu0 %11171, %v774_v30   ;;  %v785_v23 = vld [vmem:[%s11719_s16 + $0x20] sm:$0xff]  ;;  %v833_v30 = vadd.f32 %v11743_v54, %v807_v53 }
  0x58   : > { %v811_v31 = vmul.f32 %v11728_v3, %v785_v23 }
  0x5b   : > { %3607 = vperm.xlu1 %11172, %v3409_v34   ;;  %3602 = vperm.xlu0 %11171, %v3408_v38   ;;  %v789_v34 = vld [vmem:[%s11719_s16 + $0x40] sm:$0xff]  ;;  %v791_v38 = vld [vmem:[%s11719_s16 + $0x50] sm:$0xff] }
  0x5f   : > { %980 = vperm.xlu1 %11172, %v778_v49   ;;  %975 = vperm.xlu0 %11171, %v777_v50   ;;  %v815_v49 = vmul.f32 %v11728_v3, %v789_v34  ;;  %v853_v50 = vmax.f32 %v833_v30, 0.0 }
  0x63   : > { %6139 = vperm.xlu1 %11172, %v6009_v58   ;;  %6129 = vperm.xlu0 %11171, %v6007_v61   ;;  %v837_v58 = vadd.f32 %v11743_v54, %v811_v31  ;;  %v793_v61 = vld [vmem:[%s11719_s16 + $0x60] sm:$0xff] }
  0x67   : > { %6159 = vperm.xlu1 %11172, %v6013_v21   ;;  %6149 = vperm.xlu0 %11171, %v6011_v0   ;;  %v817_v21 = vmul.f32 %v11728_v3, %v791_v38 }
  0x6b   : > { %6179 = vperm.xlu1 %11172, %v6017_v6   ;;  %6169 = vperm.xlu0 %11171, %v6015_v7   ;;  %v841_v6 = vadd.f32 %v11743_v54, %v815_v49  ;;  %v795_v7 = vld [vmem:[%s11719_s16 + $0x70] sm:$0xff] }
  0x6f   : > { %6199 = vperm.xlu1 %11172, %v6021_v5   ;;  %6189 = vperm.xlu0 %11171, %v6019_v2   ;;  %v873_v5 = vmin.f32 %v853_v50, 6.0 }
  0x73   : > { %6144 = vperm.xlu1 %11172, %v6010_v4   ;;  %6134 = vperm.xlu0 %11171, %v6008_v1   ;;  %v819_v4 = vmul.f32 %v11728_v3, %v793_v61  ;;  %v3413_v1 = vld [vmem:[%s11763_s24 + $0x18] sm:$0x3] }
  0x77   : > { %6164 = vperm.xlu1 %11172, %v6014_v17   ;;  %6154 = vperm.xlu0 %11171, %v6012_v10   ;;  %v857_v17 = vmax.f32 %v837_v58, 0.0  ;;  %v3412_v10 = vld [vmem:[%s11763_s24 + $0x10] sm:$0xff] }
  0x78   : > { %v3432_v53 = vmul.f32 %v11728_v3, %v3412_v10 }
  0x79   : > { %v877_v23 = vmin.f32 %v857_v17, 6.0 }
  0x7a   : > { %v3452_v61 = vadd.f32 %v11743_v54, %v3432_v53 }
  0x7b   : > { %6184 = vperm.xlu1 %11172, %v6018_v11   ;;  %6174 = vperm.xlu0 %11171, %v6016_v15   ;;  %v843_v11 = vadd.f32 %v11743_v54, %v817_v21  ;;  %v821_v15 = vmul.f32 %v11728_v3, %v795_v7  ;;  %v3417_v21 = vld [vmem:[%s11763_s24 + $0x38] sm:$0x3]  ;;  %v11797_v7 = vld [vmem:[%s13861_s9 + $0x8] sm:$0xff] }
  0x7d   : > { %v863_v30 = vmax.f32 %v843_v11, 0.0 }
  0x7f   : > { %6204 = vperm.xlu1 %11172, %v6022_v16   ;;  %6194 = vperm.xlu0 %11171, %v6020_v20  }
  0x83   : > { %990 = vperm.xlu1 %11172, %v780_v24   ;;  %985 = vperm.xlu0 %11171, %v779_v27   ;;  %v861_v27 = vmax.f32 %v841_v6, 0.0 }
  0x87   : > { %6214 = vperm.xlu1 %11172, %v6024_v36   ;;  %6209 = vperm.xlu0 %11171, %v6023_v46   ;;  %v3433_v36 = vmul.f32 %v11728_v3, %v3413_v1  ;;  %v3415_v46 = vld [vmem:[%s11763_s24 + $0x28] sm:$0x3] }
  0x89   : > { %v3453_v38 = vadd.f32 %v11743_v54, %v3433_v36 }
  0x8b   : > { %3517 = vperm.xlu1 %11172, %v11468_v28   ;;  %3512 = vperm.xlu0 %11171, %v11472_v29   ;;  %v787_v28 = vld [vmem:[%s11719_s16 + $0x30] sm:$0xff]  ;;  %v809_v29 = vmul.f32 %v11728_v3, %v783_v18  ;;  %v3414_v18 = vld [vmem:[%s11763_s24 + $0x20] sm:$0xff]  ;;  %v3473_v10 = vmax.f32 %v3453_v38, 0.0 }
  0x8c   : > { %v813_v33 = vmul.f32 %v11728_v3, %v787_v28  ;;  %v847_v28 = vadd.f32 %v11743_v54, %v821_v15  ;;  %v3434_v49 = vmul.f32 %v11728_v3, %v3414_v18  ;;  %v3437_v15 = vmul.f32 %v11728_v3, %v3417_v21 }
  0x8d   : > { %v835_v55 = vadd.f32 %v11743_v54, %v809_v29  ;;  %v3435_v29 = vmul.f32 %v11728_v3, %v3415_v46  ;;  %v3472_v46 = vmax.f32 %v3452_v61, 0.0 }
  0x8e   : > { %v839_v0 = vadd.f32 %v11743_v54, %v813_v33  ;;  %v3454_v11 = vadd.f32 %v11743_v54, %v3434_v49 }
  0x8f   : > { %6224 = vperm.xlu1 %11172, %v6026_v19   ;;  %6219 = vperm.xlu0 %11171, %v6025_v43   ;;  %v855_v2 = vmax.f32 %v835_v55, 0.0  ;;  %v845_v43 = vadd.f32 %v11743_v54, %v819_v4  ;;  %v881_v55 = vmin.f32 %v861_v27, 6.0  ;;  %v3455_v4 = vadd.f32 %v11743_v54, %v3435_v29 }
  0x90   : > { %v859_v24 = vmax.f32 %v839_v0, 0.0  ;;  %v3416_v0 = vld [vmem:[%s11763_s24 + $0x30] sm:$0xff]  ;;  %v3457_v29 = vadd.f32 %v11743_v54, %v3437_v15  ;;  %v3492_v49 = vmin.f32 %v3472_v46, 6.0  ;;  %v3422_v46 = vld [vmem:[%s11763_s24 + $0x60] sm:$0xff] }
  0x91   : > { %v875_v19 = vmin.f32 %v855_v2, 6.0  ;;  %v865_v58 = vmax.f32 %v845_v43, 0.0  ;;  %v867_v2 = vmax.f32 %v847_v28, 0.0  ;;  %v3475_v43 = vmax.f32 %v3455_v4, 0.0 }
  0x92   : > { %v879_v31 = vmin.f32 %v859_v24, 6.0  ;;  %v3474_v28 = vmax.f32 %v3454_v11, 0.0 }
  0x93   : > { %v885_v36 = vmin.f32 %v865_v58, 6.0  ;;  %v3420_v58 = vld [vmem:[%s11763_s24 + $0x50] sm:$0xff]  ;;  %v3495_v61 = vmin.f32 %v3475_v43, 6.0 }
  0x94   : > { %v3440_v11 = vmul.f32 %v11728_v3, %v3420_v58 }
  0x9a   : > { %v916_v16 = vpop.permute.xlu1 %915  ;;  %v896_v20 = vpop.permute.xlu0 %895 }
  0x9b   : > { %v11776_v62 = vmul.f32 %v896_v20, %v873_v5  ;;  %v11792_v6 = vmul.f32 %v916_v16, %v877_v23  ;;  %v883_v5 = vmin.f32 %v863_v30, 6.0  ;;  %v3436_v16 = vmul.f32 %v11728_v3, %v3416_v0  ;;  %v3419_v20 = vld [vmem:[%s11763_s24 + $0x48] sm:$0x3] }
  0x9c   : > { %v3439_v53 = vmul.f32 %v11728_v3, %v3419_v20  ;;  %v3493_v30 = vmin.f32 %v3473_v10, 6.0 }
  0x9d   : > { %9940 = vmatprep.mubr.msk.f32.mxu1 %vm1034_vm1, %v11776_v62 }
  0x9e   : > { %v926_v34 = vpop.permute.xlu1 %925  ;;  %v906_v33 = vpop.permute.xlu0 %905  ;;  %v3459_v21 = vadd.f32 %v11743_v54, %v3439_v53 }
  0x9f   : > { %v11787_v50 = vmul.f32 %v906_v33, %v875_v19  ;;  %v11809_v24 = vmul.f32 %v926_v34, %v879_v31  ;;  %v3418_v19 = vld [vmem:[%s11763_s24 + $0x40] sm:$0xff]  ;;  %v3456_v34 = vadd.f32 %v11743_v54, %v3436_v16  ;;  %v3421_v31 = vld [vmem:[%s11763_s24 + $0x58] sm:$0x3] }
  0xa0   : > { %v3441_v0 = vmul.f32 %v11728_v3, %v3421_v31  ;;  %v3460_v31 = vadd.f32 %v11743_v54, %v3440_v11 }
  0xa1   : > { %9941 = vmatmul.mubr.msk.f32.vlgmr.msra.gmra.mrb[0].mxu1 %vm1034_vm1, %v11787_v50  ;;  %v3476_v10 = vmax.f32 %v3456_v34, 0.0 }
  0xa2   : > { %v946_v1 = vpop.permute.xlu1 %945  ;;  %v936_v17 = vpop.permute.xlu0 %935  ;;  %9943 = vmatprep.mubr.msk.f32.mxu1 %vm1034_vm1, %v11792_v6  ;;  %9953 = vmatpush3.msra.mxu1 %v11535_v52  ;;  %v887_v52 = vmin.f32 %v867_v2, 6.0 }
  0xa3   : > { %v11811_v27 = vmul.f32 %v936_v17, %v881_v55  ;;  %9966 = vmatprep.subr.mxu1 %v11797_v7  ;;  %v11823_v33 = vmul.f32 %v946_v1, %v883_v5  ;;  %v3438_v55 = vmul.f32 %v11728_v3, %v3418_v19  ;;  %v3423_v5 = vld [vmem:[%s11763_s24 + $0x68] sm:$0x3]  ;;  %v3494_v1 = vmin.f32 %v3474_v28, 6.0  ;;  %v11853_v19 = vld [vmem:[%s11834_s18] sm:$0xff] }
  0xa4   : > { %v3477_v17 = vmax.f32 %v3457_v29, 0.0  ;;  %v3443_v43 = vmul.f32 %v11728_v3, %v3423_v5  ;;  %v3496_v34 = vmin.f32 %v3476_v10, 6.0 }
  0xa5   : > { %9944 = vmatmul.mubr.msk.f32.gmra.mrb[2].mxu1 %vm1034_vm1, %v11809_v24 }
  0xa6   : > { %v966_v18 = vpop.permute.xlu1 %965  ;;  %v956_v23 = vpop.permute.xlu0 %955  ;;  %9946 = vmatprep.mubr.msk.f32.mxu1 %vm1034_vm1, %v11811_v27  ;;  %v3497_v29 = vmin.f32 %v3477_v17, 6.0  ;;  %v11878_v17 = vld [vmem:[%s11834_s18 + $0x20] sm:$0xff]  ;;  %v3463_v10 = vadd.f32 %v11743_v54, %v3443_v43 }
  0xa7   : > { %v11825_v38 = vmul.f32 %v956_v23, %v885_v36  ;;  %v11844_v15 = vmul.f32 %v966_v18, %v887_v52  ;;  %v3458_v36 = vadd.f32 %v11743_v54, %v3438_v55  ;;  %v3479_v18 = vmax.f32 %v3459_v21, 0.0  ;;  %v11866_v55 = vld [vmem:[%s11834_s18 + $0x10] sm:$0xff] }
  0xa8   : > { %v3461_v23 = vadd.f32 %v11743_v54, %v3441_v0 }
  0xa9   : > { %9947 = vmatmul.mubr.msk.f32.gmra.mrb[4].mxu1 %vm1034_vm1, %v11823_v33  ;;  %v3478_v5 = vmax.f32 %v3458_v36, 0.0  ;;  %v3499_v36 = vmin.f32 %v3479_v18, 6.0  ;;  %v11900_v18 = vld [vmem:[%s11834_s18 + $0x30] sm:$0xff] }
  0xaa   : > { %v3528_v2 = vpop.permute.xlu1 %3527  ;;  %v3523_v4 = vpop.permute.xlu0 %3522  ;;  %9949 = vmatprep.mubr.msk.f32.mxu1 %vm1034_vm1, %v11825_v38 }
  0xab   : > { %v11846_v16 = vmul.f32 %v3528_v2, %v3493_v30  ;;  %v11848_v20 = vmul.f32 %v3523_v4, %v3492_v49  ;;  %v3442_v49 = vmul.f32 %v11728_v3, %v3422_v46  ;;  %v3425_v2 = vld [vmem:[%s11763_s24 + $0x78] sm:$0x3]  ;;  %v3424_v4 = vld [vmem:[%s11763_s24 + $0x70] sm:$0xff]  ;;  %v3481_v46 = vmax.f32 %v3461_v23, 0.0 }
  0xac   : > { %v3444_v37 = vmul.f32 %v11728_v3, %v3424_v4 }
  0xad   : > { %14015 = vst [vmem:[#allocation11_spill] sm:$0xff] %v11846_v16  ;;  %14016 = vst [vmem:[#allocation12_spill] sm:$0xff] %v11848_v20  ;;  %v4258_v53 = vrot.slane %v11846_v16, 2  ;;  %9950 = vmatmul.mubr.msk.f32.gmra.mrb[6].mxu1 %vm1034_vm1, %v11844_v15  ;;  %v4257_v52 = vrot.slane %v11848_v20, 2  ;;  %v3501_v4 = vmin.f32 %v3481_v46, 6.0  ;;  %v11933_v46 = vld [vmem:[%s11834_s18 + $0x50] sm:$0xff] }
  0xae   : > { %v3538_v30 = vpop.permute.xlu1 %3537  ;;  %v3533_v28 = vpop.permute.xlu0 %3532  ;;  %9954 = vmatprep.mubr.msk.f32.mxu1 %vm1034_vm1, %v11853_v19 }
  0xaf   : > { %v11868_v58 = vmul.f32 %v3538_v30, %v3495_v61  ;;  %v11870_v21 = vmul.f32 %v3533_v28, %v3494_v1  ;;  %v11873_v0 = vsel %vm1637_vm2, %v4257_v52, %v4258_v53  ;;  %v11886_v61 = vld [vmem:[%s13862_s10 + $0x8] sm:$0xff]  ;;  %v3480_v30 = vmax.f32 %v3460_v31, 0.0 }
  0xb0   : > { %14019 = vst [vmem:[#allocation15_spill] sm:$0xff] %v11873_v0  ;;  %10332 = vmatprep.mubr.msk.f32.mxu0 %vm1034_vm1, %v11873_v0  ;;  %v3427_v53 = vld [vmem:[%s11763_s24 + $0x88] sm:$0x3]  ;;  %v3462_v28 = vadd.f32 %v11743_v54, %v3442_v49  ;;  %v3445_v0 = vmul.f32 %v11728_v3, %v3425_v2  ;;  %v3498_v31 = vmin.f32 %v3478_v5, 6.0  ;;  %v3426_v49 = vld [vmem:[%s11763_s24 + $0x80] sm:$0xff] }
  0xb1   : > { %14017 = vst [vmem:[#allocation13_spill] sm:$0xff] %v11868_v58  ;;  %14018 = vst [vmem:[#allocation14_spill] sm:$0xff] %v11870_v21  ;;  %v4261_v1 = vrot.slane %v11868_v58, 2  ;;  %v4260_v11 = vrot.slane %v11870_v21, 2  ;;  %9955 = vmatmul.mubr.msk.f32.vlgmr.msra.gmra.mrb[0].mxu1 %vm1034_vm1, %v11866_v55 }
  0xb2   : > { %v3548_v52 = vpop.permute.xlu1 %3547  ;;  %v3543_v43 = vpop.permute.xlu0 %3542  ;;  %9967 = vmatpush3.msra.mxu1 %v11797_v7  ;;  %9957 = vmatprep.mubr.msk.f32.mxu1 %vm1034_vm1, %v11878_v17  ;;  %v11917_v7 = vld [vmem:[%s13861_s9 + $0x78] sm:$0xff] }
  0xb3   : > { %v11902_v23 = vmul.f32 %v3548_v52, %v3497_v29  ;;  %v11904_v16 = vmul.f32 %v3543_v43, %v3496_v34  ;;  %v11907_v20 = vsel %vm1637_vm2, %v4260_v11, %v4261_v1  ;;  %9980 = vmatprep.subr.mxu1 %v11886_v61  ;;  %v3483_v29 = vmax.f32 %v3463_v10, 0.0 }
  0xb4   : > { %14022 = vst [vmem:[#allocation18_spill] sm:$0xff] %v11907_v20  ;;  %10333 = vmatmul.mubr.msk.f32.vlgmr.msra.gmra.mrb[0].mxu0 %vm1034_vm1, %v11907_v20  ;;  %v3447_v34 = vmul.f32 %v11728_v3, %v3427_v53  ;;  %v3482_v52 = vmax.f32 %v3462_v28, 0.0  ;;  %v3465_v43 = vadd.f32 %v11743_v54, %v3445_v0  ;;  %v3464_v10 = vadd.f32 %v11743_v54, %v3444_v37  ;;  %v782_v20 = vld [vmem:[%s11719_s16 + $0x8] sm:$0x3]  ;;  %v11946_v37 = vld [vmem:[%s11834_s18 + $0x60] sm:$0xff] }
  0xb5   : > { %14020 = vst [vmem:[#allocation16_spill] sm:$0xff] %v11902_v23  ;;  %14021 = vst [vmem:[#allocation17_spill] sm:$0xff] %v11904_v16  ;;  %v4264_v5 = vrot.slane %v11902_v23, 2  ;;  %v4263_v2 = vrot.slane %v11904_v16, 2  ;;  %10345 = vmatpush3.msra.mxu0 %v11647_v59  ;;  %9958 = vmatmul.mubr.msk.f32.gmra.mrb[2].mxu1 %vm1034_vm1, %v11900_v18  ;;  %v3446_v53 = vmul.f32 %v11728_v3, %v3426_v49  ;;  %v784_v59 = vld [vmem:[%s11719_s16 + $0x18] sm:$0x3] }
  0xb6   : > { %v3558_v1 = vpop.permute.xlu1 %3557  ;;  %v3553_v11 = vpop.permute.xlu0 %3552  ;;  %9960 = vmatprep.mubr.msk.f32.mxu1 %vm1034_vm1, %v11911_v42  ;;  %10358 = vmatprep.subr.mxu0 %v11917_v7  ;;  %v3500_v28 = vmin.f32 %v3480_v30, 6.0  ;;  %14026 = vst [vmem:[#allocation22_spill] sm:$0xff] %v11946_v37  ;;  %v3503_v49 = vmin.f32 %v3483_v29, 6.0  ;;  %v3467_v9 = vadd.f32 %v11743_v54, %v3447_v34  ;;  %v810_v30 = vmul.f32 %v11728_v3, %v784_v59 }
  0xb7   : > { %v11938_v39 = vmul.f32 %v3558_v1, %v3499_v36  ;;  %v11940_v22 = vmul.f32 %v3553_v11, %v3498_v31  ;;  %v11943_v0 = vsel %vm1637_vm2, %v4263_v2, %v4264_v5  ;;  %v808_v31 = vmul.f32 %v11728_v3, %v782_v20 }
  0xb8   : > { %14025 = vst [vmem:[#allocation21_spill] sm:$0xff] %v11943_v0  ;;  %10335 = vmatprep.mubr.msk.f32.mxu0 %vm1034_vm1, %v11943_v0  ;;  %v3502_v1 = vmin.f32 %v3482_v52, 6.0  ;;  %v3485_v11 = vmax.f32 %v3465_v43, 0.0  ;;  %v3484_v29 = vmax.f32 %v3464_v10, 0.0  ;;  %v3466_v34 = vadd.f32 %v11743_v54, %v3446_v53  ;;  %v11962_v0 = vld [vmem:[%s11834_s18 + $0x70] sm:$0xff] }
  0xb9   : > { %14023 = vst [vmem:[#allocation19_spill] sm:$0xff] %v11938_v39  ;;  %14024 = vst [vmem:[#allocation20_spill] sm:$0xff] %v11940_v22  ;;  %v4267_v60 = vrot.slane %v11938_v39, 2  ;;  %v4266_v36 = vrot.slane %v11940_v22, 2  ;;  %9961 = vmatmul.mubr.msk.f32.gmra.mrb[4].mxu1 %vm1034_vm1, %v11933_v46  ;;  %v814_v52 = vmul.f32 %v11728_v3, %v788_v63  ;;  %v786_v43 = vld [vmem:[%s11719_s16 + $0x28] sm:$0x3]  ;;  %v836_v23 = vadd.f32 %v11743_v54, %v810_v30 }
  0xba   : > { %v3568_v5 = vpop.permute.xlu1 %3567  ;;  %v3563_v2 = vpop.permute.xlu0 %3562  ;;  %9963 = vmatprep.mubr.msk.f32.mxu1 %vm1034_vm1, %v11946_v37  ;;  %14027 = vst [vmem:[#allocation23_spill] sm:$0xff] %v11962_v0  ;;  %v3487_v10 = vmax.f32 %v3467_v9, 0.0  ;;  %v812_v9 = vmul.f32 %v11728_v3, %v786_v43 }
  0xbb   : > { %v11964_v47 = vmul.f32 %v3568_v5, %v3501_v4  ;;  %v11966_v39 = vmul.f32 %v3563_v2, %v3500_v28  ;;  %v11969_v20 = vsel %vm1637_vm2, %v4266_v36, %v4267_v60  ;;  %v834_v4 = vadd.f32 %v11743_v54, %v808_v31  ;;  %v792_v60 = vld [vmem:[%s11719_s16 + $0x58] sm:$0x3]  ;;  %v790_v28 = vld [vmem:[%s11719_s16 + $0x48] sm:$0x3] }
  0xbc   : > { %14030 = vst [vmem:[#allocation26_spill] sm:$0xff] %v11969_v20  ;;  %10336 = vmatmul.mubr.msk.f32.gmra.mrb[2].mxu0 %vm1034_vm1, %v11969_v20  ;;  %v3505_v5 = vmin.f32 %v3485_v11, 6.0  ;;  %v3504_v2 = vmin.f32 %v3484_v29, 6.0  ;;  %v3486_v20 = vmax.f32 %v3466_v34, 0.0  ;;  %v840_v31 = vadd.f32 %v11743_v54, %v814_v52 }
  0xbd   : > { %14028 = vst [vmem:[#allocation24_spill] sm:$0xff] %v11964_v47  ;;  %14029 = vst [vmem:[#allocation25_spill] sm:$0xff] %v11966_v39  ;;  %v4270_v53 = vrot.slane %v11964_v47, 2  ;;  %v4269_v59 = vrot.slane %v11966_v39, 2  ;;  %9964 = vmatmul.mubr.msk.f32.gmra.mrb[6].mxu1 %vm1034_vm1, %v11962_v0  ;;  %v818_v0 = vmul.f32 %v11728_v3, %v792_v60  ;;  %v816_v11 = vmul.f32 %v11728_v3, %v790_v28 }
  0xbe   : > { %v3578_v36 = vpop.permute.xlu1 %3577  ;;  %v3573_v63 = vpop.permute.xlu0 %3572  ;;  %v856_v34 = vmax.f32 %v836_v23, 0.0  ;;  %v838_v52 = vadd.f32 %v11743_v54, %v812_v9  ;;  %v860_v28 = vmax.f32 %v840_v31, 0.0 }
  0xbf   : > { %v11984_v47 = vmul.f32 %v3578_v36, %v3503_v49  ;;  %v11986_v58 = vmul.f32 %v3573_v63, %v3502_v1  ;;  %v11989_v30 = vsel %vm1637_vm2, %v4269_v59, %v4270_v53  ;;  %v796_v1 = vld [vmem:[%s11719_s16 + $0x78] sm:$0x3]  ;;  %v3507_v53 = vmin.f32 %v3487_v10, 6.0 }
  0xc0   : > { %14033 = vst [vmem:[#allocation29_spill] sm:$0xff] %v11989_v30  ;;  %10338 = vmatprep.mubr.msk.f32.mxu0 %vm1034_vm1, %v11989_v30  ;;  %v3506_v59 = vmin.f32 %v3486_v20, 6.0  ;;  %v854_v63 = vmax.f32 %v834_v4, 0.0  ;;  %v844_v23 = vadd.f32 %v11743_v54, %v818_v0  ;;  %v842_v20 = vadd.f32 %v11743_v54, %v816_v11 }
  0xc1   : > { %14031 = vst [vmem:[#allocation27_spill] sm:$0xff] %v11984_v47  ;;  %14032 = vst [vmem:[#allocation28_spill] sm:$0xff] %v11986_v58  ;;  %v4273_v29 = vrot.slane %v11984_v47, 2  ;;  %v4272_v49 = vrot.slane %v11986_v58, 2  ;;  %v794_v47 = vld [vmem:[%s11719_s16 + $0x68] sm:$0x3]  ;;  %v822_v10 = vmul.f32 %v11728_v3, %v796_v1 }
  0xc2   : > { %v3588_v43 = vpop.permute.xlu1 %3587  ;;  %v3583_v36 = vpop.permute.xlu0 %3582  ;;  %v4413_v58 = vrot.slane %v11459_v26, 2  ;;  %v4416_v4 = vrot.slane %v11484_v35, 2  ;;  %v876_v9 = vmin.f32 %v856_v34, 6.0  ;;  %v858_v26 = vmax.f32 %v838_v52, 0.0 }
  0xc3   : > { %v12000_v37 = vmul.f32 %v3588_v43, %v3505_v5  ;;  %v12002_v30 = vmul.f32 %v3583_v36, %v3504_v2  ;;  %v12005_v60 = vsel %vm1637_vm2, %v4272_v49, %v4273_v29  ;;  %v874_v49 = vmin.f32 %v854_v63, 6.0 }
  0xc4   : > { %14035 = vst [vmem:[#allocation31_spill] sm:$0xff] %v12005_v60  ;;  %10339 = vmatmul.mubr.msk.f32.gmra.mrb[4].mxu0 %vm1034_vm1, %v12005_v60  ;;  %v4412_v43 = vrot.slane %v11456_v25, 2  ;;  %v820_v36 = vmul.f32 %v11728_v3, %v794_v47  ;;  %v880_v35 = vmin.f32 %v860_v28, 6.0  ;;  %v4415_v34 = vrot.slane %v11477_v32, 2 }
  0xc5   : > { %14034 = vst [vmem:[#allocation30_spill] sm:$0xff] %v12002_v30  ;;  %v4276_v5 = vrot.slane %v12000_v37, 2  ;;  %v4275_v2 = vrot.slane %v12002_v30, 2  ;;  %v864_v60 = vmax.f32 %v844_v23, 0.0  ;;  %v862_v63 = vmax.f32 %v842_v20, 0.0 }
  0xc6   : > { %v3598_v31 = vpop.permute.xlu1 %3597  ;;  %v3593_v29 = vpop.permute.xlu0 %3592  ;;  %v848_v52 = vadd.f32 %v11743_v54, %v822_v10  ;;  %v878_v28 = vmin.f32 %v858_v26, 6.0  ;;  %v4421_v32 = vrot.slane %v11509_v44, 2  ;;  %v846_v23 = vadd.f32 %v11743_v54, %v820_v36 }
  0xc7   : > { %v12019_v0 = vmul.f32 %v3598_v31, %v3507_v53  ;;  %v12021_v11 = vmul.f32 %v3593_v29, %v3506_v59  ;;  %v12024_v1 = vsel %vm1637_vm2, %v4275_v2, %v4276_v5  ;;  %v4418_v53 = vrot.slane %v11499_v40, 2 }
  0xc8   : > { %14037 = vst [vmem:[#allocation33_spill] sm:$0xff] %v12024_v1  ;;  %10341 = vmatprep.mubr.msk.f32.mxu0 %vm1034_vm1, %v12024_v1  ;;  %v4419_v59 = vrot.slane %v11502_v41, 2  ;;  %v12035_v31 = vsel %vm1637_vm2, %v4412_v43, %v4413_v58  ;;  %v4422_v40 = vrot.slane %v11512_v45, 2  ;;  %v12050_v41 = vsel %vm1637_vm2, %v4415_v34, %v4416_v4 }
  0xc9   : > { %14036 = vst [vmem:[#allocation32_spill] sm:$0xff] %v12021_v11  ;;  %v5043_v25 = vrot.slane %v12019_v0, 2  ;;  %v5042_v47 = vrot.slane %v12021_v11, 2  ;;  %14038 = vst [vmem:[#allocation34_spill] sm:$0xff] %v12035_v31  ;;  %v884_v58 = vmin.f32 %v864_v60, 6.0  ;;  %v882_v26 = vmin.f32 %v862_v63, 6.0 }
  0xca   : > { %v911_v5 = vpop.permute.xlu1 %910  ;;  %v901_v2 = vpop.permute.xlu0 %900  ;;  %14039 = vst [vmem:[#allocation35_spill] sm:$0xff] %v12050_v41  ;;  %v868_v44 = vmax.f32 %v848_v52, 0.0  ;;  %v1322_v43 = vrot.slane %v11787_v50, 1  ;;  %v12058_v45 = vsel %vm1637_vm2, %v4418_v53, %v4419_v59  ;;  %v1319_v36 = vrot.slane %v11776_v62, 1 }
  0xcb   : > { %v12039_v20 = vmul.f32 %v911_v5, %v876_v9  ;;  %v12041_v10 = vmul.f32 %v901_v2, %v874_v49  ;;  %v12044_v29 = vsel %vm1637_vm2, %v5042_v47, %v5043_v25  ;;  %14040 = vst [vmem:[#allocation36_spill] sm:$0xff] %v12058_v45  ;;  %v866_v34 = vmax.f32 %v846_v23, 0.0 }
  0xcc   : > { %10342 = vmatmul.mubr.msk.f32.gmra.mrb[6].mxu0 %vm1034_vm1, %v12044_v29  ;;  %v4424_v60 = vrot.slane %v11523_v48, 2  ;;  %v4425_v63 = vrot.slane %v11530_v51, 2  ;;  %v12071_v2 = vsel %vm1637_vm2, %v4421_v32, %v4422_v40  ;;  %v888_v59 = vmin.f32 %v868_v44, 6.0 }
  0xcd   : > { %v1323_v9 = vrot.slane %v12039_v20, 1  ;;  %v1320_v49 = vrot.slane %v12041_v10, 1  ;;  %10346 = vmatprep.mubr.msk.f32.mxu0 %vm1034_vm1, %v12035_v31  ;;  %14041 = vst [vmem:[#allocation37_spill] sm:$0xff] %v12071_v2  ;;  %v4427_v48 = vrot.slane %v11543_v56, 2  ;;  %v4428_v51 = vrot.slane %v11546_v57, 2 }
  0xce   : > { %v931_v25 = vpop.permute.xlu1 %930  ;;  %v921_v4 = vpop.permute.xlu0 %920  ;;  %v1328_v32 = vrot.slane %v11809_v24, 1  ;;  %v886_v57 = vmin.f32 %v866_v34, 6.0  ;;  %v12089_v44 = vsel %vm1637_vm2, %v4424_v60, %v4425_v63  ;;  %v1331_v60 = vrot.slane %v11811_v27, 1 }
  0xcf   : > { %v12064_v52 = vsel %vm1318_vm0, %v1322_v43, %v1323_v9  ;;  %v12066_v47 = vmul.f32 %v931_v25, %v880_v35  ;;  %v12068_v5 = vmul.f32 %v921_v4, %v878_v28  ;;  %v1321_v53 = vsel %vm1318_vm0, %v1319_v36, %v1320_v49  ;;  %14042 = vst [vmem:[#allocation38_spill] sm:$0xff] %v12089_v44  ;;  %v12096_v49 = vld [vmem:[%s13861_s9 + $0x10] sm:$0xff] }
  0xd0   : > { %10347 = vmatmul.mubr.msk.f32.vlgmr.msra.gmra.mrb[0].mxu0 %vm1034_vm1, %v12050_v41  ;;  %9968 = vmatprep.mubr.msk.f32.mxu1 %vm1034_vm1, %v1321_v53  ;;  %v1325_v28 = vrot.slane %v11792_v6, 1  ;;  %v4430_v43 = vrot.slane %v11573_v8, 2  ;;  %v4431_v9 = vrot.slane %v11579_v12, 2  ;;  %v9242_v8 = vld [vmem:[%s13862_s10 + $0x78] sm:$0xff]  ;;  %v12117_v12 = vsel %vm1637_vm2, %v4427_v48, %v4428_v51  ;;  %v12128_v53 = vld [vmem:[%s11834_s18 + $0x8] sm:$0x3] }
  0xd1   : > { %v1329_v23 = vrot.slane %v12066_v47, 1  ;;  %v1326_v35 = vrot.slane %v12068_v5, 1  ;;  %10349 = vmatprep.mubr.msk.f32.mxu0 %vm1034_vm1, %v12058_v45  ;;  %9969 = vmatmul.mubr.msk.f32.vlgmr.msra.gmra.mrb[0].mxu1 %vm1034_vm1, %v12064_v52  ;;  %14044 = vst [vmem:[#allocation40_spill] sm:$0xff] %v12117_v12  ;;  %v1334_v63 = vrot.slane %v11823_v33, 1 }
  0xd2   : > { %v951_v40 = vpop.permute.xlu1 %950  ;;  %v941_v56 = vpop.permute.xlu0 %940  ;;  %10359 = vmatpush3.msra.mxu0 %v11917_v7  ;;  %9981 = vmatpush3.msra.mxu1 %v11886_v61  ;;  %v5162_v61 = vrot.slane %v11582_v13, 2  ;;  %v12134_v48 = vsel %vm1637_vm2, %v4430_v43, %v4431_v9 }
  0xd3   : > { %v12099_v36 = vmul.f32 %v951_v40, %v884_v58  ;;  %v12101_v25 = vmul.f32 %v941_v56, %v882_v26  ;;  %v12104_v7 = vsel %vm1318_vm0, %v1325_v28, %v1326_v35  ;;  %v12107_v4 = vsel %vm1318_vm0, %v1328_v32, %v1329_v23  ;;  %9994 = vmatprep.subr.mxu1 %v12096_v49  ;;  %v3428_v32 = vld [vmem:[%s11763_s24 + $0x90] sm:$0xff] }
  0xd4   : > { %14043 = vst [vmem:[#allocation39_spill] sm:$0xff] %v12107_v4  ;;  %9971 = vmatprep.mubr.msk.f32.mxu1 %vm1034_vm1, %v12104_v7  ;;  %10350 = vmatmul.mubr.msk.f32.gmra.mrb[2].mxu0 %vm1034_vm1, %v12071_v2  ;;  %v5163_v58 = vrot.slane %v11585_v14, 2  ;;  %14045 = vst [vmem:[#allocation41_spill] sm:$0xff] %v12134_v48  ;;  %v1482_v40 = vrot.slane %v11853_v19, 1  ;;  %v1483_v56 = vrot.slane %v12128_v53, 1 }
  0xd5   : > { %v1335_v26 = vrot.slane %v12099_v36, 1  ;;  %v1332_v34 = vrot.slane %v12101_v25, 1  ;;  %10352 = vmatprep.mubr.msk.f32.mxu0 %vm1034_vm1, %v12089_v44  ;;  %9972 = vmatmul.mubr.msk.f32.gmra.mrb[2].mxu1 %vm1034_vm1, %v12107_v4 }
  0xd6   : > { %v971_v13 = vpop.permute.xlu1 %970  ;;  %v961_v14 = vpop.permute.xlu0 %960  ;;  %10372 = vmatprep.subr.mxu0 %v9242_v8  ;;  %v1484_v31 = vsel %vm1318_vm0, %v1482_v40, %v1483_v56  ;;  %v1491_v56 = vrot.slane %v11900_v18, 1 }
  0xd7   : > { %v12136_v51 = vmul.f32 %v971_v13, %v888_v59  ;;  %v12138_v23 = vmul.f32 %v961_v14, %v886_v57  ;;  %v12141_v35 = vsel %vm1318_vm0, %v1331_v60, %v1332_v34  ;;  %v12144_v28 = vsel %vm1318_vm0, %v1334_v63, %v1335_v26  ;;  %v12157_v57 = vld [vmem:[%s11834_s18 + $0x18] sm:$0x3]  ;;  %v12166_v60 = vld [vmem:[%s11834_s18 + $0x28] sm:$0x3] }
  0xd8   : > { %14046 = vst [vmem:[#allocation42_spill] sm:$0xff] %v12141_v35  ;;  %14047 = vst [vmem:[#allocation43_spill] sm:$0xff] %v12144_v28  ;;  %9974 = vmatprep.mubr.msk.f32.mxu1 %vm1034_vm1, %v12141_v35  ;;  %10353 = vmatmul.mubr.msk.f32.gmra.mrb[4].mxu0 %vm1034_vm1, %v12117_v12  ;;  %v12153_v59 = vsel %vm1637_vm2, %v5162_v61, %v5163_v58  ;;  %v1337_v26 = vrot.slane %v11825_v38, 1  ;;  %v1340_v34 = vrot.slane %v11844_v15, 1  ;;  %v1485_v58 = vrot.slane %v11866_v55, 1 }
  0xd9   : > { %14048 = vst [vmem:[#allocation44_spill] sm:$0xff] %v12153_v59  ;;  %v1341_v43 = vrot.slane %v12136_v51, 1  ;;  %v1338_v9 = vrot.slane %v12138_v23, 1  ;;  %10355 = vmatprep.mubr.msk.f32.mxu0 %vm1034_vm1, %v12134_v48  ;;  %9975 = vmatmul.mubr.msk.f32.gmra.mrb[4].mxu1 %vm1034_vm1, %v12144_v28  ;;  %v3448_v61 = vmul.f32 %v11728_v3, %v3428_v32  ;;  %v1486_v14 = vrot.slane %v12157_v57, 1  ;;  %v12242_v12 = vld [vmem:[%s11834_s18 + $0x78] sm:$0x3] }
  0xda   : > { %v1488_v32 = vrot.slane %v11878_v17, 1  ;;  %v1489_v48 = vrot.slane %v12166_v60, 1  ;;  %v1504_v4 = vrot.slane %v12242_v12, 1 }
  0xdb   : > { %v12173_v63 = vsel %vm1318_vm0, %v1337_v26, %v1338_v9  ;;  %v12176_v13 = vsel %vm1318_vm0, %v1340_v34, %v1341_v43  ;;  %v12187_v9 = vld [vmem:[%s11834_s18 + $0x38] sm:$0x3]  ;;  %v12192_v43 = vld [vmem:[%s11834_s18 + $0x48] sm:$0x3]  ;;  %v3468_v26 = vadd.f32 %v11743_v54, %v3448_v61  ;;  %v12199_v40 = vsel %vm1318_vm0, %v1485_v58, %v1486_v14 }
  0xdc   : > { %14049 = vst [vmem:[#allocation45_spill] sm:$0xff] %v12173_v63  ;;  %14050 = vst [vmem:[#allocation46_spill] sm:$0xff] %v12176_v13  ;;  %9977 = vmatprep.mubr.msk.f32.mxu1 %vm1034_vm1, %v12173_v63  ;;  %10356 = vmatmul.mubr.msk.f32.gmra.mrb[6].mxu0 %vm1034_vm1, %v12153_v59  ;;  %v1492_v34 = vrot.slane %v12187_v9, 1  ;;  %v9251_v63 = vld [vmem:[%s13861_s9 + $0x80] sm:$0xff]  ;;  %v12209_v61 = vsel %vm1318_vm0, %v1488_v32, %v1489_v48  ;;  %v12214_v58 = vld [vmem:[%s11834_s18 + $0x58] sm:$0x3] }
  0xdd   : > { %10360 = vmatprep.mubr.msk.f32.mxu0 %vm1034_vm1, %v11870_v21  ;;  %9978 = vmatmul.mubr.msk.f32.gmra.mrb[6].mxu1 %vm1034_vm1, %v12176_v13  ;;  %14051 = vst [vmem:[#allocation47_spill] sm:$0xff] %v12199_v40  ;;  %14052 = vst [vmem:[#allocation48_spill] sm:$0xff] %v12209_v61  ;;  %v1494_v13 = vrot.slane %v11911_v42, 1  ;;  %v12219_v14 = vld [vmem:[%s11834_s18 + $0x68] sm:$0x3]  ;;  %v9007_v59 = vld [vmem:[%s13862_s10 + $0x10] sm:$0xff] }
  0xde   : > { %9982 = vmatprep.mubr.msk.f32.mxu1 %vm1034_vm1, %v1484_v31  ;;  %v1495_v31 = vrot.slane %v12192_v43, 1  ;;  %v3488_v28 = vmax.f32 %v3468_v26, 0.0  ;;  %v12230_v48 = vsel %vm1318_vm0, %v1491_v56, %v1492_v34  ;;  %v1498_v32 = vrot.slane %v12214_v58, 1  ;;  %v3603_v34 = vpop.permute.xlu0 %3602 }
  0xdf   : > { %14053 = vst [vmem:[#allocation49_spill] sm:$0xff] %v12230_v48 }
  0xe0   : > { %10361 = vmatmul.mubr.msk.f32.vlgmr.msra.gmra.mrb[0].mxu0 %vm1034_vm1, %v11904_v16  ;;  %v12237_v26 = vsel %vm1318_vm0, %v1494_v13, %v1495_v31  ;;  %v3508_v56 = vmin.f32 %v3488_v28, 6.0  ;;  %v14058_v31 = vld [vmem:[#allocation23_spill] sm:$0xff] }
  0xe1   : > { %10363 = vmatprep.mubr.msk.f32.mxu0 %vm1034_vm1, %v11940_v22  ;;  %10373 = vmatpush3.msra.mxu0 %v9242_v8  ;;  %v1497_v8 = vrot.slane %v11933_v46, 1  ;;  %14054 = vst [vmem:[#allocation50_spill] sm:$0xff] %v12237_v26  ;;  %v1503_v44 = vrot.slane %v14058_v31, 1 }
  0xe2   : > { %9983 = vmatmul.mubr.msk.f32.vlgmr.msra.gmra.mrb[0].mxu1 %vm1034_vm1, %v12199_v40  ;;  %10386 = vmatprep.subr.mxu0 %v9251_v63  ;;  %v14055_v40 = vld [vmem:[#allocation22_spill] sm:$0xff] }
  0xe3   : > { %9995 = vmatpush3.msra.mxu1 %v12096_v49  ;;  %9985 = vmatprep.mubr.msk.f32.mxu1 %vm1034_vm1, %v12209_v61  ;;  %v1500_v35 = vrot.slane %v14055_v40, 1  ;;  %v1501_v49 = vrot.slane %v12219_v14, 1  ;;  %v14056_v61 = vld [vmem:[#allocation28_spill] sm:$0xff]  ;;  %v12251_v13 = vsel %vm1318_vm0, %v1497_v8, %v1498_v32  ;;  %v12270_v8 = vsel %vm1318_vm0, %v1503_v44, %v1504_v4  ;;  %v11173_v32 = vld [vmem:[%s11444_s22 + $0x20] sm:$0xff]  ;;  %v3429_v4 = vld [vmem:[%s11763_s24 + $0x98] sm:$0x3] }
  0xe4   : > { %10364 = vmatmul.mubr.msk.f32.gmra.mrb[2].mxu0 %vm1034_vm1, %v11966_v39  ;;  %10008 = vmatprep.subr.mxu1 %v9007_v59  ;;  %14057 = vst [vmem:[#allocation22_spill] sm:$0xff] %v12251_v13  ;;  %14060 = vst [vmem:[#allocation51_spill] sm:$0xff] %v12270_v8  ;;  %v1641_v44 = vrot.slane %v11787_v50, 2 }
  0xe5   : > { %10366 = vmatprep.mubr.msk.f32.mxu0 %vm1034_vm1, %v14056_v61  ;;  %v12258_v28 = vsel %vm1318_vm0, %v1500_v35, %v1501_v49  ;;  %v1638_v35 = vrot.slane %v11776_v62, 2  ;;  %v1645_v49 = vrot.slane %v12068_v5, 2  ;;  %v12288_v62 = vld [vmem:[%s13862_s10 + $0x80] sm:$0xff]  ;;  %v1644_v5 = vrot.slane %v11792_v6, 2 }
  0xe6   : > { %9986 = vmatmul.mubr.msk.f32.gmra.mrb[2].mxu1 %vm1034_vm1, %v12230_v48  ;;  %14059 = vst [vmem:[#allocation23_spill] sm:$0xff] %v12258_v28  ;;  %v1639_v48 = vrot.slane %v12041_v10, 2  ;;  %v1642_v10 = vrot.slane %v12039_v20, 2  ;;  %v11174_v20 = vld [vmem:[%s11444_s22 + $0x30] sm:$0xff] }
  0xe7   : > { %9988 = vmatprep.mubr.msk.f32.mxu1 %vm1034_vm1, %v12237_v26  ;;  %v12263_v26 = vmul.f32 %v3603_v34, %v3508_v56 }
  0xe8   : > { %10367 = vmatmul.mubr.msk.f32.gmra.mrb[4].mxu0 %vm1034_vm1, %v12002_v30  ;;  %v1640_v56 = vsel %vm1637_vm2, %v1638_v35, %v1639_v48  ;;  %v12294_v34 = vsel %vm1637_vm2, %v1641_v44, %v1642_v10  ;;  %v1648_v48 = vrot.slane %v12066_v47, 2  ;;  %v11175_v35 = vld [vmem:[%s11444_s22 + $0x40] sm:$0xff]  ;;  %v12309_v10 = vsel %vm1637_vm2, %v1644_v5, %v1645_v49 }
  0xe9   : > { %10369 = vmatprep.mubr.msk.f32.mxu0 %vm1034_vm1, %v12021_v11  ;;  %14061 = vst [vmem:[#allocation52_spill] sm:$0xff] %v12309_v10  ;;  %v1647_v47 = vrot.slane %v11809_v24, 2  ;;  %v1654_v49 = vrot.slane %v12099_v36, 2  ;;  %v1653_v36 = vrot.slane %v11823_v33, 2 }
  0xea   : > { %9989 = vmatmul.mubr.msk.f32.gmra.mrb[4].mxu1 %vm1034_vm1, %v12251_v13 }
  0xeb   : > { %9991 = vmatprep.mubr.msk.f32.mxu1 %vm1034_vm1, %v12258_v28  ;;  %v12322_v44 = vsel %vm1637_vm2, %v1647_v47, %v1648_v48  ;;  %v14064_v48 = vld [vmem:[#allocation13_spill] sm:$0xff] }
  0xec   : > { %10370 = vmatmul.mubr.msk.f32.gmra.mrb[6].mxu0 %vm1034_vm1, %v12263_v26  ;;  %14062 = vst [vmem:[#allocation53_spill] sm:$0xff] %v12322_v44  ;;  %v3943_v47 = vrot.slane %v14064_v48, 1 }
  0xed   : > { %10374 = vmatprep.mubr.msk.f32.mxu0 %vm1034_vm1, %v11173_v32  ;;  %v12302_v32 = vld [vmem:[%s13861_s9 + $0x18] sm:$0xff] }
  0xee   : > { %9992 = vmatmul.mubr.msk.f32.gmra.mrb[6].mxu1 %vm1034_vm1, %v12270_v8 }
  0xef   : > { %9996 = vmatprep.mubr.msk.f32.mxu1 %vm1034_vm1, %v1640_v56  ;;  %v1651_v56 = vrot.slane %v12101_v25, 2  ;;  %v1793_v25 = vrot.slane %v11853_v19, 2  ;;  %v1794_v19 = vrot.slane %v12128_v53, 2  ;;  %v12345_v53 = vsel %vm1637_vm2, %v1653_v36, %v1654_v49 }
  0xf0   : > { %10375 = vmatmul.mubr.msk.f32.vlgmr.msra.gmra.mrb[0].mxu0 %vm1034_vm1, %v11174_v20  ;;  %v3449_v20 = vmul.f32 %v11728_v3, %v3429_v4  ;;  %v1650_v3 = vrot.slane %v11811_v27, 2  ;;  %v1657_v4 = vrot.slane %v12138_v23, 2  ;;  %v3942_v23 = vrot.slane %v11870_v21, 1  ;;  %14065 = vst [vmem:[#allocation13_spill] sm:$0xff] %v12345_v53 }
  0xf1   : > { %10377 = vmatprep.mubr.msk.f32.mxu0 %vm1034_vm1, %v11175_v35  ;;  %10387 = vmatpush3.msra.mxu0 %v9251_v63  ;;  %v11176_v63 = vld [vmem:[%s11444_s22 + $0x50] sm:$0xff]  ;;  %v1795_v21 = vsel %vm1637_vm2, %v1793_v25, %v1794_v19  ;;  %v1659_v49 = vrot.slane %v11844_v15, 2  ;;  %v3945_v36 = vrot.slane %v11904_v16, 1 }
  0xf2   : > { %9997 = vmatmul.mubr.msk.f32.vlgmr.msra.gmra.mrb[0].mxu1 %vm1034_vm1, %v12294_v34  ;;  %10400 = vmatprep.subr.mxu0 %v12288_v62  ;;  %v3469_v5 = vadd.f32 %v11743_v54, %v3449_v20  ;;  %v12331_v35 = vsel %vm1637_vm2, %v1650_v3, %v1651_v56  ;;  %v1656_v54 = vrot.slane %v11825_v38, 2  ;;  %v1796_v20 = vrot.slane %v11866_v55, 2  ;;  %v11179_v3 = vld [vmem:[%s11444_s22 + $0x80] sm:$0xff] }
  0xf3   : > { %10009 = vmatpush3.msra.mxu1 %v9007_v59  ;;  %9999 = vmatprep.mubr.msk.f32.mxu1 %vm1034_vm1, %v12309_v10  ;;  %v11177_v59 = vld [vmem:[%s11444_s22 + $0x60] sm:$0xff]  ;;  %14063 = vst [vmem:[#allocation54_spill] sm:$0xff] %v12331_v35  ;;  %v1660_v56 = vrot.slane %v12136_v51, 2  ;;  %v14067_v51 = vld [vmem:[#allocation16_spill] sm:$0xff]  ;;  %v12369_v25 = vsel %vm1318_vm0, %v3942_v23, %v3943_v47  ;;  %v1805_v47 = vrot.slane %v11911_v42, 2  ;;  %v1806_v23 = vrot.slane %v12192_v43, 2 }
  0xf4   : > { %10378 = vmatmul.mubr.msk.f32.gmra.mrb[2].mxu0 %vm1034_vm1, %v11176_v63  ;;  %10022 = vmatprep.subr.mxu1 %v12302_v32  ;;  %v11178_v63 = vld [vmem:[%s11444_s22 + $0x70] sm:$0xff]  ;;  %v3489_v48 = vmax.f32 %v3469_v5, 0.0  ;;  %v1799_v5 = vrot.slane %v11878_v17, 2  ;;  %14069 = vst [vmem:[#allocation16_spill] sm:$0xff] %v12369_v25  ;;  %v3954_v43 = vrot.slane %v14056_v61, 1 }
  0xf5   : > { %10380 = vmatprep.mubr.msk.f32.mxu0 %vm1034_vm1, %v11177_v59  ;;  %v12350_v59 = vld [vmem:[%s11444_s22 + $0x90] sm:$0xff]  ;;  %v12374_v19 = vsel %vm1637_vm2, %v1659_v49, %v1660_v56 }
  0xf6   : > { %10000 = vmatmul.mubr.msk.f32.gmra.mrb[2].mxu1 %vm1034_vm1, %v12322_v44  ;;  %v3946_v44 = vrot.slane %v14067_v51, 1  ;;  %v1803_v51 = vrot.slane %v12187_v9, 2  ;;  %v3951_v9 = vrot.slane %v11966_v39, 1 }
  0xf7   : > { %10002 = vmatprep.mubr.msk.f32.mxu1 %vm1034_vm1, %v12331_v35  ;;  %v1797_v35 = vrot.slane %v12157_v57, 2  ;;  %v3948_v57 = vrot.slane %v11940_v22, 1  ;;  %v14071_v22 = vld [vmem:[#allocation24_spill] sm:$0xff] }
  0xf8   : > { %10381 = vmatmul.mubr.msk.f32.gmra.mrb[4].mxu0 %vm1034_vm1, %v11178_v63  ;;  %v12355_v63 = vsel %vm1637_vm2, %v1656_v54, %v1657_v4  ;;  %v1800_v4 = vrot.slane %v12166_v60, 2  ;;  %v1802_v54 = vrot.slane %v11900_v18, 2  ;;  %v3952_v60 = vrot.slane %v14071_v22, 1 }
  0xf9   : > { %10383 = vmatprep.mubr.msk.f32.mxu0 %vm1034_vm1, %v11179_v3  ;;  %14066 = vst [vmem:[#allocation55_spill] sm:$0xff] %v12355_v63  ;;  %v14068_v3 = vld [vmem:[#allocation19_spill] sm:$0xff]  ;;  %v12387_v56 = vsel %vm1318_vm0, %v3945_v36, %v3946_v44  ;;  %v12390_v49 = vsel %vm1637_vm2, %v1796_v20, %v1797_v35  ;;  %v9025_v35 = vld [vmem:[%s13862_s10 + $0x18] sm:$0xff]  ;;  %v12418_v20 = vsel %vm1637_vm2, %v1805_v47, %v1806_v23  ;;  %v1809_v36 = vrot.slane %v12214_v58, 2 }
  0xfa   : > { %10003 = vmatmul.mubr.msk.f32.gmra.mrb[4].mxu1 %vm1034_vm1, %v12345_v53  ;;  %v3949_v53 = vrot.slane %v14068_v3, 1  ;;  %14070 = vst [vmem:[#allocation19_spill] sm:$0xff] %v12374_v19  ;;  %v3509_v3 = vmin.f32 %v3489_v48, 6.0  ;;  %14072 = vst [vmem:[#allocation24_spill] sm:$0xff] %v12387_v56  ;;  %v9269_v48 = vld [vmem:[%s13861_s9 + $0x88] sm:$0xff]  ;;  %v12410_v44 = vsel %vm1637_vm2, %v1802_v54, %v1803_v51  ;;  %v4802_v54 = vrot.slane %v12019_v0, 1 }
  0xfb   : > { %10005 = vmatprep.mubr.msk.f32.mxu1 %vm1034_vm1, %v12355_v63  ;;  %14075 = vst [vmem:[#allocation56_spill] sm:$0xff] %v12410_v44  ;;  %14076 = vst [vmem:[#allocation57_spill] sm:$0xff] %v12418_v20  ;;  %v5519_v51 = vrot.slane %v12263_v26, 1 }
  0xfc   : > { %10384 = vmatmul.mubr.msk.f32.gmra.mrb[6].mxu0 %vm1034_vm1, %v12350_v59  ;;  %v12400_v22 = vsel %vm1318_vm0, %v3948_v57, %v3949_v53  ;;  %v1808_v53 = vrot.slane %v11933_v46, 2  ;;  %v12430_v57 = vsel %vm1318_vm0, %v3951_v9, %v3952_v60  ;;  %v797_v60 = vld [vmem:[%s11719_s16 + $0x80] sm:$0xff] }
  0xfd   : > { %10388 = vmatprep.mubr.msk.f32.mxu0 %vm1034_vm1, %v12369_v25  ;;  %v14073_v25 = vld [vmem:[#allocation27_spill] sm:$0xff]  ;;  %14077 = vst [vmem:[#allocation58_spill] sm:$0xff] %v12430_v57 }
  0xfe   : > { %10006 = vmatmul.mubr.msk.f32.gmra.mrb[6].mxu1 %vm1034_vm1, %v12374_v19  ;;  %v3955_v16 = vrot.slane %v14073_v25, 1  ;;  %v3608_v19 = vpop.permute.xlu1 %3607  ;;  %14074 = vst [vmem:[#allocation27_spill] sm:$0xff] %v12400_v22  ;;  %v12446_v0 = vsel %vm1637_vm2, %v1808_v53, %v1809_v36  ;;  %v14084_v36 = vld [vmem:[#allocation4_spill] sm:$0xff] }
  0xff   : > { %10010 = vmatprep.mubr.msk.f32.mxu1 %vm1034_vm1, %v1795_v21  ;;  %v12403_v21 = vsel %vm1637_vm2, %v1799_v5, %v1800_v4  ;;  %v1811_v5 = vrot.slane %v14055_v40, 2  ;;  %v12424_v25 = vmul.f32 %v3608_v19, %v3509_v3  ;;  %v3957_v4 = vrot.slane %v12002_v30, 1  ;;  %14079 = vst [vmem:[#allocation60_spill] sm:$0xff] %v12446_v0 }
 0x100   : > { %10389 = vmatmul.mubr.msk.f32.vlgmr.msra.gmra.mrb[0].mxu0 %vm1034_vm1, %v12387_v56  ;;  %v12437_v58 = vsel %vm1318_vm0, %v3954_v43, %v3955_v16  ;;  %v1814_v19 = vrot.slane %v14058_v31, 2  ;;  %v1815_v3 = vrot.slane %v12242_v12, 2  ;;  %v12477_v43 = vld [vmem:[%s11725_s21] ss:$0 sm:$0xff] }
 0x101   : > { %10391 = vmatprep.mubr.msk.f32.mxu0 %vm1034_vm1, %v12400_v22  ;;  %10401 = vmatpush3.msra.mxu0 %v12288_v62  ;;  %v3958_v62 = vrot.slane %v12000_v37, 1  ;;  %14078 = vst [vmem:[#allocation59_spill] sm:$0xff] %v12437_v58  ;;  %v4801_v37 = vrot.slane %v12021_v11, 1  ;;  %v5520_v16 = vrot.slane %v12424_v25, 1  ;;  %v823_v53 = vmul.f32 %v12477_v43, %v797_v60  ;;  %v14089_v60 = vld [vmem:[#allocation9_spill] sm:$0xff]  ;;  %v6031_v11 = vld [vmem:[%s12564_s4 + $0x20] sm:$0xff] }
 0x102   : > { %10011 = vmatmul.mubr.msk.f32.vlgmr.msra.gmra.mrb[0].mxu1 %vm1034_vm1, %v12390_v49  ;;  %10414 = vmatprep.subr.mxu0 %v9269_v48  ;;  %v12474_v9 = vsel %vm1637_vm2, %v1814_v19, %v1815_v3 }
 0x103   : > { %10023 = vmatpush3.msra.mxu1 %v12302_v32  ;;  %10013 = vmatprep.mubr.msk.f32.mxu1 %vm1034_vm1, %v12403_v21  ;;  %v1812_v32 = vrot.slane %v12219_v14, 2  ;;  %v12454_v14 = vsel %vm1318_vm0, %v3957_v4, %v3958_v62  ;;  %v12460_v47 = vsel %vm1318_vm0, %v4801_v37, %v4802_v54  ;;  %v5521_v12 = vsel %vm1318_vm0, %v5519_v51, %v5520_v16  ;;  %v12491_v62 = vld [vmem:[%s11735_s17] ss:$0 sm:$0xff]  ;;  %v14085_v54 = vld [vmem:[#allocation5_spill] sm:$0xff]  ;;  %v14086_v37 = vld [vmem:[#allocation6_spill] sm:$0xff] }
 0x104   : > { %10392 = vmatmul.mubr.msk.f32.gmra.mrb[2].mxu0 %vm1034_vm1, %v12430_v57  ;;  %10036 = vmatprep.subr.mxu1 %v9025_v35  ;;  %14080 = vst [vmem:[#allocation61_spill] sm:$0xff] %v12454_v14  ;;  %14081 = vst [vmem:[#allocation62_spill] sm:$0xff] %v12460_v47  ;;  %v849_v4 = vadd.f32 %v12491_v62, %v823_v53  ;;  %v14087_v16 = vld [vmem:[#allocation7_spill] sm:$0xff]  ;;  %v14088_v51 = vld [vmem:[#allocation8_spill] sm:$0xff] }
 0x105   : > { %10394 = vmatprep.mubr.msk.f32.mxu0 %vm1034_vm1, %v12437_v58  ;;  %v12463_v23 = vsel %vm1637_vm2, %v1811_v5, %v1812_v32  ;;  %14083 = vst [vmem:[#allocation64_spill] sm:$0xff] %v12474_v9  ;;  %v9278_v5 = vld [vmem:[%s13862_s10 + $0x88] sm:$0xff]  ;;  %v12505_v32 = vld [vmem:[%s11444_s22 + $0x98] sm:$0x3] }
 0x106   : > { %10014 = vmatmul.mubr.msk.f32.gmra.mrb[2].mxu1 %vm1034_vm1, %v12410_v44  ;;  %14082 = vst [vmem:[#allocation63_spill] sm:$0xff] %v12463_v23  ;;  %v869_v19 = vmax.f32 %v849_v4, 0.0  ;;  %v5641_v3 = vrot.slane %v12505_v32, 1  ;;  %v14090_v53 = vld [vmem:[#allocation10_spill] sm:$0xff] }
 0x107   : > { %10016 = vmatprep.mubr.msk.f32.mxu1 %vm1034_vm1, %v12418_v20 }
 0x108   : > { %10395 = vmatmul.mubr.msk.f32.gmra.mrb[4].mxu0 %vm1034_vm1, %v12454_v14  ;;  %v14104_v14 = vld [vmem:[#allocation46_spill] sm:$0xff] }
 0x109   : > { %10397 = vmatprep.mubr.msk.f32.mxu0 %vm1034_vm1, %v12460_v47 }
 0x10a   : > { %10017 = vmatmul.mubr.msk.f32.gmra.mrb[4].mxu1 %vm1034_vm1, %v12446_v0 }
 0x10b   : > { %10019 = vmatprep.mubr.msk.f32.mxu1 %vm1034_vm1, %v12463_v23 }
 0x10c   : > { %10398 = vmatmul.mubr.msk.f32.gmra.mrb[6].mxu0 %vm1034_vm1, %v5521_v12  ;;  %v976_v12 = vpop.permute.xlu0 %975 }
 0x10d   : > { %10402 = vmatprep.mubr.msk.f32.mxu0 %vm1034_vm1, %v14084_v36 }
 0x10e   : > { %10020 = vmatmul.mubr.msk.f32.gmra.mrb[6].mxu1 %vm1034_vm1, %v12474_v9 }
 0x10f   : > { %10024 = vmatprep.mubr.msk.f32.mxu1 %vm1034_vm1, %v11787_v50  ;;  %v9034_v50 = vld [vmem:[%s13861_s9 + $0x20] sm:$0xff] }
 0x110   : > { %10403 = vmatmul.mubr.msk.f32.vlgmr.msra.gmra.mrb[0].mxu0 %vm1034_vm1, %v14085_v54 }
 0x111   : > { %10405 = vmatprep.mubr.msk.f32.mxu0 %vm1034_vm1, %v14086_v37  ;;  %10415 = vmatpush3.msra.mxu0 %v9269_v48  ;;  %v5640_v48 = vrot.slane %v12350_v59, 1 }
 0x112   : > { %10025 = vmatmul.mubr.msk.f32.vlgmr.msra.gmra.mrb[0].mxu1 %vm1034_vm1, %v11792_v6  ;;  %10428 = vmatprep.subr.mxu0 %v9278_v5 }
 0x113   : > { %10037 = vmatpush3.msra.mxu1 %v9025_v35  ;;  %10027 = vmatprep.mubr.msk.f32.mxu1 %vm1034_vm1, %v11809_v24  ;;  %v889_v35 = vmin.f32 %v869_v19, 6.0  ;;  %v5642_v4 = vsel %vm1318_vm0, %v5640_v48, %v5641_v3  ;;  %v14091_v19 = vld [vmem:[#allocation18_spill] sm:$0xff]  ;;  %v9288_v48 = vld [vmem:[%s13861_s9 + $0x90] sm:$0xff] }
 0x114   : > { %10406 = vmatmul.mubr.msk.f32.gmra.mrb[2].mxu0 %vm1034_vm1, %v14087_v16  ;;  %10050 = vmatprep.subr.mxu1 %v9034_v50  ;;  %v14092_v3 = vld [vmem:[#allocation21_spill] sm:$0xff] }
 0x115   : > { %10408 = vmatprep.mubr.msk.f32.mxu0 %vm1034_vm1, %v14088_v51  ;;  %v12528_v47 = vmul.f32 %v976_v12, %v889_v35  ;;  %v14093_v35 = vld [vmem:[#allocation26_spill] sm:$0xff]  ;;  %v9043_v12 = vld [vmem:[%s13862_s10 + $0x20] sm:$0xff]  ;;  %v14103_v16 = vld [vmem:[#allocation45_spill] sm:$0xff] }
 0x116   : > { %10028 = vmatmul.mubr.msk.f32.gmra.mrb[2].mxu1 %vm1034_vm1, %v11811_v27 }
 0x117   : > { %10030 = vmatprep.mubr.msk.f32.mxu1 %vm1034_vm1, %v11823_v33 }
 0x118   : > { %10409 = vmatmul.mubr.msk.f32.gmra.mrb[4].mxu0 %vm1034_vm1, %v14089_v60  ;;  %v14100_v60 = vld [vmem:[#allocation43_spill] sm:$0xff] }
 0x119   : > { %10411 = vmatprep.mubr.msk.f32.mxu0 %vm1034_vm1, %v14090_v53  ;;  %v798_v53 = vld [vmem:[%s11719_s16 + $0x88] sm:$0x3] }
 0x11a   : > { %10031 = vmatmul.mubr.msk.f32.gmra.mrb[4].mxu1 %vm1034_vm1, %v11825_v38 }
 0x11b   : > { %10033 = vmatprep.mubr.msk.f32.mxu1 %vm1034_vm1, %v11844_v15 }
 0x11c   : > { %10412 = vmatmul.mubr.msk.f32.gmra.mrb[6].mxu0 %vm1034_vm1, %v5642_v4  ;;  %v14095_v4 = vld [vmem:[#allocation31_spill] sm:$0xff] }
 0x11d   : > { %10416 = vmatprep.mubr.msk.f32.mxu0 %vm1034_vm1, %v14091_v19 }
 0x11e   : > { %10034 = vmatmul.mubr.msk.f32.gmra.mrb[6].mxu1 %vm1034_vm1, %v12528_v47 }
 0x11f   : > { %10038 = vmatprep.mubr.msk.f32.mxu1 %vm1034_vm1, %v11866_v55  ;;  %v14094_v55 = vld [vmem:[#allocation29_spill] sm:$0xff] }
 0x120   : > { %10417 = vmatmul.mubr.msk.f32.vlgmr.msra.gmra.mrb[0].mxu0 %vm1034_vm1, %v14092_v3  ;;  %v14099_v3 = vld [vmem:[#allocation42_spill] sm:$0xff] }
 0x121   : > { %10419 = vmatprep.mubr.msk.f32.mxu0 %vm1034_vm1, %v14093_v35  ;;  %10429 = vmatpush3.msra.mxu0 %v9278_v5  ;;  %v824_v5 = vmul.f32 %v12477_v43, %v798_v53 }
 0x122   : > { %10039 = vmatmul.mubr.msk.f32.vlgmr.msra.gmra.mrb[0].mxu1 %vm1034_vm1, %v11878_v17  ;;  %10442 = vmatprep.subr.mxu0 %v9288_v48  ;;  %v5761_v17 = vrot.slane %v12424_v25, 2 }
 0x123   : > { %10051 = vmatpush3.msra.mxu1 %v9034_v50  ;;  %10041 = vmatprep.mubr.msk.f32.mxu1 %vm1034_vm1, %v11900_v18  ;;  %v5760_v18 = vrot.slane %v12263_v26, 2  ;;  %v6027_v50 = vld [vmem:[%s12564_s4] sm:$0xff]  ;;  %v850_v53 = vadd.f32 %v12491_v62, %v824_v5 }
 0x124   : > { %10420 = vmatmul.mubr.msk.f32.gmra.mrb[2].mxu0 %vm1034_vm1, %v14094_v55  ;;  %10064 = vmatprep.subr.mxu1 %v9043_v12  ;;  %v6047_v25 = vmul.f32 %v12477_v43, %v6027_v50  ;;  %v12588_v26 = vld [vmem:[%s11834_s18 + $0x80] sm:$0xff] }
 0x125   : > { %10422 = vmatprep.mubr.msk.f32.mxu0 %vm1034_vm1, %v14095_v4  ;;  %v870_v5 = vmax.f32 %v850_v53, 0.0  ;;  %v6035_v53 = vld [vmem:[%s12564_s4 + $0x40] sm:$0xff] }
 0x126   : > { %10042 = vmatmul.mubr.msk.f32.gmra.mrb[2].mxu1 %vm1034_vm1, %v11911_v42  ;;  %v6029_v42 = vld [vmem:[%s12564_s4 + $0x10] sm:$0xff]  ;;  %v6067_v50 = vadd.f32 %v12491_v62, %v6047_v25  ;;  %v6130_v25 = vpop.permute.xlu0 %6129 }
 0x127   : > { %10044 = vmatprep.mubr.msk.f32.mxu1 %vm1034_vm1, %v11933_v46  ;;  %v5762_v46 = vsel %vm1637_vm2, %v5760_v18, %v5761_v17  ;;  %v6051_v17 = vmul.f32 %v12477_v43, %v6031_v11  ;;  %v12605_v18 = vld [vmem:[%s13862_s10 + $0x90] sm:$0xff]  ;;  %v12615_v11 = vld [vmem:[%s13861_s9 + $0x28] sm:$0xff] }
 0x128   : > { %10423 = vmatmul.mubr.msk.f32.gmra.mrb[4].mxu0 %vm1034_vm1, %v12024_v1  ;;  %v14097_v1 = vld [vmem:[#allocation38_spill] sm:$0xff] }
 0x129   : > { %10425 = vmatprep.mubr.msk.f32.mxu0 %vm1034_vm1, %v12044_v29  ;;  %v6049_v29 = vmul.f32 %v12477_v43, %v6029_v42  ;;  %v890_v42 = vmin.f32 %v870_v5, 6.0  ;;  %v6087_v5 = vmax.f32 %v6067_v50, 0.0  ;;  %v5880_v50 = vrot.slane %v12350_v59, 2 }
 0x12a   : > { %10045 = vmatmul.mubr.msk.f32.gmra.mrb[4].mxu1 %vm1034_vm1, %v14055_v40  ;;  %v981_v40 = vpop.permute.xlu1 %980 }
 0x12b   : > { %10047 = vmatprep.mubr.msk.f32.mxu1 %vm1034_vm1, %v14058_v31  ;;  %v6033_v31 = vld [vmem:[%s12564_s4 + $0x30] sm:$0xff] }
 0x12c   : > { %10426 = vmatmul.mubr.msk.f32.gmra.mrb[6].mxu0 %vm1034_vm1, %v5762_v46  ;;  %v6053_v46 = vmul.f32 %v12477_v43, %v6033_v31  ;;  %v12631_v31 = vmul.f32 %v981_v40, %v890_v42  ;;  %v6041_v42 = vld [vmem:[%s12564_s4 + $0x70] sm:$0xff] }
 0x12d   : > { %10430 = vmatprep.mubr.msk.f32.mxu0 %vm1034_vm1, %v12050_v41  ;;  %v14096_v41 = vld [vmem:[#allocation39_spill] sm:$0xff]  ;;  %v6061_v51 = vmul.f32 %v12477_v43, %v6041_v42 }
 0x12e   : > { %10048 = vmatmul.mubr.msk.f32.gmra.mrb[6].mxu1 %vm1034_vm1, %v12588_v26  ;;  %v6140_v4 = vpop.permute.xlu1 %6139  ;;  %v6073_v55 = vadd.f32 %v12491_v62, %v6053_v46  ;;  %v14106_v42 = vld [vmem:[#allocation47_spill] sm:$0xff] }
 0x12f   : > { %10052 = vmatprep.mubr.msk.f32.mxu1 %vm1034_vm1, %v12064_v52  ;;  %v6069_v52 = vadd.f32 %v12491_v62, %v6049_v29  ;;  %v6039_v29 = vld [vmem:[%s12564_s4 + $0x60] sm:$0xff] }
 0x130   : > { %10431 = vmatmul.mubr.msk.f32.vlgmr.msra.gmra.mrb[0].mxu0 %vm1034_vm1, %v12058_v45  ;;  %v6071_v45 = vadd.f32 %v12491_v62, %v6051_v17  ;;  %v14098_v17 = vld [vmem:[#allocation40_spill] sm:$0xff]  ;;  %v6059_v59 = vmul.f32 %v12477_v43, %v6039_v29 }
 0x131   : > { %10433 = vmatprep.mubr.msk.f32.mxu0 %vm1034_vm1, %v12071_v2  ;;  %10443 = vmatpush3.msra.mxu0 %v9288_v48  ;;  %v6037_v2 = vld [vmem:[%s12564_s4 + $0x50] sm:$0xff]  ;;  %v6055_v48 = vmul.f32 %v12477_v43, %v6035_v53  ;;  %v6089_v53 = vmax.f32 %v6069_v52, 0.0  ;;  %v2186_v52 = vrot.slane %v12631_v31, 1 }
 0x132   : > { %10053 = vmatmul.mubr.msk.f32.vlgmr.msra.gmra.mrb[0].mxu1 %vm1034_vm1, %v12104_v7  ;;  %10456 = vmatprep.subr.mxu0 %v12605_v18  ;;  %v6057_v35 = vmul.f32 %v12477_v43, %v6037_v2  ;;  %v6091_v19 = vmax.f32 %v6071_v45, 0.0  ;;  %v14102_v2 = vld [vmem:[#allocation44_spill] sm:$0xff]  ;;  %v2185_v45 = vrot.slane %v12528_v47, 1 }
 0x133   : > { %10065 = vmatpush3.msra.mxu1 %v9043_v12  ;;  %10055 = vmatprep.mubr.msk.f32.mxu1 %vm1034_vm1, %v14096_v41  ;;  %v5881_v12 = vrot.slane %v12505_v32, 2  ;;  %v6075_v40 = vadd.f32 %v12491_v62, %v6055_v48  ;;  %v14101_v32 = vld [vmem:[#allocation41_spill] sm:$0xff]  ;;  %v6093_v48 = vmax.f32 %v6073_v55, 0.0 }
 0x134   : > { %10434 = vmatmul.mubr.msk.f32.gmra.mrb[2].mxu0 %vm1034_vm1, %v14097_v1  ;;  %10078 = vmatprep.subr.mxu1 %v12615_v11  ;;  %v6107_v1 = vmin.f32 %v6087_v5, 6.0  ;;  %v6109_v5 = vmin.f32 %v6089_v53, 6.0  ;;  %v6077_v29 = vadd.f32 %v12491_v62, %v6057_v35  ;;  %v6111_v54 = vmin.f32 %v6091_v19, 6.0 }
 0x135   : > { %10436 = vmatprep.mubr.msk.f32.mxu0 %vm1034_vm1, %v14098_v17  ;;  %v6150_v17 = vpop.permute.xlu0 %6149  ;;  %v5882_v46 = vsel %vm1637_vm2, %v5880_v50, %v5881_v12  ;;  %v6095_v36 = vmax.f32 %v6075_v40, 0.0  ;;  %v12664_v35 = vsel %vm1318_vm0, %v2185_v45, %v2186_v52  ;;  %v6081_v50 = vadd.f32 %v12491_v62, %v6061_v51 }
 0x136   : > { %10056 = vmatmul.mubr.msk.f32.gmra.mrb[2].mxu1 %vm1034_vm1, %v14099_v3  ;;  %v12657_v37 = vmul.f32 %v6130_v25, %v6107_v1  ;;  %14105 = vst [vmem:[#allocation10_spill] sm:$0xff] %v12664_v35  ;;  %v12668_v55 = vmul.f32 %v6140_v4, %v6109_v5  ;;  %v6113_v1 = vmin.f32 %v6093_v48, 6.0  ;;  %v6097_v25 = vmax.f32 %v6077_v29, 0.0  ;;  %v12680_v4 = vld [vmem:[%s13861_s9 + $0x98] sm:$0xff] }
 0x137   : > { %10058 = vmatprep.mubr.msk.f32.mxu1 %vm1034_vm1, %v14100_v60  ;;  %v12673_v12 = vmul.f32 %v6150_v17, %v6111_v54  ;;  %v6115_v53 = vmin.f32 %v6095_v36, 6.0  ;;  %v12691_v36 = vld [vmem:[%s13862_s10 + $0x28] sm:$0xff]  ;;  %v6101_v52 = vmax.f32 %v6081_v50, 0.0  ;;  %v6030_v29 = vld [vmem:[%s12564_s4 + $0x18] sm:$0x3] }
 0x138   : > { %10437 = vmatmul.mubr.msk.f32.gmra.mrb[4].mxu0 %vm1034_vm1, %v14101_v32  ;;  %v6160_v32 = vpop.permute.xlu1 %6159  ;;  %v6117_v17 = vmin.f32 %v6097_v25, 6.0 }
 0x139   : > { %10439 = vmatprep.mubr.msk.f32.mxu0 %vm1034_vm1, %v14102_v2  ;;  %v6079_v2 = vadd.f32 %v12491_v62, %v6059_v59  ;;  %v6170_v19 = vpop.permute.xlu0 %6169  ;;  %v6028_v59 = vld [vmem:[%s12564_s4 + $0x8] sm:$0x3]  ;;  %v12693_v54 = vmul.f32 %v6160_v32, %v6113_v1  ;;  %v6121_v25 = vmin.f32 %v6101_v52, 6.0 }
 0x13a   : > { %10059 = vmatmul.mubr.msk.f32.gmra.mrb[4].mxu1 %vm1034_vm1, %v14103_v16  ;;  %v12698_v45 = vmul.f32 %v6170_v19, %v6115_v53  ;;  %v6048_v32 = vmul.f32 %v12477_v43, %v6028_v59  ;;  %v6032_v1 = vld [vmem:[%s12564_s4 + $0x28] sm:$0x3]  ;;  %v14109_v19 = vld [vmem:[#allocation50_spill] sm:$0xff] }
 0x13b   : > { %10061 = vmatprep.mubr.msk.f32.mxu1 %vm1034_vm1, %v14104_v14  ;;  %v6099_v40 = vmax.f32 %v6079_v2, 0.0  ;;  %v12708_v2 = vld [vmem:[%s11834_s18 + $0x88] sm:$0x3]  ;;  %v6052_v52 = vmul.f32 %v12477_v43, %v6032_v1 }
 0x13c   : > { %10440 = vmatmul.mubr.msk.f32.gmra.mrb[6].mxu0 %vm1034_vm1, %v5882_v46  ;;  %v6180_v51 = vpop.permute.xlu1 %6179  ;;  %v14107_v46 = vld [vmem:[#allocation48_spill] sm:$0xff]  ;;  %v2307_v59 = vrot.slane %v12708_v2, 1 }
 0x13d   : > { %10444 = vmatprep.mubr.msk.f32.mxu0 %vm1034_vm1, %v12657_v37  ;;  %v6119_v5 = vmin.f32 %v6099_v40, 6.0  ;;  %v6190_v48 = vpop.permute.xlu0 %6189  ;;  %v6050_v40 = vmul.f32 %v12477_v43, %v6030_v29  ;;  %v12745_v29 = vld [vmem:[%s12730_s23] sm:$0xff] }
 0x13e   : > { %10062 = vmatmul.mubr.msk.f32.gmra.mrb[6].mxu1 %vm1034_vm1, %v12664_v35 }
 0x13f   : > { %10066 = vmatprep.mubr.msk.f32.mxu1 %vm1034_vm1, %v14106_v42  ;;  %v12718_v53 = vmul.f32 %v6190_v48, %v6119_v5  ;;  %v2306_v42 = vrot.slane %v12588_v26, 1  ;;  %v6036_v5 = vld [vmem:[%s12564_s4 + $0x48] sm:$0x3] }
 0x140   : > { %10445 = vmatmul.mubr.msk.f32.vlgmr.msra.gmra.mrb[0].mxu0 %vm1034_vm1, %v12668_v55  ;;  %v6200_v50 = vpop.permute.xlu1 %6199  ;;  %v6056_v56 = vmul.f32 %v12477_v43, %v6036_v5  ;;  %v12777_v5 = vld [vmem:[%s13862_s10 + $0x98] sm:$0xff] }
 0x141   : > { %10447 = vmatprep.mubr.msk.f32.mxu0 %vm1034_vm1, %v12673_v12  ;;  %10457 = vmatpush3.msra.mxu0 %v12605_v18  ;;  %v14108_v18 = vld [vmem:[#allocation49_spill] sm:$0xff]  ;;  %v12740_v48 = vmul.f32 %v6200_v50, %v6121_v25  ;;  %v6135_v1 = vpop.permute.xlu0 %6134  ;;  %v12752_v57 = vsel %vm1318_vm0, %v2306_v42, %v2307_v59  ;;  %v6072_v25 = vadd.f32 %v12491_v62, %v6052_v52  ;;  %v6038_v50 = vld [vmem:[%s12564_s4 + $0x58] sm:$0x3]  ;;  %v12768_v42 = vld [vmem:[%s12730_s23 + $0x20] sm:$0xff] }
 0x142   : > { %10067 = vmatmul.mubr.msk.f32.vlgmr.msra.gmra.mrb[0].mxu1 %vm1034_vm1, %v14107_v46  ;;  %10470 = vmatprep.subr.mxu0 %v12680_v4  ;;  %14110 = vst [vmem:[#allocation39_spill] sm:$0xff] %v12752_v57  ;;  %v6058_v52 = vmul.f32 %v12477_v43, %v6038_v50 }
 0x143   : > { %10079 = vmatpush3.msra.mxu1 %v12615_v11  ;;  %10069 = vmatprep.mubr.msk.f32.mxu1 %vm1034_vm1, %v14108_v18  ;;  %v12714_v11 = vmul.f32 %v6180_v51, %v6117_v17  ;;  %v6068_v51 = vadd.f32 %v12491_v62, %v6048_v32  ;;  %v6034_v17 = vld [vmem:[%s12564_s4 + $0x38] sm:$0x3]  ;;  %v6070_v32 = vadd.f32 %v12491_v62, %v6050_v40  ;;  %v6040_v40 = vld [vmem:[%s12564_s4 + $0x68] sm:$0x3]  ;;  %v6092_v39 = vmax.f32 %v6072_v25, 0.0 }
 0x144   : > { %10448 = vmatmul.mubr.msk.f32.gmra.mrb[2].mxu0 %vm1034_vm1, %v12693_v54  ;;  %10092 = vmatprep.subr.mxu1 %v12691_v36  ;;  %v6054_v58 = vmul.f32 %v12477_v43, %v6034_v17  ;;  %v12763_v17 = vld [vmem:[%s12730_s23 + $0x10] sm:$0xff]  ;;  %v6145_v30 = vpop.permute.xlu1 %6144 }
 0x145   : > { %10450 = vmatprep.mubr.msk.f32.mxu0 %vm1034_vm1, %v12698_v45  ;;  %v6088_v22 = vmax.f32 %v6068_v51, 0.0  ;;  %v6090_v59 = vmax.f32 %v6070_v32, 0.0  ;;  %v6060_v32 = vmul.f32 %v12477_v43, %v6040_v40 }
 0x146   : > { %10070 = vmatmul.mubr.msk.f32.gmra.mrb[2].mxu1 %vm1034_vm1, %v14109_v19  ;;  %v6074_v51 = vadd.f32 %v12491_v62, %v6054_v58  ;;  %v6155_v58 = vpop.permute.xlu0 %6154  ;;  %v6112_v19 = vmin.f32 %v6092_v39, 6.0 }
 0x147   : > { %10072 = vmatprep.mubr.msk.f32.mxu1 %vm1034_vm1, %v12251_v13  ;;  %v6108_v61 = vmin.f32 %v6088_v22, 6.0  ;;  %v12793_v22 = vld [vmem:[%s13861_s9 + $0x30] sm:$0xff]  ;;  %v6110_v25 = vmin.f32 %v6090_v59, 6.0  ;;  %v6080_v46 = vadd.f32 %v12491_v62, %v6060_v32 }
 0x148   : > { %10451 = vmatmul.mubr.msk.f32.gmra.mrb[4].mxu0 %vm1034_vm1, %v12714_v11  ;;  %v6094_v50 = vmax.f32 %v6074_v51, 0.0 }
 0x149   : > { %10453 = vmatprep.mubr.msk.f32.mxu0 %vm1034_vm1, %v12718_v53  ;;  %v12806_v13 = vmul.f32 %v6135_v1, %v6108_v61  ;;  %v12820_v61 = vld [vmem:[%s12730_s23 + $0x60] sm:$0xff]  ;;  %v12822_v39 = vmul.f32 %v6145_v30, %v6110_v25  ;;  %v6100_v14 = vmax.f32 %v6080_v46, 0.0  ;;  %v2427_v30 = vrot.slane %v12631_v31, 2  ;;  %v12836_v25 = vld [vmem:[%s12730_s23 + $0x70] sm:$0xff] }
 0x14a   : > { %10073 = vmatmul.mubr.msk.f32.gmra.mrb[4].mxu1 %vm1034_vm1, %v12258_v28  ;;  %v14111_v28 = vld [vmem:[#allocation53_spill] sm:$0xff]  ;;  %v6175_v59 = vpop.permute.xlu0 %6174  ;;  %v14114_v31 = vld [vmem:[#allocation19_spill] sm:$0xff] }
 0x14b   : > { %10075 = vmatprep.mubr.msk.f32.mxu1 %vm1034_vm1, %v12270_v8  ;;  %v6042_v8 = vld [vmem:[%s12564_s4 + $0x78] sm:$0x3]  ;;  %v6554_v32 = vrot.slane %v12806_v13, 1  ;;  %v6557_v46 = vrot.slane %v12822_v39, 1  ;;  %v6120_v16 = vmin.f32 %v6100_v14, 6.0 }
 0x14c   : > { %10454 = vmatmul.mubr.msk.f32.gmra.mrb[6].mxu0 %vm1034_vm1, %v12740_v48  ;;  %v6062_v40 = vmul.f32 %v12477_v43, %v6042_v8  ;;  %v12815_v8 = vld [vmem:[%s12730_s23 + $0x50] sm:$0xff] }
 0x14d   : > { %10458 = vmatprep.mubr.msk.f32.mxu0 %vm1034_vm1, %v12745_v29 }
 0x14e   : > { %10076 = vmatmul.mubr.msk.f32.gmra.mrb[6].mxu1 %vm1034_vm1, %v12752_v57  ;;  %v6076_v57 = vadd.f32 %v12491_v62, %v6056_v56  ;;  %v12798_v56 = vld [vmem:[%s12730_s23 + $0x40] sm:$0xff]  ;;  %v6082_v51 = vadd.f32 %v12491_v62, %v6062_v40  ;;  %v6195_v3 = vpop.permute.xlu0 %6194 }
 0x14f   : > { %10080 = vmatprep.mubr.msk.f32.mxu1 %vm1034_vm1, %v12294_v34  ;;  %v12788_v34 = vld [vmem:[%s12730_s23 + $0x30] sm:$0xff] }
 0x150   : > { %10459 = vmatmul.mubr.msk.f32.vlgmr.msra.gmra.mrb[0].mxu0 %vm1034_vm1, %v12763_v17  ;;  %v6096_v18 = vmax.f32 %v6076_v57, 0.0  ;;  %v6114_v57 = vmin.f32 %v6094_v50, 6.0  ;;  %v2426_v50 = vrot.slane %v12528_v47, 2 }
 0x151   : > { %10461 = vmatprep.mubr.msk.f32.mxu0 %vm1034_vm1, %v12768_v42  ;;  %10471 = vmatpush3.msra.mxu0 %v12680_v4  ;;  %v6078_v4 = vadd.f32 %v12491_v62, %v6058_v52  ;;  %v14113_v52 = vld [vmem:[#allocation13_spill] sm:$0xff] }
 0x152   : > { %10081 = vmatmul.mubr.msk.f32.vlgmr.msra.gmra.mrb[0].mxu1 %vm1034_vm1, %v12309_v10  ;;  %10484 = vmatprep.subr.mxu0 %v12777_v5  ;;  %v6165_v10 = vpop.permute.xlu1 %6164  ;;  %v6116_v35 = vmin.f32 %v6096_v18, 6.0 }
 0x153   : > { %10093 = vmatpush3.msra.mxu1 %v12691_v36  ;;  %10083 = vmatprep.mubr.msk.f32.mxu1 %vm1034_vm1, %v14111_v28  ;;  %v14112_v36 = vld [vmem:[#allocation54_spill] sm:$0xff]  ;;  %v6098_v1 = vmax.f32 %v6078_v4, 0.0  ;;  %v12828_v28 = vmul.f32 %v6155_v58, %v6112_v19  ;;  %v6553_v4 = vrot.slane %v12657_v37, 1  ;;  %v12843_v18 = vmul.f32 %v6165_v10, %v6114_v57 }
 0x154   : > { %10462 = vmatmul.mubr.msk.f32.gmra.mrb[2].mxu0 %vm1034_vm1, %v12788_v34  ;;  %10106 = vmatprep.subr.mxu1 %v12793_v22  ;;  %v6102_v58 = vmax.f32 %v6082_v51, 0.0  ;;  %v12855_v10 = vsel %vm1637_vm2, %v2426_v50, %v2427_v30  ;;  %v12875_v30 = vmul.f32 %v6195_v3, %v6120_v16  ;;  %v12889_v50 = vld [vmem:[%s13862_s10 + $0x30] sm:$0xff]  ;;  %v6565_v16 = vrot.slane %v12698_v45, 1 }
 0x155   : > { %10464 = vmatprep.mubr.msk.f32.mxu0 %vm1034_vm1, %v12798_v56  ;;  %v6118_v19 = vmin.f32 %v6098_v1, 6.0  ;;  %v6555_v60 = vsel %vm1318_vm0, %v6553_v4, %v6554_v32  ;;  %v6563_v57 = vrot.slane %v12843_v18, 1  ;;  %v12905_v4 = vld [vmem:[%s12730_s23 + $0x8] sm:$0x3] }
 0x156   : > { %10084 = vmatmul.mubr.msk.f32.gmra.mrb[2].mxu1 %vm1034_vm1, %v14112_v36  ;;  %v6185_v40 = vpop.permute.xlu1 %6184  ;;  %v12848_v36 = vmul.f32 %v6175_v59, %v6116_v35  ;;  %v6559_v35 = vrot.slane %v12673_v12, 1  ;;  %v6122_v59 = vmin.f32 %v6102_v58, 6.0  ;;  %v6571_v58 = vrot.slane %v12718_v53, 1 }
 0x157   : > { %10086 = vmatprep.mubr.msk.f32.mxu1 %vm1034_vm1, %v14113_v52  ;;  %v6560_v52 = vrot.slane %v12828_v28, 1  ;;  %v12865_v1 = vmul.f32 %v6185_v40, %v6118_v19  ;;  %v6572_v40 = vrot.slane %v12875_v30, 1  ;;  %v6716_v19 = vrot.slane %v12745_v29, 1 }
 0x158   : > { %10465 = vmatmul.mubr.msk.f32.gmra.mrb[4].mxu0 %vm1034_vm1, %v12815_v8  ;;  %v6566_v51 = vrot.slane %v12848_v36, 1 }
 0x159   : > { %10467 = vmatprep.mubr.msk.f32.mxu0 %vm1034_vm1, %v12820_v61  ;;  %v6569_v3 = vrot.slane %v12865_v1, 1 }
 0x15a   : > { %10087 = vmatmul.mubr.msk.f32.gmra.mrb[4].mxu1 %vm1034_vm1, %v12355_v63  ;;  %v6556_v63 = vrot.slane %v12668_v55, 1  ;;  %v6205_v32 = vpop.permute.xlu1 %6204 }
 0x15b   : > { %10089 = vmatprep.mubr.msk.f32.mxu1 %vm1034_vm1, %v14114_v31 }
 0x15c   : > { %10468 = vmatmul.mubr.msk.f32.gmra.mrb[6].mxu0 %vm1034_vm1, %v12836_v25  ;;  %v12862_v14 = vsel %vm1318_vm0, %v6556_v63, %v6557_v46  ;;  %v12880_v63 = vsel %vm1318_vm0, %v6559_v35, %v6560_v52  ;;  %v12896_v52 = vmul.f32 %v6205_v32, %v6122_v59  ;;  %v12911_v46 = vsel %vm1318_vm0, %v6565_v16, %v6566_v51  ;;  %v12934_v16 = vld [vmem:[%s12730_s23 + $0x28] sm:$0x3] }
 0x15d   : > { %10472 = vmatprep.mubr.msk.f32.mxu0 %vm1034_vm1, %v6555_v60  ;;  %v12872_v60 = vld [vmem:[%s13861_s9 + $0xa0] sm:$0xff]  ;;  %14115 = vst [vmem:[#allocation44_spill] sm:$0xff] %v12911_v46  ;;  %v6717_v35 = vrot.slane %v12905_v4, 1  ;;  %v2546_v51 = vrot.slane %v12588_v26, 2 }
 0x15e   : > { %10090 = vmatmul.mubr.msk.f32.gmra.mrb[6].mxu1 %vm1034_vm1, %v12855_v10  ;;  %v6575_v59 = vrot.slane %v12896_v52, 1 }
 0x15f   : > { %10094 = vmatprep.mubr.msk.f32.mxu1 %vm1034_vm1, %v12390_v49  ;;  %v6562_v49 = vrot.slane %v12693_v54, 1 }
 0x160   : > { %10473 = vmatmul.mubr.msk.f32.vlgmr.msra.gmra.mrb[0].mxu0 %vm1034_vm1, %v12862_v14 }
 0x161   : > { %10475 = vmatprep.mubr.msk.f32.mxu0 %vm1034_vm1, %v12880_v63  ;;  %10485 = vmatpush3.msra.mxu0 %v12777_v5  ;;  %v12902_v5 = vsel %vm1318_vm0, %v6562_v49, %v6563_v57  ;;  %v12923_v57 = vld [vmem:[%s12730_s23 + $0x18] sm:$0x3]  ;;  %v2547_v49 = vrot.slane %v12708_v2, 2  ;;  %v6718_v2 = vsel %vm1318_vm0, %v6716_v19, %v6717_v35 }
 0x162   : > { %10095 = vmatmul.mubr.msk.f32.vlgmr.msra.gmra.mrb[0].mxu1 %vm1034_vm1, %v12403_v21  ;;  %10498 = vmatprep.subr.mxu0 %v12872_v60 }
 0x163   : > { %10107 = vmatpush3.msra.mxu1 %v12793_v22  ;;  %10097 = vmatprep.mubr.msk.f32.mxu1 %vm1034_vm1, %v12410_v44  ;;  %v6568_v22 = vrot.slane %v12714_v11, 1  ;;  %v6719_v44 = vrot.slane %v12763_v17, 1 }
 0x164   : > { %10476 = vmatmul.mubr.msk.f32.gmra.mrb[2].mxu0 %vm1034_vm1, %v12902_v5  ;;  %10120 = vmatprep.subr.mxu1 %v12889_v50 }
 0x165   : > { %10478 = vmatprep.mubr.msk.f32.mxu0 %vm1034_vm1, %v12911_v46  ;;  %v12930_v32 = vsel %vm1318_vm0, %v6568_v22, %v6569_v3  ;;  %v12939_v46 = vsel %vm1318_vm0, %v6571_v58, %v6572_v40  ;;  %v6574_v3 = vrot.slane %v12740_v48, 1  ;;  %v6720_v22 = vrot.slane %v12923_v57, 1  ;;  %v12953_v58 = vld [vmem:[%s12730_s23 + $0x38] sm:$0x3] }
 0x166   : > { %10098 = vmatmul.mubr.msk.f32.gmra.mrb[2].mxu1 %vm1034_vm1, %v12418_v20  ;;  %14116 = vst [vmem:[#allocation47_spill] sm:$0xff] %v12930_v32  ;;  %14117 = vst [vmem:[#allocation19_spill] sm:$0xff] %v12939_v46  ;;  %v799_v20 = vld [vmem:[%s11719_s16 + $0x90] sm:$0xff]  ;;  %v6723_v40 = vrot.slane %v12934_v16, 1 }
 0x167   : > { %10100 = vmatprep.mubr.msk.f32.mxu1 %vm1034_vm1, %v12446_v0  ;;  %v6722_v0 = vrot.slane %v12768_v42, 1  ;;  %v825_v19 = vmul.f32 %v12477_v43, %v799_v20  ;;  %v12971_v35 = vsel %vm1318_vm0, %v6719_v44, %v6720_v22  ;;  %v6728_v20 = vrot.slane %v12798_v56, 1  ;;  %v12988_v44 = vld [vmem:[%s12730_s23 + $0x68] sm:$0x3]  ;;  %v9333_v22 = vld [vmem:[%s13862_s10 + $0xa0] sm:$0xff] }
 0x168   : > { %10479 = vmatmul.mubr.msk.f32.gmra.mrb[4].mxu0 %vm1034_vm1, %v12930_v32  ;;  %v12961_v32 = vsel %vm1637_vm2, %v2546_v51, %v2547_v49 }
 0x169   : > { %10481 = vmatprep.mubr.msk.f32.mxu0 %vm1034_vm1, %v12939_v46  ;;  %v12958_v46 = vsel %vm1318_vm0, %v6574_v3, %v6575_v59  ;;  %14118 = vst [vmem:[#allocation65_spill] sm:$0xff] %v12961_v32  ;;  %v6726_v59 = vrot.slane %v12953_v58, 1  ;;  %v12978_v51 = vsel %vm1318_vm0, %v6722_v0, %v6723_v40  ;;  %v12983_v3 = vld [vmem:[%s12730_s23 + $0x58] sm:$0x3] }
 0x16a   : > { %10101 = vmatmul.mubr.msk.f32.gmra.mrb[4].mxu1 %vm1034_vm1, %v12463_v23  ;;  %v12964_v23 = vld [vmem:[%s12730_s23 + $0x48] sm:$0x3]  ;;  %14119 = vst [vmem:[#allocation66_spill] sm:$0xff] %v12978_v51  ;;  %v6732_v40 = vrot.slane %v12983_v3, 1 }
 0x16b   : > { %10103 = vmatprep.mubr.msk.f32.mxu1 %vm1034_vm1, %v12474_v9  ;;  %v6725_v9 = vrot.slane %v12788_v34, 1  ;;  %v6729_v49 = vrot.slane %v12964_v23, 1 }
 0x16c   : > { %10482 = vmatmul.mubr.msk.f32.gmra.mrb[6].mxu0 %vm1034_vm1, %v12958_v46 }
 0x16d   : > { %10486 = vmatprep.mubr.msk.f32.mxu0 %vm1034_vm1, %v6718_v2  ;;  %v851_v2 = vadd.f32 %v12491_v62, %v825_v19  ;;  %v13000_v0 = vsel %vm1318_vm0, %v6725_v9, %v6726_v59  ;;  %v13010_v19 = vsel %vm1318_vm0, %v6728_v20, %v6729_v49  ;;  %v13015_v9 = vld [vmem:[%s12730_s23 + $0x78] sm:$0x3]  ;;  %v6737_v20 = vrot.slane %v12836_v25, 1 }
 0x16e   : > { %10104 = vmatmul.mubr.msk.f32.gmra.mrb[6].mxu1 %vm1034_vm1, %v12961_v32  ;;  %v9088_v32 = vld [vmem:[%s13861_s9 + $0x38] sm:$0xff]  ;;  %v6738_v49 = vrot.slane %v13015_v9, 1 }
 0x16f   : > { %10108 = vmatprep.mubr.msk.f32.mxu1 %vm1034_vm1, %v11792_v6  ;;  %v6731_v6 = vrot.slane %v12815_v8, 1  ;;  %v871_v59 = vmax.f32 %v851_v2, 0.0 }
 0x170   : > { %10487 = vmatmul.mubr.msk.f32.vlgmr.msra.gmra.mrb[0].mxu0 %vm1034_vm1, %v12971_v35 }
 0x171   : > { %10489 = vmatprep.mubr.msk.f32.mxu0 %vm1034_vm1, %v12978_v51  ;;  %10499 = vmatpush3.msra.mxu0 %v12872_v60  ;;  %v6734_v51 = vrot.slane %v12820_v61, 1  ;;  %v6735_v60 = vrot.slane %v12988_v44, 1  ;;  %v891_v2 = vmin.f32 %v871_v59, 6.0  ;;  %v6874_v59 = vrot.slane %v12668_v55, 2 }
 0x172   : > { %10109 = vmatmul.mubr.msk.f32.vlgmr.msra.gmra.mrb[0].mxu1 %vm1034_vm1, %v11809_v24  ;;  %10512 = vmatprep.subr.mxu0 %v9333_v22  ;;  %v13025_v24 = vsel %vm1318_vm0, %v6731_v6, %v6732_v40  ;;  %v986_v6 = vpop.permute.xlu0 %985  ;;  %v13042_v40 = vsel %vm1318_vm0, %v6737_v20, %v6738_v49  ;;  %v6884_v20 = vrot.slane %v12848_v36, 2  ;;  %v6883_v36 = vrot.slane %v12698_v45, 2 }
 0x173   : > { %10121 = vmatpush3.msra.mxu1 %v12889_v50  ;;  %10111 = vmatprep.mubr.msk.f32.mxu1 %vm1034_vm1, %v11811_v27  ;;  %v13032_v27 = vsel %vm1318_vm0, %v6734_v51, %v6735_v60  ;;  %v6872_v50 = vrot.slane %v12806_v13, 2  ;;  %v6878_v13 = vrot.slane %v12828_v28, 2  ;;  %v13051_v51 = vmul.f32 %v986_v6, %v891_v2  ;;  %v800_v2 = vld [vmem:[%s11719_s16 + $0x98] sm:$0x3]  ;;  %v11183_v6 = vld [vmem:[%s11834_s18 + $0x30] sm:$0xff] }
 0x174   : > { %10490 = vmatmul.mubr.msk.f32.gmra.mrb[2].mxu0 %vm1034_vm1, %v13000_v0  ;;  %10134 = vmatprep.subr.mxu1 %v9088_v32 }
 0x175   : > { %10492 = vmatprep.mubr.msk.f32.mxu0 %vm1034_vm1, %v13010_v19 }
 0x176   : > { %10112 = vmatmul.mubr.msk.f32.gmra.mrb[2].mxu1 %vm1034_vm1, %v11823_v33  ;;  %v6871_v33 = vrot.slane %v12657_v37, 2  ;;  %v11182_v37 = vld [vmem:[%s11834_s18 + $0x20] sm:$0xff] }
 0x177   : > { %10114 = vmatprep.mubr.msk.f32.mxu1 %vm1034_vm1, %v11825_v38  ;;  %v6875_v38 = vrot.slane %v12822_v39, 2  ;;  %v13070_v39 = vld [vmem:[%s13861_s9 + $0xa8] sm:$0xff] }
 0x178   : > { %10493 = vmatmul.mubr.msk.f32.gmra.mrb[4].mxu0 %vm1034_vm1, %v13025_v24  ;;  %v6873_v60 = vsel %vm1637_vm2, %v6871_v33, %v6872_v50  ;;  %v13084_v50 = vld [vmem:[%s13862_s10 + $0x38] sm:$0xff]  ;;  %v6887_v33 = vrot.slane %v12865_v1, 2  ;;  %v826_v1 = vmul.f32 %v12477_v43, %v800_v2 }
 0x179   : > { %10495 = vmatprep.mubr.msk.f32.mxu0 %vm1034_vm1, %v13032_v27  ;;  %v13062_v28 = vsel %vm1637_vm2, %v6874_v59, %v6875_v38  ;;  %v7026_v59 = vrot.slane %v12745_v29, 2 }
 0x17a   : > { %10115 = vmatmul.mubr.msk.f32.gmra.mrb[4].mxu1 %vm1034_vm1, %v11844_v15  ;;  %v6877_v15 = vrot.slane %v12673_v12, 2  ;;  %v852_v2 = vadd.f32 %v12491_v62, %v826_v1 }
 0x17b   : > { %10117 = vmatprep.mubr.msk.f32.mxu1 %vm1034_vm1, %v12528_v47  ;;  %v6881_v47 = vrot.slane %v12843_v18, 2  ;;  %v6880_v18 = vrot.slane %v12693_v54, 2 }
 0x17c   : > { %10496 = vmatmul.mubr.msk.f32.gmra.mrb[6].mxu0 %vm1034_vm1, %v13042_v40  ;;  %v13076_v49 = vsel %vm1637_vm2, %v6877_v15, %v6878_v13  ;;  %v6890_v13 = vrot.slane %v12875_v30, 2  ;;  %v11185_v15 = vld [vmem:[%s11834_s18 + $0x50] sm:$0xff]  ;;  %v6889_v30 = vrot.slane %v12718_v53, 2 }
 0x17d   : > { %10500 = vmatprep.mubr.msk.f32.mxu0 %vm1034_vm1, %v6873_v60  ;;  %v13095_v38 = vsel %vm1637_vm2, %v6880_v18, %v6881_v47  ;;  %v13101_v60 = vsel %vm1637_vm2, %v6883_v36, %v6884_v20  ;;  %v7027_v47 = vrot.slane %v12905_v4, 2  ;;  %v11186_v20 = vld [vmem:[%s11834_s18 + $0x60] sm:$0xff]  ;;  %v7030_v4 = vrot.slane %v12923_v57, 2  ;;  %v11187_v36 = vld [vmem:[%s11834_s18 + $0x70] sm:$0xff] }
 0x17e   : > { %10118 = vmatmul.mubr.msk.f32.gmra.mrb[6].mxu1 %vm1034_vm1, %v13051_v51  ;;  %14120 = vst [vmem:[#allocation67_spill] sm:$0xff] %v13101_v60  ;;  %v13122_v29 = vsel %vm1637_vm2, %v6889_v30, %v6890_v13  ;;  %v7033_v13 = vrot.slane %v12934_v16, 2  ;;  %v872_v57 = vmax.f32 %v852_v2, 0.0  ;;  %v7036_v16 = vrot.slane %v12953_v58, 2  ;;  %v9106_v2 = vld [vmem:[%s13861_s9 + $0x40] sm:$0xff] }
 0x17f   : > { %10122 = vmatprep.mubr.msk.f32.mxu1 %vm1034_vm1, %v11182_v37  ;;  %v6893_v37 = vrot.slane %v12896_v52, 2  ;;  %14122 = vst [vmem:[#allocation69_spill] sm:$0xff] %v13122_v29  ;;  %v6892_v52 = vrot.slane %v12740_v48, 2  ;;  %v7038_v30 = vrot.slane %v12798_v56, 2 }
 0x180   : > { %10501 = vmatmul.mubr.msk.f32.vlgmr.msra.gmra.mrb[0].mxu0 %vm1034_vm1, %v13062_v28  ;;  %v892_v58 = vmin.f32 %v872_v57, 6.0  ;;  %v14128_v57 = vld [vmem:[#allocation45_spill] sm:$0xff] }
 0x181   : > { %10503 = vmatprep.mubr.msk.f32.mxu0 %vm1034_vm1, %v13076_v49  ;;  %10513 = vmatpush3.msra.mxu0 %v9333_v22  ;;  %v11184_v22 = vld [vmem:[%s11834_s18 + $0x40] sm:$0xff]  ;;  %v13138_v1 = vsel %vm1637_vm2, %v6892_v52, %v6893_v37  ;;  %v9351_v37 = vld [vmem:[%s13862_s10 + $0xa8] sm:$0xff] }
 0x182   : > { %10123 = vmatmul.mubr.msk.f32.vlgmr.msra.gmra.mrb[0].mxu1 %vm1034_vm1, %v11183_v6  ;;  %10526 = vmatprep.subr.mxu0 %v13070_v39  ;;  %v7029_v6 = vrot.slane %v12763_v17, 2  ;;  %14123 = vst [vmem:[#allocation70_spill] sm:$0xff] %v13138_v1 }
 0x183   : > { %10135 = vmatpush3.msra.mxu1 %v9088_v32  ;;  %10125 = vmatprep.mubr.msk.f32.mxu1 %vm1034_vm1, %v11184_v22  ;;  %v6886_v32 = vrot.slane %v12714_v11, 2  ;;  %v7032_v22 = vrot.slane %v12768_v42, 2 }
 0x184   : > { %10504 = vmatmul.mubr.msk.f32.gmra.mrb[2].mxu0 %vm1034_vm1, %v13095_v38  ;;  %10148 = vmatprep.subr.mxu1 %v13084_v50 }
 0x185   : > { %10506 = vmatprep.mubr.msk.f32.mxu0 %vm1034_vm1, %v13101_v60  ;;  %v13117_v18 = vsel %vm1637_vm2, %v6886_v32, %v6887_v33  ;;  %v7028_v33 = vsel %vm1637_vm2, %v7026_v59, %v7027_v47  ;;  %v13141_v32 = vld [vmem:[%s11834_s18 + $0x90] sm:$0xff]  ;;  %v13147_v59 = vsel %vm1637_vm2, %v7029_v6, %v7030_v4  ;;  %v7039_v47 = vrot.slane %v12964_v23, 2  ;;  %v991_v6 = vpop.permute.xlu1 %990 }
 0x186   : > { %10126 = vmatmul.mubr.msk.f32.gmra.mrb[2].mxu1 %vm1034_vm1, %v11185_v15  ;;  %14121 = vst [vmem:[#allocation68_spill] sm:$0xff] %v13117_v18  ;;  %v7035_v15 = vrot.slane %v12788_v34, 2  ;;  %v7041_v23 = vrot.slane %v12815_v8, 2  ;;  %v7045_v4 = vrot.slane %v12988_v44, 2  ;;  %v7047_v44 = vrot.slane %v12836_v25, 2 }
 0x187   : > { %10128 = vmatprep.mubr.msk.f32.mxu1 %vm1034_vm1, %v11186_v20  ;;  %v13179_v52 = vsel %vm1637_vm2, %v7038_v30, %v7039_v47  ;;  %v14130_v47 = vld [vmem:[#allocation46_spill] sm:$0xff] }
 0x188   : > { %10507 = vmatmul.mubr.msk.f32.gmra.mrb[4].mxu0 %vm1034_vm1, %v13117_v18  ;;  %v13169_v20 = vsel %vm1637_vm2, %v7035_v15, %v7036_v16  ;;  %14124 = vst [vmem:[#allocation71_spill] sm:$0xff] %v13179_v52  ;;  %v2903_v16 = vrot.slane %v13051_v51, 1 }
 0x189   : > { %10509 = vmatprep.mubr.msk.f32.mxu0 %vm1034_vm1, %v13122_v29 }
 0x18a   : > { %10129 = vmatmul.mubr.msk.f32.gmra.mrb[4].mxu1 %vm1034_vm1, %v11187_v36  ;;  %v13188_v36 = vmul.f32 %v991_v6, %v892_v58  ;;  %v14131_v58 = vld [vmem:[#allocation10_spill] sm:$0xff]  ;;  %v9360_v6 = vld [vmem:[%s13861_s9 + $0xb0] sm:$0xff] }
 0x18b   : > { %10131 = vmatprep.mubr.msk.f32.mxu1 %vm1034_vm1, %v12588_v26  ;;  %v13154_v26 = vsel %vm1637_vm2, %v7032_v22, %v7033_v13  ;;  %v6043_v13 = vld [vmem:[%s12564_s4 + $0x80] sm:$0xff] }
 0x18c   : > { %10510 = vmatmul.mubr.msk.f32.gmra.mrb[6].mxu0 %vm1034_vm1, %v13138_v1  ;;  %v2904_v15 = vrot.slane %v13188_v36, 1  ;;  %v6063_v30 = vmul.f32 %v12477_v43, %v6043_v13  ;;  %v14132_v43 = vld [vmem:[#allocation48_spill] sm:$0xff] }
 0x18d   : > { %10514 = vmatprep.mubr.msk.f32.mxu0 %vm1034_vm1, %v7028_v33  ;;  %v7048_v33 = vrot.slane %v13015_v9, 2 }
 0x18e   : > { %10132 = vmatmul.mubr.msk.f32.gmra.mrb[6].mxu1 %vm1034_vm1, %v13141_v32 }
 0x18f   : > { %10136 = vmatprep.mubr.msk.f32.mxu1 %vm1034_vm1, %v12104_v7  ;;  %v7042_v7 = vrot.slane %v12983_v3, 2  ;;  %v14125_v3 = vld [vmem:[#allocation42_spill] sm:$0xff]  ;;  %v13212_v9 = vsel %vm1637_vm2, %v7047_v44, %v7048_v33  ;;  %v6210_v33 = vpop.permute.xlu0 %6209 }
 0x190   : > { %10515 = vmatmul.mubr.msk.f32.vlgmr.msra.gmra.mrb[0].mxu0 %vm1034_vm1, %v13147_v59  ;;  %v14135_v44 = vld [vmem:[#allocation22_spill] sm:$0xff] }
 0x191   : > { %10517 = vmatprep.mubr.msk.f32.mxu0 %vm1034_vm1, %v13154_v26  ;;  %10527 = vmatpush3.msra.mxu0 %v13070_v39  ;;  %v7044_v39 = vrot.slane %v12820_v61, 2 }
 0x192   : > { %10137 = vmatmul.mubr.msk.f32.vlgmr.msra.gmra.mrb[0].mxu1 %vm1034_vm1, %v14096_v41  ;;  %10540 = vmatprep.subr.mxu0 %v9351_v37  ;;  %v13193_v41 = vsel %vm1637_vm2, %v7041_v23, %v7042_v7  ;;  %v2905_v23 = vsel %vm1318_vm0, %v2903_v16, %v2904_v15  ;;  %v6083_v7 = vadd.f32 %v12491_v62, %v6063_v30  ;;  %v9115_v62 = vld [vmem:[%s13862_s10 + $0x40] sm:$0xff] }
 0x193   : > { %10149 = vmatpush3.msra.mxu1 %v13084_v50  ;;  %10139 = vmatprep.mubr.msk.f32.mxu1 %vm1034_vm1, %v14125_v3  ;;  %14126 = vst [vmem:[#allocation42_spill] sm:$0xff] %v13193_v41  ;;  %v14127_v50 = vld [vmem:[#allocation43_spill] sm:$0xff]  ;;  %v13200_v22 = vsel %vm1637_vm2, %v7044_v39, %v7045_v4  ;;  %v14133_v39 = vld [vmem:[#allocation49_spill] sm:$0xff]  ;;  %v14134_v4 = vld [vmem:[#allocation50_spill] sm:$0xff] }
 0x194   : > { %10518 = vmatmul.mubr.msk.f32.gmra.mrb[2].mxu0 %vm1034_vm1, %v13169_v20  ;;  %10162 = vmatprep.subr.mxu1 %v9106_v2  ;;  %14129 = vst [vmem:[#allocation43_spill] sm:$0xff] %v13212_v9  ;;  %v13245_v3 = vld [vmem:[%s11834_s18 + $0x98] sm:$0x3]  ;;  %v14137_v15 = vld [vmem:[#allocation51_spill] sm:$0xff] }
 0x195   : > { %10520 = vmatprep.mubr.msk.f32.mxu0 %vm1034_vm1, %v13179_v52  ;;  %v3025_v13 = vrot.slane %v13245_v3, 1  ;;  %v14138_v16 = vld [vmem:[#allocation39_spill] sm:$0xff] }
 0x196   : > { %10140 = vmatmul.mubr.msk.f32.gmra.mrb[2].mxu1 %vm1034_vm1, %v14127_v50  ;;  %v14136_v50 = vld [vmem:[#allocation23_spill] sm:$0xff] }
 0x197   : > { %10142 = vmatprep.mubr.msk.f32.mxu1 %vm1034_vm1, %v14128_v57 }
 0x198   : > { %10521 = vmatmul.mubr.msk.f32.gmra.mrb[4].mxu0 %vm1034_vm1, %v13193_v41 }
 0x199   : > { %10523 = vmatprep.mubr.msk.f32.mxu0 %vm1034_vm1, %v13200_v22 }
 0x19a   : > { %10143 = vmatmul.mubr.msk.f32.gmra.mrb[4].mxu1 %vm1034_vm1, %v14130_v47  ;;  %v14139_v47 = vld [vmem:[#allocation52_spill] sm:$0xff] }
 0x19b   : > { %10145 = vmatprep.mubr.msk.f32.mxu1 %vm1034_vm1, %v14131_v58  ;;  %v9369_v58 = vld [vmem:[%s13862_s10 + $0xb0] sm:$0xff] }
 0x19c   : > { %10524 = vmatmul.mubr.msk.f32.gmra.mrb[6].mxu0 %vm1034_vm1, %v13212_v9 }
 0x19d   : > { %10528 = vmatprep.mubr.msk.f32.mxu0 %vm1034_vm1, %v12668_v55  ;;  %v6103_v55 = vmax.f32 %v6083_v7, 0.0  ;;  %v14140_v7 = vld [vmem:[#allocation53_spill] sm:$0xff] }
 0x19e   : > { %10146 = vmatmul.mubr.msk.f32.gmra.mrb[6].mxu1 %vm1034_vm1, %v2905_v23  ;;  %v6044_v23 = vld [vmem:[%s12564_s4 + $0x88] sm:$0x3] }
 0x19f   : > { %10150 = vmatprep.mubr.msk.f32.mxu1 %vm1034_vm1, %v14132_v43  ;;  %v13287_v43 = vld [vmem:[%s11725_s21] ss:$0 sm:$0xff] }
 0x1a0   : > { %10529 = vmatmul.mubr.msk.f32.vlgmr.msra.gmra.mrb[0].mxu0 %vm1034_vm1, %v12673_v12 }
 0x1a1   : > { %10531 = vmatprep.mubr.msk.f32.mxu0 %vm1034_vm1, %v12693_v54  ;;  %10541 = vmatpush3.msra.mxu0 %v9351_v37  ;;  %v6123_v37 = vmin.f32 %v6103_v55, 6.0  ;;  %v6064_v55 = vmul.f32 %v13287_v43, %v6044_v23  ;;  %v14146_v23 = vld [vmem:[#allocation44_spill] sm:$0xff] }
 0x1a2   : > { %10151 = vmatmul.mubr.msk.f32.vlgmr.msra.gmra.mrb[0].mxu1 %vm1034_vm1, %v14133_v39  ;;  %10554 = vmatprep.subr.mxu0 %v9360_v6  ;;  %v14141_v39 = vld [vmem:[#allocation54_spill] sm:$0xff] }
 0x1a3   : > { %10163 = vmatpush3.msra.mxu1 %v9106_v2  ;;  %10153 = vmatprep.mubr.msk.f32.mxu1 %vm1034_vm1, %v14134_v4  ;;  %v3024_v2 = vrot.slane %v13141_v32, 1  ;;  %v13259_v57 = vmul.f32 %v6210_v33, %v6123_v37  ;;  %v13299_v4 = vld [vmem:[%s11735_s17] ss:$0 sm:$0xff]  ;;  %v3144_v33 = vrot.slane %v13051_v51, 2 }
 0x1a4   : > { %10532 = vmatmul.mubr.msk.f32.gmra.mrb[2].mxu0 %vm1034_vm1, %v12698_v45  ;;  %10176 = vmatprep.subr.mxu1 %v9115_v62  ;;  %v6084_v37 = vadd.f32 %v13299_v4, %v6064_v55  ;;  %v14148_v55 = vld [vmem:[#allocation60_spill] sm:$0xff] }
 0x1a5   : > { %10534 = vmatprep.mubr.msk.f32.mxu0 %vm1034_vm1, %v12714_v11  ;;  %v3026_v30 = vsel %vm1318_vm0, %v3024_v2, %v3025_v13  ;;  %v13311_v2 = vld [vmem:[%s12730_s23 + $0x80] sm:$0xff] }
 0x1a6   : > { %10154 = vmatmul.mubr.msk.f32.gmra.mrb[2].mxu1 %vm1034_vm1, %v14135_v44  ;;  %v14143_v44 = vld [vmem:[#allocation55_spill] sm:$0xff]  ;;  %v6104_v13 = vmax.f32 %v6084_v37, 0.0 }
 0x1a7   : > { %10156 = vmatprep.mubr.msk.f32.mxu1 %vm1034_vm1, %v14136_v50  ;;  %v3410_v50 = vld [vmem:[%s11763_s24] sm:$0xff] }
 0x1a8   : > { %10535 = vmatmul.mubr.msk.f32.gmra.mrb[4].mxu0 %vm1034_vm1, %v12718_v53  ;;  %v14149_v37 = vld [vmem:[#allocation63_spill] sm:$0xff] }
 0x1a9   : > { %10537 = vmatprep.mubr.msk.f32.mxu0 %vm1034_vm1, %v12740_v48 }
 0x1aa   : > { %10157 = vmatmul.mubr.msk.f32.gmra.mrb[4].mxu1 %vm1034_vm1, %v14137_v15  ;;  %v6124_v15 = vmin.f32 %v6104_v13, 6.0  ;;  %v14151_v13 = vld [vmem:[#allocation64_spill] sm:$0xff] }
 0x1ab   : > { %10159 = vmatprep.mubr.msk.f32.mxu1 %vm1034_vm1, %v14138_v16 }
 0x1ac   : > { %10538 = vmatmul.mubr.msk.f32.gmra.mrb[6].mxu0 %vm1034_vm1, %v13259_v57 }
 0x1ad   : > { %10542 = vmatprep.mubr.msk.f32.mxu0 %vm1034_vm1, %v12763_v17  ;;  %v9125_v17 = vld [vmem:[%s13861_s9 + $0x48] sm:$0xff] }
 0x1ae   : > { %10160 = vmatmul.mubr.msk.f32.gmra.mrb[6].mxu1 %vm1034_vm1, %v3026_v30  ;;  %v14144_v30 = vld [vmem:[#allocation56_spill] sm:$0xff] }
 0x1af   : > { %10164 = vmatprep.mubr.msk.f32.mxu1 %vm1034_vm1, %v14139_v47  ;;  %v14145_v47 = vld [vmem:[#allocation57_spill] sm:$0xff] }
 0x1b0   : > { %10543 = vmatmul.mubr.msk.f32.vlgmr.msra.gmra.mrb[0].mxu0 %vm1034_vm1, %v12768_v42 }
 0x1b1   : > { %10545 = vmatprep.mubr.msk.f32.mxu0 %vm1034_vm1, %v12788_v34  ;;  %10555 = vmatpush3.msra.mxu0 %v9360_v6  ;;  %v14142_v6 = vld [vmem:[#allocation13_spill] sm:$0xff] }
 0x1b2   : > { %10165 = vmatmul.mubr.msk.f32.vlgmr.msra.gmra.mrb[0].mxu1 %vm1034_vm1, %v14140_v7  ;;  %10568 = vmatprep.subr.mxu0 %v9369_v58 }
 0x1b3   : > { %10177 = vmatpush3.msra.mxu1 %v9115_v62  ;;  %10167 = vmatprep.mubr.msk.f32.mxu1 %vm1034_vm1, %v14141_v39  ;;  %v3145_v62 = vrot.slane %v13188_v36, 2  ;;  %v3430_v36 = vmul.f32 %v13287_v43, %v3410_v50  ;;  %v3513_v50 = vpop.permute.xlu0 %3512 }
 0x1b4   : > { %10546 = vmatmul.mubr.msk.f32.gmra.mrb[2].mxu0 %vm1034_vm1, %v12798_v56  ;;  %10190 = vmatprep.subr.mxu1 %v9125_v17 }
 0x1b5   : > { %10548 = vmatprep.mubr.msk.f32.mxu0 %vm1034_vm1, %v12815_v8  ;;  %v3146_v51 = vsel %vm1637_vm2, %v3144_v33, %v3145_v62  ;;  %v3450_v16 = vadd.f32 %v13299_v4, %v3430_v36  ;;  %v14150_v62 = vld [vmem:[#allocation19_spill] sm:$0xff] }
 0x1b6   : > { %10168 = vmatmul.mubr.msk.f32.gmra.mrb[2].mxu1 %vm1034_vm1, %v14142_v6  ;;  %v3264_v6 = vrot.slane %v13141_v32, 2  ;;  %v14152_v32 = vld [vmem:[#allocation65_spill] sm:$0xff] }
 0x1b7   : > { %10170 = vmatprep.mubr.msk.f32.mxu1 %vm1034_vm1, %v14143_v44  ;;  %v3470_v7 = vmax.f32 %v3450_v16, 0.0  ;;  %v3265_v44 = vrot.slane %v13245_v3, 2  ;;  %v14154_v16 = vld [vmem:[#allocation12_spill] sm:$0xff] }
 0x1b8   : > { %10549 = vmatmul.mubr.msk.f32.gmra.mrb[4].mxu0 %vm1034_vm1, %v12820_v61 }
 0x1b9   : > { %10551 = vmatprep.mubr.msk.f32.mxu0 %vm1034_vm1, %v12836_v25  ;;  %v3490_v33 = vmin.f32 %v3470_v7, 6.0  ;;  %v3266_v3 = vsel %vm1637_vm2, %v3264_v6, %v3265_v44  ;;  %v14155_v7 = vld [vmem:[#allocation14_spill] sm:$0xff]  ;;  %v14156_v6 = vld [vmem:[#allocation17_spill] sm:$0xff] }
 0x1ba   : > { %10171 = vmatmul.mubr.msk.f32.gmra.mrb[4].mxu1 %vm1034_vm1, %v14114_v31  ;;  %v9378_v31 = vld [vmem:[%s13861_s9 + $0xb8] sm:$0xff]  ;;  %v14158_v44 = vld [vmem:[#allocation25_spill] sm:$0xff] }
 0x1bb   : > { %10173 = vmatprep.mubr.msk.f32.mxu1 %vm1034_vm1, %v12855_v10  ;;  %v6215_v10 = vpop.permute.xlu1 %6214 }
 0x1bc   : > { %10552 = vmatmul.mubr.msk.f32.gmra.mrb[6].mxu0 %vm1034_vm1, %v13311_v2 }
 0x1bd   : > { %10556 = vmatprep.mubr.msk.f32.mxu0 %vm1034_vm1, %v12862_v14  ;;  %v9134_v14 = vld [vmem:[%s13862_s10 + $0x48] sm:$0xff] }
 0x1be   : > { %10174 = vmatmul.mubr.msk.f32.gmra.mrb[6].mxu1 %vm1034_vm1, %v3146_v51  ;;  %v13370_v51 = vmul.f32 %v3513_v50, %v3490_v33  ;;  %v14159_v33 = vld [vmem:[#allocation28_spill] sm:$0xff]  ;;  %v13421_v50 = vld [vmem:[%s11444_s22] sm:$0xff] }
 0x1bf   : > { %10178 = vmatprep.mubr.msk.f32.mxu1 %vm1034_vm1, %v12403_v21  ;;  %v13340_v21 = vmul.f32 %v6215_v10, %v6124_v15  ;;  %v9387_v15 = vld [vmem:[%s13862_s10 + $0xb8] sm:$0xff] }
 0x1c0   : > { %10557 = vmatmul.mubr.msk.f32.vlgmr.msra.gmra.mrb[0].mxu0 %vm1034_vm1, %v12880_v63  ;;  %v14153_v10 = vld [vmem:[#allocation66_spill] sm:$0xff] }
 0x1c1   : > { %10559 = vmatprep.mubr.msk.f32.mxu0 %vm1034_vm1, %v12902_v5  ;;  %10569 = vmatpush3.msra.mxu0 %v9369_v58  ;;  %v14147_v58 = vld [vmem:[#allocation47_spill] sm:$0xff]  ;;  %v7419_v39 = vrot.slane %v13340_v21, 1 }
 0x1c2   : > { %10179 = vmatmul.mubr.msk.f32.vlgmr.msra.gmra.mrb[0].mxu1 %vm1034_vm1, %v14144_v30  ;;  %10582 = vmatprep.subr.mxu0 %v9378_v31  ;;  %v13390_v30 = vld [vmem:[%s12730_s23 + $0x88] sm:$0x3] }
 0x1c3   : > { %10191 = vmatpush3.msra.mxu1 %v9125_v17  ;;  %10181 = vmatprep.mubr.msk.f32.mxu1 %vm1034_vm1, %v14145_v47  ;;  %v7418_v17 = vrot.slane %v13259_v57, 1  ;;  %v3411_v47 = vld [vmem:[%s11763_s24 + $0x8] sm:$0x3]  ;;  %s721_s24 = sadd.s32 %s8958_s19, %s14225_s25 }
 0x1c4   : > { %10560 = vmatmul.mubr.msk.f32.gmra.mrb[2].mxu0 %vm1034_vm1, %v14146_v23  ;;  %10204 = vmatprep.subr.mxu1 %v9134_v14  ;;  %s8959_s20 = sshll.u32 %s721_s24, 1 }
 0x1c5   : > { %10562 = vmatprep.mubr.msk.f32.mxu0 %vm1034_vm1, %v14147_v58  ;;  %v13365_v36 = vsel %vm1318_vm0, %v7418_v17, %v7419_v39  ;;  %v3431_v39 = vmul.f32 %v13287_v43, %v3411_v47 }
 0x1c6   : > { %10182 = vmatmul.mubr.msk.f32.gmra.mrb[2].mxu1 %vm1034_vm1, %v14148_v55  ;;  %v7540_v55 = vrot.slane %v13390_v30, 1 }
 0x1c7   : > { %10184 = vmatprep.mubr.msk.f32.mxu1 %vm1034_vm1, %v14149_v37  ;;  %v3451_v17 = vadd.f32 %v13299_v4, %v3431_v39  ;;  %v13445_v39 = vld [vmem:[%s11444_s22 + $0x20] sm:$0xff] }
 0x1c8   : > { %10563 = vmatmul.mubr.msk.f32.gmra.mrb[4].mxu0 %vm1034_vm1, %v14150_v62  ;;  %14161 = vst [vmem:[#allocation45_spill] sm:$0xff] %v13445_v39 }
 0x1c9   : > { %10565 = vmatprep.mubr.msk.f32.mxu0 %vm1034_vm1, %v12958_v46 }
 0x1ca   : > { %10185 = vmatmul.mubr.msk.f32.gmra.mrb[4].mxu1 %vm1034_vm1, %v14151_v13  ;;  %v3471_v13 = vmax.f32 %v3451_v17, 0.0  ;;  %v13456_v17 = vld [vmem:[%s11444_s22 + $0x30] sm:$0xff] }
 0x1cb   : > { %10187 = vmatprep.mubr.msk.f32.mxu1 %vm1034_vm1, %v14152_v32  ;;  %v14160_v32 = vld [vmem:[#allocation30_spill] sm:$0xff]  ;;  %14162 = vst [vmem:[#allocation46_spill] sm:$0xff] %v13456_v17 }
 0x1cc   : > { %10566 = vmatmul.mubr.msk.f32.gmra.mrb[6].mxu0 %vm1034_vm1, %v13365_v36  ;;  %v3491_v47 = vmin.f32 %v3471_v13, 6.0  ;;  %v13462_v13 = vld [vmem:[%s11444_s22 + $0x40] sm:$0xff] }
 0x1cd   : > { %10570 = vmatprep.mubr.msk.f32.mxu0 %vm1034_vm1, %v12971_v35  ;;  %v9143_v35 = vld [vmem:[%s13861_s9 + $0x50] sm:$0xff]  ;;  %14163 = vst [vmem:[#allocation10_spill] sm:$0xff] %v13462_v13 }
 0x1ce   : > { %10188 = vmatmul.mubr.msk.f32.gmra.mrb[6].mxu1 %vm1034_vm1, %v3266_v3  ;;  %v9396_v3 = vld [vmem:[%s13861_s9 + $0xc0] sm:$0xff] }
 0x1cf   : > { %10192 = vmatprep.mubr.msk.f32.mxu1 %vm1034_vm1, %v13370_v51 }
 0x1d0   : > { %10571 = vmatmul.mubr.msk.f32.vlgmr.msra.gmra.mrb[0].mxu0 %vm1034_vm1, %v14153_v10 }
 0x1d1   : > { %10573 = vmatprep.mubr.msk.f32.mxu0 %vm1034_vm1, %v13000_v0  ;;  %10583 = vmatpush3.msra.mxu0 %v9378_v31  ;;  %v7539_v31 = vrot.slane %v13311_v2, 1 }
 0x1d2   : > { %10193 = vmatmul.mubr.msk.f32.vlgmr.msra.gmra.mrb[0].mxu1 %vm1034_vm1, %v14154_v16  ;;  %10596 = vmatprep.subr.mxu0 %v9387_v15 }
 0x1d3   : > { %10205 = vmatpush3.msra.mxu1 %v9134_v14  ;;  %10195 = vmatprep.mubr.msk.f32.mxu1 %vm1034_vm1, %v14155_v7  ;;  %v14157_v14 = vld [vmem:[#allocation20_spill] sm:$0xff]  ;;  %v13411_v37 = vsel %vm1318_vm0, %v7539_v31, %v7540_v55  ;;  %v13440_v31 = vld [vmem:[%s11444_s22 + $0x10] sm:$0xff]  ;;  %v3518_v55 = vpop.permute.xlu1 %3517 }
 0x1d4   : > { %10574 = vmatmul.mubr.msk.f32.gmra.mrb[2].mxu0 %vm1034_vm1, %v13010_v19  ;;  %10218 = vmatprep.subr.mxu1 %v9143_v35 }
 0x1d5   : > { %10576 = vmatprep.mubr.msk.f32.mxu0 %vm1034_vm1, %v13025_v24 }
 0x1d6   : > { %10196 = vmatmul.mubr.msk.f32.gmra.mrb[2].mxu1 %vm1034_vm1, %v14156_v6 }
 0x1d7   : > { %10198 = vmatprep.mubr.msk.f32.mxu1 %vm1034_vm1, %v14157_v14 }
 0x1d8   : > { %10577 = vmatmul.mubr.msk.f32.gmra.mrb[4].mxu0 %vm1034_vm1, %v13032_v27 }
 0x1d9   : > { %10579 = vmatprep.mubr.msk.f32.mxu0 %vm1034_vm1, %v13042_v40 }
 0x1da   : > { %10199 = vmatmul.mubr.msk.f32.gmra.mrb[4].mxu1 %vm1034_vm1, %v14158_v44 }
 0x1db   : > { %10201 = vmatprep.mubr.msk.f32.mxu1 %vm1034_vm1, %v14159_v33 }
 0x1dc   : > { %10580 = vmatmul.mubr.msk.f32.gmra.mrb[6].mxu0 %vm1034_vm1, %v13411_v37 }
 0x1dd   : > { %10584 = vmatprep.mubr.msk.f32.mxu0 %vm1034_vm1, %v13062_v28  ;;  %v9152_v28 = vld [vmem:[%s13862_s10 + $0x50] sm:$0xff] }
 0x1de   : > { %10202 = vmatmul.mubr.msk.f32.gmra.mrb[6].mxu1 %vm1034_vm1, %v14160_v32 }
 0x1df   : > { %10206 = vmatprep.mubr.msk.f32.mxu1 %vm1034_vm1, %v13421_v50 }
 0x1e0   : > { %10585 = vmatmul.mubr.msk.f32.vlgmr.msra.gmra.mrb[0].mxu0 %vm1034_vm1, %v13076_v49 }
 0x1e1   : > { %10587 = vmatprep.mubr.msk.f32.mxu0 %vm1034_vm1, %v13095_v38  ;;  %10597 = vmatpush3.msra.mxu0 %v9387_v15  ;;  %v13453_v15 = vmul.f32 %v3518_v55, %v3491_v47  ;;  %v3936_v55 = vrot.slane %v13370_v51, 1 }
 0x1e2   : > { %10207 = vmatmul.mubr.msk.f32.vlgmr.msra.gmra.mrb[0].mxu1 %vm1034_vm1, %v13440_v31  ;;  %10610 = vmatprep.subr.mxu0 %v9396_v3 }
 0x1e3   : > { %10219 = vmatpush3.msra.mxu1 %v9143_v35  ;;  %10209 = vmatprep.mubr.msk.f32.mxu1 %vm1034_vm1, %v13445_v39  ;;  %v7660_v35 = vrot.slane %v13340_v21, 2  ;;  %v7659_v39 = vrot.slane %v13259_v57, 2  ;;  %v3937_v47 = vrot.slane %v13453_v15, 1  ;;  %v13479_v21 = vld [vmem:[%s11444_s22 + $0x60] sm:$0xff] }
 0x1e4   : > { %10588 = vmatmul.mubr.msk.f32.gmra.mrb[2].mxu0 %vm1034_vm1, %v13101_v60  ;;  %10232 = vmatprep.subr.mxu1 %v9152_v28  ;;  %14164 = vst [vmem:[#allocation48_spill] sm:$0xff] %v13479_v21  ;;  %v13493_v60 = vld [vmem:[%s11444_s22 + $0x70] sm:$0xff] }
 0x1e5   : > { %10590 = vmatprep.mubr.msk.f32.mxu0 %vm1034_vm1, %v13117_v18  ;;  %v13474_v18 = vld [vmem:[%s11444_s22 + $0x50] sm:$0xff] }
 0x1e6   : > { %10210 = vmatmul.mubr.msk.f32.gmra.mrb[2].mxu1 %vm1034_vm1, %v13456_v17  ;;  %v3939_v17 = vrot.slane %v14154_v16, 1 }
 0x1e7   : > { %10212 = vmatprep.mubr.msk.f32.mxu1 %vm1034_vm1, %v13462_v13  ;;  %v13484_v13 = vsel %vm1637_vm2, %v7659_v39, %v7660_v35  ;;  %v9405_v39 = vld [vmem:[%s13862_s10 + $0xc0] sm:$0xff]  ;;  %v14166_v35 = vld [vmem:[#allocation16_spill] sm:$0xff] }
 0x1e8   : > { %10591 = vmatmul.mubr.msk.f32.gmra.mrb[4].mxu0 %vm1034_vm1, %v13122_v29 }
 0x1e9   : > { %10593 = vmatprep.mubr.msk.f32.mxu0 %vm1034_vm1, %v13138_v1  ;;  %v14165_v1 = vld [vmem:[#allocation11_spill] sm:$0xff] }
 0x1ea   : > { %10213 = vmatmul.mubr.msk.f32.gmra.mrb[4].mxu1 %vm1034_vm1, %v13474_v18  ;;  %v3940_v29 = vrot.slane %v14165_v1, 1 }
 0x1eb   : > { %10215 = vmatprep.mubr.msk.f32.mxu1 %vm1034_vm1, %v13479_v21  ;;  %v3938_v21 = vsel %vm1318_vm0, %v3936_v55, %v3937_v47  ;;  %v14167_v47 = vld [vmem:[#allocation24_spill] sm:$0xff]  ;;  %v14168_v55 = vld [vmem:[#allocation27_spill] sm:$0xff] }
 0x1ec   : > { %10594 = vmatmul.mubr.msk.f32.gmra.mrb[6].mxu0 %vm1034_vm1, %v13484_v13  ;;  %v13505_v1 = vsel %vm1318_vm0, %v3939_v17, %v3940_v29  ;;  %v7779_v29 = vrot.slane %v13311_v2, 2  ;;  %v13523_v17 = vld [vmem:[%s11444_s22 + $0x8] sm:$0x3] }
 0x1ed   : > { %10598 = vmatprep.mubr.msk.f32.mxu0 %vm1034_vm1, %v13147_v59  ;;  %v9161_v59 = vld [vmem:[%s13861_s9 + $0x58] sm:$0xff] }
 0x1ee   : > { %10216 = vmatmul.mubr.msk.f32.gmra.mrb[6].mxu1 %vm1034_vm1, %v13493_v60 }
 0x1ef   : > { %10220 = vmatprep.mubr.msk.f32.mxu1 %vm1034_vm1, %v3938_v21  ;;  %v4099_v21 = vrot.slane %v13421_v50, 1 }
 0x1f0   : > { %10599 = vmatmul.mubr.msk.f32.vlgmr.msra.gmra.mrb[0].mxu0 %vm1034_vm1, %v13154_v26 }
 0x1f1   : > { %10601 = vmatprep.mubr.msk.f32.mxu0 %vm1034_vm1, %v13169_v20  ;;  %10611 = vmatpush3.msra.mxu0 %v9396_v3  ;;  %v7780_v3 = vrot.slane %v13390_v30, 2 }
 0x1f2   : > { %10221 = vmatmul.mubr.msk.f32.vlgmr.msra.gmra.mrb[0].mxu1 %vm1034_vm1, %v13505_v1  ;;  %10624 = vmatprep.subr.mxu0 %v9405_v39 }
 0x1f3   : > { %10233 = vmatpush3.msra.mxu1 %v9152_v28  ;;  %10223 = vmatprep.mubr.msk.f32.mxu1 %vm1034_vm1, %v14166_v35  ;;  %v6045_v28 = vld [vmem:[%s12564_s4 + $0x90] sm:$0xff]  ;;  %v4100_v35 = vrot.slane %v13523_v17, 1  ;;  %v13537_v30 = vsel %vm1637_vm2, %v7779_v29, %v7780_v3  ;;  %v9414_v3 = vld [vmem:[%s13861_s9 + $0xc8] sm:$0xff] }
 0x1f4   : > { %10602 = vmatmul.mubr.msk.f32.gmra.mrb[2].mxu0 %vm1034_vm1, %v13179_v52  ;;  %10246 = vmatprep.subr.mxu1 %v9161_v59  ;;  %v14170_v52 = vld [vmem:[#allocation59_spill] sm:$0xff]  ;;  %v14171_v29 = vld [vmem:[#allocation61_spill] sm:$0xff] }
 0x1f5   : > { %10604 = vmatprep.mubr.msk.f32.mxu0 %vm1034_vm1, %v13193_v41  ;;  %v6065_v41 = vmul.f32 %v13287_v43, %v6045_v28  ;;  %v14173_v28 = vld [vmem:[#allocation4_spill] sm:$0xff] }
 0x1f6   : > { %10224 = vmatmul.mubr.msk.f32.gmra.mrb[2].mxu1 %vm1034_vm1, %v14167_v47  ;;  %v14169_v47 = vld [vmem:[#allocation58_spill] sm:$0xff] }
 0x1f7   : > { %10226 = vmatprep.mubr.msk.f32.mxu1 %vm1034_vm1, %v14168_v55  ;;  %v4101_v55 = vsel %vm1318_vm0, %v4099_v21, %v4100_v35  ;;  %v14172_v35 = vld [vmem:[#allocation3_spill] sm:$0xff]  ;;  %v14177_v21 = vld [vmem:[#allocation8_spill] sm:$0xff] }
 0x1f8   : > { %10605 = vmatmul.mubr.msk.f32.gmra.mrb[4].mxu0 %vm1034_vm1, %v13200_v22 }
 0x1f9   : > { %10607 = vmatprep.mubr.msk.f32.mxu0 %vm1034_vm1, %v13212_v9  ;;  %v6085_v9 = vadd.f32 %v13299_v4, %v6065_v41 }
 0x1fa   : > { %10227 = vmatmul.mubr.msk.f32.gmra.mrb[4].mxu1 %vm1034_vm1, %v14169_v47 }
 0x1fb   : > { %10229 = vmatprep.mubr.msk.f32.mxu1 %vm1034_vm1, %v14170_v52  ;;  %v6105_v41 = vmax.f32 %v6085_v9, 0.0  ;;  %v6220_v9 = vpop.permute.xlu0 %6219 }
 0x1fc   : > { %10608 = vmatmul.mubr.msk.f32.gmra.mrb[6].mxu0 %vm1034_vm1, %v13537_v30 }
 0x1fd   : > { %10612 = vmatprep.mubr.msk.f32.mxu0 %vm1034_vm1, %v12673_v12  ;;  %v9170_v12 = vld [vmem:[%s13862_s10 + $0x58] sm:$0xff] }
 0x1fe   : > { %10230 = vmatmul.mubr.msk.f32.gmra.mrb[6].mxu1 %vm1034_vm1, %v14171_v29 }
 0x1ff   : > { %10234 = vmatprep.mubr.msk.f32.mxu1 %vm1034_vm1, %v4101_v55  ;;  %v14176_v55 = vld [vmem:[#allocation7_spill] sm:$0xff] }
 0x200   : > { %10613 = vmatmul.mubr.msk.f32.vlgmr.msra.gmra.mrb[0].mxu0 %vm1034_vm1, %v12693_v54  ;;  %v6125_v54 = vmin.f32 %v6105_v41, 6.0  ;;  %v14179_v41 = vld [vmem:[#allocation15_spill] sm:$0xff] }
 0x201   : > { %10615 = vmatprep.mubr.msk.f32.mxu0 %vm1034_vm1, %v12698_v45  ;;  %10625 = vmatpush3.msra.mxu0 %v9405_v39  ;;  %v14174_v45 = vld [vmem:[#allocation5_spill] sm:$0xff]  ;;  %v14175_v39 = vld [vmem:[#allocation6_spill] sm:$0xff] }
 0x202   : > { %10235 = vmatmul.mubr.msk.f32.vlgmr.msra.gmra.mrb[0].mxu1 %vm1034_vm1, %v14172_v35  ;;  %10638 = vmatprep.subr.mxu0 %v9414_v3 }
 0x203   : > { %10247 = vmatpush3.msra.mxu1 %v9161_v59  ;;  %10237 = vmatprep.mubr.msk.f32.mxu1 %vm1034_vm1, %v14173_v28  ;;  %v4254_v59 = vrot.slane %v13370_v51, 2  ;;  %v9423_v51 = vld [vmem:[%s13862_s10 + $0xc8] sm:$0xff]  ;;  %v14180_v28 = vld [vmem:[#allocation18_spill] sm:$0xff] }
 0x204   : > { %10616 = vmatmul.mubr.msk.f32.gmra.mrb[2].mxu0 %vm1034_vm1, %v12714_v11  ;;  %10260 = vmatprep.subr.mxu1 %v9170_v12  ;;  %v4255_v11 = vrot.slane %v13453_v15, 2  ;;  %v6046_v15 = vld [vmem:[%s12564_s4 + $0x98] sm:$0x3] }
 0x205   : > { %10618 = vmatprep.mubr.msk.f32.mxu0 %vm1034_vm1, %v12718_v53  ;;  %v13581_v53 = vmul.f32 %v6220_v9, %v6125_v54  ;;  %v6066_v35 = vmul.f32 %v13287_v43, %v6046_v15  ;;  %v4409_v43 = vrot.slane %v13421_v50, 2  ;;  %v14186_v9 = vld [vmem:[#allocation34_spill] sm:$0xff] }
 0x206   : > { %10238 = vmatmul.mubr.msk.f32.gmra.mrb[2].mxu1 %vm1034_vm1, %v14174_v45  ;;  %v6225_v45 = vpop.permute.xlu1 %6224 }
 0x207   : > { %10240 = vmatprep.mubr.msk.f32.mxu1 %vm1034_vm1, %v14175_v39 }
 0x208   : > { %10619 = vmatmul.mubr.msk.f32.gmra.mrb[4].mxu0 %vm1034_vm1, %v12740_v48  ;;  %v14178_v48 = vld [vmem:[#allocation9_spill] sm:$0xff] }
 0x209   : > { %10621 = vmatprep.mubr.msk.f32.mxu0 %vm1034_vm1, %v13259_v57  ;;  %v4256_v57 = vsel %vm1637_vm2, %v4254_v59, %v4255_v11  ;;  %v14187_v11 = vld [vmem:[#allocation35_spill] sm:$0xff]  ;;  %v8136_v59 = vrot.slane %v13581_v53, 1 }
 0x20a   : > { %10241 = vmatmul.mubr.msk.f32.gmra.mrb[4].mxu1 %vm1034_vm1, %v14176_v55  ;;  %v14189_v55 = vld [vmem:[#allocation37_spill] sm:$0xff] }
 0x20b   : > { %10243 = vmatprep.mubr.msk.f32.mxu1 %vm1034_vm1, %v14177_v21 }
 0x20c   : > { %10622 = vmatmul.mubr.msk.f32.gmra.mrb[6].mxu0 %vm1034_vm1, %v13581_v53 }
 0x20d   : > { %10626 = vmatprep.mubr.msk.f32.mxu0 %vm1034_vm1, %v12768_v42  ;;  %v9179_v42 = vld [vmem:[%s13861_s9 + $0x60] sm:$0xff] }
 0x20e   : > { %10244 = vmatmul.mubr.msk.f32.gmra.mrb[6].mxu1 %vm1034_vm1, %v14178_v48  ;;  %v14192_v48 = vld [vmem:[#allocation41_spill] sm:$0xff] }
 0x20f   : > { %10248 = vmatprep.mubr.msk.f32.mxu1 %vm1034_vm1, %v4256_v57  ;;  %v14207_v57 = vld [vmem:[#allocation43_spill] sm:$0xff] }
 0x210   : > { %10627 = vmatmul.mubr.msk.f32.vlgmr.msra.gmra.mrb[0].mxu0 %vm1034_vm1, %v12788_v34  ;;  %v14181_v34 = vld [vmem:[#allocation21_spill] sm:$0xff] }
 0x211   : > { %10629 = vmatprep.mubr.msk.f32.mxu0 %vm1034_vm1, %v12798_v56  ;;  %10639 = vmatpush3.msra.mxu0 %v9414_v3  ;;  %v6086_v56 = vadd.f32 %v13299_v4, %v6066_v35  ;;  %v14182_v3 = vld [vmem:[#allocation26_spill] sm:$0xff]  ;;  %v14184_v4 = vld [vmem:[#allocation31_spill] sm:$0xff] }
 0x212   : > { %10249 = vmatmul.mubr.msk.f32.vlgmr.msra.gmra.mrb[0].mxu1 %vm1034_vm1, %v14179_v41  ;;  %10652 = vmatprep.subr.mxu0 %v9423_v51 }
 0x213   : > { %10261 = vmatpush3.msra.mxu1 %v9170_v12  ;;  %10251 = vmatprep.mubr.msk.f32.mxu1 %vm1034_vm1, %v14180_v28  ;;  %v4410_v12 = vrot.slane %v13523_v17, 2  ;;  %v6106_v54 = vmax.f32 %v6086_v56, 0.0  ;;  %v9432_v17 = vld [vmem:[%s13861_s9 + $0xd0] sm:$0xff] }
 0x214   : > { %10630 = vmatmul.mubr.msk.f32.gmra.mrb[2].mxu0 %vm1034_vm1, %v12815_v8  ;;  %10274 = vmatprep.subr.mxu1 %v9179_v42  ;;  %v13627_v8 = vld [vmem:[%s12730_s23 + $0x90] sm:$0xff] }
 0x215   : > { %10632 = vmatprep.mubr.msk.f32.mxu0 %vm1034_vm1, %v12820_v61  ;;  %v14183_v61 = vld [vmem:[#allocation29_spill] sm:$0xff]  ;;  %v4411_v50 = vsel %vm1637_vm2, %v4409_v43, %v4410_v12 }
 0x216   : > { %10252 = vmatmul.mubr.msk.f32.gmra.mrb[2].mxu1 %vm1034_vm1, %v14181_v34 }
 0x217   : > { %10254 = vmatprep.mubr.msk.f32.mxu1 %vm1034_vm1, %v14182_v3 }
 0x218   : > { %10633 = vmatmul.mubr.msk.f32.gmra.mrb[4].mxu0 %vm1034_vm1, %v12836_v25  ;;  %v14185_v25 = vld [vmem:[#allocation33_spill] sm:$0xff] }
 0x219   : > { %10635 = vmatprep.mubr.msk.f32.mxu0 %vm1034_vm1, %v13311_v2  ;;  %v6126_v2 = vmin.f32 %v6106_v54, 6.0 }
 0x21a   : > { %10255 = vmatmul.mubr.msk.f32.gmra.mrb[4].mxu1 %vm1034_vm1, %v14183_v61 }
 0x21b   : > { %10257 = vmatprep.mubr.msk.f32.mxu1 %vm1034_vm1, %v14184_v4  ;;  %v13653_v39 = vmul.f32 %v6225_v45, %v6126_v2 }
 0x21c   : > { %10636 = vmatmul.mubr.msk.f32.gmra.mrb[6].mxu0 %vm1034_vm1, %v13627_v8 }
 0x21d   : > { %10640 = vmatprep.mubr.msk.f32.mxu0 %vm1034_vm1, %v12880_v63  ;;  %v9188_v63 = vld [vmem:[%s13862_s10 + $0x60] sm:$0xff] }
 0x21e   : > { %10258 = vmatmul.mubr.msk.f32.gmra.mrb[6].mxu1 %vm1034_vm1, %v14185_v25 }
 0x21f   : > { %10262 = vmatprep.mubr.msk.f32.mxu1 %vm1034_vm1, %v4411_v50 }
 0x220   : > { %10641 = vmatmul.mubr.msk.f32.vlgmr.msra.gmra.mrb[0].mxu0 %vm1034_vm1, %v12902_v5  ;;  %v14188_v5 = vld [vmem:[#allocation36_spill] sm:$0xff] }
 0x221   : > { %10643 = vmatprep.mubr.msk.f32.mxu0 %vm1034_vm1, %v14146_v23  ;;  %10653 = vmatpush3.msra.mxu0 %v9423_v51  ;;  %v8137_v23 = vrot.slane %v13653_v39, 1 }
 0x222   : > { %10263 = vmatmul.mubr.msk.f32.vlgmr.msra.gmra.mrb[0].mxu1 %vm1034_vm1, %v14186_v9  ;;  %10666 = vmatprep.subr.mxu0 %v9432_v17 }
 0x223   : > { %10275 = vmatpush3.msra.mxu1 %v9179_v42  ;;  %10265 = vmatprep.mubr.msk.f32.mxu1 %vm1034_vm1, %v14187_v11  ;;  %v8138_v21 = vsel %vm1318_vm0, %v8136_v59, %v8137_v23 }
 0x224   : > { %10644 = vmatmul.mubr.msk.f32.gmra.mrb[2].mxu0 %vm1034_vm1, %v14147_v58  ;;  %10288 = vmatprep.subr.mxu1 %v9188_v63  ;;  %v14190_v58 = vld [vmem:[#allocation38_spill] sm:$0xff] }
 0x225   : > { %10646 = vmatprep.mubr.msk.f32.mxu0 %vm1034_vm1, %v14150_v62  ;;  %v14191_v62 = vld [vmem:[#allocation40_spill] sm:$0xff] }
 0x226   : > { %10266 = vmatmul.mubr.msk.f32.gmra.mrb[2].mxu1 %vm1034_vm1, %v14188_v5 }
 0x227   : > { %10268 = vmatprep.mubr.msk.f32.mxu1 %vm1034_vm1, %v14189_v55 }
 0x228   : > { %10647 = vmatmul.mubr.msk.f32.gmra.mrb[4].mxu0 %vm1034_vm1, %v12958_v46  ;;  %v9441_v46 = vld [vmem:[%s13862_s10 + $0xd0] sm:$0xff] }
 0x229   : > { %10649 = vmatprep.mubr.msk.f32.mxu0 %vm1034_vm1, %v13365_v36  ;;  %v9197_v36 = vld [vmem:[%s13861_s9 + $0x68] sm:$0xff] }
 0x22a   : > { %10269 = vmatmul.mubr.msk.f32.gmra.mrb[4].mxu1 %vm1034_vm1, %v14190_v58 }
 0x22b   : > { %10271 = vmatprep.mubr.msk.f32.mxu1 %vm1034_vm1, %v14191_v62 }
 0x22c   : > { %10650 = vmatmul.mubr.msk.f32.gmra.mrb[6].mxu0 %vm1034_vm1, %v8138_v21 }
 0x22d   : > { %10654 = vmatprep.mubr.msk.f32.mxu0 %vm1034_vm1, %v14153_v10  ;;  %v6266_v10 = vld [vmem:[%s12730_s23 + $0x98] sm:$0x3]  ;;  %s8956_s23 = sshll.u32 %s14221_s26, 6 }
 0x22e   : > { %10272 = vmatmul.mubr.msk.f32.gmra.mrb[6].mxu1 %vm1034_vm1, %v14192_v48 }
 0x22f   : > { %10276 = vmatprep.mubr.msk.f32.mxu1 %vm1034_vm1, %v14154_v16  ;;  %v14195_v16 = vld [vmem:[#allocation45_spill] sm:$0xff] }
 0x230   : > { %10655 = vmatmul.mubr.msk.f32.vlgmr.msra.gmra.mrb[0].mxu0 %vm1034_vm1, %v13000_v0  ;;  %v8257_v0 = vrot.slane %v13627_v8, 1 }
 0x231   : > { %10657 = vmatprep.mubr.msk.f32.mxu0 %vm1034_vm1, %v13010_v19  ;;  %10667 = vmatpush3.msra.mxu0 %v9432_v17  ;;  %v8258_v19 = vrot.slane %v6266_v10, 1 }
 0x232   : > { %10277 = vmatmul.mubr.msk.f32.vlgmr.msra.gmra.mrb[0].mxu1 %vm1034_vm1, %v14155_v7  ;;  %10680 = vmatprep.subr.mxu0 %v9441_v46  ;;  %v14196_v7 = vld [vmem:[#allocation46_spill] sm:$0xff] }
 0x233   : > { %10289 = vmatpush3.msra.mxu1 %v9188_v63  ;;  %10279 = vmatprep.mubr.msk.f32.mxu1 %vm1034_vm1, %v14156_v6  ;;  %v14198_v6 = vld [vmem:[#allocation69_spill] sm:$0xff] }
 0x234   : > { %10658 = vmatmul.mubr.msk.f32.gmra.mrb[2].mxu0 %vm1034_vm1, %v13025_v24  ;;  %10302 = vmatprep.subr.mxu1 %v9197_v36  ;;  %v8259_v24 = vsel %vm1318_vm0, %v8257_v0, %v8258_v19 }
 0x235   : > { %10660 = vmatprep.mubr.msk.f32.mxu0 %vm1034_vm1, %v13032_v27  ;;  %v14193_v27 = vld [vmem:[#allocation32_spill] sm:$0xff] }
 0x236   : > { %10280 = vmatmul.mubr.msk.f32.gmra.mrb[2].mxu1 %vm1034_vm1, %v14157_v14  ;;  %v14199_v14 = vld [vmem:[#allocation10_spill] sm:$0xff] }
 0x237   : > { %10282 = vmatprep.mubr.msk.f32.mxu1 %vm1034_vm1, %v14158_v44  ;;  %v14200_v44 = vld [vmem:[#allocation70_spill] sm:$0xff] }
 0x238   : > { %10661 = vmatmul.mubr.msk.f32.gmra.mrb[4].mxu0 %vm1034_vm1, %v13042_v40  ;;  %v14194_v40 = vld [vmem:[#allocation67_spill] sm:$0xff] }
 0x239   : > { %10663 = vmatprep.mubr.msk.f32.mxu0 %vm1034_vm1, %v13411_v37  ;;  %v8377_v37 = vrot.slane %v13581_v53, 2  ;;  %v14206_v53 = vld [vmem:[#allocation27_spill] sm:$0xff] }
 0x23a   : > { %10283 = vmatmul.mubr.msk.f32.gmra.mrb[4].mxu1 %vm1034_vm1, %v14159_v33  ;;  %v14201_v33 = vld [vmem:[#allocation48_spill] sm:$0xff] }
 0x23b   : > { %10285 = vmatprep.mubr.msk.f32.mxu1 %vm1034_vm1, %v14160_v32 }
 0x23c   : > { %10664 = vmatmul.mubr.msk.f32.gmra.mrb[6].mxu0 %vm1034_vm1, %v8259_v24 }
 0x23d   : > { %10668 = vmatprep.mubr.msk.f32.mxu0 %vm1034_vm1, %v13076_v49  ;;  %v14197_v49 = vld [vmem:[#allocation68_spill] sm:$0xff] }
 0x23e   : > { %10286 = vmatmul.mubr.msk.f32.gmra.mrb[6].mxu1 %vm1034_vm1, %v14193_v27 }
 0x23f   : > { %10290 = vmatprep.mubr.msk.f32.mxu1 %vm1034_vm1, %v13440_v31  ;;  %v14202_v31 = vld [vmem:[#allocation71_spill] sm:$0xff] }
 0x240   : > { %10669 = vmatmul.mubr.msk.f32.vlgmr.msra.gmra.mrb[0].mxu0 %vm1034_vm1, %v13095_v38  ;;  %v8378_v38 = vrot.slane %v13653_v39, 2 }
 0x241   : > { %10671 = vmatprep.mubr.msk.f32.mxu0 %vm1034_vm1, %v14194_v40  ;;  %10681 = vmatpush3.msra.mxu0 %v9441_v46 }
 0x242   : > { %10291 = vmatmul.mubr.msk.f32.vlgmr.msra.gmra.mrb[0].mxu1 %vm1034_vm1, %v14195_v16  ;;  %v8379_v32 = vsel %vm1637_vm2, %v8377_v37, %v8378_v38 }
 0x243   : > { %10303 = vmatpush3.msra.mxu1 %v9197_v36  ;;  %10293 = vmatprep.mubr.msk.f32.mxu1 %vm1034_vm1, %v14196_v7 }
 0x244   : > { %10672 = vmatmul.mubr.msk.f32.gmra.mrb[2].mxu0 %vm1034_vm1, %v14197_v49 }
 0x245   : > { %10674 = vmatprep.mubr.msk.f32.mxu0 %vm1034_vm1, %v14198_v6 }
 0x246   : > { %10294 = vmatmul.mubr.msk.f32.gmra.mrb[2].mxu1 %vm1034_vm1, %v14199_v14 }
 0x247   : > { %10296 = vmatprep.mubr.msk.f32.mxu1 %vm1034_vm1, %v13474_v18  ;;  %v11197_v18 = vld [vmem:[%s11444_s22 + $0x80] sm:$0xff]  ;;  %s8955_s22 = sshll.u32 %s14225_s25, 3 }
 0x248   : > { %10675 = vmatmul.mubr.msk.f32.gmra.mrb[4].mxu0 %vm1034_vm1, %v14200_v44  ;;  %s713_s17 = sadd.s32 %s8956_s23, %s8955_s22  ;;  %s723_s23 = scalar_lea.vmem %s13865_s13, %s8959_s20 }
 0x249   : > { %10677 = vmatprep.mubr.msk.f32.mxu0 %vm1034_vm1, %v13484_v13  ;;  %v14204_v13 = vld [vmem:[#allocation24_spill] sm:$0xff]  ;;  %s8957_s4 = sshll.u32 %s713_s17, 3 }
 0x24a   : > { %10297 = vmatmul.mubr.msk.f32.gmra.mrb[4].mxu1 %vm1034_vm1, %v14201_v33  ;;  %s13798_s0 = scalar_lea.vmem %s13864_s12, %s8957_s4 }
 0x24b   : > { %10299 = vmatprep.mubr.msk.f32.mxu1 %vm1034_vm1, %v13493_v60  ;;  %v14203_v60 = vld [vmem:[#allocation16_spill] sm:$0xff] }
 0x24c   : > { %10678 = vmatmul.mubr.msk.f32.gmra.mrb[6].mxu0 %vm1034_vm1, %v8379_v32 }
 0x24d   : > { %10682 = vmatprep.mubr.msk.f32.mxu0 %vm1034_vm1, %v13154_v26  ;;  %v14205_v26 = vld [vmem:[#allocation42_spill] sm:$0xff] }
 0x24e   : > { %10300 = vmatmul.mubr.msk.f32.gmra.mrb[6].mxu1 %vm1034_vm1, %v11197_v18 }
 0x24f   : > { %10304 = vmatprep.mubr.msk.f32.mxu1 %vm1034_vm1, %v13505_v1  ;;  %v8497_v1 = vrot.slane %v13627_v8, 2 }
 0x250   : > { %10683 = vmatmul.mubr.msk.f32.vlgmr.msra.gmra.mrb[0].mxu0 %vm1034_vm1, %v13169_v20  ;;  %v8498_v20 = vrot.slane %v6266_v10, 2 }
 0x251   : > { %10685 = vmatprep.mubr.msk.f32.mxu0 %vm1034_vm1, %v14202_v31 }
 0x252   : > { %10305 = vmatmul.mubr.msk.f32.vlgmr.msra.gmra.mrb[0].mxu1 %vm1034_vm1, %v14203_v60  ;;  %v8499_v51 = vsel %vm1637_vm2, %v8497_v1, %v8498_v20 }
 0x253   : > { %10307 = vmatprep.mubr.msk.f32.mxu1 %vm1034_vm1, %v14204_v13 }
 0x254   : > { %10686 = vmatmul.mubr.msk.f32.gmra.mrb[2].mxu0 %vm1034_vm1, %v14205_v26 }
 0x255   : > { %10688 = vmatprep.mubr.msk.f32.mxu0 %vm1034_vm1, %v13200_v22  ;;  %v14208_v22 = vld [vmem:[#allocation62_spill] sm:$0xff] }
 0x256   : > { %10308 = vmatmul.mubr.msk.f32.gmra.mrb[2].mxu1 %vm1034_vm1, %v14206_v53 }
 0x257   : > { %10310 = vmatprep.mubr.msk.f32.mxu1 %vm1034_vm1, %v14169_v47 }
 0x258   : > { %10689 = vmatmul.mubr.msk.f32.gmra.mrb[4].mxu0 %vm1034_vm1, %v14207_v57 }
 0x259   : > { %10691 = vmatprep.mubr.msk.f32.mxu0 %vm1034_vm1, %v13537_v30 }
 0x25a   : > { %10311 = vmatmul.mubr.msk.f32.gmra.mrb[4].mxu1 %vm1034_vm1, %v14170_v52  ;;  %v8960_v52 = vld [vmem:[%s13863_s11] ss:$0 sm:$0xff] }
 0x25b   : > { %10313 = vmatprep.mubr.msk.f32.mxu1 %vm1034_vm1, %v14171_v29 }
 0x25c   : > { %10692 = vmatmul.mubr.msk.f32.gmra.mrb[6].mxu0 %vm1034_vm1, %v8499_v51 }
 0x25e   : > { %10314 = vmatmul.mubr.msk.f32.gmra.mrb[6].mxu1 %vm1034_vm1, %v14208_v22 }
 0x323   : > { %v10684_v47 = vpop.f32.mrb[0].mxu0 }
 0x324   : > { %v8570_v30 = vpop.f32.mrb[1].mxu0 }
 0x325   : > { %v10306_v29 = vpop.f32.mrb[0].mxu1 }
 0x326   : > { %v10694_v15 = vadd.f32 %v10306_v29, %v8960_v52  ;;  %v4874_v42 = vpop.f32.mrb[1].mxu1 }
 0x327   : > { %v10696_v41 = vadd.f32 %v8960_v52, %v4874_v42  ;;  %v10687_v35 = vpop.f32.mrb[2].mxu0 }
 0x328   : > { %v10695_v28 = vadd.f32 %v10694_v15, %v10684_v47  ;;  %v8580_v34 = vpop.f32.mrb[3].mxu0 }
 0x329   : > { %v10697_v56 = vadd.f32 %v10696_v41, %v8570_v30  ;;  %v10309_v3 = vpop.f32.mrb[2].mxu1 }
 0x32a   : > { %8618 = vst.msk [vmem:[%s13798_s0 + $0x8] sm:$0xff] %vm1034_vm1, %v10695_v28  ;;  %v8626_v43 = vsel %vm1034_vm1, %v10695_v28, 0.0  ;;  %v8647_v12 = vmul.f32 %v10695_v28, %v10695_v28  ;;  %v10698_v8 = vadd.f32 %v10309_v3, %v8960_v52  ;;  %v4884_v61 = vpop.f32.mrb[3].mxu1 }
 0x32b   : > { %8617 = vst.msk [vmem:[%s13798_s0] sm:$0xff] %vm1034_vm1, %v10697_v56  ;;  %v8625_v54 = vsel %vm1034_vm1, %v10697_v56, 0.0  ;;  %v8646_v4 = vmul.f32 %v10697_v56, %v10697_v56  ;;  %v10700_v50 = vadd.f32 %v8960_v52, %v4884_v61  ;;  %v10690_v25 = vpop.f32.mrb[4].mxu0 }
 0x32c   : > { %v8655_v2 = vsel %vm1034_vm1, %v8647_v12, 0.0  ;;  %v8627_v17 = vadd.f32 %v8626_v43, %v8625_v54  ;;  %v10699_v45 = vadd.f32 %v10698_v8, %v10687_v35  ;;  %v8590_v63 = vpop.f32.mrb[5].mxu0 }
 0x32d   : > { %v8654_v9 = vsel %vm1034_vm1, %v8646_v4, 0.0  ;;  %v10701_v39 = vadd.f32 %v10700_v50, %v8580_v34  ;;  %v10312_v11 = vpop.f32.mrb[4].mxu1 }
 0x32e   : > { %v8656_v5 = vadd.f32 %v8655_v2, %v8654_v9  ;;  %8620 = vst.msk [vmem:[%s13798_s0 + $0x18] sm:$0xff] %vm1034_vm1, %v10699_v45  ;;  %v8649_v23 = vmul.f32 %v10699_v45, %v10699_v45  ;;  %v10702_v59 = vadd.f32 %v10312_v11, %v8960_v52  ;;  %v4894_v55 = vpop.f32.mrb[5].mxu1  ;;  %v8630_v0 = vsel %vm1034_vm1, %v10699_v45, 0.0 }
 0x32f   : > { %8619 = vst.msk [vmem:[%s13798_s0 + $0x10] sm:$0xff] %vm1034_vm1, %v10701_v39  ;;  %v8628_v58 = vsel %vm1034_vm1, %v10701_v39, 0.0  ;;  %v8648_v62 = vmul.f32 %v10701_v39, %v10701_v39  ;;  %v10704_v21 = vadd.f32 %v8960_v52, %v4894_v55  ;;  %v10693_v48 = vpop.f32.mrb[6].mxu0 }
 0x330   : > { %v8629_v46 = vadd.f32 %v8628_v58, %v8627_v17  ;;  %v10703_v36 = vadd.f32 %v10702_v59, %v10690_v25  ;;  %v8600_v10 = vpop.f32.mrb[7].mxu0  ;;  %v8659_v40 = vsel %vm1034_vm1, %v8649_v23, 0.0 }
 0x331   : > { %v8657_v19 = vsel %vm1034_vm1, %v8648_v62, 0.0  ;;  %v10705_v24 = vadd.f32 %v10704_v21, %v8590_v63  ;;  %v10315_v27 = vpop.f32.mrb[6].mxu1 }
 0x332   : > { %v8658_v16 = vadd.f32 %v8657_v19, %v8656_v5  ;;  %8622 = vst.msk [vmem:[%s13798_s0 + $0x28] sm:$0xff] %vm1034_vm1, %v10703_v36  ;;  %v8651_v7 = vmul.f32 %v10703_v36, %v10703_v36  ;;  %v8631_v49 = vadd.f32 %v8630_v0, %v8629_v46  ;;  %v4904_v6 = vpop.f32.mrb[7].mxu1  ;;  %v10706_v37 = vadd.f32 %v10315_v27, %v8960_v52 }
 0x333   : > { %8621 = vst.msk [vmem:[%s13798_s0 + $0x20] sm:$0xff] %vm1034_vm1, %v10705_v24  ;;  %v8632_v14 = vsel %vm1034_vm1, %v10705_v24, 0.0  ;;  %v8650_v38 = vmul.f32 %v10705_v24, %v10705_v24  ;;  %v10708_v44 = vadd.f32 %v8960_v52, %v4904_v6  ;;  %v8634_v18 = vsel %vm1034_vm1, %v10703_v36, 0.0 }
 0x334   : > { %v8633_v33 = vadd.f32 %v8632_v14, %v8631_v49  ;;  %v8660_v32 = vadd.f32 %v8659_v40, %v8658_v16  ;;  %v10707_v60 = vadd.f32 %v10706_v37, %v10693_v48  ;;  %v8663_v20 = vsel %vm1034_vm1, %v8651_v7, 0.0 }
 0x335   : > { %v8661_v31 = vsel %vm1034_vm1, %v8650_v38, 0.0  ;;  %v10709_v13 = vadd.f32 %v10708_v44, %v8600_v10 }
 0x336   : > { %v8662_v26 = vadd.f32 %v8661_v31, %v8660_v32  ;;  %v8635_v1 = vadd.f32 %v8634_v18, %v8633_v33  ;;  %8624 = vst.msk [vmem:[%s13798_s0 + $0x38] sm:$0xff] %vm1034_vm1, %v10707_v60  ;;  %v8653_v53 = vmul.f32 %v10707_v60, %v10707_v60  ;;  %v8638_v52 = vsel %vm1034_vm1, %v10707_v60, 0.0 }
 0x337   : > { %8623 = vst.msk [vmem:[%s13798_s0 + $0x30] sm:$0xff] %vm1034_vm1, %v10709_v13  ;;  %v8636_v57 = vsel %vm1034_vm1, %v10709_v13, 0.0  ;;  %v8652_v51 = vmul.f32 %v10709_v13, %v10709_v13 }
 0x338   : > { %v8637_v22 = vadd.f32 %v8636_v57, %v8635_v1  ;;  %v8664_v47 = vadd.f32 %v8663_v20, %v8662_v26  ;;  %v8667_v42 = vsel %vm1034_vm1, %v8653_v53, 0.0 }
 0x339   : > { %v8665_v30 = vsel %vm1034_vm1, %v8652_v51, 0.0 }
 0x33a   : > { %v8639_v29 = vadd.f32 %v8638_v52, %v8637_v22  ;;  %v8666_v15 = vadd.f32 %v8665_v30, %v8664_v47 }
 0x33c   : > { %v8640_v41 = vrot.slane %v8639_v29, 4  ;;  %v8668_v35 = vadd.f32 %v8667_v42, %v8666_v15 }
 0x33e   : > { %v8641_v28 = vadd.f32 %v8640_v41, %v8639_v29  ;;  %v8669_v34 = vrot.slane %v8668_v35, 4 }
 0x340   : > { %v8642_v56 = vrot.slane %v8641_v28, 2  ;;  %v8670_v3 = vadd.f32 %v8669_v34, %v8668_v35 }
 0x342   : > { %v8643_v43 = vadd.f32 %v8642_v56, %v8641_v28  ;;  %v8671_v12 = vrot.slane %v8670_v3, 2 }
 0x344   : > { %v8644_v8 = vrot.slane %v8643_v43, 1  ;;  %v8672_v61 = vadd.f32 %v8671_v12, %v8670_v3 }
 0x346   : > { %v8673_v54 = vrot.slane %v8672_v61, 1  ;;  %v8645_v4 = vadd.f32 %v8644_v8, %v8643_v43 }
 0x348   : > { %v8674_v50 = vadd.f32 %v8673_v54, %v8672_v61 }
 0x34a   : > { %v8676_v25 = vsel %vm8675_vm3, %v8645_v4, %v8674_v50 }
 0x34b   : > { %8678 = vst.msk [vmem:[%s723_s23] sm:$0x3] %vm8677_vm4, %v8676_v25 }
 0x34c PF: > { %s24_s29 = sadd.s32 1, %s11236_s29   ;;  %s14209_s17 = sld [smem:[#allocation2_spill]] }
 0x34d   : > { %p21_p5 = scmp.ge.s32.totalorder %s24_s29, 18   ;;  %s14210_s25 = smov %s11228_s27 }
 0x34e   : > { %s14211_s26 = smov %s11232_s28  ;;  %s14212_s27 = smov %s14215_s30 }
 0x34f   :  { %23 = sbr.rel (!%p21_p5) target bundleno = 4 (0x4), region = 183 }
 0x352   : > { %s14213_s28 = smov %s14209_s17 }

</bundles_post_ra>
